<compile_context>
chip_gen: v6e
topology: v6e:2x2x1
jax: 0.10.0
libtpu: 0.0.40
codegen_flags: <defaults>
</compile_context>

<pallas_src>
import functools

import numpy as np
import jax
import jax.numpy as jnp
from jax.experimental import pallas as pl
from jax.experimental.pallas import tpu as pltpu

EPS = 1e-5  # torch.nn.BatchNorm2d default eps


# --------------------------------------------------------------------------
# Weight -> banded-matrix helpers (wrapper side, plain JAX / numpy constants)
# --------------------------------------------------------------------------
def _band_selector(w_in, w_out, upsample):
    """sel[kw, j, q] = 1 if output column q, tap kw reads input column j (zero pad outside)."""
    sel = np.zeros((3, w_in, w_out), np.float32)
    for kw in range(3):
        for q in range(w_out):
            p = q + kw - 1                  # column in the (possibly upsampled) padded row
            if 0 <= p < w_out:
                j = p // 2 if upsample else p
                sel[kw, j, q] = 1.0
    return jnp.asarray(sel)


def conv_band(w, w_out, *, upsample=False):
    """w: (3,3,Cin,Cout) -> band matrices (3, Win*Cin, w_out*Cout) for flat-row conv."""
    _, _, cin, cout = w.shape
    w_in = w_out // 2 if upsample else w_out
    sel = _band_selector(w_in, w_out, upsample)
    m = jnp.einsum('kjq,hkio->hjiqo', sel, w)        # (3, w_in, Cin, w_out, Cout)
    return m.reshape(3, w_in * cin, w_out * cout)


def blockdiag_1x1(w, W):
    """1x1 conv weights (Cin, Cout) -> block-diagonal (W*Cin, W*Cout) flat-row matrix."""
    cin, cout = w.shape
    eye = jnp.asarray(np.eye(W, dtype=np.float32))
    return jnp.einsum('jq,io->jiqo', eye, w).reshape(W * cin, W * cout)


def tile_w(v, W):
    """Replicate a per-channel vector across the W column blocks of a flat (.., W*C) row."""
    if v.ndim == 1:
        return jnp.tile(v, (W,)).reshape(1, -1)       # (1, W*C)
    return jnp.tile(v, (1, W))                        # (N, W*C)


def channel_stats(x_nhwc):
    """Per-channel (sum, sum of squares) over (N,H,W) -- used only for *external* inputs."""
    return (jnp.sum(x_nhwc, axis=(0, 1, 2)),
            jnp.sum(jnp.square(x_nhwc), axis=(0, 1, 2)))


def reduce_stats(stats_raw, C):
    """(N, 2, W*C) per-sample column sums from the kernels -> per-channel (sum, sumsq)."""
    N = stats_raw.shape[0]
    s = stats_raw.reshape(N, 2, -1, C).sum(axis=(0, 2))
    return s[0], s[1]


def bn_fold(sum_, sumsq, count, gamma, beta):
    """Fold training-mode BatchNorm (batch stats, biased var) into per-channel scale/shift."""
    mean = sum_ / count
    var = sumsq / count - mean * mean
    a = gamma * jax.lax.rsqrt(var + EPS)
    b = beta - mean * a
    return a, b


# --------------------------------------------------------------------------
# Pallas kernels (flat (H, W*C) rows; per-sample grid over batch)
# --------------------------------------------------------------------------
def _act_pad(x_ref, a_ref, b_ref):
    """silu(x * a + b), zero-padded with one extra row top & bottom (in VMEM)."""
    x = x_ref[0].astype(jnp.float32)
    y = x * a_ref[...] + b_ref[...]
    y = y * jax.nn.sigmoid(y)
    z = jnp.zeros((1, y.shape[1]), jnp.float32)
    return jnp.concatenate([z, y, z], axis=0)


def _emit_stats(st_ref, out):
    s = jnp.sum(out, axis=0, keepdims=True)
    ss = jnp.sum(out * out, axis=0, keepdims=True)
    st_ref[0] = jnp.concatenate([s, ss], axis=0)


def _fused_conv1_kernel(xa_ref, xb_ref, aa_ref, ba_ref, ab_ref, bb_ref,
                        ma_ref, mb_ref, bias_ref, esc_ref, esh_ref,
                        o_ref, st_ref, *, H):
    """BN1 -> SiLU -> 3x3 conv (split over the two concat parts) -> emb affine  (+ stats)."""
    f32 = jnp.float32
    wt = ma_ref.dtype
    ya = _act_pad(xa_ref, aa_ref, ba_ref)                      # (H+2, W*Ca)
    yb = _act_pad(xb_ref, ab_ref, bb_ref)                      # (H+2, W*Cb)
    acc = jnp.zeros(o_ref.shape[1:], f32)                      # (H, W*Cout)
    for kh in range(3):                                        # 3 static taps, unrolled
        acc += jnp.dot(ya[kh:kh + H].astype(wt), ma_ref[kh], preferred_element_type=f32)
        acc += jnp.dot(yb[kh:kh + H].astype(wt), mb_ref[kh], preferred_element_type=f32)
    out = (acc + bias_ref[...]) * esc_ref[0] + esh_ref[0]
    o_ref[0] = out.astype(o_ref.dtype)
    _emit_stats(st_ref, out)


def _fused_conv2_kernel(h_ref, a_ref, b_ref, m_ref, bias_ref,
                        xa_ref, xb_ref, ida_ref, idb_ref, idbias_ref,
                        o_ref, st_ref, *, H):
    """BN2 -> SiLU -> 3x3 conv + fused 1x1 idconv residual of the original input  (+ stats)."""
    f32 = jnp.float32
    wt = m_ref.dtype
    yp = _act_pad(h_ref, a_ref, b_ref)                         # (H+2, W*Cnf)
    acc = jnp.zeros(o_ref.shape[1:], f32)
    for kh in range(3):
        acc += jnp.dot(yp[kh:kh + H].astype(wt), m_ref[kh], preferred_element_type=f32)
    res = jnp.dot(xa_ref[0].astype(wt), ida_ref[...], preferred_element_type=f32)
    res += jnp.dot(xb_ref[0].astype(wt), idb_ref[...], preferred_element_type=f32)
    out = acc + bias_ref[...] + res + idbias_ref[...]
    o_ref[0] = out.astype(o_ref.dtype)
    _emit_stats(st_ref, out)


def _fused_upconv_kernel(x_ref, rh_ref, m_ref, bias_ref, o_ref, *, H_out):
    """Nearest 2x upsample (row-replication matmul + column replication in the band) + 3x3 conv."""
    f32 = jnp.float32
    wt = m_ref.dtype
    xup = jnp.dot(rh_ref[...].astype(wt), x_ref[0].astype(wt),
                  preferred_element_type=f32)                  # (2H, W*C)
    z = jnp.zeros((1, xup.shape[1]), f32)
    xp = jnp.concatenate([z, xup, z], axis=0)                  # (2H+2, W*C)
    acc = jnp.zeros(o_ref.shape[1:], f32)                      # (2H, 2W*C)
    for kh in range(3):
        acc += jnp.dot(xp[kh:kh + H_out].astype(wt), m_ref[kh], preferred_element_type=f32)
    o_ref[0] = (acc + bias_ref[...]).astype(o_ref.dtype)


# --------------------------------------------------------------------------
# pallas_call wrappers
# --------------------------------------------------------------------------
def _shared2(r, c):
    return pl.BlockSpec((r, c), lambda n: (0, 0))


def _shared3(a, b, c):
    return pl.BlockSpec((a, b, c), lambda n: (0, 0, 0))


def _per_n3(a, b, c):
    return pl.BlockSpec((a, b, c), lambda n: (n, 0, 0))


_PARALLEL = pltpu.CompilerParams(dimension_semantics=("parallel",))


def fused_conv1(xa, xb, aa, ba, ab, bb, ma, mb, bias, esc, esh):
    N, H, WCa = xa.shape
    WCb = xb.shape[-1]
    WCo = bias.shape[-1]
    return pl.pallas_call(
        functools.partial(_fused_conv1_kernel, H=H),
        out_shape=(jax.ShapeDtypeStruct((N, H, WCo), xa.dtype),
                   jax.ShapeDtypeStruct((N, 2, WCo), jnp.float32)),
        grid=(N,),
        in_specs=[
            _per_n3(1, H, WCa), _per_n3(1, H, WCb),
            _shared2(1, WCa), _shared2(1, WCa),
            _shared2(1, WCb), _shared2(1, WCb),
            _shared3(3, WCa, WCo), _shared3(3, WCb, WCo),
            _shared2(1, WCo),
            _per_n3(1, 1, WCo), _per_n3(1, 1, WCo),
        ],
        out_specs=(_per_n3(1, H, WCo), _per_n3(1, 2, WCo)),
        compiler_params=_PARALLEL,
    )(xa, xb, aa, ba, ab, bb, ma, mb, bias, esc, esh)


def fused_conv2(h, a2, b2, m2, bias2, xa, xb, ida, idb, id_bias):
    N, H, WCo = h.shape
    WCa = xa.shape[-1]
    WCb = xb.shape[-1]
    return pl.pallas_call(
        functools.partial(_fused_conv2_kernel, H=H),
        out_shape=(jax.ShapeDtypeStruct((N, H, WCo), h.dtype),
                   jax.ShapeDtypeStruct((N, 2, WCo), jnp.float32)),
        grid=(N,),
        in_specs=[
            _per_n3(1, H, WCo),
            _shared2(1, WCo), _shared2(1, WCo),
            _shared3(3, WCo, WCo), _shared2(1, WCo),
            _per_n3(1, H, WCa), _per_n3(1, H, WCb),
            _shared2(WCa, WCo), _shared2(WCb, WCo), _shared2(1, WCo),
        ],
        out_specs=(_per_n3(1, H, WCo), _per_n3(1, 2, WCo)),
        compiler_params=_PARALLEL,
    )(h, a2, b2, m2, bias2, xa, xb, ida, idb, id_bias)


def fused_upconv(x_flat, w, b, W):
    N, H, WC = x_flat.shape
    H2, W2 = 2 * H, 2 * W
    cout = w.shape[-1]
    m = conv_band(w, W2, upsample=True)                        # (3, W*C, 2W*Cout)
    rh = jnp.asarray(np.kron(np.eye(H, dtype=np.float32),
                             np.ones((2, 1), np.float32)))     # (2H, H): rh[p, p//2] = 1
    bias = tile_w(b, W2)
    return pl.pallas_call(
        functools.partial(_fused_upconv_kernel, H_out=H2),
        out_shape=jax.ShapeDtypeStruct((N, H2, W2 * cout), x_flat.dtype),
        grid=(N,),
        in_specs=[
            _per_n3(1, H, WC),
            _shared2(H2, H),
            _shared3(3, WC, W2 * cout),
            _shared2(1, W2 * cout),
        ],
        out_specs=_per_n3(1, H2, W2 * cout),
        compiler_params=_PARALLEL,
    )(x_flat, rh, m, bias)


# --------------------------------------------------------------------------
# Module glue: EmbResBlock / UpBlock composition
# --------------------------------------------------------------------------
def emb_res_block_flat(x_flat, Cx, x_stats, skip_flat, Cs, skip_stats, t, p, W):
    """EmbResBlock on cat([x, skip], channel), flat layout.  Returns (out_flat, out_stats, nf)."""
    N, H, _ = x_flat.shape
    nf = p['conv1_b'].shape[0]
    cnt = N * H * W

    # BN1 fold, per concat-channel group (stats come from the producing kernel or one plain-JAX
    # pass over external inputs -- no standalone BN read of intermediate activations).
    a1x, b1x = bn_fold(*x_stats, cnt, p['bn1_w'][:Cx], p['bn1_b'][:Cx])
    a1s, b1s = bn_fold(*skip_stats, cnt, p['bn1_w'][Cx:], p['bn1_b'][Cx:])

    # Time-embedding projection: tiny matmul, plain JAX (no pallas_call).
    emb = jax.nn.silu(t) @ p['emb_w'] + p['emb_b']
    esc = jnp.tile(1.0 + emb[:, :nf], (1, W)).reshape(N, 1, W * nf)
    esh = jnp.tile(emb[:, nf:], (1, W)).reshape(N, 1, W * nf)

    # Fused kernel 1: BN1 + SiLU + conv1 + emb affine (+ stats for BN2).
    h_flat, h_stats = fused_conv1(
        x_flat, skip_flat,
        tile_w(a1x, W), tile_w(b1x, W), tile_w(a1s, W), tile_w(b1s, W),
        conv_band(p['conv1_w'][:, :, :Cx, :], W),
        conv_band(p['conv1_w'][:, :, Cx:, :], W),
        tile_w(p['conv1_b'], W), esc, esh)
    h_sum, h_ssq = reduce_stats(h_stats, nf)
    a2, b2 = bn_fold(h_sum, h_ssq, cnt, p['bn2_w'], p['bn2_b'])

    # idconv (1x1) weights; identity when ni == nf (fc.noop in the reference module).
    if 'id_w' in p:
        idw, idb = p['id_w'], p['id_b']
    else:
        idw = jnp.eye(Cx + Cs, dtype=x_flat.dtype)
        idb = jnp.zeros((nf,), x_flat.dtype)

    # Fused kernel 2: BN2 + SiLU + conv2 + idconv residual (+ stats for the next block's BN1).
    out_flat, out_stats = fused_conv2(
        h_flat, tile_w(a2, W), tile_w(b2, W), conv_band(p['conv2_w'], W),
        tile_w(p['conv2_b'], W), x_flat, skip_flat,
        blockdiag_1x1(idw[:Cx], W), blockdiag_1x1(idw[Cx:], W), tile_w(idb, W))
    o_sum, o_ssq = reduce_stats(out_stats, nf)
    return out_flat, (o_sum, o_ssq), nf


def upblock_forward(x_nhwc, t, ups_nhwc, params):
    """UpBlock forward (NHWC at the boundary, flat (N,H,W*C) internally)."""
    N, H, W, Cx = x_nhwc.shape
    ups = list(ups_nhwc)
    x_flat = x_nhwc.reshape(N, H, W * Cx)
    x_stats = channel_stats(x_nhwc)
    for p in params['resnets']:
        skip = ups.pop()
        Cs = skip.shape[-1]
        x_flat, x_stats, Cx = emb_res_block_flat(
            x_flat, Cx, x_stats, skip.reshape(N, H, W * Cs), Cs, channel_stats(skip), t, p, W)
    out_flat = fused_upconv(x_flat, params['up_w'], params['up_b'], W)
    return out_flat.reshape(N, 2 * H, 2 * W, params['up_w'].shape[-1])


def upblock_forward_nchw(x, t, ups, params):
    to_nhwc = lambda a: jnp.transpose(a, (0, 2, 3, 1))
    out = upblock_forward(to_nhwc(x), t, [to_nhwc(u) for u in ups], params)
    return jnp.transpose(out, (0, 3, 1, 2))


# --------------------------------------------------------------------------
# Deterministic parameter init (shapes follow the PyTorch module __init__)
# --------------------------------------------------------------------------
def init_params(key, n_emb, ni, prev_nf, nf, num_layers=2):
    keys = iter(jax.random.split(key, num_layers * 12 + 2))
    nxt = lambda: next(keys)
    params = {'resnets': []}
    for i in range(num_layers):
        cin = (prev_nf if i == 0 else nf) + (ni if i == num_layers - 1 else nf)
        p = {
            'bn1_w':  1.0 + 0.1 * jax.random.normal(nxt(), (cin,), jnp.float32),
            'bn1_b':  0.1 * jax.random.normal(nxt(), (cin,), jnp.float32),
            'conv1_w': 0.05 * jax.random.normal(nxt(), (3, 3, cin, nf), jnp.float32),
            'conv1_b': 0.05 * jax.random.normal(nxt(), (nf,), jnp.float32),
            'emb_w':  0.05 * jax.random.normal(nxt(), (n_emb, 2 * nf), jnp.float32),
            'emb_b':  0.05 * jax.random.normal(nxt(), (2 * nf,), jnp.float32),
            'bn2_w':  1.0 + 0.1 * jax.random.normal(nxt(), (nf,), jnp.float32),
            'bn2_b':  0.1 * jax.random.normal(nxt(), (nf,), jnp.float32),
            'conv2_w': 0.05 * jax.random.normal(nxt(), (3, 3, nf, nf), jnp.float32),
            'conv2_b': 0.05 * jax.random.normal(nxt(), (nf,), jnp.float32),
        }
        if cin != nf:  # idconv = Conv2d(cin, nf, 1)
            p['id_w'] = 0.1 * jax.random.normal(nxt(), (cin, nf), jnp.float32)
            p['id_b'] = 0.05 * jax.random.normal(nxt(), (nf,), jnp.float32)
        else:
            nxt(); nxt()
        params['resnets'].append(p)
    params['up_w'] = 0.05 * jax.random.normal(nxt(), (3, 3, nf, nf), jnp.float32)
    params['up_b'] = 0.05 * jax.random.normal(nxt(), (nf,), jnp.float32)
    return params


# --------------------------------------------------------------------------
# Pure-JAX reference (independent path, for numerical sanity check)
# --------------------------------------------------------------------------
def _ref_conv3x3(x, w, b):
    return jax.lax.conv_general_dilated(
        x, w, window_strides=(1, 1), padding=((1, 1), (1, 1)),
        dimension_numbers=('NHWC', 'HWIO', 'NHWC')) + b


def _ref_bn(x, gamma, beta):
    mean = jnp.mean(x, axis=(0, 1, 2))
    var = jnp.var(x, axis=(0, 1, 2))          # biased, matches torch BN normalization
    return (x - mean) / jnp.sqrt(var + EPS) * gamma + beta


def _ref_emb_res_block(x, t, p):
    nf = p['conv1_w'].shape[-1]
    inp = x
    h = _ref_conv3x3(jax.nn.silu(_ref_bn(x, p['bn1_w'], p['bn1_b'])), p['conv1_w'], p['conv1_b'])
    emb = jax.nn.silu(t) @ p['emb_w'] + p['emb_b']
    scale, shift = emb[:, :nf], emb[:, nf:]
    h = h * (1.0 + scale)[:, None, None, :] + shift[:, None, None, :]
    h2 = _ref_conv3x3(jax.nn.silu(_ref_bn(h, p['bn2_w'], p['bn2_b'])), p['conv2_w'], p['conv2_b'])
    res = (jnp.einsum('nhwc,co->nhwo', inp, p['id_w']) + p['id_b']) if 'id_w' in p else inp
    return h2 + res


def _ref_upblock(x, t, ups, params):
    ups = list(ups)
    for rp in params['resnets']:
        x = _ref_emb_res_block(jnp.concatenate([x, ups.pop()], axis=-1), t, rp)
    x = jnp.repeat(jnp.repeat(x, 2, axis=1), 2, axis=2)
    return _ref_conv3x3(x, params['up_w'], params['up_b'])


# --------------------------------------------------------------------------
# Main
# --------------------------------------------------------------------------
if __name__ == "__main__":
    key = jax.random.PRNGKey(0)
    N, H, W = 2, 16, 16
    n_emb, ni, prev_nf, nf = 32, 8, 8, 16

    k1, k2, k3, k4, kp = jax.random.split(key, 5)
    # PyTorch-style NCHW inputs
    x = jax.random.normal(k1, (N, prev_nf, H, W), jnp.float32)
    t = jax.random.normal(k2, (N, n_emb), jnp.float32)
    up_skip_ni = jax.random.normal(k3, (N, ni, H, W), jnp.float32)   # consumed by 2nd resnet
    up_skip_nf = jax.random.normal(k4, (N, nf, H, W), jnp.float32)   # popped first (1st resnet)
    ups = [up_skip_ni, up_skip_nf]

    params = init_params(kp, n_emb, ni, prev_nf, nf, num_layers=2)

    fwd = jax.jit(upblock_forward_nchw)
    out = jax.block_until_ready(fwd(x, t, ups, params))      # (N, nf, 2H, 2W)

    # Sanity check against an independent pure-JAX reference of the same math.
    to_nhwc = lambda a: jnp.transpose(a, (0, 2, 3, 1))
    ref = _ref_upblock(to_nhwc(x), t, [to_nhwc(u) for u in ups], params)
    ref = jnp.transpose(ref, (0, 3, 1, 2))
    err = float(jnp.max(jnp.abs(out - ref)))
    assert out.shape == (N, nf, 2 * H, 2 * W), out.shape
    assert err < 1e-2, f"max abs error vs reference: {err}"

    print("KERNEL_OK")
</pallas_src>

<mosaic_0001>
module attributes {stable_mosaic.version = 11 : i64} {
  func.func @_fused_conv1_kernel(%arg0: i32, %arg1: memref<1x16x128xf32, #tpu.memory_space<vmem>>, %arg2: memref<1x16x256xf32, #tpu.memory_space<vmem>>, %arg3: memref<1x128xf32, #tpu.memory_space<vmem>>, %arg4: memref<1x128xf32, #tpu.memory_space<vmem>>, %arg5: memref<1x256xf32, #tpu.memory_space<vmem>>, %arg6: memref<1x256xf32, #tpu.memory_space<vmem>>, %arg7: memref<3x128x256xf32, #tpu.memory_space<vmem>>, %arg8: memref<3x256x256xf32, #tpu.memory_space<vmem>>, %arg9: memref<1x256xf32, #tpu.memory_space<vmem>>, %arg10: memref<1x1x256xf32, #tpu.memory_space<vmem>>, %arg11: memref<1x1x256xf32, #tpu.memory_space<vmem>>, %arg12: memref<1x16x256xf32, #tpu.memory_space<vmem>>, %arg13: memref<1x2x256xf32, #tpu.memory_space<vmem>>) attributes {dimension_semantics = [#tpu.dimension_semantics<parallel>], iteration_bounds = array<i64: 2>, scalar_prefetch = 0 : i64, scratch_operands = 0 : i64, tpu.core_type = #tpu.core_type<tc>, window_params = [{transform_indices = @transform_0, window_bounds = array<i64: 1, 16, 128>}, {transform_indices = @transform_1, window_bounds = array<i64: 1, 16, 256>}, {pipeline_mode = #tpu.pipeline_mode<synchronous>, transform_indices = @transform_2, window_bounds = array<i64: 1, 128>}, {pipeline_mode = #tpu.pipeline_mode<synchronous>, transform_indices = @transform_3, window_bounds = array<i64: 1, 128>}, {pipeline_mode = #tpu.pipeline_mode<synchronous>, transform_indices = @transform_4, window_bounds = array<i64: 1, 256>}, {pipeline_mode = #tpu.pipeline_mode<synchronous>, transform_indices = @transform_5, window_bounds = array<i64: 1, 256>}, {pipeline_mode = #tpu.pipeline_mode<synchronous>, transform_indices = @transform_6, window_bounds = array<i64: 3, 128, 256>}, {pipeline_mode = #tpu.pipeline_mode<synchronous>, transform_indices = @transform_7, window_bounds = array<i64: 3, 256, 256>}, {pipeline_mode = #tpu.pipeline_mode<synchronous>, transform_indices = @transform_8, window_bounds = array<i64: 1, 256>}, {transform_indices = @transform_9, window_bounds = array<i64: 1, 1, 256>}, {transform_indices = @transform_10, window_bounds = array<i64: 1, 1, 256>}, {transform_indices = @transform_11, window_bounds = array<i64: 1, 16, 256>}, {transform_indices = @transform_12, window_bounds = array<i64: 1, 2, 256>}]} {
    %c0 = arith.constant 0 : index
    %c0_0 = arith.constant 0 : index
    %c0_1 = arith.constant 0 : index
    %0 = vector.load %arg1[%c0, %c0_0, %c0_1] : memref<1x16x128xf32, #tpu.memory_space<vmem>>, vector<1x16x128xf32>
    %1 = vector.shape_cast %0 : vector<1x16x128xf32> to vector<16x128xf32>
    %c0_2 = arith.constant 0 : index
    %c0_3 = arith.constant 0 : index
    %2 = vector.load %arg3[%c0_2, %c0_3] : memref<1x128xf32, #tpu.memory_space<vmem>>, vector<1x128xf32>
    %3 = vector.broadcast %2 : vector<1x128xf32> to vector<16x128xf32>
    %4 = arith.mulf %1, %3 : vector<16x128xf32>
    %c0_4 = arith.constant 0 : index
    %c0_5 = arith.constant 0 : index
    %5 = vector.load %arg4[%c0_4, %c0_5] : memref<1x128xf32, #tpu.memory_space<vmem>>, vector<1x128xf32>
    %6 = vector.broadcast %5 : vector<1x128xf32> to vector<16x128xf32>
    %7 = arith.addf %4, %6 : vector<16x128xf32>
    %8 = arith.negf %7 : vector<16x128xf32>
    %9 = math.exp %8 : vector<16x128xf32>
    %cst = arith.constant 1.000000e+00 : f32
    %10 = vector.broadcast %cst : f32 to vector<16x128xf32>
    %11 = arith.addf %10, %9 : vector<16x128xf32>
    %12 = arith.divf %10, %11 : vector<16x128xf32>
    %13 = arith.mulf %7, %12 : vector<16x128xf32>
    %cst_6 = arith.constant 0.000000e+00 : f32
    %14 = vector.broadcast %cst_6 : f32 to vector<1x128xf32>
    %15 = tpu.concatenate %14, %13, %14 in 0 : vector<1x128xf32>, vector<16x128xf32>, vector<1x128xf32> -> vector<18x128xf32>
    %c0_7 = arith.constant 0 : index
    %c0_8 = arith.constant 0 : index
    %c0_9 = arith.constant 0 : index
    %16 = vector.load %arg2[%c0_7, %c0_8, %c0_9] : memref<1x16x256xf32, #tpu.memory_space<vmem>>, vector<1x16x256xf32>
    %17 = vector.shape_cast %16 : vector<1x16x256xf32> to vector<16x256xf32>
    %c0_10 = arith.constant 0 : index
    %c0_11 = arith.constant 0 : index
    %18 = vector.load %arg5[%c0_10, %c0_11] : memref<1x256xf32, #tpu.memory_space<vmem>>, vector<1x256xf32>
    %19 = vector.broadcast %18 : vector<1x256xf32> to vector<16x256xf32>
    %20 = arith.mulf %17, %19 : vector<16x256xf32>
    %c0_12 = arith.constant 0 : index
    %c0_13 = arith.constant 0 : index
    %21 = vector.load %arg6[%c0_12, %c0_13] : memref<1x256xf32, #tpu.memory_space<vmem>>, vector<1x256xf32>
    %22 = vector.broadcast %21 : vector<1x256xf32> to vector<16x256xf32>
    %23 = arith.addf %20, %22 : vector<16x256xf32>
    %24 = arith.negf %23 : vector<16x256xf32>
    %25 = math.exp %24 : vector<16x256xf32>
    %cst_14 = arith.constant 1.000000e+00 : f32
    %26 = vector.broadcast %cst_14 : f32 to vector<16x256xf32>
    %27 = arith.addf %26, %25 : vector<16x256xf32>
    %28 = arith.divf %26, %27 : vector<16x256xf32>
    %29 = arith.mulf %23, %28 : vector<16x256xf32>
    %cst_15 = arith.constant 0.000000e+00 : f32
    %30 = vector.broadcast %cst_15 : f32 to vector<1x256xf32>
    %31 = tpu.concatenate %30, %29, %30 in 0 : vector<1x256xf32>, vector<16x256xf32>, vector<1x256xf32> -> vector<18x256xf32>
    %cst_16 = arith.constant 0.000000e+00 : f32
    %32 = vector.broadcast %cst_16 : f32 to vector<16x256xf32>
    %33 = vector.extract_strided_slice %15 {offsets = [0, 0], sizes = [16, 128], strides = [1, 1]} : vector<18x128xf32> to vector<16x128xf32>
    %c0_17 = arith.constant 0 : index
    %c0_18 = arith.constant 0 : index
    %c0_19 = arith.constant 0 : index
    %34 = vector.load %arg7[%c0_17, %c0_18, %c0_19] : memref<3x128x256xf32, #tpu.memory_space<vmem>>, vector<1x128x256xf32>
    %35 = vector.shape_cast %34 : vector<1x128x256xf32> to vector<128x256xf32>
    %cst_20 = arith.constant dense<0.000000e+00> : vector<16x256xf32>
    %36 = tpu.matmul %33, %35, %cst_20 {dimension_numbers = #tpu.dot_dimension_numbers<[1], [0], [0], [1], [0, 0, 1, 1], [], []>} : vector<16x128xf32>, vector<128x256xf32>, vector<16x256xf32> -> vector<16x256xf32>
    %37 = arith.addf %32, %36 : vector<16x256xf32>
    %38 = vector.extract_strided_slice %31 {offsets = [0, 0], sizes = [16, 256], strides = [1, 1]} : vector<18x256xf32> to vector<16x256xf32>
    %c0_21 = arith.constant 0 : index
    %c0_22 = arith.constant 0 : index
    %c0_23 = arith.constant 0 : index
    %39 = vector.load %arg8[%c0_21, %c0_22, %c0_23] : memref<3x256x256xf32, #tpu.memory_space<vmem>>, vector<1x256x256xf32>
    %40 = vector.shape_cast %39 : vector<1x256x256xf32> to vector<256x256xf32>
    %cst_24 = arith.constant dense<0.000000e+00> : vector<16x256xf32>
    %41 = tpu.matmul %38, %40, %cst_24 {dimension_numbers = #tpu.dot_dimension_numbers<[1], [0], [0], [1], [0, 0, 1, 1], [], []>} : vector<16x256xf32>, vector<256x256xf32>, vector<16x256xf32> -> vector<16x256xf32>
    %42 = arith.addf %37, %41 : vector<16x256xf32>
    %43 = vector.extract_strided_slice %15 {offsets = [1, 0], sizes = [16, 128], strides = [1, 1]} : vector<18x128xf32> to vector<16x128xf32>
    %c1 = arith.constant 1 : index
    %c0_25 = arith.constant 0 : index
    %c0_26 = arith.constant 0 : index
    %44 = vector.load %arg7[%c1, %c0_25, %c0_26] : memref<3x128x256xf32, #tpu.memory_space<vmem>>, vector<1x128x256xf32>
    %45 = vector.shape_cast %44 : vector<1x128x256xf32> to vector<128x256xf32>
    %cst_27 = arith.constant dense<0.000000e+00> : vector<16x256xf32>
    %46 = tpu.matmul %43, %45, %cst_27 {dimension_numbers = #tpu.dot_dimension_numbers<[1], [0], [0], [1], [0, 0, 1, 1], [], []>} : vector<16x128xf32>, vector<128x256xf32>, vector<16x256xf32> -> vector<16x256xf32>
    %47 = arith.addf %42, %46 : vector<16x256xf32>
    %48 = vector.extract_strided_slice %31 {offsets = [1, 0], sizes = [16, 256], strides = [1, 1]} : vector<18x256xf32> to vector<16x256xf32>
    %c1_28 = arith.constant 1 : index
    %c0_29 = arith.constant 0 : index
    %c0_30 = arith.constant 0 : index
    %49 = vector.load %arg8[%c1_28, %c0_29, %c0_30] : memref<3x256x256xf32, #tpu.memory_space<vmem>>, vector<1x256x256xf32>
    %50 = vector.shape_cast %49 : vector<1x256x256xf32> to vector<256x256xf32>
    %cst_31 = arith.constant dense<0.000000e+00> : vector<16x256xf32>
    %51 = tpu.matmul %48, %50, %cst_31 {dimension_numbers = #tpu.dot_dimension_numbers<[1], [0], [0], [1], [0, 0, 1, 1], [], []>} : vector<16x256xf32>, vector<256x256xf32>, vector<16x256xf32> -> vector<16x256xf32>
    %52 = arith.addf %47, %51 : vector<16x256xf32>
    %53 = vector.extract_strided_slice %15 {offsets = [2, 0], sizes = [16, 128], strides = [1, 1]} : vector<18x128xf32> to vector<16x128xf32>
    %c2 = arith.constant 2 : index
    %c0_32 = arith.constant 0 : index
    %c0_33 = arith.constant 0 : index
    %54 = vector.load %arg7[%c2, %c0_32, %c0_33] : memref<3x128x256xf32, #tpu.memory_space<vmem>>, vector<1x128x256xf32>
    %55 = vector.shape_cast %54 : vector<1x128x256xf32> to vector<128x256xf32>
    %cst_34 = arith.constant dense<0.000000e+00> : vector<16x256xf32>
    %56 = tpu.matmul %53, %55, %cst_34 {dimension_numbers = #tpu.dot_dimension_numbers<[1], [0], [0], [1], [0, 0, 1, 1], [], []>} : vector<16x128xf32>, vector<128x256xf32>, vector<16x256xf32> -> vector<16x256xf32>
    %57 = arith.addf %52, %56 : vector<16x256xf32>
    %58 = vector.extract_strided_slice %31 {offsets = [2, 0], sizes = [16, 256], strides = [1, 1]} : vector<18x256xf32> to vector<16x256xf32>
    %c2_35 = arith.constant 2 : index
    %c0_36 = arith.constant 0 : index
    %c0_37 = arith.constant 0 : index
    %59 = vector.load %arg8[%c2_35, %c0_36, %c0_37] : memref<3x256x256xf32, #tpu.memory_space<vmem>>, vector<1x256x256xf32>
    %60 = vector.shape_cast %59 : vector<1x256x256xf32> to vector<256x256xf32>
    %cst_38 = arith.constant dense<0.000000e+00> : vector<16x256xf32>
    %61 = tpu.matmul %58, %60, %cst_38 {dimension_numbers = #tpu.dot_dimension_numbers<[1], [0], [0], [1], [0, 0, 1, 1], [], []>} : vector<16x256xf32>, vector<256x256xf32>, vector<16x256xf32> -> vector<16x256xf32>
    %62 = arith.addf %57, %61 : vector<16x256xf32>
    %c0_39 = arith.constant 0 : index
    %c0_40 = arith.constant 0 : index
    %63 = vector.load %arg9[%c0_39, %c0_40] : memref<1x256xf32, #tpu.memory_space<vmem>>, vector<1x256xf32>
    %64 = vector.broadcast %63 : vector<1x256xf32> to vector<16x256xf32>
    %65 = arith.addf %62, %64 : vector<16x256xf32>
    %c0_41 = arith.constant 0 : index
    %c0_42 = arith.constant 0 : index
    %c0_43 = arith.constant 0 : index
    %66 = vector.load %arg10[%c0_41, %c0_42, %c0_43] : memref<1x1x256xf32, #tpu.memory_space<vmem>>, vector<1x1x256xf32>
    %67 = vector.shape_cast %66 : vector<1x1x256xf32> to vector<1x256xf32>
    %68 = vector.broadcast %67 : vector<1x256xf32> to vector<16x256xf32>
    %69 = arith.mulf %65, %68 : vector<16x256xf32>
    %c0_44 = arith.constant 0 : index
    %c0_45 = arith.constant 0 : index
    %c0_46 = arith.constant 0 : index
    %70 = vector.load %arg11[%c0_44, %c0_45, %c0_46] : memref<1x1x256xf32, #tpu.memory_space<vmem>>, vector<1x1x256xf32>
    %71 = vector.shape_cast %70 : vector<1x1x256xf32> to vector<1x256xf32>
    %72 = vector.broadcast %71 : vector<1x256xf32> to vector<16x256xf32>
    %73 = arith.addf %69, %72 : vector<16x256xf32>
    %c0_47 = arith.constant 0 : index
    %c0_48 = arith.constant 0 : index
    %c0_49 = arith.constant 0 : index
    %74 = vector.load %arg12[%c0_47, %c0_48, %c0_49] : memref<1x16x256xf32, #tpu.memory_space<vmem>>, vector<1x16x256xf32>
    %75 = vector.shape_cast %74 : vector<1x16x256xf32> to vector<16x256xf32>
    %76 = vector.shape_cast %73 : vector<16x256xf32> to vector<1x16x256xf32>
    tpu.vector_store %arg12[%c0_47, %c0_48, %c0_49], %76 {strides = array<i32>} : memref<1x16x256xf32, #tpu.memory_space<vmem>>, vector<1x16x256xf32>,
    %cst_50 = arith.constant dense<0.000000e+00> : vector<256xf32>
    %77 = vector.multi_reduction <add>, %73, %cst_50 [0] : vector<16x256xf32> to vector<256xf32>
    %78 = vector.shape_cast %77 : vector<256xf32> to vector<1x256xf32>
    %79 = arith.mulf %73, %73 : vector<16x256xf32>
    %cst_51 = arith.constant dense<0.000000e+00> : vector<256xf32>
    %80 = vector.multi_reduction <add>, %79, %cst_51 [0] : vector<16x256xf32> to vector<256xf32>
    %81 = vector.shape_cast %80 : vector<256xf32> to vector<1x256xf32>
    %82 = tpu.concatenate %78, %81 in 0 : vector<1x256xf32>, vector<1x256xf32> -> vector<2x256xf32>
    %c0_52 = arith.constant 0 : index
    %c0_53 = arith.constant 0 : index
    %c0_54 = arith.constant 0 : index
    %83 = vector.load %arg13[%c0_52, %c0_53, %c0_54] : memref<1x2x256xf32, #tpu.memory_space<vmem>>, vector<1x2x256xf32>
    %84 = vector.shape_cast %83 : vector<1x2x256xf32> to vector<2x256xf32>
    %85 = vector.shape_cast %82 : vector<2x256xf32> to vector<1x2x256xf32>
    tpu.vector_store %arg13[%c0_52, %c0_53, %c0_54], %85 {strides = array<i32>} : memref<1x2x256xf32, #tpu.memory_space<vmem>>, vector<1x2x256xf32>,
    return
  }
  func.func @transform_0(%arg0: i32) -> (i32, i32, i32) {
    %c0_i32 = arith.constant 0 : i32
    %c0_i32_0 = arith.constant 0 : i32
    %c0_i32_1 = arith.constant 0 : i32
    return %arg0, %c0_i32, %c0_i32_0 : i32, i32, i32
  }
  func.func @transform_1(%arg0: i32) -> (i32, i32, i32) {
    %c0_i32 = arith.constant 0 : i32
    %c0_i32_0 = arith.constant 0 : i32
    %c0_i32_1 = arith.constant 0 : i32
    return %arg0, %c0_i32, %c0_i32_0 : i32, i32, i32
  }
  func.func @transform_2(%arg0: i32) -> (i32, i32) {
    %c0_i32 = arith.constant 0 : i32
    %c0_i32_0 = arith.constant 0 : i32
    %c0_i32_1 = arith.constant 0 : i32
    return %c0_i32, %c0_i32_0 : i32, i32
  }
  func.func @transform_3(%arg0: i32) -> (i32, i32) {
    %c0_i32 = arith.constant 0 : i32
    %c0_i32_0 = arith.constant 0 : i32
    %c0_i32_1 = arith.constant 0 : i32
    return %c0_i32, %c0_i32_0 : i32, i32
  }
  func.func @transform_4(%arg0: i32) -> (i32, i32) {
    %c0_i32 = arith.constant 0 : i32
    %c0_i32_0 = arith.constant 0 : i32
    %c0_i32_1 = arith.constant 0 : i32
    return %c0_i32, %c0_i32_0 : i32, i32
  }
  func.func @transform_5(%arg0: i32) -> (i32, i32) {
    %c0_i32 = arith.constant 0 : i32
    %c0_i32_0 = arith.constant 0 : i32
    %c0_i32_1 = arith.constant 0 : i32
    return %c0_i32, %c0_i32_0 : i32, i32
  }
  func.func @transform_6(%arg0: i32) -> (i32, i32, i32) {
    %c0_i32 = arith.constant 0 : i32
    %c0_i32_0 = arith.constant 0 : i32
    %c0_i32_1 = arith.constant 0 : i32
    %c0_i32_2 = arith.constant 0 : i32
    return %c0_i32, %c0_i32_0, %c0_i32_1 : i32, i32, i32
  }
  func.func @transform_7(%arg0: i32) -> (i32, i32, i32) {
    %c0_i32 = arith.constant 0 : i32
    %c0_i32_0 = arith.constant 0 : i32
    %c0_i32_1 = arith.constant 0 : i32
    %c0_i32_2 = arith.constant 0 : i32
    return %c0_i32, %c0_i32_0, %c0_i32_1 : i32, i32, i32
  }
  func.func @transform_8(%arg0: i32) -> (i32, i32) {
    %c0_i32 = arith.constant 0 : i32
    %c0_i32_0 = arith.constant 0 : i32
    %c0_i32_1 = arith.constant 0 : i32
    return %c0_i32, %c0_i32_0 : i32, i32
  }
  func.func @transform_9(%arg0: i32) -> (i32, i32, i32) {
    %c0_i32 = arith.constant 0 : i32
    %c0_i32_0 = arith.constant 0 : i32
    %c0_i32_1 = arith.constant 0 : i32
    return %arg0, %c0_i32, %c0_i32_0 : i32, i32, i32
  }
  func.func @transform_10(%arg0: i32) -> (i32, i32, i32) {
    %c0_i32 = arith.constant 0 : i32
    %c0_i32_0 = arith.constant 0 : i32
    %c0_i32_1 = arith.constant 0 : i32
    return %arg0, %c0_i32, %c0_i32_0 : i32, i32, i32
  }
  func.func @transform_11(%arg0: i32) -> (i32, i32, i32) {
    %c0_i32 = arith.constant 0 : i32
    %c0_i32_0 = arith.constant 0 : i32
    %c0_i32_1 = arith.constant 0 : i32
    return %arg0, %c0_i32, %c0_i32_0 : i32, i32, i32
  }
  func.func @transform_12(%arg0: i32) -> (i32, i32, i32) {
    %c0_i32 = arith.constant 0 : i32
    %c0_i32_0 = arith.constant 0 : i32
    %c0_i32_1 = arith.constant 0 : i32
    return %arg0, %c0_i32, %c0_i32_0 : i32, i32, i32
  }
}

module attributes {stable_mosaic.version = 11 : i64} {
  func.func @_fused_conv2_kernel(%arg0: i32, %arg1: memref<1x16x256xf32, #tpu.memory_space<vmem>>, %arg2: memref<1x256xf32, #tpu.memory_space<vmem>>, %arg3: memref<1x256xf32, #tpu.memory_space<vmem>>, %arg4: memref<3x256x256xf32, #tpu.memory_space<vmem>>, %arg5: memref<1x256xf32, #tpu.memory_space<vmem>>, %arg6: memref<1x16x128xf32, #tpu.memory_space<vmem>>, %arg7: memref<1x16x256xf32, #tpu.memory_space<vmem>>, %arg8: memref<128x256xf32, #tpu.memory_space<vmem>>, %arg9: memref<256x256xf32, #tpu.memory_space<vmem>>, %arg10: memref<1x256xf32, #tpu.memory_space<vmem>>, %arg11: memref<1x16x256xf32, #tpu.memory_space<vmem>>, %arg12: memref<1x2x256xf32, #tpu.memory_space<vmem>>) attributes {dimension_semantics = [#tpu.dimension_semantics<parallel>], iteration_bounds = array<i64: 2>, scalar_prefetch = 0 : i64, scratch_operands = 0 : i64, tpu.core_type = #tpu.core_type<tc>, window_params = [{transform_indices = @transform_0, window_bounds = array<i64: 1, 16, 256>}, {pipeline_mode = #tpu.pipeline_mode<synchronous>, transform_indices = @transform_1, window_bounds = array<i64: 1, 256>}, {pipeline_mode = #tpu.pipeline_mode<synchronous>, transform_indices = @transform_2, window_bounds = array<i64: 1, 256>}, {pipeline_mode = #tpu.pipeline_mode<synchronous>, transform_indices = @transform_3, window_bounds = array<i64: 3, 256, 256>}, {pipeline_mode = #tpu.pipeline_mode<synchronous>, transform_indices = @transform_4, window_bounds = array<i64: 1, 256>}, {transform_indices = @transform_5, window_bounds = array<i64: 1, 16, 128>}, {transform_indices = @transform_6, window_bounds = array<i64: 1, 16, 256>}, {pipeline_mode = #tpu.pipeline_mode<synchronous>, transform_indices = @transform_7, window_bounds = array<i64: 128, 256>}, {pipeline_mode = #tpu.pipeline_mode<synchronous>, transform_indices = @transform_8, window_bounds = array<i64: 256, 256>}, {pipeline_mode = #tpu.pipeline_mode<synchronous>, transform_indices = @transform_9, window_bounds = array<i64: 1, 256>}, {transform_indices = @transform_10, window_bounds = array<i64: 1, 16, 256>}, {transform_indices = @transform_11, window_bounds = array<i64: 1, 2, 256>}]} {
    %c0 = arith.constant 0 : index
    %c0_0 = arith.constant 0 : index
    %c0_1 = arith.constant 0 : index
    %0 = vector.load %arg1[%c0, %c0_0, %c0_1] : memref<1x16x256xf32, #tpu.memory_space<vmem>>, vector<1x16x256xf32>
    %1 = vector.shape_cast %0 : vector<1x16x256xf32> to vector<16x256xf32>
    %c0_2 = arith.constant 0 : index
    %c0_3 = arith.constant 0 : index
    %2 = vector.load %arg2[%c0_2, %c0_3] : memref<1x256xf32, #tpu.memory_space<vmem>>, vector<1x256xf32>
    %3 = vector.broadcast %2 : vector<1x256xf32> to vector<16x256xf32>
    %4 = arith.mulf %1, %3 : vector<16x256xf32>
    %c0_4 = arith.constant 0 : index
    %c0_5 = arith.constant 0 : index
    %5 = vector.load %arg3[%c0_4, %c0_5] : memref<1x256xf32, #tpu.memory_space<vmem>>, vector<1x256xf32>
    %6 = vector.broadcast %5 : vector<1x256xf32> to vector<16x256xf32>
    %7 = arith.addf %4, %6 : vector<16x256xf32>
    %8 = arith.negf %7 : vector<16x256xf32>
    %9 = math.exp %8 : vector<16x256xf32>
    %cst = arith.constant 1.000000e+00 : f32
    %10 = vector.broadcast %cst : f32 to vector<16x256xf32>
    %11 = arith.addf %10, %9 : vector<16x256xf32>
    %12 = arith.divf %10, %11 : vector<16x256xf32>
    %13 = arith.mulf %7, %12 : vector<16x256xf32>
    %cst_6 = arith.constant 0.000000e+00 : f32
    %14 = vector.broadcast %cst_6 : f32 to vector<1x256xf32>
    %15 = tpu.concatenate %14, %13, %14 in 0 : vector<1x256xf32>, vector<16x256xf32>, vector<1x256xf32> -> vector<18x256xf32>
    %cst_7 = arith.constant 0.000000e+00 : f32
    %16 = vector.broadcast %cst_7 : f32 to vector<16x256xf32>
    %17 = vector.extract_strided_slice %15 {offsets = [0, 0], sizes = [16, 256], strides = [1, 1]} : vector<18x256xf32> to vector<16x256xf32>
    %c0_8 = arith.constant 0 : index
    %c0_9 = arith.constant 0 : index
    %c0_10 = arith.constant 0 : index
    %18 = vector.load %arg4[%c0_8, %c0_9, %c0_10] : memref<3x256x256xf32, #tpu.memory_space<vmem>>, vector<1x256x256xf32>
    %19 = vector.shape_cast %18 : vector<1x256x256xf32> to vector<256x256xf32>
    %cst_11 = arith.constant dense<0.000000e+00> : vector<16x256xf32>
    %20 = tpu.matmul %17, %19, %cst_11 {dimension_numbers = #tpu.dot_dimension_numbers<[1], [0], [0], [1], [0, 0, 1, 1], [], []>} : vector<16x256xf32>, vector<256x256xf32>, vector<16x256xf32> -> vector<16x256xf32>
    %21 = arith.addf %16, %20 : vector<16x256xf32>
    %22 = vector.extract_strided_slice %15 {offsets = [1, 0], sizes = [16, 256], strides = [1, 1]} : vector<18x256xf32> to vector<16x256xf32>
    %c1 = arith.constant 1 : index
    %c0_12 = arith.constant 0 : index
    %c0_13 = arith.constant 0 : index
    %23 = vector.load %arg4[%c1, %c0_12, %c0_13] : memref<3x256x256xf32, #tpu.memory_space<vmem>>, vector<1x256x256xf32>
    %24 = vector.shape_cast %23 : vector<1x256x256xf32> to vector<256x256xf32>
    %cst_14 = arith.constant dense<0.000000e+00> : vector<16x256xf32>
    %25 = tpu.matmul %22, %24, %cst_14 {dimension_numbers = #tpu.dot_dimension_numbers<[1], [0], [0], [1], [0, 0, 1, 1], [], []>} : vector<16x256xf32>, vector<256x256xf32>, vector<16x256xf32> -> vector<16x256xf32>
    %26 = arith.addf %21, %25 : vector<16x256xf32>
    %27 = vector.extract_strided_slice %15 {offsets = [2, 0], sizes = [16, 256], strides = [1, 1]} : vector<18x256xf32> to vector<16x256xf32>
    %c2 = arith.constant 2 : index
    %c0_15 = arith.constant 0 : index
    %c0_16 = arith.constant 0 : index
    %28 = vector.load %arg4[%c2, %c0_15, %c0_16] : memref<3x256x256xf32, #tpu.memory_space<vmem>>, vector<1x256x256xf32>
    %29 = vector.shape_cast %28 : vector<1x256x256xf32> to vector<256x256xf32>
    %cst_17 = arith.constant dense<0.000000e+00> : vector<16x256xf32>
    %30 = tpu.matmul %27, %29, %cst_17 {dimension_numbers = #tpu.dot_dimension_numbers<[1], [0], [0], [1], [0, 0, 1, 1], [], []>} : vector<16x256xf32>, vector<256x256xf32>, vector<16x256xf32> -> vector<16x256xf32>
    %31 = arith.addf %26, %30 : vector<16x256xf32>
    %c0_18 = arith.constant 0 : index
    %c0_19 = arith.constant 0 : index
    %c0_20 = arith.constant 0 : index
    %32 = vector.load %arg6[%c0_18, %c0_19, %c0_20] : memref<1x16x128xf32, #tpu.memory_space<vmem>>, vector<1x16x128xf32>
    %33 = vector.shape_cast %32 : vector<1x16x128xf32> to vector<16x128xf32>
    %c0_21 = arith.constant 0 : index
    %c0_22 = arith.constant 0 : index
    %34 = vector.load %arg8[%c0_21, %c0_22] : memref<128x256xf32, #tpu.memory_space<vmem>>, vector<128x256xf32>
    %cst_23 = arith.constant dense<0.000000e+00> : vector<16x256xf32>
    %35 = tpu.matmul %33, %34, %cst_23 {dimension_numbers = #tpu.dot_dimension_numbers<[1], [0], [0], [1], [0, 0, 1, 1], [], []>} : vector<16x128xf32>, vector<128x256xf32>, vector<16x256xf32> -> vector<16x256xf32>
    %c0_24 = arith.constant 0 : index
    %c0_25 = arith.constant 0 : index
    %c0_26 = arith.constant 0 : index
    %36 = vector.load %arg7[%c0_24, %c0_25, %c0_26] : memref<1x16x256xf32, #tpu.memory_space<vmem>>, vector<1x16x256xf32>
    %37 = vector.shape_cast %36 : vector<1x16x256xf32> to vector<16x256xf32>
    %c0_27 = arith.constant 0 : index
    %c0_28 = arith.constant 0 : index
    %38 = vector.load %arg9[%c0_27, %c0_28] : memref<256x256xf32, #tpu.memory_space<vmem>>, vector<256x256xf32>
    %cst_29 = arith.constant dense<0.000000e+00> : vector<16x256xf32>
    %39 = tpu.matmul %37, %38, %cst_29 {dimension_numbers = #tpu.dot_dimension_numbers<[1], [0], [0], [1], [0, 0, 1, 1], [], []>} : vector<16x256xf32>, vector<256x256xf32>, vector<16x256xf32> -> vector<16x256xf32>
    %40 = arith.addf %35, %39 : vector<16x256xf32>
    %c0_30 = arith.constant 0 : index
    %c0_31 = arith.constant 0 : index
    %41 = vector.load %arg5[%c0_30, %c0_31] : memref<1x256xf32, #tpu.memory_space<vmem>>, vector<1x256xf32>
    %42 = vector.broadcast %41 : vector<1x256xf32> to vector<16x256xf32>
    %43 = arith.addf %31, %42 : vector<16x256xf32>
    %44 = arith.addf %43, %40 : vector<16x256xf32>
    %c0_32 = arith.constant 0 : index
    %c0_33 = arith.constant 0 : index
    %45 = vector.load %arg10[%c0_32, %c0_33] : memref<1x256xf32, #tpu.memory_space<vmem>>, vector<1x256xf32>
    %46 = vector.broadcast %45 : vector<1x256xf32> to vector<16x256xf32>
    %47 = arith.addf %44, %46 : vector<16x256xf32>
    %c0_34 = arith.constant 0 : index
    %c0_35 = arith.constant 0 : index
    %c0_36 = arith.constant 0 : index
    %48 = vector.load %arg11[%c0_34, %c0_35, %c0_36] : memref<1x16x256xf32, #tpu.memory_space<vmem>>, vector<1x16x256xf32>
    %49 = vector.shape_cast %48 : vector<1x16x256xf32> to vector<16x256xf32>
    %50 = vector.shape_cast %47 : vector<16x256xf32> to vector<1x16x256xf32>
    tpu.vector_store %arg11[%c0_34, %c0_35, %c0_36], %50 {strides = array<i32>} : memref<1x16x256xf32, #tpu.memory_space<vmem>>, vector<1x16x256xf32>,
    %cst_37 = arith.constant dense<0.000000e+00> : vector<256xf32>
    %51 = vector.multi_reduction <add>, %47, %cst_37 [0] : vector<16x256xf32> to vector<256xf32>
    %52 = vector.shape_cast %51 : vector<256xf32> to vector<1x256xf32>
    %53 = arith.mulf %47, %47 : vector<16x256xf32>
    %cst_38 = arith.constant dense<0.000000e+00> : vector<256xf32>
    %54 = vector.multi_reduction <add>, %53, %cst_38 [0] : vector<16x256xf32> to vector<256xf32>
    %55 = vector.shape_cast %54 : vector<256xf32> to vector<1x256xf32>
    %56 = tpu.concatenate %52, %55 in 0 : vector<1x256xf32>, vector<1x256xf32> -> vector<2x256xf32>
    %c0_39 = arith.constant 0 : index
    %c0_40 = arith.constant 0 : index
    %c0_41 = arith.constant 0 : index
    %57 = vector.load %arg12[%c0_39, %c0_40, %c0_41] : memref<1x2x256xf32, #tpu.memory_space<vmem>>, vector<1x2x256xf32>
    %58 = vector.shape_cast %57 : vector<1x2x256xf32> to vector<2x256xf32>
    %59 = vector.shape_cast %56 : vector<2x256xf32> to vector<1x2x256xf32>
    tpu.vector_store %arg12[%c0_39, %c0_40, %c0_41], %59 {strides = array<i32>} : memref<1x2x256xf32, #tpu.memory_space<vmem>>, vector<1x2x256xf32>,
    return
  }
  func.func @transform_0(%arg0: i32) -> (i32, i32, i32) {
    %c0_i32 = arith.constant 0 : i32
    %c0_i32_0 = arith.constant 0 : i32
    %c0_i32_1 = arith.constant 0 : i32
    return %arg0, %c0_i32, %c0_i32_0 : i32, i32, i32
  }
  func.func @transform_1(%arg0: i32) -> (i32, i32) {
    %c0_i32 = arith.constant 0 : i32
    %c0_i32_0 = arith.constant 0 : i32
    %c0_i32_1 = arith.constant 0 : i32
    return %c0_i32, %c0_i32_0 : i32, i32
  }
  func.func @transform_2(%arg0: i32) -> (i32, i32) {
    %c0_i32 = arith.constant 0 : i32
    %c0_i32_0 = arith.constant 0 : i32
    %c0_i32_1 = arith.constant 0 : i32
    return %c0_i32, %c0_i32_0 : i32, i32
  }
  func.func @transform_3(%arg0: i32) -> (i32, i32, i32) {
    %c0_i32 = arith.constant 0 : i32
    %c0_i32_0 = arith.constant 0 : i32
    %c0_i32_1 = arith.constant 0 : i32
    %c0_i32_2 = arith.constant 0 : i32
    return %c0_i32, %c0_i32_0, %c0_i32_1 : i32, i32, i32
  }
  func.func @transform_4(%arg0: i32) -> (i32, i32) {
    %c0_i32 = arith.constant 0 : i32
    %c0_i32_0 = arith.constant 0 : i32
    %c0_i32_1 = arith.constant 0 : i32
    return %c0_i32, %c0_i32_0 : i32, i32
  }
  func.func @transform_5(%arg0: i32) -> (i32, i32, i32) {
    %c0_i32 = arith.constant 0 : i32
    %c0_i32_0 = arith.constant 0 : i32
    %c0_i32_1 = arith.constant 0 : i32
    return %arg0, %c0_i32, %c0_i32_0 : i32, i32, i32
  }
  func.func @transform_6(%arg0: i32) -> (i32, i32, i32) {
    %c0_i32 = arith.constant 0 : i32
    %c0_i32_0 = arith.constant 0 : i32
    %c0_i32_1 = arith.constant 0 : i32
    return %arg0, %c0_i32, %c0_i32_0 : i32, i32, i32
  }
  func.func @transform_7(%arg0: i32) -> (i32, i32) {
    %c0_i32 = arith.constant 0 : i32
    %c0_i32_0 = arith.constant 0 : i32
    %c0_i32_1 = arith.constant 0 : i32
    return %c0_i32, %c0_i32_0 : i32, i32
  }
  func.func @transform_8(%arg0: i32) -> (i32, i32) {
    %c0_i32 = arith.constant 0 : i32
    %c0_i32_0 = arith.constant 0 : i32
    %c0_i32_1 = arith.constant 0 : i32
    return %c0_i32, %c0_i32_0 : i32, i32
  }
  func.func @transform_9(%arg0: i32) -> (i32, i32) {
    %c0_i32 = arith.constant 0 : i32
    %c0_i32_0 = arith.constant 0 : i32
    %c0_i32_1 = arith.constant 0 : i32
    return %c0_i32, %c0_i32_0 : i32, i32
  }
  func.func @transform_10(%arg0: i32) -> (i32, i32, i32) {
    %c0_i32 = arith.constant 0 : i32
    %c0_i32_0 = arith.constant 0 : i32
    %c0_i32_1 = arith.constant 0 : i32
    return %arg0, %c0_i32, %c0_i32_0 : i32, i32, i32
  }
  func.func @transform_11(%arg0: i32) -> (i32, i32, i32) {
    %c0_i32 = arith.constant 0 : i32
    %c0_i32_0 = arith.constant 0 : i32
    %c0_i32_1 = arith.constant 0 : i32
    return %arg0, %c0_i32, %c0_i32_0 : i32, i32, i32
  }
}

module attributes {stable_mosaic.version = 11 : i64} {
  func.func @_fused_conv1_kernel(%arg0: i32, %arg1: memref<1x16x256xf32, #tpu.memory_space<vmem>>, %arg2: memref<1x16x128xf32, #tpu.memory_space<vmem>>, %arg3: memref<1x256xf32, #tpu.memory_space<vmem>>, %arg4: memref<1x256xf32, #tpu.memory_space<vmem>>, %arg5: memref<1x128xf32, #tpu.memory_space<vmem>>, %arg6: memref<1x128xf32, #tpu.memory_space<vmem>>, %arg7: memref<3x256x256xf32, #tpu.memory_space<vmem>>, %arg8: memref<3x128x256xf32, #tpu.memory_space<vmem>>, %arg9: memref<1x256xf32, #tpu.memory_space<vmem>>, %arg10: memref<1x1x256xf32, #tpu.memory_space<vmem>>, %arg11: memref<1x1x256xf32, #tpu.memory_space<vmem>>, %arg12: memref<1x16x256xf32, #tpu.memory_space<vmem>>, %arg13: memref<1x2x256xf32, #tpu.memory_space<vmem>>) attributes {dimension_semantics = [#tpu.dimension_semantics<parallel>], iteration_bounds = array<i64: 2>, scalar_prefetch = 0 : i64, scratch_operands = 0 : i64, tpu.core_type = #tpu.core_type<tc>, window_params = [{transform_indices = @transform_0, window_bounds = array<i64: 1, 16, 256>}, {transform_indices = @transform_1, window_bounds = array<i64: 1, 16, 128>}, {pipeline_mode = #tpu.pipeline_mode<synchronous>, transform_indices = @transform_2, window_bounds = array<i64: 1, 256>}, {pipeline_mode = #tpu.pipeline_mode<synchronous>, transform_indices = @transform_3, window_bounds = array<i64: 1, 256>}, {pipeline_mode = #tpu.pipeline_mode<synchronous>, transform_indices = @transform_4, window_bounds = array<i64: 1, 128>}, {pipeline_mode = #tpu.pipeline_mode<synchronous>, transform_indices = @transform_5, window_bounds = array<i64: 1, 128>}, {pipeline_mode = #tpu.pipeline_mode<synchronous>, transform_indices = @transform_6, window_bounds = array<i64: 3, 256, 256>}, {pipeline_mode = #tpu.pipeline_mode<synchronous>, transform_indices = @transform_7, window_bounds = array<i64: 3, 128, 256>}, {pipeline_mode = #tpu.pipeline_mode<synchronous>, transform_indices = @transform_8, window_bounds = array<i64: 1, 256>}, {transform_indices = @transform_9, window_bounds = array<i64: 1, 1, 256>}, {transform_indices = @transform_10, window_bounds = array<i64: 1, 1, 256>}, {transform_indices = @transform_11, window_bounds = array<i64: 1, 16, 256>}, {transform_indices = @transform_12, window_bounds = array<i64: 1, 2, 256>}]} {
    %c0 = arith.constant 0 : index
    %c0_0 = arith.constant 0 : index
    %c0_1 = arith.constant 0 : index
    %0 = vector.load %arg1[%c0, %c0_0, %c0_1] : memref<1x16x256xf32, #tpu.memory_space<vmem>>, vector<1x16x256xf32>
    %1 = vector.shape_cast %0 : vector<1x16x256xf32> to vector<16x256xf32>
    %c0_2 = arith.constant 0 : index
    %c0_3 = arith.constant 0 : index
    %2 = vector.load %arg3[%c0_2, %c0_3] : memref<1x256xf32, #tpu.memory_space<vmem>>, vector<1x256xf32>
    %3 = vector.broadcast %2 : vector<1x256xf32> to vector<16x256xf32>
    %4 = arith.mulf %1, %3 : vector<16x256xf32>
    %c0_4 = arith.constant 0 : index
    %c0_5 = arith.constant 0 : index
    %5 = vector.load %arg4[%c0_4, %c0_5] : memref<1x256xf32, #tpu.memory_space<vmem>>, vector<1x256xf32>
    %6 = vector.broadcast %5 : vector<1x256xf32> to vector<16x256xf32>
    %7 = arith.addf %4, %6 : vector<16x256xf32>
    %8 = arith.negf %7 : vector<16x256xf32>
    %9 = math.exp %8 : vector<16x256xf32>
    %cst = arith.constant 1.000000e+00 : f32
    %10 = vector.broadcast %cst : f32 to vector<16x256xf32>
    %11 = arith.addf %10, %9 : vector<16x256xf32>
    %12 = arith.divf %10, %11 : vector<16x256xf32>
    %13 = arith.mulf %7, %12 : vector<16x256xf32>
    %cst_6 = arith.constant 0.000000e+00 : f32
    %14 = vector.broadcast %cst_6 : f32 to vector<1x256xf32>
    %15 = tpu.concatenate %14, %13, %14 in 0 : vector<1x256xf32>, vector<16x256xf32>, vector<1x256xf32> -> vector<18x256xf32>
    %c0_7 = arith.constant 0 : index
    %c0_8 = arith.constant 0 : index
    %c0_9 = arith.constant 0 : index
    %16 = vector.load %arg2[%c0_7, %c0_8, %c0_9] : memref<1x16x128xf32, #tpu.memory_space<vmem>>, vector<1x16x128xf32>
    %17 = vector.shape_cast %16 : vector<1x16x128xf32> to vector<16x128xf32>
    %c0_10 = arith.constant 0 : index
    %c0_11 = arith.constant 0 : index
    %18 = vector.load %arg5[%c0_10, %c0_11] : memref<1x128xf32, #tpu.memory_space<vmem>>, vector<1x128xf32>
    %19 = vector.broadcast %18 : vector<1x128xf32> to vector<16x128xf32>
    %20 = arith.mulf %17, %19 : vector<16x128xf32>
    %c0_12 = arith.constant 0 : index
    %c0_13 = arith.constant 0 : index
    %21 = vector.load %arg6[%c0_12, %c0_13] : memref<1x128xf32, #tpu.memory_space<vmem>>, vector<1x128xf32>
    %22 = vector.broadcast %21 : vector<1x128xf32> to vector<16x128xf32>
    %23 = arith.addf %20, %22 : vector<16x128xf32>
    %24 = arith.negf %23 : vector<16x128xf32>
    %25 = math.exp %24 : vector<16x128xf32>
    %cst_14 = arith.constant 1.000000e+00 : f32
    %26 = vector.broadcast %cst_14 : f32 to vector<16x128xf32>
    %27 = arith.addf %26, %25 : vector<16x128xf32>
    %28 = arith.divf %26, %27 : vector<16x128xf32>
    %29 = arith.mulf %23, %28 : vector<16x128xf32>
    %cst_15 = arith.constant 0.000000e+00 : f32
    %30 = vector.broadcast %cst_15 : f32 to vector<1x128xf32>
    %31 = tpu.concatenate %30, %29, %30 in 0 : vector<1x128xf32>, vector<16x128xf32>, vector<1x128xf32> -> vector<18x128xf32>
    %cst_16 = arith.constant 0.000000e+00 : f32
    %32 = vector.broadcast %cst_16 : f32 to vector<16x256xf32>
    %33 = vector.extract_strided_slice %15 {offsets = [0, 0], sizes = [16, 256], strides = [1, 1]} : vector<18x256xf32> to vector<16x256xf32>
    %c0_17 = arith.constant 0 : index
    %c0_18 = arith.constant 0 : index
    %c0_19 = arith.constant 0 : index
    %34 = vector.load %arg7[%c0_17, %c0_18, %c0_19] : memref<3x256x256xf32, #tpu.memory_space<vmem>>, vector<1x256x256xf32>
    %35 = vector.shape_cast %34 : vector<1x256x256xf32> to vector<256x256xf32>
    %cst_20 = arith.constant dense<0.000000e+00> : vector<16x256xf32>
    %36 = tpu.matmul %33, %35, %cst_20 {dimension_numbers = #tpu.dot_dimension_numbers<[1], [0], [0], [1], [0, 0, 1, 1], [], []>} : vector<16x256xf32>, vector<256x256xf32>, vector<16x256xf32> -> vector<16x256xf32>
    %37 = arith.addf %32, %36 : vector<16x256xf32>
    %38 = vector.extract_strided_slice %31 {offsets = [0, 0], sizes = [16, 128], strides = [1, 1]} : vector<18x128xf32> to vector<16x128xf32>
    %c0_21 = arith.constant 0 : index
    %c0_22 = arith.constant 0 : index
    %c0_23 = arith.constant 0 : index
    %39 = vector.load %arg8[%c0_21, %c0_22, %c0_23] : memref<3x128x256xf32, #tpu.memory_space<vmem>>, vector<1x128x256xf32>
    %40 = vector.shape_cast %39 : vector<1x128x256xf32> to vector<128x256xf32>
    %cst_24 = arith.constant dense<0.000000e+00> : vector<16x256xf32>
    %41 = tpu.matmul %38, %40, %cst_24 {dimension_numbers = #tpu.dot_dimension_numbers<[1], [0], [0], [1], [0, 0, 1, 1], [], []>} : vector<16x128xf32>, vector<128x256xf32>, vector<16x256xf32> -> vector<16x256xf32>
    %42 = arith.addf %37, %41 : vector<16x256xf32>
    %43 = vector.extract_strided_slice %15 {offsets = [1, 0], sizes = [16, 256], strides = [1, 1]} : vector<18x256xf32> to vector<16x256xf32>
    %c1 = arith.constant 1 : index
    %c0_25 = arith.constant 0 : index
    %c0_26 = arith.constant 0 : index
    %44 = vector.load %arg7[%c1, %c0_25, %c0_26] : memref<3x256x256xf32, #tpu.memory_space<vmem>>, vector<1x256x256xf32>
    %45 = vector.shape_cast %44 : vector<1x256x256xf32> to vector<256x256xf32>
    %cst_27 = arith.constant dense<0.000000e+00> : vector<16x256xf32>
    %46 = tpu.matmul %43, %45, %cst_27 {dimension_numbers = #tpu.dot_dimension_numbers<[1], [0], [0], [1], [0, 0, 1, 1], [], []>} : vector<16x256xf32>, vector<256x256xf32>, vector<16x256xf32> -> vector<16x256xf32>
    %47 = arith.addf %42, %46 : vector<16x256xf32>
    %48 = vector.extract_strided_slice %31 {offsets = [1, 0], sizes = [16, 128], strides = [1, 1]} : vector<18x128xf32> to vector<16x128xf32>
    %c1_28 = arith.constant 1 : index
    %c0_29 = arith.constant 0 : index
    %c0_30 = arith.constant 0 : index
    %49 = vector.load %arg8[%c1_28, %c0_29, %c0_30] : memref<3x128x256xf32, #tpu.memory_space<vmem>>, vector<1x128x256xf32>
    %50 = vector.shape_cast %49 : vector<1x128x256xf32> to vector<128x256xf32>
    %cst_31 = arith.constant dense<0.000000e+00> : vector<16x256xf32>
    %51 = tpu.matmul %48, %50, %cst_31 {dimension_numbers = #tpu.dot_dimension_numbers<[1], [0], [0], [1], [0, 0, 1, 1], [], []>} : vector<16x128xf32>, vector<128x256xf32>, vector<16x256xf32> -> vector<16x256xf32>
    %52 = arith.addf %47, %51 : vector<16x256xf32>
    %53 = vector.extract_strided_slice %15 {offsets = [2, 0], sizes = [16, 256], strides = [1, 1]} : vector<18x256xf32> to vector<16x256xf32>
    %c2 = arith.constant 2 : index
    %c0_32 = arith.constant 0 : index
    %c0_33 = arith.constant 0 : index
    %54 = vector.load %arg7[%c2, %c0_32, %c0_33] : memref<3x256x256xf32, #tpu.memory_space<vmem>>, vector<1x256x256xf32>
    %55 = vector.shape_cast %54 : vector<1x256x256xf32> to vector<256x256xf32>
    %cst_34 = arith.constant dense<0.000000e+00> : vector<16x256xf32>
    %56 = tpu.matmul %53, %55, %cst_34 {dimension_numbers = #tpu.dot_dimension_numbers<[1], [0], [0], [1], [0, 0, 1, 1], [], []>} : vector<16x256xf32>, vector<256x256xf32>, vector<16x256xf32> -> vector<16x256xf32>
    %57 = arith.addf %52, %56 : vector<16x256xf32>
    %58 = vector.extract_strided_slice %31 {offsets = [2, 0], sizes = [16, 128], strides = [1, 1]} : vector<18x128xf32> to vector<16x128xf32>
    %c2_35 = arith.constant 2 : index
    %c0_36 = arith.constant 0 : index
    %c0_37 = arith.constant 0 : index
    %59 = vector.load %arg8[%c2_35, %c0_36, %c0_37] : memref<3x128x256xf32, #tpu.memory_space<vmem>>, vector<1x128x256xf32>
    %60 = vector.shape_cast %59 : vector<1x128x256xf32> to vector<128x256xf32>
    %cst_38 = arith.constant dense<0.000000e+00> : vector<16x256xf32>
    %61 = tpu.matmul %58, %60, %cst_38 {dimension_numbers = #tpu.dot_dimension_numbers<[1], [0], [0], [1], [0, 0, 1, 1], [], []>} : vector<16x128xf32>, vector<128x256xf32>, vector<16x256xf32> -> vector<16x256xf32>
    %62 = arith.addf %57, %61 : vector<16x256xf32>
    %c0_39 = arith.constant 0 : index
    %c0_40 = arith.constant 0 : index
    %63 = vector.load %arg9[%c0_39, %c0_40] : memref<1x256xf32, #tpu.memory_space<vmem>>, vector<1x256xf32>
    %64 = vector.broadcast %63 : vector<1x256xf32> to vector<16x256xf32>
    %65 = arith.addf %62, %64 : vector<16x256xf32>
    %c0_41 = arith.constant 0 : index
    %c0_42 = arith.constant 0 : index
    %c0_43 = arith.constant 0 : index
    %66 = vector.load %arg10[%c0_41, %c0_42, %c0_43] : memref<1x1x256xf32, #tpu.memory_space<vmem>>, vector<1x1x256xf32>
    %67 = vector.shape_cast %66 : vector<1x1x256xf32> to vector<1x256xf32>
    %68 = vector.broadcast %67 : vector<1x256xf32> to vector<16x256xf32>
    %69 = arith.mulf %65, %68 : vector<16x256xf32>
    %c0_44 = arith.constant 0 : index
    %c0_45 = arith.constant 0 : index
    %c0_46 = arith.constant 0 : index
    %70 = vector.load %arg11[%c0_44, %c0_45, %c0_46] : memref<1x1x256xf32, #tpu.memory_space<vmem>>, vector<1x1x256xf32>
    %71 = vector.shape_cast %70 : vector<1x1x256xf32> to vector<1x256xf32>
    %72 = vector.broadcast %71 : vector<1x256xf32> to vector<16x256xf32>
    %73 = arith.addf %69, %72 : vector<16x256xf32>
    %c0_47 = arith.constant 0 : index
    %c0_48 = arith.constant 0 : index
    %c0_49 = arith.constant 0 : index
    %74 = vector.load %arg12[%c0_47, %c0_48, %c0_49] : memref<1x16x256xf32, #tpu.memory_space<vmem>>, vector<1x16x256xf32>
    %75 = vector.shape_cast %74 : vector<1x16x256xf32> to vector<16x256xf32>
    %76 = vector.shape_cast %73 : vector<16x256xf32> to vector<1x16x256xf32>
    tpu.vector_store %arg12[%c0_47, %c0_48, %c0_49], %76 {strides = array<i32>} : memref<1x16x256xf32, #tpu.memory_space<vmem>>, vector<1x16x256xf32>,
    %cst_50 = arith.constant dense<0.000000e+00> : vector<256xf32>
    %77 = vector.multi_reduction <add>, %73, %cst_50 [0] : vector<16x256xf32> to vector<256xf32>
    %78 = vector.shape_cast %77 : vector<256xf32> to vector<1x256xf32>
    %79 = arith.mulf %73, %73 : vector<16x256xf32>
    %cst_51 = arith.constant dense<0.000000e+00> : vector<256xf32>
    %80 = vector.multi_reduction <add>, %79, %cst_51 [0] : vector<16x256xf32> to vector<256xf32>
    %81 = vector.shape_cast %80 : vector<256xf32> to vector<1x256xf32>
    %82 = tpu.concatenate %78, %81 in 0 : vector<1x256xf32>, vector<1x256xf32> -> vector<2x256xf32>
    %c0_52 = arith.constant 0 : index
    %c0_53 = arith.constant 0 : index
    %c0_54 = arith.constant 0 : index
    %83 = vector.load %arg13[%c0_52, %c0_53, %c0_54] : memref<1x2x256xf32, #tpu.memory_space<vmem>>, vector<1x2x256xf32>
    %84 = vector.shape_cast %83 : vector<1x2x256xf32> to vector<2x256xf32>
    %85 = vector.shape_cast %82 : vector<2x256xf32> to vector<1x2x256xf32>
    tpu.vector_store %arg13[%c0_52, %c0_53, %c0_54], %85 {strides = array<i32>} : memref<1x2x256xf32, #tpu.memory_space<vmem>>, vector<1x2x256xf32>,
    return
  }
  func.func @transform_0(%arg0: i32) -> (i32, i32, i32) {
    %c0_i32 = arith.constant 0 : i32
    %c0_i32_0 = arith.constant 0 : i32
    %c0_i32_1 = arith.constant 0 : i32
    return %arg0, %c0_i32, %c0_i32_0 : i32, i32, i32
  }
  func.func @transform_1(%arg0: i32) -> (i32, i32, i32) {
    %c0_i32 = arith.constant 0 : i32
    %c0_i32_0 = arith.constant 0 : i32
    %c0_i32_1 = arith.constant 0 : i32
    return %arg0, %c0_i32, %c0_i32_0 : i32, i32, i32
  }
  func.func @transform_2(%arg0: i32) -> (i32, i32) {
    %c0_i32 = arith.constant 0 : i32
    %c0_i32_0 = arith.constant 0 : i32
    %c0_i32_1 = arith.constant 0 : i32
    return %c0_i32, %c0_i32_0 : i32, i32
  }
  func.func @transform_3(%arg0: i32) -> (i32, i32) {
    %c0_i32 = arith.constant 0 : i32
    %c0_i32_0 = arith.constant 0 : i32
    %c0_i32_1 = arith.constant 0 : i32
    return %c0_i32, %c0_i32_0 : i32, i32
  }
  func.func @transform_4(%arg0: i32) -> (i32, i32) {
    %c0_i32 = arith.constant 0 : i32
    %c0_i32_0 = arith.constant 0 : i32
    %c0_i32_1 = arith.constant 0 : i32
    return %c0_i32, %c0_i32_0 : i32, i32
  }
  func.func @transform_5(%arg0: i32) -> (i32, i32) {
    %c0_i32 = arith.constant 0 : i32
    %c0_i32_0 = arith.constant 0 : i32
    %c0_i32_1 = arith.constant 0 : i32
    return %c0_i32, %c0_i32_0 : i32, i32
  }
  func.func @transform_6(%arg0: i32) -> (i32, i32, i32) {
    %c0_i32 = arith.constant 0 : i32
    %c0_i32_0 = arith.constant 0 : i32
    %c0_i32_1 = arith.constant 0 : i32
    %c0_i32_2 = arith.constant 0 : i32
    return %c0_i32, %c0_i32_0, %c0_i32_1 : i32, i32, i32
  }
  func.func @transform_7(%arg0: i32) -> (i32, i32, i32) {
    %c0_i32 = arith.constant 0 : i32
    %c0_i32_0 = arith.constant 0 : i32
    %c0_i32_1 = arith.constant 0 : i32
    %c0_i32_2 = arith.constant 0 : i32
    return %c0_i32, %c0_i32_0, %c0_i32_1 : i32, i32, i32
  }
  func.func @transform_8(%arg0: i32) -> (i32, i32) {
    %c0_i32 = arith.constant 0 : i32
    %c0_i32_0 = arith.constant 0 : i32
    %c0_i32_1 = arith.constant 0 : i32
    return %c0_i32, %c0_i32_0 : i32, i32
  }
  func.func @transform_9(%arg0: i32) -> (i32, i32, i32) {
    %c0_i32 = arith.constant 0 : i32
    %c0_i32_0 = arith.constant 0 : i32
    %c0_i32_1 = arith.constant 0 : i32
    return %arg0, %c0_i32, %c0_i32_0 : i32, i32, i32
  }
  func.func @transform_10(%arg0: i32) -> (i32, i32, i32) {
    %c0_i32 = arith.constant 0 : i32
    %c0_i32_0 = arith.constant 0 : i32
    %c0_i32_1 = arith.constant 0 : i32
    return %arg0, %c0_i32, %c0_i32_0 : i32, i32, i32
  }
  func.func @transform_11(%arg0: i32) -> (i32, i32, i32) {
    %c0_i32 = arith.constant 0 : i32
    %c0_i32_0 = arith.constant 0 : i32
    %c0_i32_1 = arith.constant 0 : i32
    return %arg0, %c0_i32, %c0_i32_0 : i32, i32, i32
  }
  func.func @transform_12(%arg0: i32) -> (i32, i32, i32) {
    %c0_i32 = arith.constant 0 : i32
    %c0_i32_0 = arith.constant 0 : i32
    %c0_i32_1 = arith.constant 0 : i32
    return %arg0, %c0_i32, %c0_i32_0 : i32, i32, i32
  }
}

module attributes {stable_mosaic.version = 11 : i64} {
  func.func @_fused_conv2_kernel(%arg0: i32, %arg1: memref<1x16x256xf32, #tpu.memory_space<vmem>>, %arg2: memref<1x256xf32, #tpu.memory_space<vmem>>, %arg3: memref<1x256xf32, #tpu.memory_space<vmem>>, %arg4: memref<3x256x256xf32, #tpu.memory_space<vmem>>, %arg5: memref<1x256xf32, #tpu.memory_space<vmem>>, %arg6: memref<1x16x256xf32, #tpu.memory_space<vmem>>, %arg7: memref<1x16x128xf32, #tpu.memory_space<vmem>>, %arg8: memref<256x256xf32, #tpu.memory_space<vmem>>, %arg9: memref<128x256xf32, #tpu.memory_space<vmem>>, %arg10: memref<1x256xf32, #tpu.memory_space<vmem>>, %arg11: memref<1x16x256xf32, #tpu.memory_space<vmem>>, %arg12: memref<1x2x256xf32, #tpu.memory_space<vmem>>) attributes {dimension_semantics = [#tpu.dimension_semantics<parallel>], iteration_bounds = array<i64: 2>, scalar_prefetch = 0 : i64, scratch_operands = 0 : i64, tpu.core_type = #tpu.core_type<tc>, window_params = [{transform_indices = @transform_0, window_bounds = array<i64: 1, 16, 256>}, {pipeline_mode = #tpu.pipeline_mode<synchronous>, transform_indices = @transform_1, window_bounds = array<i64: 1, 256>}, {pipeline_mode = #tpu.pipeline_mode<synchronous>, transform_indices = @transform_2, window_bounds = array<i64: 1, 256>}, {pipeline_mode = #tpu.pipeline_mode<synchronous>, transform_indices = @transform_3, window_bounds = array<i64: 3, 256, 256>}, {pipeline_mode = #tpu.pipeline_mode<synchronous>, transform_indices = @transform_4, window_bounds = array<i64: 1, 256>}, {transform_indices = @transform_5, window_bounds = array<i64: 1, 16, 256>}, {transform_indices = @transform_6, window_bounds = array<i64: 1, 16, 128>}, {pipeline_mode = #tpu.pipeline_mode<synchronous>, transform_indices = @transform_7, window_bounds = array<i64: 256, 256>}, {pipeline_mode = #tpu.pipeline_mode<synchronous>, transform_indices = @transform_8, window_bounds = array<i64: 128, 256>}, {pipeline_mode = #tpu.pipeline_mode<synchronous>, transform_indices = @transform_9, window_bounds = array<i64: 1, 256>}, {transform_indices = @transform_10, window_bounds = array<i64: 1, 16, 256>}, {transform_indices = @transform_11, window_bounds = array<i64: 1, 2, 256>}]} {
    %c0 = arith.constant 0 : index
    %c0_0 = arith.constant 0 : index
    %c0_1 = arith.constant 0 : index
    %0 = vector.load %arg1[%c0, %c0_0, %c0_1] : memref<1x16x256xf32, #tpu.memory_space<vmem>>, vector<1x16x256xf32>
    %1 = vector.shape_cast %0 : vector<1x16x256xf32> to vector<16x256xf32>
    %c0_2 = arith.constant 0 : index
    %c0_3 = arith.constant 0 : index
    %2 = vector.load %arg2[%c0_2, %c0_3] : memref<1x256xf32, #tpu.memory_space<vmem>>, vector<1x256xf32>
    %3 = vector.broadcast %2 : vector<1x256xf32> to vector<16x256xf32>
    %4 = arith.mulf %1, %3 : vector<16x256xf32>
    %c0_4 = arith.constant 0 : index
    %c0_5 = arith.constant 0 : index
    %5 = vector.load %arg3[%c0_4, %c0_5] : memref<1x256xf32, #tpu.memory_space<vmem>>, vector<1x256xf32>
    %6 = vector.broadcast %5 : vector<1x256xf32> to vector<16x256xf32>
    %7 = arith.addf %4, %6 : vector<16x256xf32>
    %8 = arith.negf %7 : vector<16x256xf32>
    %9 = math.exp %8 : vector<16x256xf32>
    %cst = arith.constant 1.000000e+00 : f32
    %10 = vector.broadcast %cst : f32 to vector<16x256xf32>
    %11 = arith.addf %10, %9 : vector<16x256xf32>
    %12 = arith.divf %10, %11 : vector<16x256xf32>
    %13 = arith.mulf %7, %12 : vector<16x256xf32>
    %cst_6 = arith.constant 0.000000e+00 : f32
    %14 = vector.broadcast %cst_6 : f32 to vector<1x256xf32>
    %15 = tpu.concatenate %14, %13, %14 in 0 : vector<1x256xf32>, vector<16x256xf32>, vector<1x256xf32> -> vector<18x256xf32>
    %cst_7 = arith.constant 0.000000e+00 : f32
    %16 = vector.broadcast %cst_7 : f32 to vector<16x256xf32>
    %17 = vector.extract_strided_slice %15 {offsets = [0, 0], sizes = [16, 256], strides = [1, 1]} : vector<18x256xf32> to vector<16x256xf32>
    %c0_8 = arith.constant 0 : index
    %c0_9 = arith.constant 0 : index
    %c0_10 = arith.constant 0 : index
    %18 = vector.load %arg4[%c0_8, %c0_9, %c0_10] : memref<3x256x256xf32, #tpu.memory_space<vmem>>, vector<1x256x256xf32>
    %19 = vector.shape_cast %18 : vector<1x256x256xf32> to vector<256x256xf32>
    %cst_11 = arith.constant dense<0.000000e+00> : vector<16x256xf32>
    %20 = tpu.matmul %17, %19, %cst_11 {dimension_numbers = #tpu.dot_dimension_numbers<[1], [0], [0], [1], [0, 0, 1, 1], [], []>} : vector<16x256xf32>, vector<256x256xf32>, vector<16x256xf32> -> vector<16x256xf32>
    %21 = arith.addf %16, %20 : vector<16x256xf32>
    %22 = vector.extract_strided_slice %15 {offsets = [1, 0], sizes = [16, 256], strides = [1, 1]} : vector<18x256xf32> to vector<16x256xf32>
    %c1 = arith.constant 1 : index
    %c0_12 = arith.constant 0 : index
    %c0_13 = arith.constant 0 : index
    %23 = vector.load %arg4[%c1, %c0_12, %c0_13] : memref<3x256x256xf32, #tpu.memory_space<vmem>>, vector<1x256x256xf32>
    %24 = vector.shape_cast %23 : vector<1x256x256xf32> to vector<256x256xf32>
    %cst_14 = arith.constant dense<0.000000e+00> : vector<16x256xf32>
    %25 = tpu.matmul %22, %24, %cst_14 {dimension_numbers = #tpu.dot_dimension_numbers<[1], [0], [0], [1], [0, 0, 1, 1], [], []>} : vector<16x256xf32>, vector<256x256xf32>, vector<16x256xf32> -> vector<16x256xf32>
    %26 = arith.addf %21, %25 : vector<16x256xf32>
    %27 = vector.extract_strided_slice %15 {offsets = [2, 0], sizes = [16, 256], strides = [1, 1]} : vector<18x256xf32> to vector<16x256xf32>
    %c2 = arith.constant 2 : index
    %c0_15 = arith.constant 0 : index
    %c0_16 = arith.constant 0 : index
    %28 = vector.load %arg4[%c2, %c0_15, %c0_16] : memref<3x256x256xf32, #tpu.memory_space<vmem>>, vector<1x256x256xf32>
    %29 = vector.shape_cast %28 : vector<1x256x256xf32> to vector<256x256xf32>
    %cst_17 = arith.constant dense<0.000000e+00> : vector<16x256xf32>
    %30 = tpu.matmul %27, %29, %cst_17 {dimension_numbers = #tpu.dot_dimension_numbers<[1], [0], [0], [1], [0, 0, 1, 1], [], []>} : vector<16x256xf32>, vector<256x256xf32>, vector<16x256xf32> -> vector<16x256xf32>
    %31 = arith.addf %26, %30 : vector<16x256xf32>
    %c0_18 = arith.constant 0 : index
    %c0_19 = arith.constant 0 : index
    %c0_20 = arith.constant 0 : index
    %32 = vector.load %arg6[%c0_18, %c0_19, %c0_20] : memref<1x16x256xf32, #tpu.memory_space<vmem>>, vector<1x16x256xf32>
    %33 = vector.shape_cast %32 : vector<1x16x256xf32> to vector<16x256xf32>
    %c0_21 = arith.constant 0 : index
    %c0_22 = arith.constant 0 : index
    %34 = vector.load %arg8[%c0_21, %c0_22] : memref<256x256xf32, #tpu.memory_space<vmem>>, vector<256x256xf32>
    %cst_23 = arith.constant dense<0.000000e+00> : vector<16x256xf32>
    %35 = tpu.matmul %33, %34, %cst_23 {dimension_numbers = #tpu.dot_dimension_numbers<[1], [0], [0], [1], [0, 0, 1, 1], [], []>} : vector<16x256xf32>, vector<256x256xf32>, vector<16x256xf32> -> vector<16x256xf32>
    %c0_24 = arith.constant 0 : index
    %c0_25 = arith.constant 0 : index
    %c0_26 = arith.constant 0 : index
    %36 = vector.load %arg7[%c0_24, %c0_25, %c0_26] : memref<1x16x128xf32, #tpu.memory_space<vmem>>, vector<1x16x128xf32>
    %37 = vector.shape_cast %36 : vector<1x16x128xf32> to vector<16x128xf32>
    %c0_27 = arith.constant 0 : index
    %c0_28 = arith.constant 0 : index
    %38 = vector.load %arg9[%c0_27, %c0_28] : memref<128x256xf32, #tpu.memory_space<vmem>>, vector<128x256xf32>
    %cst_29 = arith.constant dense<0.000000e+00> : vector<16x256xf32>
    %39 = tpu.matmul %37, %38, %cst_29 {dimension_numbers = #tpu.dot_dimension_numbers<[1], [0], [0], [1], [0, 0, 1, 1], [], []>} : vector<16x128xf32>, vector<128x256xf32>, vector<16x256xf32> -> vector<16x256xf32>
    %40 = arith.addf %35, %39 : vector<16x256xf32>
    %c0_30 = arith.constant 0 : index
    %c0_31 = arith.constant 0 : index
    %41 = vector.load %arg5[%c0_30, %c0_31] : memref<1x256xf32, #tpu.memory_space<vmem>>, vector<1x256xf32>
    %42 = vector.broadcast %41 : vector<1x256xf32> to vector<16x256xf32>
    %43 = arith.addf %31, %42 : vector<16x256xf32>
    %44 = arith.addf %43, %40 : vector<16x256xf32>
    %c0_32 = arith.constant 0 : index
    %c0_33 = arith.constant 0 : index
    %45 = vector.load %arg10[%c0_32, %c0_33] : memref<1x256xf32, #tpu.memory_space<vmem>>, vector<1x256xf32>
    %46 = vector.broadcast %45 : vector<1x256xf32> to vector<16x256xf32>
    %47 = arith.addf %44, %46 : vector<16x256xf32>
    %c0_34 = arith.constant 0 : index
    %c0_35 = arith.constant 0 : index
    %c0_36 = arith.constant 0 : index
    %48 = vector.load %arg11[%c0_34, %c0_35, %c0_36] : memref<1x16x256xf32, #tpu.memory_space<vmem>>, vector<1x16x256xf32>
    %49 = vector.shape_cast %48 : vector<1x16x256xf32> to vector<16x256xf32>
    %50 = vector.shape_cast %47 : vector<16x256xf32> to vector<1x16x256xf32>
    tpu.vector_store %arg11[%c0_34, %c0_35, %c0_36], %50 {strides = array<i32>} : memref<1x16x256xf32, #tpu.memory_space<vmem>>, vector<1x16x256xf32>,
    %cst_37 = arith.constant dense<0.000000e+00> : vector<256xf32>
    %51 = vector.multi_reduction <add>, %47, %cst_37 [0] : vector<16x256xf32> to vector<256xf32>
    %52 = vector.shape_cast %51 : vector<256xf32> to vector<1x256xf32>
    %53 = arith.mulf %47, %47 : vector<16x256xf32>
    %cst_38 = arith.constant dense<0.000000e+00> : vector<256xf32>
    %54 = vector.multi_reduction <add>, %53, %cst_38 [0] : vector<16x256xf32> to vector<256xf32>
    %55 = vector.shape_cast %54 : vector<256xf32> to vector<1x256xf32>
    %56 = tpu.concatenate %52, %55 in 0 : vector<1x256xf32>, vector<1x256xf32> -> vector<2x256xf32>
    %c0_39 = arith.constant 0 : index
    %c0_40 = arith.constant 0 : index
    %c0_41 = arith.constant 0 : index
    %57 = vector.load %arg12[%c0_39, %c0_40, %c0_41] : memref<1x2x256xf32, #tpu.memory_space<vmem>>, vector<1x2x256xf32>
    %58 = vector.shape_cast %57 : vector<1x2x256xf32> to vector<2x256xf32>
    %59 = vector.shape_cast %56 : vector<2x256xf32> to vector<1x2x256xf32>
    tpu.vector_store %arg12[%c0_39, %c0_40, %c0_41], %59 {strides = array<i32>} : memref<1x2x256xf32, #tpu.memory_space<vmem>>, vector<1x2x256xf32>,
    return
  }
  func.func @transform_0(%arg0: i32) -> (i32, i32, i32) {
    %c0_i32 = arith.constant 0 : i32
    %c0_i32_0 = arith.constant 0 : i32
    %c0_i32_1 = arith.constant 0 : i32
    return %arg0, %c0_i32, %c0_i32_0 : i32, i32, i32
  }
  func.func @transform_1(%arg0: i32) -> (i32, i32) {
    %c0_i32 = arith.constant 0 : i32
    %c0_i32_0 = arith.constant 0 : i32
    %c0_i32_1 = arith.constant 0 : i32
    return %c0_i32, %c0_i32_0 : i32, i32
  }
  func.func @transform_2(%arg0: i32) -> (i32, i32) {
    %c0_i32 = arith.constant 0 : i32
    %c0_i32_0 = arith.constant 0 : i32
    %c0_i32_1 = arith.constant 0 : i32
    return %c0_i32, %c0_i32_0 : i32, i32
  }
  func.func @transform_3(%arg0: i32) -> (i32, i32, i32) {
    %c0_i32 = arith.constant 0 : i32
    %c0_i32_0 = arith.constant 0 : i32
    %c0_i32_1 = arith.constant 0 : i32
    %c0_i32_2 = arith.constant 0 : i32
    return %c0_i32, %c0_i32_0, %c0_i32_1 : i32, i32, i32
  }
  func.func @transform_4(%arg0: i32) -> (i32, i32) {
    %c0_i32 = arith.constant 0 : i32
    %c0_i32_0 = arith.constant 0 : i32
    %c0_i32_1 = arith.constant 0 : i32
    return %c0_i32, %c0_i32_0 : i32, i32
  }
  func.func @transform_5(%arg0: i32) -> (i32, i32, i32) {
    %c0_i32 = arith.constant 0 : i32
    %c0_i32_0 = arith.constant 0 : i32
    %c0_i32_1 = arith.constant 0 : i32
    return %arg0, %c0_i32, %c0_i32_0 : i32, i32, i32
  }
  func.func @transform_6(%arg0: i32) -> (i32, i32, i32) {
    %c0_i32 = arith.constant 0 : i32
    %c0_i32_0 = arith.constant 0 : i32
    %c0_i32_1 = arith.constant 0 : i32
    return %arg0, %c0_i32, %c0_i32_0 : i32, i32, i32
  }
  func.func @transform_7(%arg0: i32) -> (i32, i32) {
    %c0_i32 = arith.constant 0 : i32
    %c0_i32_0 = arith.constant 0 : i32
    %c0_i32_1 = arith.constant 0 : i32
    return %c0_i32, %c0_i32_0 : i32, i32
  }
  func.func @transform_8(%arg0: i32) -> (i32, i32) {
    %c0_i32 = arith.constant 0 : i32
    %c0_i32_0 = arith.constant 0 : i32
    %c0_i32_1 = arith.constant 0 : i32
    return %c0_i32, %c0_i32_0 : i32, i32
  }
  func.func @transform_9(%arg0: i32) -> (i32, i32) {
    %c0_i32 = arith.constant 0 : i32
    %c0_i32_0 = arith.constant 0 : i32
    %c0_i32_1 = arith.constant 0 : i32
    return %c0_i32, %c0_i32_0 : i32, i32
  }
  func.func @transform_10(%arg0: i32) -> (i32, i32, i32) {
    %c0_i32 = arith.constant 0 : i32
    %c0_i32_0 = arith.constant 0 : i32
    %c0_i32_1 = arith.constant 0 : i32
    return %arg0, %c0_i32, %c0_i32_0 : i32, i32, i32
  }
  func.func @transform_11(%arg0: i32) -> (i32, i32, i32) {
    %c0_i32 = arith.constant 0 : i32
    %c0_i32_0 = arith.constant 0 : i32
    %c0_i32_1 = arith.constant 0 : i32
    return %arg0, %c0_i32, %c0_i32_0 : i32, i32, i32
  }
}

module attributes {stable_mosaic.version = 11 : i64} {
  func.func @_fused_upconv_kernel(%arg0: i32, %arg1: memref<1x16x256xf32, #tpu.memory_space<vmem>>, %arg2: memref<32x16xf32, #tpu.memory_space<vmem>>, %arg3: memref<3x256x512xf32, #tpu.memory_space<vmem>>, %arg4: memref<1x512xf32, #tpu.memory_space<vmem>>, %arg5: memref<1x32x512xf32, #tpu.memory_space<vmem>>) attributes {dimension_semantics = [#tpu.dimension_semantics<parallel>], iteration_bounds = array<i64: 2>, scalar_prefetch = 0 : i64, scratch_operands = 0 : i64, tpu.core_type = #tpu.core_type<tc>, window_params = [{transform_indices = @transform_0, window_bounds = array<i64: 1, 16, 256>}, {pipeline_mode = #tpu.pipeline_mode<synchronous>, transform_indices = @transform_1, window_bounds = array<i64: 32, 16>}, {pipeline_mode = #tpu.pipeline_mode<synchronous>, transform_indices = @transform_2, window_bounds = array<i64: 3, 256, 512>}, {pipeline_mode = #tpu.pipeline_mode<synchronous>, transform_indices = @transform_3, window_bounds = array<i64: 1, 512>}, {transform_indices = @transform_4, window_bounds = array<i64: 1, 32, 512>}]} {
    %c0 = arith.constant 0 : index
    %c0_0 = arith.constant 0 : index
    %0 = vector.load %arg2[%c0, %c0_0] : memref<32x16xf32, #tpu.memory_space<vmem>>, vector<32x16xf32>
    %c0_1 = arith.constant 0 : index
    %c0_2 = arith.constant 0 : index
    %c0_3 = arith.constant 0 : index
    %1 = vector.load %arg1[%c0_1, %c0_2, %c0_3] : memref<1x16x256xf32, #tpu.memory_space<vmem>>, vector<1x16x256xf32>
    %2 = vector.shape_cast %1 : vector<1x16x256xf32> to vector<16x256xf32>
    %cst = arith.constant dense<0.000000e+00> : vector<32x256xf32>
    %3 = tpu.matmul %0, %2, %cst {dimension_numbers = #tpu.dot_dimension_numbers<[1], [0], [0], [1], [0, 0, 1, 1], [], []>} : vector<32x16xf32>, vector<16x256xf32>, vector<32x256xf32> -> vector<32x256xf32>
    %cst_4 = arith.constant 0.000000e+00 : f32
    %4 = vector.broadcast %cst_4 : f32 to vector<1x256xf32>
    %5 = tpu.concatenate %4, %3, %4 in 0 : vector<1x256xf32>, vector<32x256xf32>, vector<1x256xf32> -> vector<34x256xf32>
    %cst_5 = arith.constant 0.000000e+00 : f32
    %6 = vector.broadcast %cst_5 : f32 to vector<32x512xf32>
    %7 = vector.extract_strided_slice %5 {offsets = [0, 0], sizes = [32, 256], strides = [1, 1]} : vector<34x256xf32> to vector<32x256xf32>
    %c0_6 = arith.constant 0 : index
    %c0_7 = arith.constant 0 : index
    %c0_8 = arith.constant 0 : index
    %8 = vector.load %arg3[%c0_6, %c0_7, %c0_8] : memref<3x256x512xf32, #tpu.memory_space<vmem>>, vector<1x256x512xf32>
    %9 = vector.shape_cast %8 : vector<1x256x512xf32> to vector<256x512xf32>
    %cst_9 = arith.constant dense<0.000000e+00> : vector<32x512xf32>
    %10 = tpu.matmul %7, %9, %cst_9 {dimension_numbers = #tpu.dot_dimension_numbers<[1], [0], [0], [1], [0, 0, 1, 1], [], []>} : vector<32x256xf32>, vector<256x512xf32>, vector<32x512xf32> -> vector<32x512xf32>
    %11 = arith.addf %6, %10 : vector<32x512xf32>
    %12 = vector.extract_strided_slice %5 {offsets = [1, 0], sizes = [32, 256], strides = [1, 1]} : vector<34x256xf32> to vector<32x256xf32>
    %c1 = arith.constant 1 : index
    %c0_10 = arith.constant 0 : index
    %c0_11 = arith.constant 0 : index
    %13 = vector.load %arg3[%c1, %c0_10, %c0_11] : memref<3x256x512xf32, #tpu.memory_space<vmem>>, vector<1x256x512xf32>
    %14 = vector.shape_cast %13 : vector<1x256x512xf32> to vector<256x512xf32>
    %cst_12 = arith.constant dense<0.000000e+00> : vector<32x512xf32>
    %15 = tpu.matmul %12, %14, %cst_12 {dimension_numbers = #tpu.dot_dimension_numbers<[1], [0], [0], [1], [0, 0, 1, 1], [], []>} : vector<32x256xf32>, vector<256x512xf32>, vector<32x512xf32> -> vector<32x512xf32>
    %16 = arith.addf %11, %15 : vector<32x512xf32>
    %17 = vector.extract_strided_slice %5 {offsets = [2, 0], sizes = [32, 256], strides = [1, 1]} : vector<34x256xf32> to vector<32x256xf32>
    %c2 = arith.constant 2 : index
    %c0_13 = arith.constant 0 : index
    %c0_14 = arith.constant 0 : index
    %18 = vector.load %arg3[%c2, %c0_13, %c0_14] : memref<3x256x512xf32, #tpu.memory_space<vmem>>, vector<1x256x512xf32>
    %19 = vector.shape_cast %18 : vector<1x256x512xf32> to vector<256x512xf32>
    %cst_15 = arith.constant dense<0.000000e+00> : vector<32x512xf32>
    %20 = tpu.matmul %17, %19, %cst_15 {dimension_numbers = #tpu.dot_dimension_numbers<[1], [0], [0], [1], [0, 0, 1, 1], [], []>} : vector<32x256xf32>, vector<256x512xf32>, vector<32x512xf32> -> vector<32x512xf32>
    %21 = arith.addf %16, %20 : vector<32x512xf32>
    %c0_16 = arith.constant 0 : index
    %c0_17 = arith.constant 0 : index
    %22 = vector.load %arg4[%c0_16, %c0_17] : memref<1x512xf32, #tpu.memory_space<vmem>>, vector<1x512xf32>
    %23 = vector.broadcast %22 : vector<1x512xf32> to vector<32x512xf32>
    %24 = arith.addf %21, %23 : vector<32x512xf32>
    %c0_18 = arith.constant 0 : index
    %c0_19 = arith.constant 0 : index
    %c0_20 = arith.constant 0 : index
    %25 = vector.load %arg5[%c0_18, %c0_19, %c0_20] : memref<1x32x512xf32, #tpu.memory_space<vmem>>, vector<1x32x512xf32>
    %26 = vector.shape_cast %25 : vector<1x32x512xf32> to vector<32x512xf32>
    %27 = vector.shape_cast %24 : vector<32x512xf32> to vector<1x32x512xf32>
    tpu.vector_store %arg5[%c0_18, %c0_19, %c0_20], %27 {strides = array<i32>} : memref<1x32x512xf32, #tpu.memory_space<vmem>>, vector<1x32x512xf32>,
    return
  }
  func.func @transform_0(%arg0: i32) -> (i32, i32, i32) {
    %c0_i32 = arith.constant 0 : i32
    %c0_i32_0 = arith.constant 0 : i32
    %c0_i32_1 = arith.constant 0 : i32
    return %arg0, %c0_i32, %c0_i32_0 : i32, i32, i32
  }
  func.func @transform_1(%arg0: i32) -> (i32, i32) {
    %c0_i32 = arith.constant 0 : i32
    %c0_i32_0 = arith.constant 0 : i32
    %c0_i32_1 = arith.constant 0 : i32
    return %c0_i32, %c0_i32_0 : i32, i32
  }
  func.func @transform_2(%arg0: i32) -> (i32, i32, i32) {
    %c0_i32 = arith.constant 0 : i32
    %c0_i32_0 = arith.constant 0 : i32
    %c0_i32_1 = arith.constant 0 : i32
    %c0_i32_2 = arith.constant 0 : i32
    return %c0_i32, %c0_i32_0, %c0_i32_1 : i32, i32, i32
  }
  func.func @transform_3(%arg0: i32) -> (i32, i32) {
    %c0_i32 = arith.constant 0 : i32
    %c0_i32_0 = arith.constant 0 : i32
    %c0_i32_1 = arith.constant 0 : i32
    return %c0_i32, %c0_i32_0 : i32, i32
  }
  func.func @transform_4(%arg0: i32) -> (i32, i32, i32) {
    %c0_i32 = arith.constant 0 : i32
    %c0_i32_0 = arith.constant 0 : i32
    %c0_i32_1 = arith.constant 0 : i32
    return %arg0, %c0_i32, %c0_i32_0 : i32, i32, i32
  }
}

</mosaic_0001>

<bundles_post_ra>
// kernel: tile.138
= control target key start
LH: loop header
LB: loop body
LE: loop exit
PB: predicated region body
PF: predicated region fallthrough
CT: control target
= control target key end

     0   :  { %s28_s0 = inlined_call_operand.vmem [shape: f32[16], index: 0, kind: input, shape index: {}]   ;;  %s29_s1 = inlined_call_operand.vmem [shape: f32[16,16], index: 1, kind: output, shape index: {}]  }
   0x1   :  { %v4_v0 = vld [vmem:[%s28_s0] ss:$0 sm:$0xff] }
   0x2   :  { %5 = vst [vmem:[%s29_s1] sm:$0xff] %v4_v0  ;;  %8 = vst [vmem:[%s29_s1 + $0x8] sm:$0xff] %v4_v0 }

// kernel: tile.139
= control target key start
LH: loop header
LB: loop body
LE: loop exit
PB: predicated region body
PF: predicated region fallthrough
CT: control target
= control target key end

     0   :  { %s7_s6 = smov 3  ;;  %s21_s9 = smov 3  ;;  %vm4_vm0 = vcmask 130048   ;;  %vm11_vm1 = vcmask 1048448   ;;  %vm18_vm2 = vcmask 917248   ;;  %vm25_vm3 = vcmask 786048   ;;  %s131_s0 = inlined_call_operand.vmem [shape: f32[16,16], index: 0, kind: input, shape index: {}]   ;;  %s132_s1 = inlined_call_operand.vmem [shape: f32[1,256], index: 1, kind: output, shape index: {}]  }
   0x1   :  { %v69_v0 = vld [vmem:[%s131_s0 + $0x7] ss:$8 sm:%s7_s6]   ;;  %s84_s10 = smov 112   ;;  %v71_v1 = vld [vmem:[%s131_s0 + $0x5] ss:$8 sm:%s21_s9]   ;;  %s14_s13 = smov 3 }
   0x2   :  { %9 = vrot.lane.b32.xlu0 %v69_v0, %s84_s10  ;;  %s85_s14 = smov 80   ;;  %v70_v2 = vld [vmem:[%s131_s0 + $0x6] ss:$8 sm:%s14_s13]   ;;  %s28_s17 = smov 3  ;;  %vm32_vm4 = vcmask 654848   ;;  %vm39_vm5 = vcmask 523648  }
   0x3   :  { %23 = vrot.lane.b32.xlu1 %v71_v1, %s85_s14  ;;  %v72_v3 = vld [vmem:[%s131_s0 + $0x4] ss:$8 sm:%s28_s17]   ;;  %s35_s20 = smov 3  ;;  %s42_s21 = smov 3  ;;  %vm46_vm6 = vcmask 392448   ;;  %vm53_vm7 = vcmask 261248  }
   0x4   :  { %s86_s22 = smov 96   ;;  %s87_s23 = smov 64   ;;  %v73_v4 = vld [vmem:[%s131_s0 + $0x3] ss:$8 sm:%s35_s20]   ;;  %v74_v5 = vld [vmem:[%s131_s0 + $0x2] ss:$8 sm:%s42_s21]  }
   0x5   :  { %s2_s26 = smov 3  ;;  %s49_s29 = smov 3 }
   0x6   :  { %16 = vrot.lane.b32.xlu0 %v70_v2, %s86_s22  ;;  %v3_v6 = vld [vmem:[%s131_s0] ss:$8 sm:%s2_s26]   ;;  %s88_s3 = smov 48   ;;  %s89_s4 = smov 32  }
   0x7   :  { %30 = vrot.lane.b32.xlu1 %v72_v3, %s87_s23  ;;  %5 = vst.msk [vmem:[#allocation0] ss:$8 sm:$0x3] %vm4_vm0, %v3_v6   ;;  %v75_v7 = vld [vmem:[%s131_s0 + $0x1] ss:$8 sm:%s49_s29]   ;;  %s90_s0 = smov 16  }
   0xa   :  { %37 = vrot.lane.b32.xlu0 %v73_v4, %s88_s3 }
   0xb   :  { %44 = vrot.lane.b32.xlu1 %v74_v5, %s89_s4 }
   0xe   :  { %51 = vrot.lane.b32.xlu0 %v75_v7, %s90_s0 }
  0x74   :  { %v10_v8 = vpop.permute.xlu0 %9  }
  0x75   :  { %12 = vst.msk [vmem:[#allocation0] ss:$8 sm:$0x3] %vm11_vm1, %v10_v8   ;;  %v24_v9 = vpop.permute.xlu1 %23  }
  0x78   :  { %v17_v10 = vpop.permute.xlu0 %16  }
  0x79   :  { %19 = vst.msk [vmem:[#allocation0] ss:$8 sm:$0x3] %vm18_vm2, %v17_v10   ;;  %v31_v11 = vpop.permute.xlu1 %30  }
  0x7a   :  { %26 = vst.msk [vmem:[#allocation0] ss:$8 sm:$0x3] %vm25_vm3, %v24_v9  }
  0x7b   :  { %33 = vst.msk [vmem:[#allocation0] ss:$8 sm:$0x3] %vm32_vm4, %v31_v11  }
  0x7c   :  { %v38_v12 = vpop.permute.xlu0 %37  }
  0x7d   :  { %40 = vst.msk [vmem:[#allocation0] ss:$8 sm:$0x3] %vm39_vm5, %v38_v12   ;;  %v45_v13 = vpop.permute.xlu1 %44  }
  0x7e   :  { %47 = vst.msk [vmem:[#allocation0] ss:$8 sm:$0x3] %vm46_vm6, %v45_v13  }
  0x80   :  { %v52_v14 = vpop.permute.xlu0 %51  }
  0x81   :  { %54 = vst.msk [vmem:[#allocation0] ss:$8 sm:$0x3] %vm53_vm7, %v52_v14  }
  0x88   :  { %v59_v15 = vld [vmem:[#allocation0] sm:$0x1]  ;;  %v64_v16 = vld [vmem:[#allocation0 + $0x8] sm:$0x1] }
  0x89   :  { %62 = vst [vmem:[%s132_s1] sm:$0x1] %v59_v15  ;;  %76 = vst [vmem:[%s132_s1 + $0x1] sm:$0x1] %v64_v16 }

// kernel: tile.128
= control target key start
LH: loop header
LB: loop body
LE: loop exit
PB: predicated region body
PF: predicated region fallthrough
CT: control target
= control target key end

     0   :  { %s28_s0 = inlined_call_operand.vmem [shape: f32[8], index: 0, kind: input, shape index: {}]   ;;  %s29_s1 = inlined_call_operand.vmem [shape: f32[16,8], index: 1, kind: output, shape index: {}]  }
   0x1   :  { %v4_v0 = vld [vmem:[%s28_s0] ss:$0 sm:$0xff] }
   0x2   :  { %5 = vst [vmem:[%s29_s1] sm:$0xff] %v4_v0  ;;  %8 = vst [vmem:[%s29_s1 + $0x8] sm:$0xff] %v4_v0 }

// kernel: tile.129
= control target key start
LH: loop header
LB: loop body
LE: loop exit
PB: predicated region body
PF: predicated region fallthrough
CT: control target
= control target key end

     0   :  { %s133_s10 = smov 120   ;;  %s134_s11 = smov 104   ;;  %vm3_vm0 = vcmask 64512   ;;  %vm9_vm1 = vcmask 1048512   ;;  %vm15_vm2 = vcmask 982912   ;;  %vm21_vm3 = vcmask 917312   ;;  %s209_s0 = inlined_call_operand.vmem [shape: f32[16,8], index: 0, kind: input, shape index: {}]   ;;  %s210_s1 = inlined_call_operand.vmem [shape: f32[1,128], index: 1, kind: output, shape index: {}]  }
   0x1   :  { %v103_v0 = vld [vmem:[%s209_s0 + $0xf] sm:$0x1]   ;;  %v105_v1 = vld [vmem:[%s209_s0 + $0xd] sm:$0x1]   ;;  %v104_v2 = vld [vmem:[%s209_s0 + $0xe] sm:$0x1]  }
   0x2   :  { %7 = vrot.lane.b32.xlu0 %v103_v0, %s133_s10  ;;  %19 = vrot.lane.b32.xlu1 %v105_v1, %s134_s11  ;;  %v106_v3 = vld [vmem:[%s209_s0 + $0xc] sm:$0x1]   ;;  %s135_s16 = smov 112   ;;  %s136_s17 = smov 96   ;;  %v107_v4 = vld [vmem:[%s209_s0 + $0xb] sm:$0x1]  }
   0x3   :  { %v108_v5 = vld [vmem:[%s209_s0 + $0xa] sm:$0x1]   ;;  %v2_v6 = vld [vmem:[%s209_s0] sm:$0x1]   ;;  %s137_s24 = smov 88   ;;  %s138_s25 = smov 80  }
   0x4   :  { %4 = vst.msk [vmem:[#allocation0] sm:$0x1] %vm3_vm0, %v2_v6   ;;  %v109_v7 = vld [vmem:[%s209_s0 + $0x9] sm:$0x1]   ;;  %v110_v8 = vld [vmem:[%s209_s0 + $0x8] sm:$0x1]  }
   0x5   :  { %s139_s30 = smov 72   ;;  %s140_s2 = smov 64   ;;  %v111_v9 = vld [vmem:[%s209_s0 + $0x7] sm:$0x1]   ;;  %v112_v10 = vld [vmem:[%s209_s0 + $0x6] sm:$0x1]  }
   0x6   :  { %13 = vrot.lane.b32.xlu0 %v104_v2, %s135_s16  ;;  %25 = vrot.lane.b32.xlu1 %v106_v3, %s136_s17  ;;  %s141_s7 = smov 56   ;;  %s142_s8 = smov 48   ;;  %v113_v11 = vld [vmem:[%s209_s0 + $0x5] sm:$0x1]   ;;  %v114_v12 = vld [vmem:[%s209_s0 + $0x4] sm:$0x1]  }
   0x7   :  { %s143_s13 = smov 40   ;;  %s144_s14 = smov 32   ;;  %v115_v13 = vld [vmem:[%s209_s0 + $0x3] sm:$0x1]   ;;  %v116_v14 = vld [vmem:[%s209_s0 + $0x2] sm:$0x1]  }
   0x8   :  { %s145_s19 = smov 24   ;;  %s146_s20 = smov 16   ;;  %v117_v15 = vld [vmem:[%s209_s0 + $0x1] sm:$0x1]   ;;  %vm27_vm4 = vcmask 851712   ;;  %vm33_vm5 = vcmask 786112  }
   0x9   :  { %s147_s0 = smov 8   ;;  %vm39_vm6 = vcmask 720512   ;;  %vm45_vm7 = vcmask 654912   ;;  %vm51_vm8 = vcmask 589312   ;;  %vm57_vm9 = vcmask 523712  }
   0xa   :  { %31 = vrot.lane.b32.xlu0 %v107_v4, %s137_s24  ;;  %37 = vrot.lane.b32.xlu1 %v108_v5, %s138_s25  ;;  %vm63_vm10 = vcmask 458112   ;;  %vm69_vm11 = vcmask 392512   ;;  %vm75_vm12 = vcmask 326912   ;;  %vm81_vm13 = vcmask 261312  }
   0xb   :  { %vm87_vm14 = vcmask 195712   ;;  %vm93_vm15 = vcmask 130112  }
   0xe   :  { %43 = vrot.lane.b32.xlu0 %v109_v7, %s139_s30  ;;  %49 = vrot.lane.b32.xlu1 %v110_v8, %s140_s2 }
  0x12   :  { %55 = vrot.lane.b32.xlu0 %v111_v9, %s141_s7  ;;  %61 = vrot.lane.b32.xlu1 %v112_v10, %s142_s8 }
  0x16   :  { %67 = vrot.lane.b32.xlu0 %v113_v11, %s143_s13  ;;  %73 = vrot.lane.b32.xlu1 %v114_v12, %s144_s14 }
  0x1a   :  { %79 = vrot.lane.b32.xlu0 %v115_v13, %s145_s19  ;;  %85 = vrot.lane.b32.xlu1 %v116_v14, %s146_s20 }
  0x1e   :  { %91 = vrot.lane.b32.xlu0 %v117_v15, %s147_s0 }
  0x74   :  { %v8_v16 = vpop.permute.xlu0 %7   ;;  %v20_v17 = vpop.permute.xlu1 %19  }
  0x75   :  { %10 = vst.msk [vmem:[#allocation0] sm:$0x1] %vm9_vm1, %v8_v16  }
  0x78   :  { %v14_v18 = vpop.permute.xlu0 %13   ;;  %v26_v19 = vpop.permute.xlu1 %25  }
  0x79   :  { %16 = vst.msk [vmem:[#allocation0] sm:$0x1] %vm15_vm2, %v14_v18  }
  0x7a   :  { %22 = vst.msk [vmem:[#allocation0] sm:$0x1] %vm21_vm3, %v20_v17  }
  0x7b   :  { %28 = vst.msk [vmem:[#allocation0] sm:$0x1] %vm27_vm4, %v26_v19  }
  0x7c   :  { %v32_v20 = vpop.permute.xlu0 %31   ;;  %v38_v21 = vpop.permute.xlu1 %37  }
  0x7d   :  { %34 = vst.msk [vmem:[#allocation0] sm:$0x1] %vm33_vm5, %v32_v20  }
  0x7e   :  { %40 = vst.msk [vmem:[#allocation0] sm:$0x1] %vm39_vm6, %v38_v21  }
  0x80   :  { %v44_v22 = vpop.permute.xlu0 %43   ;;  %v50_v23 = vpop.permute.xlu1 %49  }
  0x81   :  { %46 = vst.msk [vmem:[#allocation0] sm:$0x1] %vm45_vm7, %v44_v22  }
  0x82   :  { %52 = vst.msk [vmem:[#allocation0] sm:$0x1] %vm51_vm8, %v50_v23  }
  0x84   :  { %v56_v24 = vpop.permute.xlu0 %55   ;;  %v62_v25 = vpop.permute.xlu1 %61  }
  0x85   :  { %58 = vst.msk [vmem:[#allocation0] sm:$0x1] %vm57_vm9, %v56_v24  }
  0x86   :  { %64 = vst.msk [vmem:[#allocation0] sm:$0x1] %vm63_vm10, %v62_v25  }
  0x88   :  { %v68_v26 = vpop.permute.xlu0 %67   ;;  %v74_v27 = vpop.permute.xlu1 %73  }
  0x89   :  { %70 = vst.msk [vmem:[#allocation0] sm:$0x1] %vm69_vm11, %v68_v26  }
  0x8a   :  { %76 = vst.msk [vmem:[#allocation0] sm:$0x1] %vm75_vm12, %v74_v27  }
  0x8c   :  { %v80_v28 = vpop.permute.xlu0 %79   ;;  %v86_v29 = vpop.permute.xlu1 %85  }
  0x8d   :  { %82 = vst.msk [vmem:[#allocation0] sm:$0x1] %vm81_vm13, %v80_v28  }
  0x8e   :  { %88 = vst.msk [vmem:[#allocation0] sm:$0x1] %vm87_vm14, %v86_v29  }
  0x90   :  { %v92_v30 = vpop.permute.xlu0 %91  }
  0x91   :  { %94 = vst.msk [vmem:[#allocation0] sm:$0x1] %vm93_vm15, %v92_v30  }
  0x98   :  { %v99_v31 = vld [vmem:[#allocation0] sm:$0x1] }
  0x99   :  { %102 = vst [vmem:[%s210_s1] sm:$0x1] %v99_v31 }

// kernel: upblock_forward_nchw.5
= control target key start
LH: loop header
LB: loop body
LE: loop exit
PB: predicated region body
PF: predicated region fallthrough
CT: control target
= control target key end

     0   :  { %s1987_s21 = smov 0   ;;  %s3071_s0 = inlined_call_operand.vmem [shape: f32[2,16,128], index: 0, kind: input, shape index: {}]   ;;  %s3072_s1 = inlined_call_operand.vmem [shape: f32[2,16,256], index: 1, kind: input, shape index: {}]   ;;  %s3073_s2 = inlined_call_operand.vmem [shape: f32[1,128], index: 2, kind: input, shape index: {}]   ;;  %s3074_s3 = inlined_call_operand.vmem [shape: f32[1,128], index: 3, kind: input, shape index: {}]   ;;  %s3075_s4 = inlined_call_operand.vmem [shape: f32[1,256], index: 4, kind: input, shape index: {}]   ;;  %s3076_s5 = inlined_call_operand.vmem [shape: f32[1,256], index: 5, kind: input, shape index: {}]   ;;  %s3077_s6 = inlined_call_operand.vmem [shape: f32[3,128,256], index: 6, kind: input, shape index: {}]   ;;  %s3078_s7 = inlined_call_operand.vmem [shape: f32[3,256,256], index: 7, kind: input, shape index: {}]   ;;  %s3079_s8 = inlined_call_operand.vmem [shape: f32[1,256], index: 8, kind: input, shape index: {}]   ;;  %s3080_s9 = inlined_call_operand.vmem [shape: f32[2,1,256], index: 9, kind: input, shape index: {}]   ;;  %s3081_s10 = inlined_call_operand.vmem [shape: f32[2,1,256], index: 10, kind: input, shape index: {}]   ;;  %s3082_s11 = inlined_call_operand.vmem [shape: f32[2,16,256], index: 11, kind: output, shape index: {0}]   ;;  %s3083_s12 = inlined_call_operand.vmem [shape: f32[2,2,256], index: 12, kind: output, shape index: {1}]  }
   0x1 LB: > { %s1652_s22 = sadd.s32 4294967295, %s1919_s21   ;;  %p1656_p0 = scmp.ge.s32.totalorder %s1919_s21, 1  ;;  %s1919_s21 = sphi %s1987_s21, %s23_s21  }
   0x2   : > { %p393_p1 = scmp.lt.s32.totalorder %s1919_s21, 3 }
   0x4   : > { %p394_p2 = pnand %p1656_p0, %p393_p1 }
   0x5   : > { %p2076_p3 = scmp.lt.s32.totalorder (!%p394_p2), %s1652_s22, 1 }
   0x6   : > { %397 = sbr.rel (%p394_p2) target bundleno = 427 (0x1ab), region = 64 }
   0xb   : > { %v673_v0 = vld [vmem:[%s3078_s7 + $0xf8] sm:$0xff]  ;;  %v672_v1 = vld [vmem:[%s3078_s7 + $0xf0] sm:$0xff]  ;;  %v671_v2 = vld [vmem:[%s3078_s7 + $0xe8] sm:$0xff]  ;;  %v1921_v4 = vmov 0.0   ;;  %s3088_s22 = smov (!%p2076_p3, %s1652_s22), 1  ;;  %v532_v63 = vlaneseq  ;;  %vm517_vm0 = vcmask 1040384  }
   0xc   : > { %706 = vmatprep.subr.mxu0 %v673_v0  ;;  %v670_v3 = vld [vmem:[%s3078_s7 + $0xe0] sm:$0xff]  ;;  %847 = vmatprep.mubr.f32.mxu1 %v1921_v4  ;;  %v669_v5 = vld [vmem:[%s3078_s7 + $0xd8] sm:$0xff]  ;;  %v668_v6 = vld [vmem:[%s3078_s7 + $0xd0] sm:$0xff]  ;;  %s1876_s29 = sshll.u32 %s3088_s22, 4  ;;  %s1877_s26 = sshll.u32 %s3088_s22, 5  ;;  %vm1181_vm2 = vcmask 1045504  }
   0xd   : > { %707 = vmatpush1.msra.mxu0 %v672_v1  ;;  %v667_v7 = vld [vmem:[%s3078_s7 + $0xc8] sm:$0xff]  ;;  %v641_v8 = vld [vmem:[%s3077_s6 + $0xf8] sm:$0xff]  ;;  %v666_v9 = vld [vmem:[%s3078_s7 + $0xc0] sm:$0xff]  ;;  %s2156_s28 = scalar_lea.vmem %s3071_s0, %s1876_s29  ;;  %s2252_s20 = scalar_lea.vmem %s3072_s1, %s1877_s26  ;;  %vm895_vm3 = vcmask 1046528  }
   0xe   : > { %708 = vmatprep.subr.mxu0 %v671_v2  ;;  %783 = vmatprep.subr.mxu1 %v641_v8  ;;  %v640_v10 = vld [vmem:[%s3077_s6 + $0xf0] sm:$0xff]  ;;  %v665_v11 = vld [vmem:[%s3078_s7 + $0xb8] sm:$0xff]  ;;  %v639_v12 = vld [vmem:[%s3077_s6 + $0xe8] sm:$0xff]  ;;  %s475_s24 = scalar_lea.vmem %s3082_s11, %s1877_s26  ;;  %s1879_s26 = sshll.u32 %s3088_s22, 2 }
   0xf   : > { %709 = vmatpush1.msra.mxu0 %v670_v3  ;;  %784 = vmatpush1.msra.mxu1 %v640_v10  ;;  %v638_v13 = vld [vmem:[%s3077_s6 + $0xe0] sm:$0xff]  ;;  %v664_v14 = vld [vmem:[%s3078_s7 + $0xb0] sm:$0xff]  ;;  %v637_v15 = vld [vmem:[%s3077_s6 + $0xd8] sm:$0xff] }
  0x10   : > { %710 = vmatprep.subr.mxu0 %v669_v5  ;;  %785 = vmatprep.subr.mxu1 %v639_v12  ;;  %v663_v16 = vld [vmem:[%s3078_s7 + $0xa8] sm:$0xff]  ;;  %v636_v17 = vld [vmem:[%s3077_s6 + $0xd0] sm:$0xff]  ;;  %v662_v19 = vld [vmem:[%s3078_s7 + $0xa0] sm:$0xff] }
  0x11   : > { %711 = vmatpush1.msra.mxu0 %v668_v6  ;;  %786 = vmatpush1.msra.mxu1 %v638_v13  ;;  %v635_v18 = vld [vmem:[%s3077_s6 + $0xc8] sm:$0xff]  ;;  %v634_v20 = vld [vmem:[%s3077_s6 + $0xc0] sm:$0xff]  ;;  %v661_v21 = vld [vmem:[%s3078_s7 + $0x98] sm:$0xff] }
  0x12   : > { %712 = vmatprep.subr.mxu0 %v667_v7  ;;  %787 = vmatprep.subr.mxu1 %v637_v15  ;;  %v633_v22 = vld [vmem:[%s3077_s6 + $0xb8] sm:$0xff]  ;;  %v660_v23 = vld [vmem:[%s3078_s7 + $0x90] sm:$0xff]  ;;  %v659_v25 = vld [vmem:[%s3078_s7 + $0x88] sm:$0xff] }
  0x13   : > { %713 = vmatpush1.msra.mxu0 %v666_v9  ;;  %788 = vmatpush1.msra.mxu1 %v636_v17  ;;  %v632_v24 = vld [vmem:[%s3077_s6 + $0xb0] sm:$0xff]  ;;  %v631_v26 = vld [vmem:[%s3077_s6 + $0xa8] sm:$0xff]  ;;  %v658_v27 = vld [vmem:[%s3078_s7 + $0x80] sm:$0xff] }
  0x14   : > { %714 = vmatprep.subr.mxu0 %v665_v11  ;;  %789 = vmatprep.subr.mxu1 %v635_v18  ;;  %v630_v28 = vld [vmem:[%s3077_s6 + $0xa0] sm:$0xff]  ;;  %v657_v29 = vld [vmem:[%s3078_s7 + $0x78] sm:$0xff]  ;;  %v656_v31 = vld [vmem:[%s3078_s7 + $0x70] sm:$0xff]  ;;  %v533_v11 = vshrl.u32 %v532_v63, 7 }
  0x15   : > { %715 = vmatpush1.msra.mxu0 %v664_v14  ;;  %790 = vmatpush1.msra.mxu1 %v634_v20  ;;  %v629_v30 = vld [vmem:[%s3077_s6 + $0x98] sm:$0xff]  ;;  %v628_v32 = vld [vmem:[%s3077_s6 + $0x90] sm:$0xff]  ;;  %v655_v33 = vld [vmem:[%s3078_s7 + $0x68] sm:$0xff] }
  0x16   : > { %716 = vmatprep.subr.mxu0 %v663_v16  ;;  %791 = vmatprep.subr.mxu1 %v633_v22  ;;  %v627_v34 = vld [vmem:[%s3077_s6 + $0x88] sm:$0xff]  ;;  %v654_v35 = vld [vmem:[%s3078_s7 + $0x60] sm:$0xff]  ;;  %v653_v37 = vld [vmem:[%s3078_s7 + $0x58] sm:$0xff]  ;;  %v2254_v18 = vsub.s32 0, %v533_v11 }
  0x17   : > { %717 = vmatpush1.msra.mxu0 %v662_v19  ;;  %792 = vmatpush1.msra.mxu1 %v632_v24  ;;  %v626_v36 = vld [vmem:[%s3077_s6 + $0x80] sm:$0xff]  ;;  %v625_v38 = vld [vmem:[%s3077_s6 + $0x78] sm:$0xff]  ;;  %v652_v39 = vld [vmem:[%s3078_s7 + $0x50] sm:$0xff]  ;;  %v2256_v19 = vsub.s32 1, %v533_v11 }
  0x18   : > { %718 = vmatprep.subr.mxu0 %v661_v21  ;;  %793 = vmatprep.subr.mxu1 %v631_v26  ;;  %v624_v40 = vld [vmem:[%s3077_s6 + $0x70] sm:$0xff]  ;;  %v651_v41 = vld [vmem:[%s3078_s7 + $0x48] sm:$0xff]  ;;  %v650_v43 = vld [vmem:[%s3078_s7 + $0x40] sm:$0xff] }
  0x19   : > { %719 = vmatpush1.msra.mxu0 %v660_v23  ;;  %794 = vmatpush1.msra.mxu1 %v630_v28  ;;  %v623_v42 = vld [vmem:[%s3077_s6 + $0x68] sm:$0xff]  ;;  %v622_v44 = vld [vmem:[%s3077_s6 + $0x60] sm:$0xff]  ;;  %v649_v45 = vld [vmem:[%s3078_s7 + $0x38] sm:$0xff] }
  0x1a   : > { %720 = vmatprep.subr.mxu0 %v659_v25  ;;  %795 = vmatprep.subr.mxu1 %v629_v30  ;;  %v621_v46 = vld [vmem:[%s3077_s6 + $0x58] sm:$0xff]  ;;  %v648_v47 = vld [vmem:[%s3078_s7 + $0x30] sm:$0xff]  ;;  %v647_v49 = vld [vmem:[%s3078_s7 + $0x28] sm:$0xff] }
  0x1b   : > { %721 = vmatpush1.msra.mxu0 %v658_v27  ;;  %796 = vmatpush1.msra.mxu1 %v628_v32  ;;  %v620_v48 = vld [vmem:[%s3077_s6 + $0x50] sm:$0xff]  ;;  %v619_v50 = vld [vmem:[%s3077_s6 + $0x48] sm:$0xff]  ;;  %v646_v51 = vld [vmem:[%s3078_s7 + $0x20] sm:$0xff] }
  0x1c   : > { %722 = vmatprep.subr.mxu0 %v657_v29  ;;  %797 = vmatprep.subr.mxu1 %v627_v34  ;;  %v645_v52 = vld [vmem:[%s3078_s7 + $0x18] sm:$0xff]  ;;  %v618_v53 = vld [vmem:[%s3077_s6 + $0x40] sm:$0xff]  ;;  %v644_v54 = vld [vmem:[%s3078_s7 + $0x10] sm:$0xff] }
  0x1d   : > { %723 = vmatpush1.msra.mxu0 %v656_v31  ;;  %798 = vmatpush1.msra.mxu1 %v626_v36  ;;  %v617_v55 = vld [vmem:[%s3077_s6 + $0x38] sm:$0xff]  ;;  %v481_v56 = vld [vmem:[%s2156_s28] sm:$0xff]  ;;  %v616_v57 = vld [vmem:[%s3077_s6 + $0x30] sm:$0xff] }
  0x1e   : > { %724 = vmatprep.subr.mxu0 %v655_v33  ;;  %799 = vmatprep.subr.mxu1 %v625_v38  ;;  %v2186_v58 = vld [vmem:[%s3073_s2] ss:$0 sm:$0xff]  ;;  %v643_v60 = vld [vmem:[%s3078_s7 + $0x8] sm:$0xff]  ;;  %v705_v2 = vld [vmem:[%s3078_s7 + $0x1f8] sm:$0xff] }
  0x1f   : > { %725 = vmatpush1.msra.mxu0 %v654_v35  ;;  %800 = vmatpush1.msra.mxu1 %v624_v40  ;;  %v2191_v59 = vld [vmem:[%s3074_s3] ss:$0 sm:$0xff]  ;;  %v615_v61 = vld [vmem:[%s3077_s6 + $0x28] sm:$0xff]  ;;  %v490_v62 = vmul.f32 %v2186_v58, %v481_v56  ;;  %v613_v3 = vld [vmem:[%s3077_s6 + $0x18] sm:$0xff] }
  0x20   : > { %726 = vmatprep.subr.mxu0 %v653_v37  ;;  %801 = vmatprep.subr.mxu1 %v623_v42  ;;  %v642_v0 = vld [vmem:[%s3078_s7] sm:$0xff]  ;;  %v704_v6 = vld [vmem:[%s3078_s7 + $0x1f0] sm:$0xff]  ;;  %v703_v8 = vld [vmem:[%s3078_s7 + $0x1e8] sm:$0xff] }
  0x21   : > { %727 = vmatpush1.msra.mxu0 %v652_v39  ;;  %802 = vmatpush1.msra.mxu1 %v622_v44  ;;  %v614_v1 = vld [vmem:[%s3077_s6 + $0x20] sm:$0xff]  ;;  %v2213_v5 = vadd.f32 %v2191_v59, %v490_v62  ;;  %v612_v7 = vld [vmem:[%s3077_s6 + $0x10] sm:$0xff]  ;;  %v611_v9 = vld [vmem:[%s3077_s6 + $0x8] sm:$0xff] }
  0x22   : > { %728 = vmatprep.subr.mxu0 %v651_v41  ;;  %803 = vmatprep.subr.mxu1 %v621_v46  ;;  %v702_v12 = vld [vmem:[%s3078_s7 + $0x1e0] sm:$0xff]  ;;  %v701_v14 = vld [vmem:[%s3078_s7 + $0x1d8] sm:$0xff]  ;;  %v700_v16 = vld [vmem:[%s3078_s7 + $0x1d0] sm:$0xff] }
  0x23   : > { %729 = vmatpush1.msra.mxu0 %v650_v43  ;;  %804 = vmatpush1.msra.mxu1 %v620_v48  ;;  %v1669_v10 = vmul.f32 -1.442695, %v2213_v5  ;;  %v610_v13 = vld [vmem:[%s3077_s6] sm:$0xff]  ;;  %v1712_v15 = vld [vmem:[%s3077_s6 + $0x1f8] sm:$0xff]  ;;  %v699_v17 = vld [vmem:[%s3078_s7 + $0x1c8] sm:$0xff] }
  0x24   : > { %730 = vmatprep.subr.mxu0 %v649_v45  ;;  %805 = vmatprep.subr.mxu1 %v619_v50  ;;  %v698_v20 = vld [vmem:[%s3078_s7 + $0x1c0] sm:$0xff]  ;;  %v697_v21 = vld [vmem:[%s3078_s7 + $0x1b8] sm:$0xff]  ;;  %v696_v22 = vld [vmem:[%s3078_s7 + $0x1b0] sm:$0xff] }
  0x25   : > { %731 = vmatpush1.msra.mxu0 %v648_v47  ;;  %806 = vmatpush1.msra.mxu1 %v618_v53  ;;  %1889 = vpow2.f32 %v1669_v10  ;;  %v527_v23 = vld [vmem:[%s2252_s20 + $0x8] sm:$0xff]  ;;  %v530_v24 = vld [vmem:[%s3075_s4] sm:$0x3]  ;;  %v693_v33 = vld [vmem:[%s3078_s7 + $0x198] sm:$0xff] }
  0x26   : > { %732 = vmatprep.subr.mxu0 %v647_v49  ;;  %807 = vmatprep.subr.mxu1 %v617_v55  ;;  %v695_v25 = vld [vmem:[%s3078_s7 + $0x1a8] sm:$0xff]  ;;  %v535_v26 = vrot.slane %v530_v24, %v2254_v18  ;;  %v539_v27 = vrot.slane %v530_v24, %v2256_v19  ;;  %v546_v28 = vld [vmem:[%s3076_s5] sm:$0x3]  ;;  %v692_v36 = vld [vmem:[%s3078_s7 + $0x190] sm:$0xff] }
  0x27   : > { %733 = vmatpush1.msra.mxu0 %v646_v51  ;;  %808 = vmatpush1.msra.mxu1 %v616_v57  ;;  %v526_v29 = vld [vmem:[%s2252_s20] sm:$0xff]  ;;  %v551_v31 = vrot.slane %v546_v28, %v2254_v18  ;;  %v555_v32 = vrot.slane %v546_v28, %v2256_v19  ;;  %v691_v37 = vld [vmem:[%s3078_s7 + $0x188] sm:$0xff]  ;;  %v529_v41 = vld [vmem:[%s2252_s20 + $0x18] sm:$0xff] }
  0x28   : > { %734 = vmatprep.subr.mxu0 %v645_v52  ;;  %809 = vmatprep.subr.mxu1 %v615_v61  ;;  %v694_v30 = vld [vmem:[%s3078_s7 + $0x1a0] sm:$0xff]  ;;  %v543_v34 = vmul.f32 %v539_v27, %v527_v23  ;;  %v542_v35 = vmul.f32 %v535_v26, %v526_v29  ;;  %v689_v42 = vld [vmem:[%s3078_s7 + $0x178] sm:$0xff]  ;;  %v545_v45 = vmul.f32 %v539_v27, %v529_v41  ;;  %v688_v47 = vld [vmem:[%s3078_s7 + $0x170] sm:$0xff] }
  0x29   : > { %735 = vmatpush1.msra.mxu0 %v644_v54  ;;  %810 = vmatpush1.msra.mxu1 %v614_v1  ;;  %v690_v40 = vld [vmem:[%s3078_s7 + $0x180] sm:$0xff]  ;;  %v528_v48 = vld [vmem:[%s2252_s20 + $0x10] sm:$0xff]  ;;  %v482_v49 = vld [vmem:[%s2156_s28 + $0x8] sm:$0xff]  ;;  %s1661_s20 = sshll.u32 %s3088_s22, 1  ;;  %s480_s28 = scalar_lea.vmem %s3083_s12, %s1879_s26 }
  0x2a   : > { %736 = vmatprep.subr.mxu0 %v643_v60  ;;  %811 = vmatprep.subr.mxu1 %v613_v3  ;;  %v2294_v38 = vadd.f32 %v555_v32, %v543_v34  ;;  %v2296_v39 = vadd.f32 %v551_v31, %v542_v35  ;;  %v687_v51 = vld [vmem:[%s3078_s7 + $0x168] sm:$0xff]  ;;  %v2315_v52 = vadd.f32 %v555_v32, %v545_v45  ;;  %v686_v54 = vld [vmem:[%s3078_s7 + $0x160] sm:$0xff]  ;;  %v685_v56 = vld [vmem:[%s3078_s7 + $0x158] sm:$0xff]  ;;  %s466_s15 = scalar_lea.vmem %s3080_s9, %s1661_s20  ;;  %s470_s17 = scalar_lea.vmem %s3081_s10, %s1661_s20 }
  0x2b   : > { %737 = vmatpush1.msra.mxu0 %v642_v0  ;;  %812 = vmatpush1.msra.mxu1 %v612_v7  ;;  %v544_v53 = vmul.f32 %v535_v26, %v528_v48  ;;  %v491_v55 = vmul.f32 %v2186_v58, %v482_v49  ;;  %v684_v61 = vld [vmem:[%s3078_s7 + $0x150] sm:$0xff]  ;;  %v683_v58 = vld [vmem:[%s3078_s7 + $0x148] sm:$0xff]  ;;  %v682_v0 = vld [vmem:[%s3078_s7 + $0x140] sm:$0xff] }
  0x2c   : > { %738 = vmatprep.subr.mxu0 %v705_v2  ;;  %813 = vmatprep.subr.mxu1 %v611_v9  ;;  %v1672_v43 = vmul.f32 -1.442695, %v2294_v38  ;;  %v1671_v44 = vmul.f32 -1.442695, %v2296_v39  ;;  %v1674_v57 = vmul.f32 -1.442695, %v2315_v52  ;;  %vm2370_vm1 = vmneg %vm517_vm0 }
  0x2d   : > { %739 = vmatpush2.msra.mxu0 %v704_v6  ;;  %814 = vmatpush1.msra.mxu1 %v610_v13  ;;  %v2325_v60 = vadd.f32 %v551_v31, %v544_v53  ;;  %v2331_v62 = vadd.f32 %v2191_v59, %v491_v55  ;;  %v681_v59 = vld [vmem:[%s3078_s7 + $0x138] sm:$0xff]  ;;  %v680_v2 = vld [vmem:[%s3078_s7 + $0x130] sm:$0xff]  ;;  %v679_v3 = vld [vmem:[%s3078_s7 + $0x128] sm:$0xff] }
  0x2e   : > { %740 = vmatprep.subr.mxu0 %v703_v8  ;;  %903 = vmatprep.subr.mxu1 %v1712_v15  ;;  %1891 = vpow2.f32 %v1672_v43  ;;  %v678_v6 = vld [vmem:[%s3078_s7 + $0x120] sm:$0xff]  ;;  %v677_v7 = vld [vmem:[%s3078_s7 + $0x118] sm:$0xff]  ;;  %v676_v8 = vld [vmem:[%s3078_s7 + $0x110] sm:$0xff] }
  0x2f   : > { %741 = vmatpush2.msra.mxu0 %v702_v12  ;;  %1893 = vpow2.f32 %v1671_v44  ;;  %v1673_v63 = vmul.f32 -1.442695, %v2325_v60  ;;  %v1670_v1 = vmul.f32 -1.442695, %v2331_v62  ;;  %v675_v9 = vld [vmem:[%s3078_s7 + $0x108] sm:$0xff]  ;;  %v674_v11 = vld [vmem:[%s3078_s7 + $0x100] sm:$0xff] }
  0x30   : > { %742 = vmatprep.subr.mxu0 %v701_v14  ;;  %v1744_v14 = vld [vmem:[%s3078_s7 + $0x2f8] sm:$0xff]  ;;  %v1711_v23 = vld [vmem:[%s3077_s6 + $0x1f0] sm:$0xff]  ;;  %v1709_v27 = vld [vmem:[%s3077_s6 + $0x1e0] sm:$0xff] }
  0x31   : > { %743 = vmatpush2.msra.mxu0 %v700_v16  ;;  %v1708_v29 = vld [vmem:[%s3077_s6 + $0x1d8] sm:$0xff]  ;;  %v1707_v31 = vld [vmem:[%s3077_s6 + $0x1d0] sm:$0xff]  ;;  %v1706_v32 = vld [vmem:[%s3077_s6 + $0x1c8] sm:$0xff] }
  0x32   : > { %744 = vmatprep.subr.mxu0 %v699_v17  ;;  %v1890_v46 = vpop.eup %1889  ;;  %v1704_v34 = vld [vmem:[%s3077_s6 + $0x1b8] sm:$0xff]  ;;  %v1703_v35 = vld [vmem:[%s3077_s6 + $0x1b0] sm:$0xff]  ;;  %v1698_v45 = vld [vmem:[%s3077_s6 + $0x188] sm:$0xff] }
  0x33   : > { %745 = vmatpush2.msra.mxu0 %v698_v20  ;;  %v507_v50 = vadd.f32 1.0, %v1890_v46  ;;  %v1700_v41 = vld [vmem:[%s3077_s6 + $0x198] sm:$0xff]  ;;  %v1699_v43 = vld [vmem:[%s3077_s6 + $0x190] sm:$0xff]  ;;  %v1742_v53 = vld [vmem:[%s3078_s7 + $0x2e8] sm:$0xff] }
  0x34   : > { %746 = vmatprep.subr.mxu0 %v697_v21 }
  0x35   : > { %747 = vmatpush2.msra.mxu0 %v696_v22  ;;  %1895 = vrcp.f32 %v507_v50  ;;  %v1696_v50 = vld [vmem:[%s3077_s6 + $0x178] sm:$0xff] }
  0x36   : > { %748 = vmatprep.subr.mxu0 %v695_v25  ;;  %1897 = vpow2.f32 %v1674_v57  ;;  %v1741_v57 = vld [vmem:[%s3078_s7 + $0x2e0] sm:$0xff] }
  0x37   : > { %749 = vmatpush2.msra.mxu0 %v694_v30  ;;  %1899 = vpow2.f32 %v1673_v63 }
  0x38   : > { %750 = vmatprep.subr.mxu0 %v693_v33  ;;  %1901 = vpow2.f32 %v1670_v1  ;;  %v1705_v33 = vld [vmem:[%s3077_s6 + $0x1c0] sm:$0xff]  ;;  %v1692_v1 = vld [vmem:[%s3077_s6 + $0x158] sm:$0xff] }
  0x39   : > { %751 = vmatpush2.msra.mxu0 %v692_v36  ;;  %v1702_v36 = vld [vmem:[%s3077_s6 + $0x1a8] sm:$0xff] }
  0x3a   : > { %752 = vmatprep.subr.mxu0 %v691_v37  ;;  %v1701_v37 = vld [vmem:[%s3077_s6 + $0x1a0] sm:$0xff] }
  0x3b   : > { %753 = vmatpush2.msra.mxu0 %v690_v40  ;;  %v1892_v10 = vpop.eup %1891 }
  0x3c   : > { %754 = vmatprep.subr.mxu0 %v689_v42  ;;  %v1894_v12 = vpop.eup %1893  ;;  %v575_v13 = vadd.f32 1.0, %v1892_v10  ;;  %v1737_v10 = vld [vmem:[%s3078_s7 + $0x2c0] sm:$0xff] }
  0x3d   : > { %755 = vmatpush2.msra.mxu0 %v688_v47  ;;  %v574_v16 = vadd.f32 1.0, %v1894_v12  ;;  %v1697_v47 = vld [vmem:[%s3077_s6 + $0x180] sm:$0xff] }
  0x3e   : > { %756 = vmatprep.subr.mxu0 %v687_v51  ;;  %1903 = vrcp.f32 %v575_v13  ;;  %v1743_v51 = vld [vmem:[%s3078_s7 + $0x2f0] sm:$0xff]  ;;  %v1688_v13 = vld [vmem:[%s3077_s6 + $0x138] sm:$0xff] }
  0x3f   : > { %757 = vmatpush2.msra.mxu0 %v686_v54  ;;  %1905 = vrcp.f32 %v574_v16 }
  0x40   : > { %758 = vmatprep.subr.mxu0 %v685_v56  ;;  %v1694_v56 = vld [vmem:[%s3077_s6 + $0x168] sm:$0xff] }
  0x41   : > { %759 = vmatpush2.msra.mxu0 %v684_v61 }
  0x42   : > { %760 = vmatprep.subr.mxu0 %v683_v58  ;;  %v1896_v15 = vpop.eup %1895  ;;  %v1693_v58 = vld [vmem:[%s3077_s6 + $0x160] sm:$0xff] }
  0x43   : > { %761 = vmatpush2.msra.mxu0 %v682_v0  ;;  %v513_v17 = vmul.f32 %v1896_v15, %v2213_v5  ;;  %v1898_v20 = vpop.eup %1897  ;;  %v1710_v5 = vld [vmem:[%s3077_s6 + $0x1e8] sm:$0xff] }
  0x44   : > { %762 = vmatprep.subr.mxu0 %v681_v59  ;;  %v577_v24 = vadd.f32 1.0, %v1898_v20  ;;  %v1900_v25 = vpop.eup %1899  ;;  %v1739_v59 = vld [vmem:[%s3078_s7 + $0x2d0] sm:$0xff] }
  0x45   : > { %763 = vmatpush2.msra.mxu0 %v680_v2  ;;  %v2374_v22 = vrot.slane %v513_v17, 7  ;;  %v1902_v26 = vpop.eup %1901  ;;  %v576_v28 = vadd.f32 1.0, %v1900_v25  ;;  %v1687_v20 = vld [vmem:[%s3077_s6 + $0x130] sm:$0xff] }
  0x46   : > { %764 = vmatprep.subr.mxu0 %v679_v3  ;;  %1907 = vrcp.f32 %v577_v24  ;;  %v508_v30 = vadd.f32 1.0, %v1902_v26  ;;  %v1691_v3 = vld [vmem:[%s3077_s6 + $0x150] sm:$0xff]  ;;  %v1686_v26 = vld [vmem:[%s3077_s6 + $0x128] sm:$0xff] }
  0x47   : > { %765 = vmatpush2.msra.mxu0 %v678_v6  ;;  %1680 = vmatmul.mubr.msk.f32.vlgmr.msra.gmra.mxu1 %vm2370_vm1, %v2374_v22  ;;  %1909 = vrcp.f32 %v576_v28  ;;  %v2509_v24 = vsel %vm517_vm0, 0.0, %v2374_v22 }
  0x48   : > { %766 = vmatprep.subr.mxu0 %v677_v7  ;;  %904 = vmatpush1.msra.mxu1 %v1711_v23  ;;  %1911 = vrcp.f32 %v508_v30  ;;  %v1690_v7 = vld [vmem:[%s3077_s6 + $0x148] sm:$0xff]  ;;  %v1736_v23 = vld [vmem:[%s3078_s7 + $0x2b8] sm:$0xff]  ;;  %v1735_v30 = vld [vmem:[%s3078_s7 + $0x2b0] sm:$0xff] }
  0x49   : > { %767 = vmatpush2.msra.mxu0 %v676_v8  ;;  %853 = vmatprep.mubr.f32.mxu1 %v1921_v4 }
  0x4a   : > { %768 = vmatprep.subr.mxu0 %v675_v9  ;;  %905 = vmatprep.subr.mxu1 %v1710_v5  ;;  %v1689_v9 = vld [vmem:[%s3077_s6 + $0x140] sm:$0xff] }
  0x4b   : > { %769 = vmatpush2.msra.mxu0 %v674_v11  ;;  %906 = vmatpush1.msra.mxu1 %v1709_v27  ;;  %v1904_v40 = vpop.eup %1903 }
  0x4c   : > { %1067 = vmatprep.subr.mxu0 %v1744_v14  ;;  %907 = vmatprep.subr.mxu1 %v1708_v29  ;;  %v1906_v42 = vpop.eup %1905  ;;  %v587_v44 = vmul.f32 %v1904_v40, %v2294_v38  ;;  %v1685_v29 = vld [vmem:[%s3077_s6 + $0x120] sm:$0xff] }
  0x4d   : > { %908 = vmatpush1.msra.mxu1 %v1707_v31  ;;  %v586_v46 = vmul.f32 %v1906_v42, %v2296_v39  ;;  %v1695_v39 = vld [vmem:[%s3077_s6 + $0x170] sm:$0xff] }
  0x4e   : > { %909 = vmatprep.subr.mxu1 %v1706_v32  ;;  %v595_v48 = vrot.slane %v587_v44, 7  ;;  %v1684_v32 = vld [vmem:[%s3077_s6 + $0x118] sm:$0xff] }
  0x4f   : > { %910 = vmatpush1.msra.mxu1 %v1705_v33  ;;  %v594_v38 = vrot.slane %v586_v46, 7  ;;  %v1734_v33 = vld [vmem:[%s3078_s7 + $0x2a8] sm:$0xff]  ;;  %v1732_v46 = vld [vmem:[%s3078_s7 + $0x298] sm:$0xff] }
  0x50   : > { %911 = vmatprep.subr.mxu1 %v1704_v34  ;;  %1676 = vmatprep.mubr.msk.f32.mxu0 %vm2370_vm1, %v595_v48  ;;  %v2483_v11 = vsel %vm517_vm0, 0.0, %v595_v48  ;;  %v896_v34 = vrot.slane %v2509_v24, 1 }
  0x51   : > { %912 = vmatpush1.msra.mxu1 %v1703_v35  ;;  %1678 = vmatmul.mubr.msk.f32.vlgmr.msra.gmra.mxu0 %vm2370_vm1, %v594_v38  ;;  %v2486_v12 = vsel %vm517_vm0, 0.0, %v594_v38  ;;  %v1338_v17 = vrot.slane %v2483_v11, 2 }
  0x52   : > { %913 = vmatprep.subr.mxu1 %v1702_v36  ;;  %1068 = vmatpush1.msra.mxu0 %v1743_v51  ;;  %v1335_v25 = vrot.slane %v2486_v12, 2  ;;  %v1683_v36 = vld [vmem:[%s3077_s6 + $0x110] sm:$0xff] }
  0x53   : > { %914 = vmatpush1.msra.mxu1 %v1701_v37  ;;  %v1908_v49 = vpop.eup %1907  ;;  %1069 = vmatprep.subr.mxu0 %v1742_v53  ;;  %v1733_v37 = vld [vmem:[%s3078_s7 + $0x2a0] sm:$0xff]  ;;  %v1807_v51 = vld [vmem:[%s3077_s6 + $0x2f0] sm:$0xff]  ;;  %v1806_v53 = vld [vmem:[%s3077_s6 + $0x2e8] sm:$0xff] }
  0x54   : > { %915 = vmatprep.subr.mxu1 %v1700_v41  ;;  %v589_v54 = vmul.f32 %v1908_v49, %v2315_v52  ;;  %v1910_v55 = vpop.eup %1909  ;;  %v1740_v52 = vld [vmem:[%s3078_s7 + $0x2d8] sm:$0xff]  ;;  %1070 = vmatpush1.msra.mxu0 %v1741_v57  ;;  %v1727_v57 = vld [vmem:[%s3078_s7 + $0x270] sm:$0xff] }
  0x55   : > { %916 = vmatpush1.msra.mxu1 %v1699_v43  ;;  %v1912_v61 = vpop.eup %1911  ;;  %v588_v0 = vmul.f32 %v1910_v55, %v2325_v60  ;;  %v1738_v60 = vld [vmem:[%s3078_s7 + $0x2c8] sm:$0xff]  ;;  %1071 = vmatprep.subr.mxu0 %v1740_v52  ;;  %v1808_v49 = vld [vmem:[%s3077_s6 + $0x2f8] sm:$0xff]  ;;  %v1805_v55 = vld [vmem:[%s3077_s6 + $0x2e0] sm:$0xff] }
  0x56   : > { %917 = vmatprep.subr.mxu1 %v1698_v45  ;;  %v598_v63 = vrot.slane %v589_v54, 7  ;;  %v514_v2 = vmul.f32 %v1912_v61, %v2331_v62  ;;  %1072 = vmatpush1.msra.mxu0 %v1739_v59  ;;  %v1682_v43 = vld [vmem:[%s3077_s6 + $0x108] sm:$0xff]  ;;  %v1681_v45 = vld [vmem:[%s3077_s6 + $0x100] sm:$0xff]  ;;  %v1728_v54 = vld [vmem:[%s3078_s7 + $0x278] sm:$0xff] }
  0x57   : > { %918 = vmatpush1.msra.mxu1 %v1697_v47  ;;  %v596_v6 = vrot.slane %v588_v0, 7  ;;  %1073 = vmatprep.subr.mxu0 %v1738_v60  ;;  %v1804_v61 = vld [vmem:[%s3077_s6 + $0x2d8] sm:$0xff]  ;;  %v1803_v52 = vld [vmem:[%s3077_s6 + $0x2d0] sm:$0xff]  ;;  %v1802_v0 = vld [vmem:[%s3077_s6 + $0x2c8] sm:$0xff] }
  0x58   : > { %919 = vmatprep.subr.mxu1 %v1696_v50  ;;  %v2474_v8 = vsel %vm517_vm0, %v595_v48, %v598_v63  ;;  %v519_v62 = vrot.slane %v514_v2, 7  ;;  %v2496_v16 = vsel %vm517_vm0, %v598_v63, 0.0  ;;  %1074 = vmatpush1.msra.mxu0 %v1737_v10  ;;  %v1731_v48 = vld [vmem:[%s3078_s7 + $0x290] sm:$0xff]  ;;  %v1730_v50 = vld [vmem:[%s3078_s7 + $0x288] sm:$0xff]  ;;  %v1725_v63 = vld [vmem:[%s3078_s7 + $0x260] sm:$0xff] }
  0x59   : > { %920 = vmatpush1.msra.mxu1 %v1695_v39  ;;  %v1339_v14 = vrot.slane %v2474_v8, 2  ;;  %v2493_v15 = vsel %vm517_vm0, %v594_v38, %v596_v6  ;;  %776 = vmatprep.mubr.f32.mxu0 %v2474_v8  ;;  %v1343_v5 = vrot.slane %v2496_v16, 2  ;;  %v2521_v28 = vsel %vm517_vm0, %v596_v6, 0.0  ;;  %v1729_v39 = vld [vmem:[%s3078_s7 + $0x280] sm:$0xff]  ;;  %v1723_v2 = vld [vmem:[%s3078_s7 + $0x250] sm:$0xff]  ;;  %v1722_v60 = vld [vmem:[%s3078_s7 + $0x248] sm:$0xff] }
  0x5a   : > { %921 = vmatprep.subr.mxu1 %v1694_v56  ;;  %v1336_v21 = vrot.slane %v2493_v15, 2  ;;  %v2518_v27 = vsel %vm517_vm0, %v2374_v22, %v519_v62  ;;  %777 = vmatmul.mubr.f32.gmra.mxu0 %v2493_v15  ;;  %v1341_v31 = vrot.slane %v2521_v28, 2  ;;  %v2562_v44 = vsel %vm517_vm0, %v519_v62, 0.0  ;;  %v1801_v59 = vld [vmem:[%s3077_s6 + $0x2c0] sm:$0xff]  ;;  %v1799_v6 = vld [vmem:[%s3077_s6 + $0x2b0] sm:$0xff]  ;;  %v1798_v62 = vld [vmem:[%s3077_s6 + $0x2a8] sm:$0xff] }
  0x5b   : > { %922 = vmatpush1.msra.mxu1 %v1693_v58  ;;  %v897_v22 = vrot.slane %v2518_v27, 1  ;;  %1075 = vmatprep.subr.mxu0 %v1736_v23  ;;  %v2540_v35 = vsel %vm1181_vm2, %v1338_v17, %v1339_v14  ;;  %v2553_v41 = vsel %vm1181_vm2, %v1339_v14, %v1343_v5  ;;  %v899_v38 = vrot.slane %v2562_v44, 1  ;;  %v1726_v58 = vld [vmem:[%s3078_s7 + $0x268] sm:$0xff]  ;;  %v1797_v10 = vld [vmem:[%s3077_s6 + $0x2a0] sm:$0xff]  ;;  %v1796_v14 = vld [vmem:[%s3077_s6 + $0x298] sm:$0xff] }
  0x5c   : > { %923 = vmatprep.subr.mxu1 %v1692_v1  ;;  %854 = vmatmul.mubr.f32.gmra.mxu1 %v2518_v27  ;;  %v2550_v40 = vsel %vm1181_vm2, %v1335_v25, %v1336_v21  ;;  %v2556_v42 = vsel %vm1181_vm2, %v1336_v21, %v1341_v31  ;;  %v1724_v1 = vld [vmem:[%s3078_s7 + $0x258] sm:$0xff]  ;;  %v1718_v17 = vld [vmem:[%s3078_s7 + $0x228] sm:$0xff]  ;;  %v1717_v21 = vld [vmem:[%s3078_s7 + $0x220] sm:$0xff] }
  0x5d   : > { %924 = vmatpush1.msra.mxu1 %v1691_v3  ;;  %1076 = vmatpush1.msra.mxu0 %v1735_v30  ;;  %v898_v47 = vsel %vm895_vm3, %v896_v34, %v897_v22  ;;  %v900_v56 = vsel %vm895_vm3, %v897_v22, %v899_v38  ;;  %v1800_v3 = vld [vmem:[%s3077_s6 + $0x2b8] sm:$0xff]  ;;  %v1794_v23 = vld [vmem:[%s3077_s6 + $0x288] sm:$0xff]  ;;  %v1793_v5 = vld [vmem:[%s3077_s6 + $0x280] sm:$0xff] }
  0x5e   : > { %925 = vmatprep.subr.mxu1 %v1690_v7  ;;  %1077 = vmatprep.subr.mxu0 %v1734_v33  ;;  %v1721_v7 = vld [vmem:[%s3078_s7 + $0x240] sm:$0xff]  ;;  %v1716_v25 = vld [vmem:[%s3078_s7 + $0x218] sm:$0xff]  ;;  %v1714_v30 = vld [vmem:[%s3078_s7 + $0x208] sm:$0xff] }
  0x5f   : > { %926 = vmatpush1.msra.mxu1 %v1689_v9  ;;  %1078 = vmatpush1.msra.mxu0 %v1733_v37  ;;  %v1720_v9 = vld [vmem:[%s3078_s7 + $0x238] sm:$0xff]  ;;  %v1791_v31 = vld [vmem:[%s3077_s6 + $0x270] sm:$0xff]  ;;  %v1713_v22 = vld [vmem:[%s3078_s7 + $0x200] sm:$0xff] }
  0x60   : > { %927 = vmatprep.subr.mxu1 %v1688_v13  ;;  %967 = vmatprep.mubr.f32.mxu1 %v1921_v4  ;;  %v1719_v13 = vld [vmem:[%s3078_s7 + $0x230] sm:$0xff]  ;;  %v1776_v33 = vld [vmem:[%s3078_s7 + $0x3f8] sm:$0xff]  ;;  %v1789_v34 = vld [vmem:[%s3077_s6 + $0x260] sm:$0xff] }
  0x61   : > { %928 = vmatpush1.msra.mxu1 %v1687_v20  ;;  %1079 = vmatprep.subr.mxu0 %v1732_v46  ;;  %v1795_v20 = vld [vmem:[%s3077_s6 + $0x290] sm:$0xff]  ;;  %v1788_v37 = vld [vmem:[%s3077_s6 + $0x258] sm:$0xff]  ;;  %v1773_v46 = vld [vmem:[%s3078_s7 + $0x3e0] sm:$0xff] }
  0x62   : > { %929 = vmatprep.subr.mxu1 %v1686_v26  ;;  %1080 = vmatpush1.msra.mxu0 %v1731_v48  ;;  %v1715_v26 = vld [vmem:[%s3078_s7 + $0x210] sm:$0xff]  ;;  %v1772_v48 = vld [vmem:[%s3078_s7 + $0x3d8] sm:$0xff] }
  0x63   : > { %930 = vmatpush1.msra.mxu1 %v1685_v29  ;;  %1081 = vmatprep.subr.mxu0 %v1730_v50  ;;  %v1792_v29 = vld [vmem:[%s3077_s6 + $0x278] sm:$0xff]  ;;  %v1771_v50 = vld [vmem:[%s3078_s7 + $0x3d0] sm:$0xff] }
  0x64   : > { %931 = vmatprep.subr.mxu1 %v1684_v32  ;;  %1082 = vmatpush1.msra.mxu0 %v1729_v39  ;;  %v1790_v32 = vld [vmem:[%s3077_s6 + $0x268] sm:$0xff]  ;;  %v1784_v38 = vld [vmem:[%s3077_s6 + $0x238] sm:$0xff]  ;;  %v1783_v39 = vld [vmem:[%s3077_s6 + $0x230] sm:$0xff] }
  0x65   : > { %932 = vmatpush1.msra.mxu1 %v1683_v36  ;;  %1083 = vmatprep.subr.mxu0 %v1728_v54  ;;  %v1775_v36 = vld [vmem:[%s3078_s7 + $0x3f0] sm:$0xff]  ;;  %v1782_v54 = vld [vmem:[%s3077_s6 + $0x228] sm:$0xff] }
  0x66   : > { %933 = vmatprep.subr.mxu1 %v1682_v43  ;;  %1084 = vmatpush1.msra.mxu0 %v1727_v57  ;;  %v1774_v43 = vld [vmem:[%s3078_s7 + $0x3e8] sm:$0xff]  ;;  %v1767_v57 = vld [vmem:[%s3078_s7 + $0x3b0] sm:$0xff] }
  0x67   : > { %934 = vmatpush1.msra.mxu1 %v1681_v45  ;;  %1085 = vmatprep.subr.mxu0 %v1726_v58  ;;  %v1787_v45 = vld [vmem:[%s3077_s6 + $0x250] sm:$0xff]  ;;  %v1780_v58 = vld [vmem:[%s3077_s6 + $0x218] sm:$0xff] }
  0x68   : > { %968 = vmatmul.mubr.f32.vlgmr.msra.gmra.mxu1 %v898_v47  ;;  %1189 = vmatprep.subr.mxu1 %v1808_v49  ;;  %v1786_v47 = vld [vmem:[%s3077_s6 + $0x248] sm:$0xff]  ;;  %v1785_v49 = vld [vmem:[%s3077_s6 + $0x240] sm:$0xff] }
  0x69   : > { %1190 = vmatpush1.msra.mxu1 %v1807_v51  ;;  %973 = vmatprep.mubr.f32.mxu1 %v1921_v4  ;;  %v1770_v51 = vld [vmem:[%s3078_s7 + $0x3c8] sm:$0xff] }
  0x6a   : > { %1191 = vmatprep.subr.mxu1 %v1806_v53  ;;  %1086 = vmatpush1.msra.mxu0 %v1725_v63  ;;  %v1769_v53 = vld [vmem:[%s3078_s7 + $0x3c0] sm:$0xff]  ;;  %v1182_v63 = vrot.slane %v2509_v24, 2  ;;  %v1764_v24 = vld [vmem:[%s3078_s7 + $0x398] sm:$0xff] }
  0x6b   : > { %1192 = vmatpush1.msra.mxu1 %v1805_v55  ;;  %1087 = vmatprep.subr.mxu0 %v1724_v1  ;;  %v1768_v55 = vld [vmem:[%s3078_s7 + $0x3b8] sm:$0xff]  ;;  %v1765_v1 = vld [vmem:[%s3078_s7 + $0x3a0] sm:$0xff] }
  0x6c   : > { %974 = vmatmul.mubr.f32.gmra.mxu1 %v900_v56  ;;  %1193 = vmatprep.subr.mxu1 %v1804_v61  ;;  %v1781_v56 = vld [vmem:[%s3077_s6 + $0x220] sm:$0xff]  ;;  %v1183_v61 = vrot.slane %v2518_v27, 2  ;;  %v1815_v27 = vld [vmem:[%s3078_s7 + $0x430] sm:$0xff] }
  0x6d   : > { %1194 = vmatpush1.msra.mxu1 %v1803_v52  ;;  %1088 = vmatpush1.msra.mxu0 %v1723_v2  ;;  %v1766_v52 = vld [vmem:[%s3078_s7 + $0x3a8] sm:$0xff]  ;;  %v1777_v2 = vld [vmem:[%s3077_s6 + $0x200] sm:$0xff] }
  0x6e   : > { %1195 = vmatprep.subr.mxu1 %v1802_v0  ;;  %1089 = vmatprep.subr.mxu0 %v1722_v60  ;;  %v1779_v0 = vld [vmem:[%s3077_s6 + $0x210] sm:$0xff]  ;;  %v1184_v60 = vsel %vm1181_vm2, %v1182_v63, %v1183_v61  ;;  %v1821_v63 = vld [vmem:[%s3078_s7 + $0x460] sm:$0xff] }
  0x6f   : > { %1196 = vmatpush1.msra.mxu1 %v1801_v59  ;;  %1090 = vmatpush1.msra.mxu0 %v1721_v7  ;;  %v1778_v59 = vld [vmem:[%s3077_s6 + $0x208] sm:$0xff] }
  0x70   : > { %1197 = vmatprep.subr.mxu1 %v1800_v3  ;;  %1091 = vmatprep.subr.mxu0 %v1720_v9  ;;  %v1763_v3 = vld [vmem:[%s3078_s7 + $0x390] sm:$0xff]  ;;  %v1762_v7 = vld [vmem:[%s3078_s7 + $0x388] sm:$0xff]  ;;  %v1761_v9 = vld [vmem:[%s3078_s7 + $0x380] sm:$0xff] }
  0x71   : > { %1198 = vmatpush1.msra.mxu1 %v1799_v6  ;;  %1092 = vmatpush1.msra.mxu0 %v1719_v13  ;;  %v1840_v6 = vld [vmem:[%s3078_s7 + $0x4f8] sm:$0xff] }
  0x72   : > { %1199 = vmatprep.subr.mxu1 %v1798_v62  ;;  %1093 = vmatprep.subr.mxu0 %v1718_v17  ;;  %v1839_v62 = vld [vmem:[%s3078_s7 + $0x4f0] sm:$0xff]  ;;  %v1760_v13 = vld [vmem:[%s3078_s7 + $0x378] sm:$0xff] }
  0x73   : > { %1200 = vmatpush1.msra.mxu1 %v1797_v10  ;;  %1094 = vmatpush1.msra.mxu0 %v1717_v21  ;;  %v1838_v10 = vld [vmem:[%s3078_s7 + $0x4e8] sm:$0xff]  ;;  %v1759_v17 = vld [vmem:[%s3078_s7 + $0x370] sm:$0xff] }
  0x74   : > { %1201 = vmatprep.subr.mxu1 %v1796_v14  ;;  %1095 = vmatprep.subr.mxu0 %v1716_v25  ;;  %v1837_v14 = vld [vmem:[%s3078_s7 + $0x4e0] sm:$0xff]  ;;  %v1758_v21 = vld [vmem:[%s3078_s7 + $0x368] sm:$0xff] }
  0x75   : > { %1202 = vmatpush1.msra.mxu1 %v1795_v20  ;;  %1096 = vmatpush1.msra.mxu0 %v1715_v26  ;;  %v1836_v20 = vld [vmem:[%s3078_s7 + $0x4d8] sm:$0xff]  ;;  %v1757_v25 = vld [vmem:[%s3078_s7 + $0x360] sm:$0xff] }
  0x76   : > { %1203 = vmatprep.subr.mxu1 %v1794_v23  ;;  %1097 = vmatprep.subr.mxu0 %v1714_v30  ;;  %v1835_v23 = vld [vmem:[%s3078_s7 + $0x4d0] sm:$0xff]  ;;  %v1756_v26 = vld [vmem:[%s3078_s7 + $0x358] sm:$0xff] }
  0x77   : > { %1204 = vmatpush1.msra.mxu1 %v1793_v5  ;;  %1098 = vmatpush1.msra.mxu0 %v1713_v22  ;;  %v1834_v5 = vld [vmem:[%s3078_s7 + $0x4c8] sm:$0xff]  ;;  %v1755_v30 = vld [vmem:[%s3078_s7 + $0x350] sm:$0xff] }
  0x78   : > { %1205 = vmatprep.subr.mxu1 %v1792_v29  ;;  %1099 = vmatprep.subr.mxu0 %v1776_v33  ;;  %v1833_v29 = vld [vmem:[%s3078_s7 + $0x4c0] sm:$0xff]  ;;  %v1754_v22 = vld [vmem:[%s3078_s7 + $0x348] sm:$0xff] }
  0x79   : > { %1206 = vmatpush1.msra.mxu1 %v1791_v31  ;;  %1100 = vmatpush2.msra.mxu0 %v1775_v36  ;;  %v1832_v31 = vld [vmem:[%s3078_s7 + $0x4b8] sm:$0xff]  ;;  %v1753_v33 = vld [vmem:[%s3078_s7 + $0x340] sm:$0xff] }
  0x7a   : > { %1207 = vmatprep.subr.mxu1 %v1790_v32  ;;  %1101 = vmatprep.subr.mxu0 %v1774_v43  ;;  %v1831_v32 = vld [vmem:[%s3078_s7 + $0x4b0] sm:$0xff]  ;;  %v1752_v36 = vld [vmem:[%s3078_s7 + $0x338] sm:$0xff] }
  0x7b   : > { %1208 = vmatpush1.msra.mxu1 %v1789_v34  ;;  %1102 = vmatpush2.msra.mxu0 %v1773_v46  ;;  %v1830_v34 = vld [vmem:[%s3078_s7 + $0x4a8] sm:$0xff]  ;;  %v1751_v43 = vld [vmem:[%s3078_s7 + $0x330] sm:$0xff] }
  0x7c   : > { %1209 = vmatprep.subr.mxu1 %v1788_v37  ;;  %1103 = vmatprep.subr.mxu0 %v1772_v48  ;;  %v1829_v37 = vld [vmem:[%s3078_s7 + $0x4a0] sm:$0xff]  ;;  %v1750_v46 = vld [vmem:[%s3078_s7 + $0x328] sm:$0xff] }
  0x7d   : > { %1210 = vmatpush1.msra.mxu1 %v1787_v45  ;;  %1104 = vmatpush2.msra.mxu0 %v1771_v50  ;;  %v1828_v45 = vld [vmem:[%s3078_s7 + $0x498] sm:$0xff]  ;;  %v1749_v48 = vld [vmem:[%s3078_s7 + $0x320] sm:$0xff]  ;;  %v1826_v50 = vld [vmem:[%s3078_s7 + $0x488] sm:$0xff] }
  0x7e   : > { %1211 = vmatprep.subr.mxu1 %v1786_v47  ;;  %1105 = vmatprep.subr.mxu0 %v1770_v51  ;;  %v1827_v47 = vld [vmem:[%s3078_s7 + $0x490] sm:$0xff]  ;;  %v1056_v51 = vrot.slane %v2483_v11, 1  ;;  %v1824_v11 = vld [vmem:[%s3078_s7 + $0x478] sm:$0xff] }
  0x7f   : > { %1212 = vmatpush1.msra.mxu1 %v1785_v49  ;;  %1106 = vmatpush2.msra.mxu0 %v1769_v53  ;;  %v1057_v49 = vrot.slane %v2474_v8, 1  ;;  %v1825_v8 = vld [vmem:[%s3078_s7 + $0x480] sm:$0xff]  ;;  %v1747_v53 = vld [vmem:[%s3078_s7 + $0x310] sm:$0xff] }
  0x80   : > { %1213 = vmatprep.subr.mxu1 %v1784_v38  ;;  %1107 = vmatprep.subr.mxu0 %v1768_v55  ;;  %v1748_v38 = vld [vmem:[%s3078_s7 + $0x318] sm:$0xff]  ;;  %v1061_v55 = vrot.slane %v2496_v16, 1  ;;  %v1185_v16 = vrot.slane %v2562_v44, 2  ;;  %v1819_v44 = vld [vmem:[%s3078_s7 + $0x450] sm:$0xff] }
  0x81   : > { %1214 = vmatpush1.msra.mxu1 %v1783_v39  ;;  %1108 = vmatpush2.msra.mxu0 %v1767_v57  ;;  %v1054_v39 = vrot.slane %v2493_v15, 1  ;;  %v1746_v15 = vld [vmem:[%s3078_s7 + $0x308] sm:$0xff]  ;;  %v1058_v57 = vsel %vm895_vm3, %v1056_v51, %v1057_v49  ;;  %v1844_v51 = vld [vmem:[%s3078_s7 + $0x518] sm:$0xff] }
  0x82   : > { %1215 = vmatprep.subr.mxu1 %v1782_v54  ;;  %1109 = vmatprep.subr.mxu0 %v1766_v52  ;;  %v1053_v54 = vrot.slane %v2486_v12, 1  ;;  %v1745_v12 = vld [vmem:[%s3078_s7 + $0x300] sm:$0xff] }
  0x83   : > { %1216 = vmatpush1.msra.mxu1 %v1781_v56  ;;  %1110 = vmatpush2.msra.mxu0 %v1765_v1  ;;  %v1823_v56 = vld [vmem:[%s3078_s7 + $0x470] sm:$0xff]  ;;  %v1820_v1 = vld [vmem:[%s3078_s7 + $0x458] sm:$0xff] }
  0x84   : > { %1217 = vmatprep.subr.mxu1 %v1780_v58  ;;  %1111 = vmatprep.subr.mxu0 %v1764_v24  ;;  %v1822_v58 = vld [vmem:[%s3078_s7 + $0x468] sm:$0xff]  ;;  %v1055_v52 = vsel %vm895_vm3, %v1053_v54, %v1054_v39  ;;  %v1186_v24 = vsel %vm1181_vm2, %v1183_v61, %v1185_v16 }
  0x85   : > { %1218 = vmatpush1.msra.mxu1 %v1779_v0  ;;  %1253 = vmatprep.mubr.f32.mxu1 %v1921_v4  ;;  %v1059_v0 = vrot.slane %v2521_v28, 1  ;;  %v1818_v28 = vld [vmem:[%s3078_s7 + $0x448] sm:$0xff] }
  0x86   : > { %1219 = vmatprep.subr.mxu1 %v1778_v59  ;;  %1112 = vmatpush2.msra.mxu0 %v1763_v3  ;;  %v1062_v59 = vsel %vm895_vm3, %v1057_v49, %v1061_v55  ;;  %v1817_v3 = vld [vmem:[%s3078_s7 + $0x440] sm:$0xff]  ;;  %v1814_v61 = vld [vmem:[%s3078_s7 + $0x428] sm:$0xff]  ;;  %v1847_v49 = vld [vmem:[%s3078_s7 + $0x530] sm:$0xff] }
  0x87   : > { %1220 = vmatpush1.msra.mxu1 %v1777_v2  ;;  %1113 = vmatprep.subr.mxu0 %v1762_v7  ;;  %v1060_v2 = vsel %vm895_vm3, %v1054_v39, %v1059_v0  ;;  %v1811_v7 = vld [vmem:[%s3078_s7 + $0x410] sm:$0xff] }
  0x88   : > { %1254 = vmatmul.mubr.f32.vlgmr.msra.gmra.mxu1 %v1184_v60  ;;  %1349 = vmatprep.subr.mxu1 %v1840_v6  ;;  %v1816_v60 = vld [vmem:[%s3078_s7 + $0x438] sm:$0xff]  ;;  %v1843_v39 = vld [vmem:[%s3078_s7 + $0x510] sm:$0xff] }
  0x89   : > { %1350 = vmatpush1.msra.mxu1 %v1839_v62  ;;  %1114 = vmatpush2.msra.mxu0 %v1761_v9  ;;  %v1812_v6 = vld [vmem:[%s3078_s7 + $0x418] sm:$0xff]  ;;  %v1810_v62 = vld [vmem:[%s3078_s7 + $0x408] sm:$0xff] }
  0x8a   : > { %1351 = vmatprep.subr.mxu1 %v1838_v10  ;;  %1115 = vmatprep.subr.mxu0 %v1760_v13  ;;  %v1872_v9 = vld [vmem:[%s3078_s7 + $0x5f8] sm:$0xff]  ;;  %v1871_v10 = vld [vmem:[%s3078_s7 + $0x5f0] sm:$0xff]  ;;  %v1870_v13 = vld [vmem:[%s3078_s7 + $0x5e8] sm:$0xff] }
  0x8b   : > { %1352 = vmatpush1.msra.mxu1 %v1837_v14  ;;  %1116 = vmatpush2.msra.mxu0 %v1759_v17  ;;  %v1869_v14 = vld [vmem:[%s3078_s7 + $0x5e0] sm:$0xff]  ;;  %v1868_v17 = vld [vmem:[%s3078_s7 + $0x5d8] sm:$0xff] }
  0x8c   : > { %1353 = vmatprep.subr.mxu1 %v1836_v20  ;;  %1117 = vmatprep.subr.mxu0 %v1758_v21  ;;  %v1867_v20 = vld [vmem:[%s3078_s7 + $0x5d0] sm:$0xff]  ;;  %v1866_v21 = vld [vmem:[%s3078_s7 + $0x5c8] sm:$0xff] }
  0x8d   : > { %1354 = vmatpush1.msra.mxu1 %v1835_v23  ;;  %1118 = vmatpush2.msra.mxu0 %v1757_v25  ;;  %v1865_v23 = vld [vmem:[%s3078_s7 + $0x5c0] sm:$0xff]  ;;  %v1864_v25 = vld [vmem:[%s3078_s7 + $0x5b8] sm:$0xff] }
  0x8e   : > { %1355 = vmatprep.subr.mxu1 %v1834_v5  ;;  %1119 = vmatprep.subr.mxu0 %v1756_v26  ;;  %v1863_v5 = vld [vmem:[%s3078_s7 + $0x5b0] sm:$0xff]  ;;  %v1862_v26 = vld [vmem:[%s3078_s7 + $0x5a8] sm:$0xff] }
  0x8f   : > { %1356 = vmatpush1.msra.mxu1 %v1833_v29  ;;  %1120 = vmatpush2.msra.mxu0 %v1755_v30  ;;  %v1861_v29 = vld [vmem:[%s3078_s7 + $0x5a0] sm:$0xff]  ;;  %v1860_v30 = vld [vmem:[%s3078_s7 + $0x598] sm:$0xff] }
  0x90   : > { %1357 = vmatprep.subr.mxu1 %v1832_v31  ;;  %1121 = vmatprep.subr.mxu0 %v1754_v22  ;;  %v1859_v31 = vld [vmem:[%s3078_s7 + $0x590] sm:$0xff]  ;;  %v1858_v22 = vld [vmem:[%s3078_s7 + $0x588] sm:$0xff] }
  0x91   : > { %1358 = vmatpush1.msra.mxu1 %v1831_v32  ;;  %1122 = vmatpush2.msra.mxu0 %v1753_v33  ;;  %v1857_v32 = vld [vmem:[%s3078_s7 + $0x580] sm:$0xff]  ;;  %v1856_v33 = vld [vmem:[%s3078_s7 + $0x578] sm:$0xff] }
  0x92   : > { %1359 = vmatprep.subr.mxu1 %v1830_v34  ;;  %1123 = vmatprep.subr.mxu0 %v1752_v36  ;;  %v1855_v34 = vld [vmem:[%s3078_s7 + $0x570] sm:$0xff]  ;;  %v1854_v36 = vld [vmem:[%s3078_s7 + $0x568] sm:$0xff] }
  0x93   : > { %1360 = vmatpush1.msra.mxu1 %v1829_v37  ;;  %1124 = vmatpush2.msra.mxu0 %v1751_v43  ;;  %v1853_v37 = vld [vmem:[%s3078_s7 + $0x560] sm:$0xff]  ;;  %v1852_v43 = vld [vmem:[%s3078_s7 + $0x558] sm:$0xff] }
  0x94   : > { %1361 = vmatprep.subr.mxu1 %v1828_v45  ;;  %1125 = vmatprep.subr.mxu0 %v1750_v46  ;;  %v1851_v45 = vld [vmem:[%s3078_s7 + $0x550] sm:$0xff]  ;;  %v1850_v46 = vld [vmem:[%s3078_s7 + $0x548] sm:$0xff] }
  0x95   : > { %1362 = vmatpush1.msra.mxu1 %v1827_v47  ;;  %1126 = vmatpush2.msra.mxu0 %v1749_v48  ;;  %v1849_v47 = vld [vmem:[%s3078_s7 + $0x540] sm:$0xff]  ;;  %v1848_v48 = vld [vmem:[%s3078_s7 + $0x538] sm:$0xff] }
  0x96   : > { %1363 = vmatprep.subr.mxu1 %v1826_v50  ;;  %1127 = vmatprep.subr.mxu0 %v1748_v38  ;;  %v1846_v50 = vld [vmem:[%s3078_s7 + $0x528] sm:$0xff]  ;;  %v1845_v38 = vld [vmem:[%s3078_s7 + $0x520] sm:$0xff] }
  0x97   : > { %1364 = vmatpush1.msra.mxu1 %v1825_v8  ;;  %1128 = vmatpush2.msra.mxu0 %v1747_v53  ;;  %v1842_v8 = vld [vmem:[%s3078_s7 + $0x508] sm:$0xff]  ;;  %v1841_v53 = vld [vmem:[%s3078_s7 + $0x500] sm:$0xff] }
  0x98   : > { %1365 = vmatprep.subr.mxu1 %v1824_v11  ;;  %1129 = vmatprep.subr.mxu0 %v1746_v15 }
  0x99   : > { %1366 = vmatpush1.msra.mxu1 %v1823_v56  ;;  %1130 = vmatpush2.msra.mxu0 %v1745_v12 }
  0x9a   : > { %1131 = vmatprep.mubr.f32.mxu0 %v1058_v57  ;;  %1367 = vmatprep.subr.mxu1 %v1822_v58 }
  0x9b   : > { %1132 = vmatmul.mubr.f32.vlgmr.msra.gmra.mxu0 %v1055_v52  ;;  %1368 = vmatpush1.msra.mxu1 %v1821_v63 }
  0x9c   : > { %1369 = vmatprep.subr.mxu1 %v1820_v1  ;;  %1137 = vmatprep.mubr.f32.mxu0 %v1062_v59 }
  0x9d   : > { %1370 = vmatpush1.msra.mxu1 %v1819_v44  ;;  %1259 = vmatprep.mubr.f32.mxu1 %v1921_v4  ;;  %v1813_v4 = vld [vmem:[%s3078_s7 + $0x420] sm:$0xff] }
  0x9e   : > { %1371 = vmatprep.subr.mxu1 %v1818_v28  ;;  %1260 = vmatmul.mubr.f32.gmra.mxu1 %v1186_v24 }
  0x9f   : > { %1138 = vmatmul.mubr.f32.gmra.mxu0 %v1060_v2  ;;  %1372 = vmatpush1.msra.mxu1 %v1817_v3 }
  0xa0   : > { %1373 = vmatprep.subr.mxu1 %v1816_v60  ;;  %1413 = vmatprep.mubr.f32.mxu1 %v2540_v35  ;;  %v1809_v35 = vld [vmem:[%s3078_s7 + $0x400] sm:$0xff] }
  0xa1   : > { %1374 = vmatpush1.msra.mxu1 %v1815_v27 }
  0xa2   : > { %1375 = vmatprep.subr.mxu1 %v1814_v61  ;;  %v1430_v61 = vld [vmem:[%s3079_s8] sm:$0x3] }
  0xa3   : > { %1376 = vmatpush1.msra.mxu1 %v1813_v4 }
  0xa4   : > { %1377 = vmatprep.subr.mxu1 %v1812_v6 }
  0xa5   : > { %1378 = vmatpush1.msra.mxu1 %v1811_v7 }
  0xa6   : > { %1379 = vmatprep.subr.mxu1 %v1810_v62  ;;  %v1446_v62 = vld [vmem:[%s466_s15] sm:$0x3] }
  0xa7   : > { %1380 = vmatpush1.msra.mxu1 %v1809_v35 }
  0xa8   : > { %1381 = vmatprep.subr.mxu1 %v1872_v9 }
  0xa9   : > { %1382 = vmatpush2.msra.mxu1 %v1871_v10 }
  0xaa   : > { %1383 = vmatprep.subr.mxu1 %v1870_v13 }
  0xab   : > { %1384 = vmatpush2.msra.mxu1 %v1869_v14 }
  0xac   : > { %1385 = vmatprep.subr.mxu1 %v1868_v17  ;;  %v1435_v17 = vrot.slane %v1430_v61, %v2254_v18 }
  0xad   : > { %1386 = vmatpush2.msra.mxu1 %v1867_v20  ;;  %v1462_v20 = vld [vmem:[%s470_s17] sm:$0x3] }
  0xae   : > { %1387 = vmatprep.subr.mxu1 %v1866_v21 }
  0xaf   : > { %1388 = vmatpush2.msra.mxu1 %v1865_v23  ;;  %v1451_v23 = vrot.slane %v1446_v62, %v2254_v18 }
  0xb0   : > { %1389 = vmatprep.subr.mxu1 %v1864_v25 }
  0xb1   : > { %1390 = vmatpush2.msra.mxu1 %v1863_v5 }
  0xb2   : > { %1391 = vmatprep.subr.mxu1 %v1862_v26 }
  0xb3   : > { %1392 = vmatpush2.msra.mxu1 %v1861_v29  ;;  %v1439_v29 = vrot.slane %v1430_v61, %v2256_v19 }
  0xb4   : > { %1393 = vmatprep.subr.mxu1 %v1860_v30  ;;  %v1467_v30 = vrot.slane %v1462_v20, %v2254_v18 }
  0xb5   : > { %1394 = vmatpush2.msra.mxu1 %v1859_v31 }
  0xb6   : > { %1395 = vmatprep.subr.mxu1 %v1858_v22 }
  0xb7   : > { %1396 = vmatpush2.msra.mxu1 %v1857_v32 }
  0xb8   : > { %1397 = vmatprep.subr.mxu1 %v1856_v33 }
  0xb9   : > { %1398 = vmatpush2.msra.mxu1 %v1855_v34  ;;  %v1455_v34 = vrot.slane %v1446_v62, %v2256_v19 }
  0xba   : > { %1399 = vmatprep.subr.mxu1 %v1854_v36  ;;  %v1471_v36 = vrot.slane %v1462_v20, %v2256_v19 }
  0xbb   : > { %1400 = vmatpush2.msra.mxu1 %v1853_v37 }
  0xbc   : > { %1401 = vmatprep.subr.mxu1 %v1852_v43 }
  0xbd   : > { %1402 = vmatpush2.msra.mxu1 %v1851_v45 }
  0xbe   : > { %1403 = vmatprep.subr.mxu1 %v1850_v46 }
  0xbf   : > { %1404 = vmatpush2.msra.mxu1 %v1849_v47 }
  0xc0   : > { %1405 = vmatprep.subr.mxu1 %v1848_v48 }
  0xc1   : > { %1406 = vmatpush2.msra.mxu1 %v1847_v49 }
  0xc2   : > { %1407 = vmatprep.subr.mxu1 %v1846_v50 }
  0xc3   : > { %1408 = vmatpush2.msra.mxu1 %v1845_v38 }
  0xc4   : > { %1409 = vmatprep.subr.mxu1 %v1844_v51 }
  0xc5   : > { %1410 = vmatpush2.msra.mxu1 %v1843_v39 }
  0xc6   : > { %1411 = vmatprep.subr.mxu1 %v1842_v8 }
  0xc7   : > { %1412 = vmatpush2.msra.mxu1 %v1841_v53 }
  0xc8   : > { %1414 = vmatmul.mubr.f32.vlgmr.msra.gmra.mxu1 %v2550_v40 }
  0xc9   : > { %1419 = vmatprep.mubr.f32.mxu1 %v2553_v41 }
  0xcc   : > { %1420 = vmatmul.mubr.f32.gmra.mxu1 %v2556_v42 }
 0x107   : > { %v849_v54 = vpop.f32.mrf.mxu1 }
 0x109   : > { %v851_v11 = vpop.f32.mrf.mxu1 }
 0x111   : > { %v772_v56 = vpop.f32.mrf.mxu0 }
 0x112   : > { %v850_v44 = vadd.f32 %v849_v54, %v772_v56 }
 0x113   : > { %v774_v57 = vpop.f32.mrf.mxu0 }
 0x114   : > { %v852_v42 = vadd.f32 %v851_v11, %v774_v57 }
 0x11a   : > { %v778_v16 = vpop.f32.mrf.mxu0 }
 0x11c   : > { %v855_v15 = vpop.f32.mrf.mxu1  ;;  %v780_v63 = vpop.f32.mrf.mxu0 }
 0x11d   : > { %v856_v3 = vadd.f32 %v855_v15, %v778_v16 }
 0x11e   : > { %v857_v55 = vpop.f32.mrf.mxu1 }
 0x11f   : > { %v858_v4 = vadd.f32 %v857_v55, %v780_v63 }
 0x128   : > { %v969_v12 = vpop.f32.mrf.mxu1 }
 0x129   : > { %v980_v28 = vadd.f32 %v969_v12, %v850_v44 }
 0x12a   : > { %v971_v58 = vpop.f32.mrf.mxu1 }
 0x12b   : > { %v981_v60 = vadd.f32 %v971_v58, %v852_v42 }
 0x12c   : > { %v975_v52 = vpop.f32.mrf.mxu1 }
 0x12d   : > { %v982_v6 = vadd.f32 %v975_v52, %v856_v3 }
 0x12e   : > { %v977_v0 = vpop.f32.mrf.mxu1 }
 0x12f   : > { %v983_v10 = vadd.f32 %v977_v0, %v858_v4 }
 0x148   : > { %v1255_v59 = vpop.f32.mrf.mxu1 }
 0x14a   : > { %v1257_v41 = vpop.f32.mrf.mxu1 }
 0x15b   : > { %v1133_v1 = vpop.f32.mrf.mxu0 }
 0x15c   : > { %v1144_v27 = vadd.f32 %v1133_v1, %v980_v28 }
 0x15d   : > { %v1135_v40 = vpop.f32.mrf.mxu0 }
 0x15e   : > { %v1261_v2 = vpop.f32.mrf.mxu1  ;;  %v1145_v7 = vadd.f32 %v1135_v40, %v981_v60  ;;  %v1266_v14 = vadd.f32 %v1255_v59, %v1144_v27 }
 0x15f   : > { %v1139_v24 = vpop.f32.mrf.mxu0 }
 0x160   : > { %v1263_v9 = vpop.f32.mrf.mxu1  ;;  %v1146_v13 = vadd.f32 %v1139_v24, %v982_v6  ;;  %v1267_v26 = vadd.f32 %v1257_v41, %v1145_v7 }
 0x161   : > { %v1141_v35 = vpop.f32.mrf.mxu0 }
 0x162   : > { %v1147_v25 = vadd.f32 %v1141_v35, %v983_v10  ;;  %v1268_v22 = vadd.f32 %v1261_v2, %v1146_v13 }
 0x164   : > { %v1269_v43 = vadd.f32 %v1263_v9, %v1147_v25 }
 0x188   : > { %v1415_v21 = vpop.f32.mrf.mxu1 }
 0x189   : > { %v1426_v5 = vadd.f32 %v1415_v21, %v1266_v14 }
 0x18a   : > { %v1417_v31 = vpop.f32.mrf.mxu1 }
 0x18b   : > { %v1442_v32 = vadd.f32 %v1435_v17, %v1426_v5  ;;  %v1427_v33 = vadd.f32 %v1417_v31, %v1267_v26 }
 0x18c   : > { %v1421_v37 = vpop.f32.mrf.mxu1 }
 0x18d   : > { %v1458_v45 = vmul.f32 %v1451_v23, %v1442_v32  ;;  %v1443_v46 = vadd.f32 %v1439_v29, %v1427_v33  ;;  %v1428_v47 = vadd.f32 %v1421_v37, %v1268_v22 }
 0x18e   : > { %v1423_v48 = vpop.f32.mrf.mxu1 }
 0x18f   : > { %v1474_v18 = vadd.f32 %v1467_v30, %v1458_v45  ;;  %v1459_v49 = vmul.f32 %v1455_v34, %v1443_v46  ;;  %v1444_v50 = vadd.f32 %v1435_v17, %v1428_v47  ;;  %v1429_v38 = vadd.f32 %v1423_v48, %v1269_v43 }
 0x191   : > { %1478 = vst [vmem:[%s475_s24] sm:$0xff] %v1474_v18  ;;  %v1475_v51 = vadd.f32 %v1471_v36, %v1459_v49  ;;  %v1460_v39 = vmul.f32 %v1451_v23, %v1444_v50  ;;  %v1445_v8 = vadd.f32 %v1439_v29, %v1429_v38  ;;  %v1496_v54 = vmul.f32 %v1474_v18, %v1474_v18 }
 0x193   : > { %1479 = vst [vmem:[%s475_s24 + $0x8] sm:$0xff] %v1475_v51  ;;  %v1476_v19 = vadd.f32 %v1467_v30, %v1460_v39  ;;  %v1461_v53 = vmul.f32 %v1455_v34, %v1445_v8  ;;  %v1497_v56 = vmul.f32 %v1475_v51, %v1475_v51 }
 0x195   : > { %1480 = vst [vmem:[%s475_s24 + $0x10] sm:$0xff] %v1476_v19  ;;  %v1482_v11 = vadd.f32 %v1476_v19, %v1474_v18  ;;  %v1498_v15 = vmul.f32 %v1476_v19, %v1476_v19  ;;  %v1477_v55 = vadd.f32 %v1471_v36, %v1461_v53 }
 0x197   : > { %v1483_v12 = vrot.slane %v1482_v11, 4  ;;  %v1500_v57 = vadd.f32 %v1498_v15, %v1496_v54  ;;  %1481 = vst [vmem:[%s475_s24 + $0x18] sm:$0xff] %v1477_v55  ;;  %v1489_v58 = vadd.f32 %v1477_v55, %v1475_v51  ;;  %v1499_v16 = vmul.f32 %v1477_v55, %v1477_v55 }
 0x199   : > { %v1484_v52 = vadd.f32 %v1483_v12, %v1482_v11  ;;  %v1501_v63 = vrot.slane %v1500_v57, 4  ;;  %v1490_v0 = vrot.slane %v1489_v58, 4  ;;  %v1507_v1 = vadd.f32 %v1499_v16, %v1497_v56 }
 0x19b   : > { %v1485_v59 = vrot.slane %v1484_v52, 2  ;;  %v1502_v40 = vadd.f32 %v1501_v63, %v1500_v57  ;;  %v1491_v44 = vadd.f32 %v1490_v0, %v1489_v58  ;;  %v1508_v41 = vrot.slane %v1507_v1, 4 }
 0x19d   : > { %v1486_v42 = vadd.f32 %v1485_v59, %v1484_v52  ;;  %v1503_v28 = vrot.slane %v1502_v40, 2  ;;  %v1492_v24 = vrot.slane %v1491_v44, 2  ;;  %v1509_v2 = vadd.f32 %v1508_v41, %v1507_v1 }
 0x19f   : > { %v1504_v3 = vadd.f32 %v1503_v28, %v1502_v40  ;;  %v1493_v60 = vadd.f32 %v1492_v24, %v1491_v44  ;;  %v1510_v27 = vrot.slane %v1509_v2, 2  ;;  %v1487_v61 = vrot.slane %v1486_v42, 1 }
 0x1a1   : > { %v1505_v4 = vrot.slane %v1504_v3, 1  ;;  %v1494_v6 = vrot.slane %v1493_v60, 1  ;;  %v1511_v7 = vadd.f32 %v1510_v27, %v1509_v2  ;;  %v1488_v9 = vadd.f32 %v1487_v61, %v1486_v42 }
 0x1a3   : > { %v1506_v62 = vadd.f32 %v1505_v4, %v1504_v3  ;;  %v1512_v35 = vrot.slane %v1511_v7, 1  ;;  %v1495_v10 = vadd.f32 %v1494_v6, %v1493_v60 }
 0x1a5   : > { %v1513_v13 = vadd.f32 %v1512_v35, %v1511_v7  ;;  %v1514_v14 = vsel %vm517_vm0, %v1488_v9, %v1506_v62 }
 0x1a7   : > { %v1515_v17 = vsel %vm517_vm0, %v1495_v10, %v1513_v13 }
 0x1a8   : > { %v1518_v20 = vcombine.low %v1514_v14, %v1515_v17 }
 0x1aa   : > { %1873 = vst.sshfl [vmem:[%s480_s28] sm:$0x33 pattern:$0x76325410] %v1518_v20 }
 0x1ab PF: > { %s23_s21 = sadd.s32 1, %s1919_s21  }
 0x1ac   : > { %p20_p4 = scmp.ge.s32.totalorder %s23_s21, 4  }
 0x1ae   :  { %22 = sbr.rel (!%p20_p4) target bundleno = 1 (0x1), region = 119 }

// kernel: upblock_forward_nchw.6
= control target key start
LH: loop header
LB: loop body
LE: loop exit
PB: predicated region body
PF: predicated region fallthrough
CT: control target
= control target key end

     0   :  { %s1727_s17 = smov 0   ;;  %s2759_s0 = inlined_call_operand.vmem [shape: f32[2,16,256], index: 0, kind: input, shape index: {}]   ;;  %s2760_s1 = inlined_call_operand.vmem [shape: f32[1,256], index: 1, kind: input, shape index: {}]   ;;  %s2761_s2 = inlined_call_operand.vmem [shape: f32[1,256], index: 2, kind: input, shape index: {}]   ;;  %s2762_s3 = inlined_call_operand.vmem [shape: f32[3,256,256], index: 3, kind: input, shape index: {}]   ;;  %s2763_s4 = inlined_call_operand.vmem [shape: f32[1,256], index: 4, kind: input, shape index: {}]   ;;  %s2764_s5 = inlined_call_operand.vmem [shape: f32[2,16,128], index: 5, kind: input, shape index: {}]   ;;  %s2765_s6 = inlined_call_operand.vmem [shape: f32[2,16,256], index: 6, kind: input, shape index: {}]   ;;  %s2766_s7 = inlined_call_operand.vmem [shape: f32[128,256], index: 7, kind: input, shape index: {}]   ;;  %s2767_s8 = inlined_call_operand.vmem [shape: f32[256,256], index: 8, kind: input, shape index: {}]   ;;  %s2768_s9 = inlined_call_operand.vmem [shape: f32[1,256], index: 9, kind: input, shape index: {}]   ;;  %s2769_s10 = inlined_call_operand.vmem [shape: f32[2,16,256], index: 10, kind: output, shape index: {0}]   ;;  %s2770_s11 = inlined_call_operand.vmem [shape: f32[2,2,256], index: 11, kind: output, shape index: {1}]  }
   0x1 LB: > { %s1442_s18 = sadd.s32 4294967295, %s1664_s17   ;;  %p1446_p0 = scmp.ge.s32.totalorder %s1664_s17, 1  ;;  %s1664_s17 = sphi %s1727_s17, %s22_s17  }
   0x2   : > { %p360_p1 = scmp.lt.s32.totalorder %s1664_s17, 3 }
   0x4   : > { %p361_p2 = pnand %p1446_p0, %p360_p1 }
   0x5   : > { %p1923_p3 = scmp.lt.s32.totalorder (!%p361_p2), %s1442_s18, 1 }
   0x6   : > { %364 = sbr.rel (%p361_p2) target bundleno = 413 (0x19d), region = 60 }
   0xb   : > { %v1492_v0 = vld [vmem:[%s2762_s3 + $0x2f8] sm:$0xff]  ;;  %v1491_v2 = vld [vmem:[%s2762_s3 + $0x2f0] sm:$0xff]  ;;  %v1490_v4 = vld [vmem:[%s2762_s3 + $0x2e8] sm:$0xff]  ;;  %s2775_s18 = smov (!%p1923_p3, %s1442_s18), 1  ;;  %vm508_vm0 = vcmask 1040384   ;;  %vm658_vm2 = vcmask 1046528  }
   0xc   : > { %v556_v1 = vld [vmem:[%s2762_s3 + $0xf8] sm:$0xff]  ;;  %673 = vmatprep.subr.mxu0 %v1492_v0  ;;  %v555_v3 = vld [vmem:[%s2762_s3 + $0xf0] sm:$0xff]  ;;  %v554_v5 = vld [vmem:[%s2762_s3 + $0xe8] sm:$0xff]  ;;  %s1982_s23 = sshll.u32 %s2775_s18, 5  ;;  %vm892_vm3 = vcmask 1045504   ;;  %s1597_s16 = sshll.u32 %s2775_s18, 4 }
   0xd   : > { %750 = vmatprep.subr.mxu1 %v556_v1  ;;  %674 = vmatpush1.msra.mxu0 %v1491_v2  ;;  %v1489_v6 = vld [vmem:[%s2762_s3 + $0x2e0] sm:$0xff]  ;;  %v1488_v8 = vld [vmem:[%s2762_s3 + $0x2d8] sm:$0xff]  ;;  %v1487_v10 = vld [vmem:[%s2762_s3 + $0x2d0] sm:$0xff]  ;;  %s419_s25 = scalar_lea.vmem %s2759_s0, %s1982_s23  ;;  %s2607_s29 = scalar_lea.vmem %s2765_s6, %s1982_s23 }
   0xe   : > { %751 = vmatpush1.msra.mxu1 %v555_v3  ;;  %v553_v7 = vld [vmem:[%s2762_s3 + $0xe0] sm:$0xff]  ;;  %675 = vmatprep.subr.mxu0 %v1490_v4  ;;  %v552_v9 = vld [vmem:[%s2762_s3 + $0xd8] sm:$0xff]  ;;  %v551_v11 = vld [vmem:[%s2762_s3 + $0xd0] sm:$0xff]  ;;  %s424_s28 = scalar_lea.vmem %s2764_s5, %s1597_s16  ;;  %s434_s20 = scalar_lea.vmem %s2769_s10, %s1982_s23 }
   0xf   : > { %752 = vmatprep.subr.mxu1 %v554_v5  ;;  %676 = vmatpush1.msra.mxu0 %v1489_v6  ;;  %v1486_v12 = vld [vmem:[%s2762_s3 + $0x2c8] sm:$0xff]  ;;  %v1485_v14 = vld [vmem:[%s2762_s3 + $0x2c0] sm:$0xff]  ;;  %v1484_v16 = vld [vmem:[%s2762_s3 + $0x2b8] sm:$0xff]  ;;  %v446_v6 = vlaneseq  ;;  %s1600_s23 = sshll.u32 %s2775_s18, 2 }
  0x10   : > { %753 = vmatpush1.msra.mxu1 %v553_v7  ;;  %v550_v13 = vld [vmem:[%s2762_s3 + $0xc8] sm:$0xff]  ;;  %677 = vmatprep.subr.mxu0 %v1488_v8  ;;  %v549_v15 = vld [vmem:[%s2762_s3 + $0xc0] sm:$0xff]  ;;  %v548_v17 = vld [vmem:[%s2762_s3 + $0xb8] sm:$0xff]  ;;  %s439_s21 = scalar_lea.vmem %s2770_s11, %s1600_s23 }
  0x11   : > { %754 = vmatprep.subr.mxu1 %v552_v9  ;;  %678 = vmatpush1.msra.mxu0 %v1487_v10  ;;  %v1483_v18 = vld [vmem:[%s2762_s3 + $0x2b0] sm:$0xff]  ;;  %v1482_v20 = vld [vmem:[%s2762_s3 + $0x2a8] sm:$0xff]  ;;  %v1481_v22 = vld [vmem:[%s2762_s3 + $0x2a0] sm:$0xff] }
  0x12   : > { %755 = vmatpush1.msra.mxu1 %v551_v11  ;;  %679 = vmatprep.subr.mxu0 %v1486_v12  ;;  %v547_v19 = vld [vmem:[%s2762_s3 + $0xb0] sm:$0xff]  ;;  %v546_v21 = vld [vmem:[%s2762_s3 + $0xa8] sm:$0xff]  ;;  %v545_v23 = vld [vmem:[%s2762_s3 + $0xa0] sm:$0xff] }
  0x13   : > { %756 = vmatprep.subr.mxu1 %v550_v13  ;;  %680 = vmatpush1.msra.mxu0 %v1485_v14  ;;  %v1480_v24 = vld [vmem:[%s2762_s3 + $0x298] sm:$0xff]  ;;  %v1479_v26 = vld [vmem:[%s2762_s3 + $0x290] sm:$0xff]  ;;  %v1478_v28 = vld [vmem:[%s2762_s3 + $0x288] sm:$0xff] }
  0x14   : > { %757 = vmatpush1.msra.mxu1 %v549_v15  ;;  %681 = vmatprep.subr.mxu0 %v1484_v16  ;;  %v544_v25 = vld [vmem:[%s2762_s3 + $0x98] sm:$0xff]  ;;  %v543_v27 = vld [vmem:[%s2762_s3 + $0x90] sm:$0xff]  ;;  %v542_v29 = vld [vmem:[%s2762_s3 + $0x88] sm:$0xff]  ;;  %v447_v15 = vshrl.u32 %v446_v6, 7 }
  0x15   : > { %758 = vmatprep.subr.mxu1 %v548_v17  ;;  %682 = vmatpush1.msra.mxu0 %v1483_v18  ;;  %v1477_v30 = vld [vmem:[%s2762_s3 + $0x280] sm:$0xff]  ;;  %v1476_v32 = vld [vmem:[%s2762_s3 + $0x278] sm:$0xff]  ;;  %v1475_v34 = vld [vmem:[%s2762_s3 + $0x270] sm:$0xff] }
  0x16   : > { %759 = vmatpush1.msra.mxu1 %v547_v19  ;;  %683 = vmatprep.subr.mxu0 %v1482_v20  ;;  %v541_v31 = vld [vmem:[%s2762_s3 + $0x80] sm:$0xff]  ;;  %v540_v33 = vld [vmem:[%s2762_s3 + $0x78] sm:$0xff]  ;;  %v539_v35 = vld [vmem:[%s2762_s3 + $0x70] sm:$0xff] }
  0x17   : > { %760 = vmatprep.subr.mxu1 %v546_v21  ;;  %684 = vmatpush1.msra.mxu0 %v1481_v22  ;;  %v1474_v36 = vld [vmem:[%s2762_s3 + $0x268] sm:$0xff]  ;;  %v1473_v38 = vld [vmem:[%s2762_s3 + $0x260] sm:$0xff]  ;;  %v1472_v40 = vld [vmem:[%s2762_s3 + $0x258] sm:$0xff] }
  0x18   : > { %761 = vmatpush1.msra.mxu1 %v545_v23  ;;  %685 = vmatprep.subr.mxu0 %v1480_v24  ;;  %v538_v37 = vld [vmem:[%s2762_s3 + $0x68] sm:$0xff]  ;;  %v537_v39 = vld [vmem:[%s2762_s3 + $0x60] sm:$0xff]  ;;  %v536_v41 = vld [vmem:[%s2762_s3 + $0x58] sm:$0xff] }
  0x19   : > { %762 = vmatprep.subr.mxu1 %v544_v25  ;;  %686 = vmatpush1.msra.mxu0 %v1479_v26  ;;  %v1471_v42 = vld [vmem:[%s2762_s3 + $0x250] sm:$0xff]  ;;  %v1470_v44 = vld [vmem:[%s2762_s3 + $0x248] sm:$0xff]  ;;  %v1469_v46 = vld [vmem:[%s2762_s3 + $0x240] sm:$0xff]  ;;  %v2018_v26 = vsub.s32 1, %v447_v15 }
  0x1a   : > { %763 = vmatpush1.msra.mxu1 %v543_v27  ;;  %687 = vmatprep.subr.mxu0 %v1478_v28  ;;  %v535_v43 = vld [vmem:[%s2762_s3 + $0x50] sm:$0xff]  ;;  %v534_v45 = vld [vmem:[%s2762_s3 + $0x48] sm:$0xff]  ;;  %v533_v47 = vld [vmem:[%s2762_s3 + $0x40] sm:$0xff]  ;;  %v2020_v27 = vsub.s32 0, %v447_v15 }
  0x1b   : > { %764 = vmatprep.subr.mxu1 %v542_v29  ;;  %688 = vmatpush1.msra.mxu0 %v1477_v30  ;;  %v1468_v48 = vld [vmem:[%s2762_s3 + $0x238] sm:$0xff]  ;;  %v1467_v50 = vld [vmem:[%s2762_s3 + $0x230] sm:$0xff]  ;;  %v1466_v52 = vld [vmem:[%s2762_s3 + $0x228] sm:$0xff] }
  0x1c   : > { %765 = vmatpush1.msra.mxu1 %v541_v31  ;;  %689 = vmatprep.subr.mxu0 %v1476_v32  ;;  %v532_v49 = vld [vmem:[%s2762_s3 + $0x38] sm:$0xff]  ;;  %v531_v51 = vld [vmem:[%s2762_s3 + $0x30] sm:$0xff]  ;;  %v530_v53 = vld [vmem:[%s2762_s3 + $0x28] sm:$0xff] }
  0x1d   : > { %766 = vmatprep.subr.mxu1 %v540_v33  ;;  %690 = vmatpush1.msra.mxu0 %v1475_v34  ;;  %v1465_v54 = vld [vmem:[%s2762_s3 + $0x220] sm:$0xff]  ;;  %v1464_v56 = vld [vmem:[%s2762_s3 + $0x218] sm:$0xff]  ;;  %v1463_v58 = vld [vmem:[%s2762_s3 + $0x210] sm:$0xff] }
  0x1e   : > { %767 = vmatpush1.msra.mxu1 %v539_v35  ;;  %691 = vmatprep.subr.mxu0 %v1474_v36  ;;  %v529_v55 = vld [vmem:[%s2762_s3 + $0x20] sm:$0xff]  ;;  %v528_v57 = vld [vmem:[%s2762_s3 + $0x18] sm:$0xff]  ;;  %v527_v59 = vld [vmem:[%s2762_s3 + $0x10] sm:$0xff] }
  0x1f   : > { %768 = vmatprep.subr.mxu1 %v538_v37  ;;  %692 = vmatpush1.msra.mxu0 %v1473_v38  ;;  %v1462_v60 = vld [vmem:[%s2762_s3 + $0x208] sm:$0xff]  ;;  %v1461_v62 = vld [vmem:[%s2762_s3 + $0x200] sm:$0xff]  ;;  %v1524_v0 = vld [vmem:[%s2762_s3 + $0x3f8] sm:$0xff] }
  0x20   : > { %769 = vmatpush1.msra.mxu1 %v537_v39  ;;  %693 = vmatprep.subr.mxu0 %v1472_v40  ;;  %v526_v61 = vld [vmem:[%s2762_s3 + $0x8] sm:$0xff]  ;;  %v525_v63 = vld [vmem:[%s2762_s3] sm:$0xff]  ;;  %v588_v1 = vld [vmem:[%s2762_s3 + $0x1f8] sm:$0xff] }
  0x21   : > { %770 = vmatprep.subr.mxu1 %v536_v41  ;;  %694 = vmatpush1.msra.mxu0 %v1471_v42  ;;  %v1523_v2 = vld [vmem:[%s2762_s3 + $0x3f0] sm:$0xff]  ;;  %v1522_v4 = vld [vmem:[%s2762_s3 + $0x3e8] sm:$0xff]  ;;  %v1521_v7 = vld [vmem:[%s2762_s3 + $0x3e0] sm:$0xff] }
  0x22   : > { %771 = vmatpush1.msra.mxu1 %v535_v43  ;;  %695 = vmatprep.subr.mxu0 %v1470_v44  ;;  %v587_v3 = vld [vmem:[%s2762_s3 + $0x1f0] sm:$0xff]  ;;  %v586_v5 = vld [vmem:[%s2762_s3 + $0x1e8] sm:$0xff]  ;;  %v585_v8 = vld [vmem:[%s2762_s3 + $0x1e0] sm:$0xff] }
  0x23   : > { %772 = vmatprep.subr.mxu1 %v534_v45  ;;  %696 = vmatpush1.msra.mxu0 %v1469_v46  ;;  %v1520_v9 = vld [vmem:[%s2762_s3 + $0x3d8] sm:$0xff]  ;;  %v1519_v11 = vld [vmem:[%s2762_s3 + $0x3d0] sm:$0xff]  ;;  %v1518_v13 = vld [vmem:[%s2762_s3 + $0x3c8] sm:$0xff] }
  0x24   : > { %773 = vmatpush1.msra.mxu1 %v533_v47  ;;  %697 = vmatprep.subr.mxu0 %v1468_v48  ;;  %v584_v10 = vld [vmem:[%s2762_s3 + $0x1d8] sm:$0xff]  ;;  %v583_v12 = vld [vmem:[%s2762_s3 + $0x1d0] sm:$0xff]  ;;  %v582_v14 = vld [vmem:[%s2762_s3 + $0x1c8] sm:$0xff] }
  0x25   : > { %774 = vmatprep.subr.mxu1 %v532_v49  ;;  %698 = vmatpush1.msra.mxu0 %v1467_v50  ;;  %v1517_v16 = vld [vmem:[%s2762_s3 + $0x3c0] sm:$0xff]  ;;  %v1516_v18 = vld [vmem:[%s2762_s3 + $0x3b8] sm:$0xff]  ;;  %v1515_v20 = vld [vmem:[%s2762_s3 + $0x3b0] sm:$0xff] }
  0x26   : > { %775 = vmatpush1.msra.mxu1 %v531_v51  ;;  %699 = vmatprep.subr.mxu0 %v1466_v52  ;;  %v581_v17 = vld [vmem:[%s2762_s3 + $0x1c0] sm:$0xff]  ;;  %v580_v19 = vld [vmem:[%s2762_s3 + $0x1b8] sm:$0xff]  ;;  %v579_v21 = vld [vmem:[%s2762_s3 + $0x1b0] sm:$0xff] }
  0x27   : > { %776 = vmatprep.subr.mxu1 %v530_v53  ;;  %700 = vmatpush1.msra.mxu0 %v1465_v54  ;;  %v1514_v22 = vld [vmem:[%s2762_s3 + $0x3a8] sm:$0xff]  ;;  %v1513_v24 = vld [vmem:[%s2762_s3 + $0x3a0] sm:$0xff]  ;;  %v1512_v28 = vld [vmem:[%s2762_s3 + $0x398] sm:$0xff] }
  0x28   : > { %777 = vmatpush1.msra.mxu1 %v529_v55  ;;  %701 = vmatprep.subr.mxu0 %v1464_v56  ;;  %v578_v23 = vld [vmem:[%s2762_s3 + $0x1a8] sm:$0xff]  ;;  %v577_v25 = vld [vmem:[%s2762_s3 + $0x1a0] sm:$0xff]  ;;  %v576_v29 = vld [vmem:[%s2762_s3 + $0x198] sm:$0xff] }
  0x29   : > { %778 = vmatprep.subr.mxu1 %v528_v57  ;;  %702 = vmatpush1.msra.mxu0 %v1463_v58  ;;  %v1511_v30 = vld [vmem:[%s2762_s3 + $0x390] sm:$0xff]  ;;  %v1510_v32 = vld [vmem:[%s2762_s3 + $0x388] sm:$0xff]  ;;  %v443_v34 = vld [vmem:[%s419_s25 + $0x18] sm:$0xff] }
  0x2a   : > { %779 = vmatpush1.msra.mxu1 %v527_v59  ;;  %703 = vmatprep.subr.mxu0 %v1462_v60  ;;  %v575_v31 = vld [vmem:[%s2762_s3 + $0x190] sm:$0xff]  ;;  %v441_v33 = vld [vmem:[%s419_s25 + $0x8] sm:$0xff]  ;;  %v444_v35 = vld [vmem:[%s2760_s1] sm:$0x3] }
  0x2b   : > { %780 = vmatprep.subr.mxu1 %v526_v61  ;;  %704 = vmatpush1.msra.mxu0 %v1461_v62  ;;  %v460_v36 = vld [vmem:[%s2761_s2] sm:$0x3]  ;;  %v574_v37 = vld [vmem:[%s2762_s3 + $0x188] sm:$0xff]  ;;  %v453_v38 = vrot.slane %v444_v35, %v2018_v26  ;;  %v442_v41 = vld [vmem:[%s419_s25 + $0x10] sm:$0xff]  ;;  %v449_v42 = vrot.slane %v444_v35, %v2020_v27 }
  0x2c   : > { %781 = vmatpush1.msra.mxu1 %v525_v63  ;;  %705 = vmatprep.subr.mxu0 %v1524_v0  ;;  %v469_v39 = vrot.slane %v460_v36, %v2018_v26  ;;  %v440_v40 = vld [vmem:[%s419_s25] sm:$0xff]  ;;  %v465_v45 = vrot.slane %v460_v36, %v2020_v27  ;;  %v1508_v46 = vld [vmem:[%s2762_s3 + $0x378] sm:$0xff]  ;;  %v1507_v51 = vld [vmem:[%s2762_s3 + $0x370] sm:$0xff] }
  0x2d   : > { %782 = vmatprep.subr.mxu1 %v588_v1  ;;  %706 = vmatpush2.msra.mxu0 %v1523_v2  ;;  %v1509_v43 = vld [vmem:[%s2762_s3 + $0x380] sm:$0xff]  ;;  %v572_v47 = vld [vmem:[%s2762_s3 + $0x178] sm:$0xff]  ;;  %v457_v48 = vmul.f32 %v453_v38, %v441_v33  ;;  %v459_v49 = vmul.f32 %v453_v38, %v443_v34  ;;  %v456_v50 = vmul.f32 %v449_v42, %v440_v40  ;;  %v571_v52 = vld [vmem:[%s2762_s3 + $0x170] sm:$0xff] }
  0x2e   : > { %783 = vmatpush2.msra.mxu1 %v587_v3  ;;  %707 = vmatprep.subr.mxu0 %v1522_v4  ;;  %v573_v44 = vld [vmem:[%s2762_s3 + $0x180] sm:$0xff]  ;;  %v458_v53 = vmul.f32 %v449_v42, %v442_v41  ;;  %v1506_v54 = vld [vmem:[%s2762_s3 + $0x368] sm:$0xff]  ;;  %v1504_v61 = vld [vmem:[%s2762_s3 + $0x358] sm:$0xff] }
  0x2f   : > { %784 = vmatprep.subr.mxu1 %v586_v5  ;;  %708 = vmatpush2.msra.mxu0 %v1521_v7  ;;  %v570_v55 = vld [vmem:[%s2762_s3 + $0x168] sm:$0xff]  ;;  %v1505_v56 = vld [vmem:[%s2762_s3 + $0x360] sm:$0xff]  ;;  %v2077_v57 = vadd.f32 %v469_v39, %v457_v48  ;;  %v2079_v58 = vadd.f32 %v469_v39, %v459_v49  ;;  %v2081_v59 = vadd.f32 %v465_v45, %v456_v50  ;;  %v568_v62 = vld [vmem:[%s2762_s3 + $0x158] sm:$0xff] }
  0x30   : > { %785 = vmatpush2.msra.mxu1 %v585_v8  ;;  %709 = vmatprep.subr.mxu0 %v1520_v9  ;;  %v569_v60 = vld [vmem:[%s2762_s3 + $0x160] sm:$0xff]  ;;  %v2092_v63 = vadd.f32 %v465_v45, %v458_v53  ;;  %v1503_v3 = vld [vmem:[%s2762_s3 + $0x350] sm:$0xff]  ;;  %v1502_v6 = vld [vmem:[%s2762_s3 + $0x348] sm:$0xff] }
  0x31   : > { %786 = vmatprep.subr.mxu1 %v584_v10  ;;  %710 = vmatpush2.msra.mxu0 %v1519_v11  ;;  %v1458_v0 = vmul.f32 -1.442695, %v2077_v57  ;;  %v1460_v1 = vmul.f32 -1.442695, %v2079_v58  ;;  %v1457_v2 = vmul.f32 -1.442695, %v2081_v59  ;;  %vm2175_vm1 = vmneg %vm508_vm0 }
  0x32   : > { %787 = vmatpush2.msra.mxu1 %v583_v12  ;;  %711 = vmatprep.subr.mxu0 %v1518_v13  ;;  %v567_v4 = vld [vmem:[%s2762_s3 + $0x150] sm:$0xff]  ;;  %v1459_v5 = vmul.f32 -1.442695, %v2092_v63  ;;  %v566_v7 = vld [vmem:[%s2762_s3 + $0x148] sm:$0xff]  ;;  %v1501_v8 = vld [vmem:[%s2762_s3 + $0x340] sm:$0xff] }
  0x33   : > { %788 = vmatprep.subr.mxu1 %v582_v14  ;;  %712 = vmatpush2.msra.mxu0 %v1517_v16  ;;  %1642 = vpow2.f32 %v1458_v0  ;;  %v565_v9 = vld [vmem:[%s2762_s3 + $0x140] sm:$0xff]  ;;  %v1500_v10 = vld [vmem:[%s2762_s3 + $0x338] sm:$0xff]  ;;  %v1499_v12 = vld [vmem:[%s2762_s3 + $0x330] sm:$0xff] }
  0x34   : > { %789 = vmatpush2.msra.mxu1 %v581_v17  ;;  %713 = vmatprep.subr.mxu0 %v1516_v18  ;;  %1644 = vpow2.f32 %v1460_v1  ;;  %v564_v11 = vld [vmem:[%s2762_s3 + $0x138] sm:$0xff]  ;;  %v563_v13 = vld [vmem:[%s2762_s3 + $0x130] sm:$0xff]  ;;  %v1498_v14 = vld [vmem:[%s2762_s3 + $0x328] sm:$0xff] }
  0x35   : > { %790 = vmatprep.subr.mxu1 %v580_v19  ;;  %714 = vmatpush2.msra.mxu0 %v1515_v20  ;;  %1646 = vpow2.f32 %v1457_v2  ;;  %v562_v15 = vld [vmem:[%s2762_s3 + $0x128] sm:$0xff]  ;;  %v1497_v16 = vld [vmem:[%s2762_s3 + $0x320] sm:$0xff]  ;;  %v1496_v18 = vld [vmem:[%s2762_s3 + $0x318] sm:$0xff] }
  0x36   : > { %791 = vmatpush2.msra.mxu1 %v579_v21  ;;  %715 = vmatprep.subr.mxu0 %v1514_v22  ;;  %1648 = vpow2.f32 %v1459_v5  ;;  %v561_v17 = vld [vmem:[%s2762_s3 + $0x120] sm:$0xff]  ;;  %v560_v19 = vld [vmem:[%s2762_s3 + $0x118] sm:$0xff]  ;;  %v1495_v20 = vld [vmem:[%s2762_s3 + $0x310] sm:$0xff] }
  0x37   : > { %792 = vmatprep.subr.mxu1 %v578_v23  ;;  %716 = vmatpush2.msra.mxu0 %v1513_v24  ;;  %v559_v21 = vld [vmem:[%s2762_s3 + $0x110] sm:$0xff]  ;;  %v1494_v22 = vld [vmem:[%s2762_s3 + $0x308] sm:$0xff]  ;;  %v1493_v24 = vld [vmem:[%s2762_s3 + $0x300] sm:$0xff] }
  0x38   : > { %793 = vmatpush2.msra.mxu1 %v577_v25  ;;  %717 = vmatprep.subr.mxu0 %v1512_v28  ;;  %v558_v23 = vld [vmem:[%s2762_s3 + $0x108] sm:$0xff]  ;;  %v557_v25 = vld [vmem:[%s2762_s3 + $0x100] sm:$0xff]  ;;  %v1560_v28 = vld [vmem:[%s2762_s3 + $0x4f8] sm:$0xff] }
  0x39   : > { %794 = vmatprep.subr.mxu1 %v576_v29  ;;  %718 = vmatpush2.msra.mxu0 %v1511_v30  ;;  %v1057_v29 = vld [vmem:[%s2767_s8 + $0xf8] sm:$0xff]  ;;  %v1052_v1 = vld [vmem:[%s2767_s8 + $0xd0] sm:$0xff] }
  0x3a   : > { %795 = vmatpush2.msra.mxu1 %v575_v31  ;;  %719 = vmatprep.subr.mxu0 %v1510_v32  ;;  %v1559_v2 = vld [vmem:[%s2762_s3 + $0x4f0] sm:$0xff] }
  0x3b   : > { %796 = vmatprep.subr.mxu1 %v574_v37  ;;  %720 = vmatpush2.msra.mxu0 %v1509_v43  ;;  %v1034_v43 = vld [vmem:[%s2767_s8 + $0x40] sm:$0xff] }
  0x3c   : > { %797 = vmatpush2.msra.mxu1 %v573_v44  ;;  %721 = vmatprep.subr.mxu0 %v1508_v46 }
  0x3d   : > { %798 = vmatprep.subr.mxu1 %v572_v47  ;;  %722 = vmatpush2.msra.mxu0 %v1507_v51  ;;  %v1056_v51 = vld [vmem:[%s2767_s8 + $0xf0] sm:$0xff] }
  0x3e   : > { %799 = vmatpush2.msra.mxu1 %v571_v52  ;;  %723 = vmatprep.subr.mxu0 %v1506_v54 }
  0x3f   : > { %800 = vmatprep.subr.mxu1 %v570_v55  ;;  %724 = vmatpush2.msra.mxu0 %v1505_v56  ;;  %v1055_v55 = vld [vmem:[%s2767_s8 + $0xe8] sm:$0xff] }
  0x40   : > { %801 = vmatpush2.msra.mxu1 %v569_v60  ;;  %725 = vmatprep.subr.mxu0 %v1504_v61  ;;  %v1643_v30 = vpop.eup %1642 }
  0x41   : > { %802 = vmatprep.subr.mxu1 %v568_v62  ;;  %726 = vmatpush2.msra.mxu0 %v1503_v3  ;;  %v1645_v31 = vpop.eup %1644  ;;  %v489_v32 = vadd.f32 1.0, %v1643_v30  ;;  %v1053_v62 = vld [vmem:[%s2767_s8 + $0xd8] sm:$0xff]  ;;  %v1051_v3 = vld [vmem:[%s2767_s8 + $0xc8] sm:$0xff]  ;;  %v1040_v30 = vld [vmem:[%s2767_s8 + $0x70] sm:$0xff] }
  0x42   : > { %803 = vmatpush2.msra.mxu1 %v567_v4  ;;  %727 = vmatprep.subr.mxu0 %v1502_v6  ;;  %v1647_v33 = vpop.eup %1646  ;;  %v491_v34 = vadd.f32 1.0, %v1645_v31  ;;  %v1558_v6 = vld [vmem:[%s2762_s3 + $0x4e8] sm:$0xff]  ;;  %v1547_v31 = vld [vmem:[%s2762_s3 + $0x490] sm:$0xff] }
  0x43   : > { %804 = vmatprep.subr.mxu1 %v566_v7  ;;  %728 = vmatpush2.msra.mxu0 %v1501_v8  ;;  %v1649_v35 = vpop.eup %1648  ;;  %1650 = vrcp.f32 %v489_v32  ;;  %v488_v36 = vadd.f32 1.0, %v1647_v33  ;;  %v1050_v7 = vld [vmem:[%s2767_s8 + $0xc0] sm:$0xff]  ;;  %v1039_v32 = vld [vmem:[%s2767_s8 + $0x68] sm:$0xff] }
  0x44   : > { %805 = vmatpush2.msra.mxu1 %v565_v9  ;;  %729 = vmatprep.subr.mxu0 %v1500_v10  ;;  %1652 = vrcp.f32 %v491_v34  ;;  %v490_v37 = vadd.f32 1.0, %v1649_v35  ;;  %v1557_v8 = vld [vmem:[%s2762_s3 + $0x4e0] sm:$0xff]  ;;  %v1049_v9 = vld [vmem:[%s2767_s8 + $0xb8] sm:$0xff]  ;;  %v1546_v33 = vld [vmem:[%s2762_s3 + $0x488] sm:$0xff] }
  0x45   : > { %806 = vmatprep.subr.mxu1 %v564_v11  ;;  %730 = vmatpush2.msra.mxu0 %v1499_v12  ;;  %1654 = vrcp.f32 %v488_v36  ;;  %v1556_v11 = vld [vmem:[%s2762_s3 + $0x4d8] sm:$0xff]  ;;  %v1048_v12 = vld [vmem:[%s2767_s8 + $0xb0] sm:$0xff]  ;;  %v1038_v34 = vld [vmem:[%s2767_s8 + $0x60] sm:$0xff] }
  0x46   : > { %807 = vmatpush2.msra.mxu1 %v563_v13  ;;  %731 = vmatprep.subr.mxu0 %v1498_v14  ;;  %1656 = vrcp.f32 %v490_v37  ;;  %v1555_v13 = vld [vmem:[%s2762_s3 + $0x4d0] sm:$0xff]  ;;  %v1047_v14 = vld [vmem:[%s2767_s8 + $0xa8] sm:$0xff]  ;;  %v1545_v35 = vld [vmem:[%s2762_s3 + $0x480] sm:$0xff] }
  0x47   : > { %808 = vmatprep.subr.mxu1 %v562_v15  ;;  %732 = vmatpush2.msra.mxu0 %v1497_v16  ;;  %v1554_v15 = vld [vmem:[%s2762_s3 + $0x4c8] sm:$0xff]  ;;  %v1046_v16 = vld [vmem:[%s2767_s8 + $0xa0] sm:$0xff]  ;;  %v1037_v36 = vld [vmem:[%s2767_s8 + $0x58] sm:$0xff] }
  0x48   : > { %809 = vmatpush2.msra.mxu1 %v561_v17  ;;  %733 = vmatprep.subr.mxu0 %v1496_v18  ;;  %v1553_v17 = vld [vmem:[%s2762_s3 + $0x4c0] sm:$0xff]  ;;  %v1045_v18 = vld [vmem:[%s2767_s8 + $0x98] sm:$0xff] }
  0x49   : > { %810 = vmatprep.subr.mxu1 %v560_v19  ;;  %734 = vmatpush2.msra.mxu0 %v1495_v20  ;;  %v1552_v19 = vld [vmem:[%s2762_s3 + $0x4b8] sm:$0xff]  ;;  %v1044_v20 = vld [vmem:[%s2767_s8 + $0x90] sm:$0xff] }
  0x4a   : > { %811 = vmatpush2.msra.mxu1 %v559_v21  ;;  %735 = vmatprep.subr.mxu0 %v1494_v22  ;;  %v1551_v21 = vld [vmem:[%s2762_s3 + $0x4b0] sm:$0xff]  ;;  %v1043_v22 = vld [vmem:[%s2767_s8 + $0x88] sm:$0xff]  ;;  %v1544_v37 = vld [vmem:[%s2762_s3 + $0x478] sm:$0xff] }
  0x4b   : > { %812 = vmatprep.subr.mxu1 %v558_v23  ;;  %736 = vmatpush2.msra.mxu0 %v1493_v24  ;;  %v1550_v23 = vld [vmem:[%s2762_s3 + $0x4a8] sm:$0xff]  ;;  %v1042_v24 = vld [vmem:[%s2767_s8 + $0x80] sm:$0xff] }
  0x4c   : > { %813 = vmatpush2.msra.mxu1 %v557_v25  ;;  %907 = vmatprep.subr.mxu0 %v1560_v28  ;;  %v1549_v25 = vld [vmem:[%s2762_s3 + $0x4a0] sm:$0xff]  ;;  %v1041_v28 = vld [vmem:[%s2767_s8 + $0x78] sm:$0xff] }
  0x4d   : > { %1090 = vmatprep.subr.mxu1 %v1057_v29  ;;  %v1548_v29 = vld [vmem:[%s2762_s3 + $0x498] sm:$0xff] }
  0x50   : > { %v1651_v38 = vpop.eup %1650 }
  0x51   : > { %v1653_v39 = vpop.eup %1652  ;;  %v501_v40 = vmul.f32 %v1651_v38, %v2077_v57  ;;  %v1036_v38 = vld [vmem:[%s2767_s8 + $0x50] sm:$0xff] }
  0x52   : > { %v1655_v41 = vpop.eup %1654  ;;  %v2172_v42 = vmul.f32 %v1653_v39, %v2079_v58  ;;  %v1054_v58 = vld [vmem:[%s2767_s8 + $0xe0] sm:$0xff]  ;;  %v1543_v39 = vld [vmem:[%s2762_s3 + $0x470] sm:$0xff] }
  0x53   : > { %v1657_v44 = vpop.eup %1656  ;;  %v510_v45 = vrot.slane %v501_v40, 7  ;;  %v500_v46 = vmul.f32 %v1655_v41, %v2081_v59  ;;  %v1035_v40 = vld [vmem:[%s2767_s8 + $0x48] sm:$0xff] }
  0x54   : > { %v513_v47 = vrot.slane %v2172_v42, 7  ;;  %v2182_v48 = vmul.f32 %v1657_v44, %v2092_v63  ;;  %v1542_v41 = vld [vmem:[%s2762_s3 + $0x468] sm:$0xff]  ;;  %v1541_v44 = vld [vmem:[%s2762_s3 + $0x460] sm:$0xff]  ;;  %v1068_v42 = vld [vmem:[%s2767_s8 + $0x150] sm:$0xff] }
  0x55   : > { %v2185_v49 = vsel %vm508_vm0, 0.0, %v510_v45  ;;  %1526 = vmatprep.mubr.msk.f32.mxu1 %vm2175_vm1, %v510_v45  ;;  %v509_v50 = vrot.slane %v500_v46, 7  ;;  %v1540_v46 = vld [vmem:[%s2762_s3 + $0x458] sm:$0xff] }
  0x56   : > { %v2195_v52 = vsel %vm508_vm0, %v510_v45, %v513_v47  ;;  %v662_v53 = vrot.slane %v2185_v49, 1  ;;  %v511_v54 = vrot.slane %v2182_v48, 7  ;;  %v1033_v45 = vld [vmem:[%s2767_s8 + $0x38] sm:$0xff] }
  0x57   : > { %v663_v56 = vrot.slane %v2195_v52, 1  ;;  %v521_v57 = vsel %vm508_vm0, 0.0, %v509_v50  ;;  %1528 = vmatmul.mubr.msk.f32.vlgmr.msra.gmra.mxu1 %vm2175_vm1, %v509_v50  ;;  %v1065_v48 = vld [vmem:[%s2767_s8 + $0x138] sm:$0xff] }
  0x58   : > { %v2212_v59 = vsel %vm508_vm0, %v509_v50, %v511_v54  ;;  %v659_v60 = vrot.slane %v521_v57, 1  ;;  %v893_v61 = vrot.slane %v521_v57, 2  ;;  %1091 = vmatpush1.msra.mxu1 %v1056_v51  ;;  %820 = vmatprep.mubr.f32.mxu1 %v2195_v52  ;;  %v1032_v50 = vld [vmem:[%s2767_s8 + $0x30] sm:$0xff]  ;;  %v1030_v57 = vld [vmem:[%s2767_s8 + $0x20] sm:$0xff] }
  0x59   : > { %v664_v63 = vsel %vm658_vm2, %v662_v53, %v663_v56  ;;  %v660_v0 = vrot.slane %v2212_v59, 1  ;;  %1092 = vmatprep.subr.mxu1 %v1055_v55  ;;  %v894_v4 = vrot.slane %v2212_v59, 2  ;;  %v1539_v51 = vld [vmem:[%s2762_s3 + $0x450] sm:$0xff]  ;;  %v1031_v53 = vld [vmem:[%s2767_s8 + $0x28] sm:$0xff] }
  0x5a   : > { %737 = vmatprep.mubr.f32.mxu0 %v664_v63  ;;  %1093 = vmatpush1.msra.mxu1 %v1054_v58  ;;  %v1538_v55 = vld [vmem:[%s2762_s3 + $0x448] sm:$0xff]  ;;  %v1537_v58 = vld [vmem:[%s2762_s3 + $0x440] sm:$0xff]  ;;  %v1535_v63 = vld [vmem:[%s2762_s3 + $0x430] sm:$0xff] }
  0x5b   : > { %v661_v5 = vsel %vm658_vm2, %v659_v60, %v660_v0  ;;  %1094 = vmatprep.subr.mxu1 %v1053_v62  ;;  %821 = vmatmul.mubr.f32.gmra.mxu1 %v2212_v59  ;;  %v2251_v10 = vsel %vm892_vm3, %v893_v61, %v894_v4  ;;  %v1029_v60 = vld [vmem:[%s2767_s8 + $0x18] sm:$0xff]  ;;  %v1028_v62 = vld [vmem:[%s2767_s8 + $0x10] sm:$0xff]  ;;  %v1014_v59 = vld [vmem:[%s2766_s7 + $0xc0] sm:$0xff] }
  0x5c   : > { %738 = vmatmul.mubr.f32.vlgmr.msra.gmra.mxu0 %v661_v5  ;;  %1095 = vmatpush1.msra.mxu1 %v1052_v1  ;;  %v1536_v61 = vld [vmem:[%s2762_s3 + $0x438] sm:$0xff]  ;;  %v1027_v1 = vld [vmem:[%s2767_s8 + $0x8] sm:$0xff]  ;;  %v1533_v5 = vld [vmem:[%s2762_s3 + $0x420] sm:$0xff] }
  0x5d   : > { %908 = vmatpush1.msra.mxu0 %v1559_v2  ;;  %1096 = vmatprep.subr.mxu1 %v1051_v3  ;;  %v1534_v2 = vld [vmem:[%s2762_s3 + $0x428] sm:$0xff]  ;;  %v1026_v3 = vld [vmem:[%s2767_s8] sm:$0xff] }
  0x5e   : > { %909 = vmatprep.subr.mxu0 %v1558_v6  ;;  %1097 = vmatpush1.msra.mxu1 %v1050_v7  ;;  %v1089_v6 = vld [vmem:[%s2767_s8 + $0x1f8] sm:$0xff] }
  0x5f   : > { %910 = vmatpush1.msra.mxu0 %v1557_v8  ;;  %1098 = vmatprep.subr.mxu1 %v1049_v9  ;;  %v1532_v7 = vld [vmem:[%s2762_s3 + $0x418] sm:$0xff]  ;;  %v1088_v8 = vld [vmem:[%s2767_s8 + $0x1f0] sm:$0xff] }
  0x60   : > { %911 = vmatprep.subr.mxu0 %v1556_v11  ;;  %1099 = vmatpush1.msra.mxu1 %v1048_v12  ;;  %v1531_v9 = vld [vmem:[%s2762_s3 + $0x410] sm:$0xff]  ;;  %v1087_v11 = vld [vmem:[%s2767_s8 + $0x1e8] sm:$0xff] }
  0x61   : > { %912 = vmatpush1.msra.mxu0 %v1555_v13  ;;  %1100 = vmatprep.subr.mxu1 %v1047_v14  ;;  %v1530_v12 = vld [vmem:[%s2762_s3 + $0x408] sm:$0xff]  ;;  %v1086_v13 = vld [vmem:[%s2767_s8 + $0x1e0] sm:$0xff] }
  0x62   : > { %913 = vmatprep.subr.mxu0 %v1554_v15  ;;  %1101 = vmatpush1.msra.mxu1 %v1046_v16  ;;  %v1529_v14 = vld [vmem:[%s2762_s3 + $0x400] sm:$0xff]  ;;  %v1085_v15 = vld [vmem:[%s2767_s8 + $0x1d8] sm:$0xff] }
  0x63   : > { %914 = vmatpush1.msra.mxu0 %v1553_v17  ;;  %1102 = vmatprep.subr.mxu1 %v1045_v18  ;;  %v1592_v16 = vld [vmem:[%s2762_s3 + $0x5f8] sm:$0xff]  ;;  %v1084_v17 = vld [vmem:[%s2767_s8 + $0x1d0] sm:$0xff] }
  0x64   : > { %915 = vmatprep.subr.mxu0 %v1552_v19  ;;  %1103 = vmatpush1.msra.mxu1 %v1044_v20  ;;  %v1591_v18 = vld [vmem:[%s2762_s3 + $0x5f0] sm:$0xff]  ;;  %v1083_v19 = vld [vmem:[%s2767_s8 + $0x1c8] sm:$0xff] }
  0x65   : > { %916 = vmatpush1.msra.mxu0 %v1551_v21  ;;  %1104 = vmatprep.subr.mxu1 %v1043_v22  ;;  %v1590_v20 = vld [vmem:[%s2762_s3 + $0x5e8] sm:$0xff]  ;;  %v1082_v21 = vld [vmem:[%s2767_s8 + $0x1c0] sm:$0xff] }
  0x66   : > { %917 = vmatprep.subr.mxu0 %v1550_v23  ;;  %1105 = vmatpush1.msra.mxu1 %v1042_v24  ;;  %v1589_v22 = vld [vmem:[%s2762_s3 + $0x5e0] sm:$0xff]  ;;  %v1081_v23 = vld [vmem:[%s2767_s8 + $0x1b8] sm:$0xff] }
  0x67   : > { %918 = vmatpush1.msra.mxu0 %v1549_v25  ;;  %1106 = vmatprep.subr.mxu1 %v1041_v28  ;;  %v1588_v24 = vld [vmem:[%s2762_s3 + $0x5d8] sm:$0xff]  ;;  %v1080_v25 = vld [vmem:[%s2767_s8 + $0x1b0] sm:$0xff] }
  0x68   : > { %919 = vmatprep.subr.mxu0 %v1548_v29  ;;  %1107 = vmatpush1.msra.mxu1 %v1040_v30  ;;  %v1587_v28 = vld [vmem:[%s2762_s3 + $0x5d0] sm:$0xff]  ;;  %v1079_v29 = vld [vmem:[%s2767_s8 + $0x1a8] sm:$0xff] }
  0x69   : > { %920 = vmatpush1.msra.mxu0 %v1547_v31  ;;  %1108 = vmatprep.subr.mxu1 %v1039_v32  ;;  %v1586_v30 = vld [vmem:[%s2762_s3 + $0x5c8] sm:$0xff]  ;;  %v1078_v31 = vld [vmem:[%s2767_s8 + $0x1a0] sm:$0xff] }
  0x6a   : > { %921 = vmatprep.subr.mxu0 %v1546_v33  ;;  %1109 = vmatpush1.msra.mxu1 %v1038_v34  ;;  %v1585_v32 = vld [vmem:[%s2762_s3 + $0x5c0] sm:$0xff]  ;;  %v1077_v33 = vld [vmem:[%s2767_s8 + $0x198] sm:$0xff] }
  0x6b   : > { %922 = vmatpush1.msra.mxu0 %v1545_v35  ;;  %1110 = vmatprep.subr.mxu1 %v1037_v36  ;;  %v1584_v34 = vld [vmem:[%s2762_s3 + $0x5b8] sm:$0xff]  ;;  %v1076_v35 = vld [vmem:[%s2767_s8 + $0x190] sm:$0xff] }
  0x6c   : > { %923 = vmatprep.subr.mxu0 %v1544_v37  ;;  %1111 = vmatpush1.msra.mxu1 %v1036_v38  ;;  %v1583_v36 = vld [vmem:[%s2762_s3 + $0x5b0] sm:$0xff]  ;;  %v1075_v37 = vld [vmem:[%s2767_s8 + $0x188] sm:$0xff] }
  0x6d   : > { %924 = vmatpush1.msra.mxu0 %v1543_v39  ;;  %1112 = vmatprep.subr.mxu1 %v1035_v40  ;;  %v1582_v38 = vld [vmem:[%s2762_s3 + $0x5a8] sm:$0xff]  ;;  %v1074_v39 = vld [vmem:[%s2767_s8 + $0x180] sm:$0xff] }
  0x6e   : > { %925 = vmatprep.subr.mxu0 %v1542_v41  ;;  %1113 = vmatpush1.msra.mxu1 %v1034_v43  ;;  %v1581_v40 = vld [vmem:[%s2762_s3 + $0x5a0] sm:$0xff]  ;;  %v1073_v41 = vld [vmem:[%s2767_s8 + $0x178] sm:$0xff] }
  0x6f   : > { %926 = vmatpush1.msra.mxu0 %v1541_v44  ;;  %1114 = vmatprep.subr.mxu1 %v1033_v45  ;;  %v1580_v43 = vld [vmem:[%s2762_s3 + $0x598] sm:$0xff]  ;;  %v1072_v44 = vld [vmem:[%s2767_s8 + $0x170] sm:$0xff] }
  0x70   : > { %927 = vmatprep.subr.mxu0 %v1540_v46  ;;  %1115 = vmatpush1.msra.mxu1 %v1032_v50  ;;  %v1579_v45 = vld [vmem:[%s2762_s3 + $0x590] sm:$0xff]  ;;  %v1071_v46 = vld [vmem:[%s2767_s8 + $0x168] sm:$0xff] }
  0x71   : > { %928 = vmatpush1.msra.mxu0 %v1539_v51  ;;  %1116 = vmatprep.subr.mxu1 %v1031_v53  ;;  %v1578_v50 = vld [vmem:[%s2762_s3 + $0x588] sm:$0xff]  ;;  %v1070_v51 = vld [vmem:[%s2767_s8 + $0x160] sm:$0xff]  ;;  %v2514_v53 = vsel %vm508_vm0, %v513_v47, 0.0  ;;  %v1575_v47 = vld [vmem:[%s2762_s3 + $0x570] sm:$0xff] }
  0x72   : > { %929 = vmatprep.subr.mxu0 %v1538_v55  ;;  %1117 = vmatpush1.msra.mxu1 %v1030_v57  ;;  %v1577_v55 = vld [vmem:[%s2762_s3 + $0x580] sm:$0xff]  ;;  %v1069_v57 = vld [vmem:[%s2767_s8 + $0x158] sm:$0xff] }
  0x73   : > { %930 = vmatpush1.msra.mxu0 %v1537_v58  ;;  %1118 = vmatprep.subr.mxu1 %v1029_v60  ;;  %v1576_v58 = vld [vmem:[%s2762_s3 + $0x578] sm:$0xff]  ;;  %v1067_v60 = vld [vmem:[%s2767_s8 + $0x148] sm:$0xff] }
  0x74   : > { %931 = vmatprep.subr.mxu0 %v1536_v61  ;;  %1119 = vmatpush1.msra.mxu1 %v1028_v62  ;;  %v667_v61 = vrot.slane %v2514_v53, 1  ;;  %v2538_v62 = vsel %vm508_vm0, %v511_v54, 0.0  ;;  %v1572_v54 = vld [vmem:[%s2762_s3 + $0x558] sm:$0xff] }
  0x75   : > { %932 = vmatpush1.msra.mxu0 %v1535_v63  ;;  %1120 = vmatprep.subr.mxu1 %v1027_v1  ;;  %v1574_v63 = vld [vmem:[%s2762_s3 + $0x568] sm:$0xff]  ;;  %v1066_v1 = vld [vmem:[%s2767_s8 + $0x140] sm:$0xff] }
  0x76   : > { %933 = vmatprep.subr.mxu0 %v1534_v2  ;;  %1121 = vmatpush1.msra.mxu1 %v1026_v3  ;;  %v1573_v2 = vld [vmem:[%s2762_s3 + $0x560] sm:$0xff]  ;;  %v1064_v3 = vld [vmem:[%s2767_s8 + $0x130] sm:$0xff] }
  0x77   : > { %934 = vmatpush1.msra.mxu0 %v1533_v5  ;;  %1122 = vmatprep.subr.mxu1 %v1089_v6  ;;  %v665_v5 = vrot.slane %v2538_v62, 1  ;;  %v1571_v6 = vld [vmem:[%s2762_s3 + $0x550] sm:$0xff] }
  0x78   : > { %935 = vmatprep.subr.mxu0 %v1532_v7  ;;  %1123 = vmatpush2.msra.mxu1 %v1088_v8  ;;  %v668_v7 = vsel %vm658_vm2, %v663_v56, %v667_v61  ;;  %v1570_v8 = vld [vmem:[%s2762_s3 + $0x548] sm:$0xff]  ;;  %v1062_v56 = vld [vmem:[%s2767_s8 + $0x120] sm:$0xff]  ;;  %v1025_v61 = vld [vmem:[%s2607_s29 + $0x18] sm:$0xff] }
  0x79   : > { %936 = vmatpush1.msra.mxu0 %v1531_v9  ;;  %1124 = vmatprep.subr.mxu1 %v1087_v11  ;;  %v1063_v9 = vld [vmem:[%s2767_s8 + $0x128] sm:$0xff]  ;;  %v1569_v11 = vld [vmem:[%s2762_s3 + $0x540] sm:$0xff] }
  0x7a   : > { %937 = vmatprep.subr.mxu0 %v1530_v12  ;;  %1125 = vmatpush2.msra.mxu1 %v1086_v13  ;;  %v1568_v12 = vld [vmem:[%s2762_s3 + $0x538] sm:$0xff]  ;;  %v666_v13 = vsel %vm658_vm2, %v660_v0, %v665_v5  ;;  %v1059_v0 = vld [vmem:[%s2767_s8 + $0x108] sm:$0xff]  ;;  %v990_v5 = vld [vmem:[%s2766_s7] sm:$0xff] }
  0x7b   : > { %938 = vmatpush1.msra.mxu0 %v1529_v14  ;;  %1126 = vmatprep.subr.mxu1 %v1085_v15  ;;  %v896_v14 = vrot.slane %v2185_v49, 2  ;;  %v897_v15 = vrot.slane %v2195_v52, 2  ;;  %v1060_v49 = vld [vmem:[%s2767_s8 + $0x110] sm:$0xff]  ;;  %v1565_v52 = vld [vmem:[%s2762_s3 + $0x520] sm:$0xff] }
  0x7c   : > { %939 = vmatprep.subr.mxu0 %v1592_v16  ;;  %1127 = vmatpush2.msra.mxu1 %v1084_v17  ;;  %v1567_v16 = vld [vmem:[%s2762_s3 + $0x530] sm:$0xff]  ;;  %v1061_v17 = vld [vmem:[%s2767_s8 + $0x118] sm:$0xff] }
  0x7d   : > { %940 = vmatpush2.msra.mxu0 %v1591_v18  ;;  %1128 = vmatprep.subr.mxu1 %v1083_v19  ;;  %v1566_v18 = vld [vmem:[%s2762_s3 + $0x528] sm:$0xff]  ;;  %v1564_v19 = vld [vmem:[%s2762_s3 + $0x518] sm:$0xff] }
  0x7e   : > { %941 = vmatprep.subr.mxu0 %v1590_v20  ;;  %1129 = vmatpush2.msra.mxu1 %v1082_v21  ;;  %v898_v20 = vsel %vm892_vm3, %v896_v14, %v897_v15  ;;  %v1563_v21 = vld [vmem:[%s2762_s3 + $0x510] sm:$0xff] }
  0x7f   : > { %942 = vmatpush2.msra.mxu0 %v1589_v22  ;;  %1130 = vmatprep.subr.mxu1 %v1081_v23  ;;  %v1058_v22 = vld [vmem:[%s2767_s8 + $0x100] sm:$0xff]  ;;  %v1562_v23 = vld [vmem:[%s2762_s3 + $0x508] sm:$0xff] }
  0x80   : > { %943 = vmatprep.subr.mxu0 %v1588_v24  ;;  %1131 = vmatpush2.msra.mxu1 %v1080_v25  ;;  %v1023_v24 = vld [vmem:[%s2607_s29 + $0x8] sm:$0xff]  ;;  %v1561_v25 = vld [vmem:[%s2762_s3 + $0x500] sm:$0xff] }
  0x81   : > { %944 = vmatpush2.msra.mxu0 %v1587_v28  ;;  %1132 = vmatprep.subr.mxu1 %v1079_v29  ;;  %v1022_v28 = vld [vmem:[%s2607_s29] sm:$0xff]  ;;  %v901_v29 = vrot.slane %v2514_v53, 2  ;;  %v1003_v53 = vld [vmem:[%s2766_s7 + $0x68] sm:$0xff] }
  0x82   : > { %945 = vmatprep.subr.mxu0 %v1586_v30  ;;  %1133 = vmatpush2.msra.mxu1 %v1078_v31  ;;  %v1021_v30 = vld [vmem:[%s2766_s7 + $0xf8] sm:$0xff]  ;;  %v1020_v31 = vld [vmem:[%s2766_s7 + $0xf0] sm:$0xff] }
  0x83   : > { %946 = vmatpush2.msra.mxu0 %v1585_v32  ;;  %1134 = vmatprep.subr.mxu1 %v1077_v33  ;;  %v899_v32 = vrot.slane %v2538_v62, 2  ;;  %v1019_v33 = vld [vmem:[%s2766_s7 + $0xe8] sm:$0xff]  ;;  %v996_v62 = vld [vmem:[%s2766_s7 + $0x30] sm:$0xff] }
  0x84   : > { %947 = vmatprep.subr.mxu0 %v1584_v34  ;;  %1135 = vmatpush2.msra.mxu1 %v1076_v35  ;;  %v902_v34 = vsel %vm892_vm3, %v897_v15, %v901_v29  ;;  %v1018_v35 = vld [vmem:[%s2766_s7 + $0xe0] sm:$0xff] }
  0x85   : > { %948 = vmatpush2.msra.mxu0 %v1583_v36  ;;  %1136 = vmatprep.subr.mxu1 %v1075_v37  ;;  %v900_v36 = vsel %vm892_vm3, %v894_v4, %v899_v32  ;;  %v1017_v37 = vld [vmem:[%s2766_s7 + $0xd8] sm:$0xff] }
  0x86   : > { %949 = vmatprep.subr.mxu0 %v1582_v38  ;;  %1137 = vmatpush2.msra.mxu1 %v1074_v39  ;;  %v1015_v38 = vld [vmem:[%s2766_s7 + $0xc8] sm:$0xff]  ;;  %v1013_v4 = vld [vmem:[%s2766_s7 + $0xb8] sm:$0xff]  ;;  %v1012_v39 = vld [vmem:[%s2766_s7 + $0xb0] sm:$0xff] }
  0x87   : > { %950 = vmatpush2.msra.mxu0 %v1581_v40  ;;  %1138 = vmatprep.subr.mxu1 %v1073_v41  ;;  %v1011_v40 = vld [vmem:[%s2766_s7 + $0xa8] sm:$0xff]  ;;  %v1010_v41 = vld [vmem:[%s2766_s7 + $0xa0] sm:$0xff] }
  0x88   : > { %951 = vmatprep.subr.mxu0 %v1580_v43  ;;  %1139 = vmatpush2.msra.mxu1 %v1072_v44  ;;  %v1009_v43 = vld [vmem:[%s2766_s7 + $0x98] sm:$0xff]  ;;  %v1008_v44 = vld [vmem:[%s2766_s7 + $0x90] sm:$0xff] }
  0x89   : > { %952 = vmatpush2.msra.mxu0 %v1579_v45  ;;  %1140 = vmatprep.subr.mxu1 %v1071_v46  ;;  %v1007_v45 = vld [vmem:[%s2766_s7 + $0x88] sm:$0xff]  ;;  %v1006_v46 = vld [vmem:[%s2766_s7 + $0x80] sm:$0xff] }
  0x8a   : > { %953 = vmatprep.subr.mxu0 %v1578_v50  ;;  %1141 = vmatpush2.msra.mxu1 %v1070_v51  ;;  %v1005_v50 = vld [vmem:[%s2766_s7 + $0x78] sm:$0xff]  ;;  %v1004_v51 = vld [vmem:[%s2766_s7 + $0x70] sm:$0xff] }
  0x8b   : > { %954 = vmatpush2.msra.mxu0 %v1577_v55  ;;  %1142 = vmatprep.subr.mxu1 %v1069_v57  ;;  %v1002_v55 = vld [vmem:[%s2766_s7 + $0x60] sm:$0xff]  ;;  %v1001_v57 = vld [vmem:[%s2766_s7 + $0x58] sm:$0xff] }
  0x8c   : > { %955 = vmatprep.subr.mxu0 %v1576_v58  ;;  %1143 = vmatpush2.msra.mxu1 %v1068_v42  ;;  %v1000_v58 = vld [vmem:[%s2766_s7 + $0x50] sm:$0xff]  ;;  %v999_v42 = vld [vmem:[%s2766_s7 + $0x48] sm:$0xff] }
  0x8d   : > { %956 = vmatpush2.msra.mxu0 %v1575_v47  ;;  %1144 = vmatprep.subr.mxu1 %v1067_v60  ;;  %v998_v47 = vld [vmem:[%s2766_s7 + $0x40] sm:$0xff]  ;;  %v997_v60 = vld [vmem:[%s2766_s7 + $0x38] sm:$0xff] }
  0x8e   : > { %957 = vmatprep.subr.mxu0 %v1574_v63  ;;  %1145 = vmatpush2.msra.mxu1 %v1066_v1  ;;  %v1024_v63 = vld [vmem:[%s2607_s29 + $0x10] sm:$0xff]  ;;  %v995_v1 = vld [vmem:[%s2766_s7 + $0x28] sm:$0xff] }
  0x8f   : > { %958 = vmatpush2.msra.mxu0 %v1573_v2  ;;  %1146 = vmatprep.subr.mxu1 %v1065_v48  ;;  %v994_v2 = vld [vmem:[%s2766_s7 + $0x20] sm:$0xff]  ;;  %v993_v48 = vld [vmem:[%s2766_s7 + $0x18] sm:$0xff] }
  0x90   : > { %959 = vmatprep.subr.mxu0 %v1572_v54  ;;  %1147 = vmatpush2.msra.mxu1 %v1064_v3  ;;  %v992_v54 = vld [vmem:[%s2766_s7 + $0x10] sm:$0xff]  ;;  %v991_v3 = vld [vmem:[%s2766_s7 + $0x8] sm:$0xff] }
  0x91   : > { %960 = vmatpush2.msra.mxu0 %v1571_v6  ;;  %743 = vmatprep.mubr.f32.mxu0 %v668_v7  ;;  %v988_v6 = vld [vmem:[%s424_s28] sm:$0xff]  ;;  %v989_v7 = vld [vmem:[%s424_s28 + $0x8] sm:$0xff] }
  0x92   : > { %961 = vmatprep.subr.mxu0 %v1570_v8  ;;  %1148 = vmatprep.subr.mxu1 %v1063_v9  ;;  %v1666_v8 = vmov 0.0  }
  0x93   : > { %962 = vmatpush2.msra.mxu0 %v1569_v11  ;;  %1149 = vmatpush2.msra.mxu1 %v1062_v56 }
  0x94   : > { %963 = vmatprep.subr.mxu0 %v1568_v12  ;;  %744 = vmatmul.mubr.f32.gmra.mxu0 %v666_v13 }
  0x95   : > { %964 = vmatpush2.msra.mxu0 %v1567_v16  ;;  %1150 = vmatprep.subr.mxu1 %v1061_v17 }
  0x96   : > { %965 = vmatprep.subr.mxu0 %v1566_v18  ;;  %1151 = vmatpush2.msra.mxu1 %v1060_v49 }
  0x97   : > { %966 = vmatpush2.msra.mxu0 %v1565_v52  ;;  %1152 = vmatprep.subr.mxu1 %v1059_v0 }
  0x98   : > { %967 = vmatprep.subr.mxu0 %v1564_v19  ;;  %971 = vmatprep.mubr.f32.mxu0 %v898_v20  ;;  %v1244_v19 = vld [vmem:[%s2763_s4] sm:$0x3] }
  0x99   : > { %968 = vmatpush2.msra.mxu0 %v1563_v21  ;;  %1153 = vmatpush2.msra.mxu1 %v1058_v22 }
  0x9a   : > { %969 = vmatprep.subr.mxu0 %v1562_v23  ;;  %1154 = vmatprep.mubr.f32.mxu1 %v1023_v24 }
  0x9b   : > { %970 = vmatpush2.msra.mxu0 %v1561_v25  ;;  %1155 = vmatmul.mubr.f32.vlgmr.msra.gmra.mxu1 %v1022_v28  ;;  %v1249_v25 = vrot.slane %v1244_v19, %v2020_v27 }
  0x9c   : > { %972 = vmatmul.mubr.f32.vlgmr.msra.gmra.mxu0 %v2251_v10  ;;  %1167 = vmatprep.subr.mxu0 %v1021_v30  ;;  %v1016_v10 = vld [vmem:[%s2766_s7 + $0xd0] sm:$0xff] }
  0x9d   : > { %1601 = vmatprep.subr.mxu1 %v1021_v30  ;;  %1168 = vmatpush1.msra.mxu0 %v1020_v31 }
  0x9e   : > { %1617 = vmatpush1.msra.mxu1 %v1020_v31  ;;  %1169 = vmatprep.subr.mxu0 %v1019_v33  ;;  %v1264_v31 = vld [vmem:[%s2768_s9] sm:$0x3] }
  0x9f   : > { %1602 = vmatprep.subr.mxu1 %v1019_v33  ;;  %977 = vmatprep.mubr.f32.mxu0 %v902_v34  ;;  %v1253_v33 = vrot.slane %v1244_v19, %v2018_v26 }
  0xa0   : > { %1170 = vmatpush1.msra.mxu0 %v1018_v35  ;;  %1618 = vmatpush1.msra.mxu1 %v1018_v35 }
  0xa1   : > { %978 = vmatmul.mubr.f32.gmra.mxu0 %v900_v36  ;;  %1171 = vmatprep.subr.mxu0 %v1017_v37 }
  0xa2   : > { %1603 = vmatprep.subr.mxu1 %v1017_v37  ;;  %1172 = vmatpush1.msra.mxu0 %v1016_v10 }
  0xa3   : > { %1619 = vmatpush1.msra.mxu1 %v1016_v10  ;;  %1173 = vmatprep.subr.mxu0 %v1015_v38 }
  0xa4   : > { %1604 = vmatprep.subr.mxu1 %v1015_v38  ;;  %1174 = vmatpush1.msra.mxu0 %v1014_v59  ;;  %v1269_v38 = vrot.slane %v1264_v31, %v2020_v27 }
  0xa5   : > { %1620 = vmatpush1.msra.mxu1 %v1014_v59  ;;  %1175 = vmatprep.subr.mxu0 %v1013_v4 }
  0xa6   : > { %1605 = vmatprep.subr.mxu1 %v1013_v4  ;;  %1176 = vmatpush1.msra.mxu0 %v1012_v39 }
  0xa7   : > { %1621 = vmatpush1.msra.mxu1 %v1012_v39  ;;  %1177 = vmatprep.subr.mxu0 %v1011_v40 }
  0xa8   : > { %1606 = vmatprep.subr.mxu1 %v1011_v40  ;;  %1178 = vmatpush1.msra.mxu0 %v1010_v41 }
  0xa9   : > { %1622 = vmatpush1.msra.mxu1 %v1010_v41  ;;  %1179 = vmatprep.subr.mxu0 %v1009_v43 }
  0xaa   : > { %1607 = vmatprep.subr.mxu1 %v1009_v43  ;;  %1180 = vmatpush1.msra.mxu0 %v1008_v44 }
  0xab   : > { %1623 = vmatpush1.msra.mxu1 %v1008_v44  ;;  %1181 = vmatprep.subr.mxu0 %v1007_v45 }
  0xac   : > { %1608 = vmatprep.subr.mxu1 %v1007_v45  ;;  %1182 = vmatpush1.msra.mxu0 %v1006_v46  ;;  %v1273_v45 = vrot.slane %v1264_v31, %v2018_v26 }
  0xad   : > { %1624 = vmatpush1.msra.mxu1 %v1006_v46  ;;  %1183 = vmatprep.subr.mxu0 %v1005_v50 }
  0xae   : > { %1609 = vmatprep.subr.mxu1 %v1005_v50  ;;  %1184 = vmatpush1.msra.mxu0 %v1004_v51 }
  0xaf   : > { %1625 = vmatpush1.msra.mxu1 %v1004_v51  ;;  %1185 = vmatprep.subr.mxu0 %v1003_v53 }
  0xb0   : > { %1610 = vmatprep.subr.mxu1 %v1003_v53  ;;  %1186 = vmatpush1.msra.mxu0 %v1002_v55 }
  0xb1   : > { %1626 = vmatpush1.msra.mxu1 %v1002_v55  ;;  %1187 = vmatprep.subr.mxu0 %v1001_v57 }
  0xb2   : > { %1611 = vmatprep.subr.mxu1 %v1001_v57  ;;  %1188 = vmatpush1.msra.mxu0 %v1000_v58 }
  0xb3   : > { %1627 = vmatpush1.msra.mxu1 %v1000_v58  ;;  %1189 = vmatprep.subr.mxu0 %v999_v42 }
  0xb4   : > { %1612 = vmatprep.subr.mxu1 %v999_v42  ;;  %1190 = vmatpush1.msra.mxu0 %v998_v47 }
  0xb5   : > { %1628 = vmatpush1.msra.mxu1 %v998_v47  ;;  %1191 = vmatprep.subr.mxu0 %v997_v60 }
  0xb6   : > { %1613 = vmatprep.subr.mxu1 %v997_v60  ;;  %1160 = vmatprep.mubr.f32.mxu1 %v1025_v61 }
  0xb7   : > { %1192 = vmatpush1.msra.mxu0 %v996_v62  ;;  %1629 = vmatpush1.msra.mxu1 %v996_v62 }
  0xb8   : > { %1161 = vmatmul.mubr.f32.gmra.mxu1 %v1024_v63  ;;  %1193 = vmatprep.subr.mxu0 %v995_v1 }
  0xb9   : > { %1614 = vmatprep.subr.mxu1 %v995_v1  ;;  %1194 = vmatpush1.msra.mxu0 %v994_v2 }
  0xba   : > { %1630 = vmatpush1.msra.mxu1 %v994_v2  ;;  %1195 = vmatprep.subr.mxu0 %v993_v48 }
  0xbb   : > { %1615 = vmatprep.subr.mxu1 %v993_v48  ;;  %1196 = vmatpush1.msra.mxu0 %v992_v54 }
  0xbc   : > { %1631 = vmatpush1.msra.mxu1 %v992_v54  ;;  %1197 = vmatprep.subr.mxu0 %v991_v3 }
  0xbd   : > { %1616 = vmatprep.subr.mxu1 %v991_v3  ;;  %1198 = vmatpush1.msra.mxu0 %v990_v5 }
  0xbe   : > { %1632 = vmatpush1.msra.mxu1 %v990_v5  ;;  %1231 = vmatprep.mubr.f32.mxu0 %v1666_v8 }
  0xbf   : > { %1237 = vmatprep.mubr.f32.mxu1 %v1666_v8  ;;  %1232 = vmatmul.mubr.f32.vlgmr.msra.gmra.mxu0 %v988_v6 }
  0xc0   : > { %1238 = vmatmul.mubr.f32.vlgmr.msra.gmra.mxu1 %v989_v7 }
 0x117   : > { %v816_v11 = vpop.f32.mrf.mxu1 }
 0x119   : > { %v818_v13 = vpop.f32.mrf.mxu1 }
 0x11b   : > { %v822_v14 = vpop.f32.mrf.mxu1 }
 0x11c   : > { %v739_v9 = vpop.f32.mrf.mxu0 }
 0x11d   : > { %v824_v16 = vpop.f32.mrf.mxu1  ;;  %v817_v20 = vadd.f32 %v816_v11, %v739_v9 }
 0x11e   : > { %v741_v56 = vpop.f32.mrf.mxu0 }
 0x11f   : > { %v819_v23 = vadd.f32 %v818_v13, %v741_v56 }
 0x154   : > { %v745_v12 = vpop.f32.mrf.mxu0 }
 0x155   : > { %v823_v22 = vadd.f32 %v822_v14, %v745_v12 }
 0x156   : > { %v747_v15 = vpop.f32.mrf.mxu0 }
 0x157   : > { %v825_v29 = vadd.f32 %v824_v16, %v747_v15 }
 0x15b   : > { %v1156_v18 = vpop.f32.mrf.mxu1 }
 0x15c   : > { %v973_v17 = vpop.f32.mrf.mxu0 }
 0x15d   : > { %v1158_v52 = vpop.f32.mrf.mxu1  ;;  %v984_v24 = vadd.f32 %v973_v17, %v817_v20 }
 0x15e   : > { %v975_v49 = vpop.f32.mrf.mxu0 }
 0x15f   : > { %v985_v32 = vadd.f32 %v975_v49, %v819_v23  ;;  %v1256_v37 = vadd.f32 %v1249_v25, %v984_v24 }
 0x161   : > { %v979_v0 = vpop.f32.mrf.mxu0  ;;  %v1257_v41 = vadd.f32 %v1253_v33, %v985_v32 }
 0x162   : > { %v986_v30 = vadd.f32 %v979_v0, %v823_v22 }
 0x163   : > { %v981_v28 = vpop.f32.mrf.mxu0 }
 0x164   : > { %v987_v35 = vadd.f32 %v981_v28, %v825_v29  ;;  %v1258_v4 = vadd.f32 %v1249_v25, %v986_v30 }
 0x166   : > { %v1259_v50 = vadd.f32 %v1253_v33, %v987_v35 }
 0x178   : > { %v1162_v21 = vpop.f32.mrf.mxu1 }
 0x17a   : > { %v1164_v34 = vpop.f32.mrf.mxu1 }
 0x17f   : > { %v1233_v36 = vpop.f32.mrf.mxu0 }
 0x180   : > { %v1234_v10 = vadd.f32 %v1233_v36, %v1156_v18  ;;  %v1239_v59 = vpop.f32.mrf.mxu1 }
 0x181   : > { %v1240_v39 = vadd.f32 %v1239_v59, %v1162_v21  ;;  %v1235_v40 = vpop.f32.mrf.mxu0 }
 0x182   : > { %v1260_v43 = vadd.f32 %v1256_v37, %v1234_v10  ;;  %v1236_v44 = vadd.f32 %v1235_v40, %v1158_v52  ;;  %v1241_v46 = vpop.f32.mrf.mxu1 }
 0x183   : > { %v1262_v51 = vadd.f32 %v1258_v4, %v1240_v39  ;;  %v1242_v53 = vadd.f32 %v1241_v46, %v1164_v34 }
 0x184   : > { %v1276_v55 = vadd.f32 %v1269_v38, %v1260_v43  ;;  %v1261_v57 = vadd.f32 %v1257_v41, %v1236_v44 }
 0x185   : > { %v1278_v27 = vadd.f32 %v1269_v38, %v1262_v51  ;;  %v1263_v58 = vadd.f32 %v1259_v50, %v1242_v53 }
 0x186   : > { %1280 = vst [vmem:[%s434_s20] sm:$0xff] %v1276_v55  ;;  %v1298_v42 = vmul.f32 %v1276_v55, %v1276_v55  ;;  %v1277_v47 = vadd.f32 %v1273_v45, %v1261_v57 }
 0x187   : > { %1282 = vst [vmem:[%s434_s20 + $0x10] sm:$0xff] %v1278_v27  ;;  %v1284_v60 = vadd.f32 %v1278_v27, %v1276_v55  ;;  %v1300_v61 = vmul.f32 %v1278_v27, %v1278_v27  ;;  %v1279_v62 = vadd.f32 %v1273_v45, %v1263_v58 }
 0x188   : > { %1281 = vst [vmem:[%s434_s20 + $0x8] sm:$0xff] %v1277_v47  ;;  %v1299_v26 = vmul.f32 %v1277_v47, %v1277_v47 }
 0x189   : > { %v1285_v63 = vrot.slane %v1284_v60, 4  ;;  %v1302_v1 = vadd.f32 %v1300_v61, %v1298_v42  ;;  %1283 = vst [vmem:[%s434_s20 + $0x18] sm:$0xff] %v1279_v62  ;;  %v1291_v2 = vadd.f32 %v1279_v62, %v1277_v47  ;;  %v1301_v48 = vmul.f32 %v1279_v62, %v1279_v62 }
 0x18b   : > { %v1286_v54 = vadd.f32 %v1285_v63, %v1284_v60  ;;  %v1303_v3 = vrot.slane %v1302_v1, 4  ;;  %v1292_v5 = vrot.slane %v1291_v2, 4  ;;  %v1309_v6 = vadd.f32 %v1301_v48, %v1299_v26 }
 0x18d   : > { %v1287_v7 = vrot.slane %v1286_v54, 2  ;;  %v1304_v8 = vadd.f32 %v1303_v3, %v1302_v1  ;;  %v1293_v9 = vadd.f32 %v1292_v5, %v1291_v2  ;;  %v1310_v11 = vrot.slane %v1309_v6, 4 }
 0x18f   : > { %v1288_v56 = vadd.f32 %v1287_v7, %v1286_v54  ;;  %v1305_v12 = vrot.slane %v1304_v8, 2  ;;  %v1294_v13 = vrot.slane %v1293_v9, 2  ;;  %v1311_v14 = vadd.f32 %v1310_v11, %v1309_v6 }
 0x191   : > { %v1306_v15 = vadd.f32 %v1305_v12, %v1304_v8  ;;  %v1295_v16 = vadd.f32 %v1294_v13, %v1293_v9  ;;  %v1312_v17 = vrot.slane %v1311_v14, 2  ;;  %v1289_v18 = vrot.slane %v1288_v56, 1 }
 0x193   : > { %v1307_v49 = vrot.slane %v1306_v15, 1  ;;  %v1296_v52 = vrot.slane %v1295_v16, 1  ;;  %v1313_v0 = vadd.f32 %v1312_v17, %v1311_v14  ;;  %v1290_v21 = vadd.f32 %v1289_v18, %v1288_v56 }
 0x195   : > { %v1308_v19 = vadd.f32 %v1307_v49, %v1306_v15  ;;  %v1314_v20 = vrot.slane %v1313_v0, 1  ;;  %v1297_v22 = vadd.f32 %v1296_v52, %v1295_v16 }
 0x197   : > { %v1315_v23 = vadd.f32 %v1314_v20, %v1313_v0  ;;  %v1316_v24 = vsel %vm508_vm0, %v1290_v21, %v1308_v19 }
 0x199   : > { %v1317_v25 = vsel %vm508_vm0, %v1297_v22, %v1315_v23 }
 0x19a   : > { %v1320_v28 = vcombine.low %v1316_v24, %v1317_v25 }
 0x19c   : > { %1593 = vst.sshfl [vmem:[%s439_s21] sm:$0x33 pattern:$0x76325410] %v1320_v28 }
 0x19d PF: > { %s22_s17 = sadd.s32 1, %s1664_s17  }
 0x19e   : > { %p19_p4 = scmp.ge.s32.totalorder %s22_s17, 4  }
 0x1a0   :  { %21 = sbr.rel (!%p19_p4) target bundleno = 1 (0x1), region = 110 }

// kernel: upblock_forward_nchw.7
= control target key start
LH: loop header
LB: loop body
LE: loop exit
PB: predicated region body
PF: predicated region fallthrough
CT: control target
= control target key end

     0   :  { %s1987_s21 = smov 0   ;;  %s3105_s0 = inlined_call_operand.vmem [shape: f32[2,16,256], index: 0, kind: input, shape index: {}]   ;;  %s3106_s1 = inlined_call_operand.vmem [shape: f32[2,16,128], index: 1, kind: input, shape index: {}]   ;;  %s3107_s2 = inlined_call_operand.vmem [shape: f32[1,256], index: 2, kind: input, shape index: {}]   ;;  %s3108_s3 = inlined_call_operand.vmem [shape: f32[1,256], index: 3, kind: input, shape index: {}]   ;;  %s3109_s4 = inlined_call_operand.vmem [shape: f32[1,128], index: 4, kind: input, shape index: {}]   ;;  %s3110_s5 = inlined_call_operand.vmem [shape: f32[1,128], index: 5, kind: input, shape index: {}]   ;;  %s3111_s6 = inlined_call_operand.vmem [shape: f32[3,256,256], index: 6, kind: input, shape index: {}]   ;;  %s3112_s7 = inlined_call_operand.vmem [shape: f32[3,128,256], index: 7, kind: input, shape index: {}]   ;;  %s3113_s8 = inlined_call_operand.vmem [shape: f32[1,256], index: 8, kind: input, shape index: {}]   ;;  %s3114_s9 = inlined_call_operand.vmem [shape: f32[2,1,256], index: 9, kind: input, shape index: {}]   ;;  %s3115_s10 = inlined_call_operand.vmem [shape: f32[2,1,256], index: 10, kind: input, shape index: {}]   ;;  %s3116_s11 = inlined_call_operand.vmem [shape: f32[2,16,256], index: 11, kind: output, shape index: {0}]   ;;  %s3117_s12 = inlined_call_operand.vmem [shape: f32[2,2,256], index: 12, kind: output, shape index: {1}]  }
   0x1 LB: > { %s1652_s22 = sadd.s32 4294967295, %s1919_s21   ;;  %p1656_p0 = scmp.ge.s32.totalorder %s1919_s21, 1  ;;  %s1919_s21 = sphi %s1987_s21, %s23_s21  }
   0x2   : > { %p393_p1 = scmp.lt.s32.totalorder %s1919_s21, 3 }
   0x4   : > { %p394_p2 = pnand %p1656_p0, %p393_p1 }
   0x5   : > { %p2076_p3 = scmp.lt.s32.totalorder (!%p394_p2), %s1652_s22, 1 }
   0x6   : > { %397 = sbr.rel (%p394_p2) target bundleno = 429 (0x1ad), region = 64 }
   0xb   : > { %v641_v0 = vld [vmem:[%s3111_s6 + $0xf8] sm:$0xff]  ;;  %v640_v1 = vld [vmem:[%s3111_s6 + $0xf0] sm:$0xff]  ;;  %v639_v2 = vld [vmem:[%s3111_s6 + $0xe8] sm:$0xff]  ;;  %v1921_v4 = vmov 0.0   ;;  %s3122_s22 = smov (!%p2076_p3, %s1652_s22), 1  ;;  %v487_v63 = vlaneseq  ;;  %vm549_vm0 = vcmask 1040384  }
   0xc   : > { %783 = vmatprep.subr.mxu1 %v641_v0  ;;  %v638_v3 = vld [vmem:[%s3111_s6 + $0xe0] sm:$0xff]  ;;  %770 = vmatprep.mubr.f32.mxu0 %v1921_v4  ;;  %v637_v5 = vld [vmem:[%s3111_s6 + $0xd8] sm:$0xff]  ;;  %v636_v6 = vld [vmem:[%s3111_s6 + $0xd0] sm:$0xff]  ;;  %s1877_s29 = sshll.u32 %s3122_s22, 4  ;;  %s1876_s26 = sshll.u32 %s3122_s22, 5  ;;  %vm1213_vm2 = vcmask 1045504  }
   0xd   : > { %784 = vmatpush1.msra.mxu1 %v640_v1  ;;  %v635_v7 = vld [vmem:[%s3111_s6 + $0xc8] sm:$0xff]  ;;  %v705_v8 = vld [vmem:[%s3112_s7 + $0xf8] sm:$0xff]  ;;  %v634_v9 = vld [vmem:[%s3111_s6 + $0xc0] sm:$0xff]  ;;  %s2156_s28 = scalar_lea.vmem %s3106_s1, %s1877_s29  ;;  %s2252_s20 = scalar_lea.vmem %s3105_s0, %s1876_s26  ;;  %vm929_vm3 = vcmask 1046528  }
   0xe   : > { %785 = vmatprep.subr.mxu1 %v639_v2  ;;  %706 = vmatprep.subr.mxu0 %v705_v8  ;;  %v704_v10 = vld [vmem:[%s3112_s7 + $0xf0] sm:$0xff]  ;;  %v703_v11 = vld [vmem:[%s3112_s7 + $0xe8] sm:$0xff]  ;;  %v633_v12 = vld [vmem:[%s3111_s6 + $0xb8] sm:$0xff]  ;;  %s1661_s16 = sshll.u32 %s3122_s22, 1  ;;  %s475_s14 = scalar_lea.vmem %s3116_s11, %s1876_s26 }
   0xf   : > { %786 = vmatpush1.msra.mxu1 %v638_v3  ;;  %707 = vmatpush1.msra.mxu0 %v704_v10  ;;  %v702_v13 = vld [vmem:[%s3112_s7 + $0xe0] sm:$0xff]  ;;  %v632_v14 = vld [vmem:[%s3111_s6 + $0xb0] sm:$0xff]  ;;  %v701_v15 = vld [vmem:[%s3112_s7 + $0xd8] sm:$0xff]  ;;  %s466_s18 = scalar_lea.vmem %s3114_s9, %s1661_s16  ;;  %s470_s23 = scalar_lea.vmem %s3115_s10, %s1661_s16 }
  0x10   : > { %787 = vmatprep.subr.mxu1 %v637_v5  ;;  %708 = vmatprep.subr.mxu0 %v703_v11  ;;  %v700_v16 = vld [vmem:[%s3112_s7 + $0xd0] sm:$0xff]  ;;  %v631_v17 = vld [vmem:[%s3111_s6 + $0xa8] sm:$0xff]  ;;  %v630_v19 = vld [vmem:[%s3111_s6 + $0xa0] sm:$0xff]  ;;  %v488_v11 = vshrl.u32 %v487_v63, 7  ;;  %s1879_s26 = sshll.u32 %s3122_s22, 2 }
  0x11   : > { %788 = vmatpush1.msra.mxu1 %v636_v6  ;;  %709 = vmatpush1.msra.mxu0 %v702_v13  ;;  %v699_v18 = vld [vmem:[%s3112_s7 + $0xc8] sm:$0xff]  ;;  %v698_v20 = vld [vmem:[%s3112_s7 + $0xc0] sm:$0xff]  ;;  %v629_v21 = vld [vmem:[%s3111_s6 + $0x98] sm:$0xff]  ;;  %s480_s15 = scalar_lea.vmem %s3117_s12, %s1879_s26 }
  0x12   : > { %789 = vmatprep.subr.mxu1 %v635_v7  ;;  %710 = vmatprep.subr.mxu0 %v701_v15  ;;  %v697_v22 = vld [vmem:[%s3112_s7 + $0xb8] sm:$0xff]  ;;  %v628_v23 = vld [vmem:[%s3111_s6 + $0x90] sm:$0xff]  ;;  %v627_v25 = vld [vmem:[%s3111_s6 + $0x88] sm:$0xff] }
  0x13   : > { %790 = vmatpush1.msra.mxu1 %v634_v9  ;;  %711 = vmatpush1.msra.mxu0 %v700_v16  ;;  %v696_v24 = vld [vmem:[%s3112_s7 + $0xb0] sm:$0xff]  ;;  %v695_v26 = vld [vmem:[%s3112_s7 + $0xa8] sm:$0xff]  ;;  %v626_v27 = vld [vmem:[%s3111_s6 + $0x80] sm:$0xff] }
  0x14   : > { %791 = vmatprep.subr.mxu1 %v633_v12  ;;  %712 = vmatprep.subr.mxu0 %v699_v18  ;;  %v694_v28 = vld [vmem:[%s3112_s7 + $0xa0] sm:$0xff]  ;;  %v625_v29 = vld [vmem:[%s3111_s6 + $0x78] sm:$0xff]  ;;  %v624_v31 = vld [vmem:[%s3111_s6 + $0x70] sm:$0xff]  ;;  %v2254_v18 = vsub.s32 0, %v488_v11 }
  0x15   : > { %792 = vmatpush1.msra.mxu1 %v632_v14  ;;  %713 = vmatpush1.msra.mxu0 %v698_v20  ;;  %v693_v30 = vld [vmem:[%s3112_s7 + $0x98] sm:$0xff]  ;;  %v692_v32 = vld [vmem:[%s3112_s7 + $0x90] sm:$0xff]  ;;  %v623_v33 = vld [vmem:[%s3111_s6 + $0x68] sm:$0xff] }
  0x16   : > { %793 = vmatprep.subr.mxu1 %v631_v17  ;;  %714 = vmatprep.subr.mxu0 %v697_v22  ;;  %v691_v34 = vld [vmem:[%s3112_s7 + $0x88] sm:$0xff]  ;;  %v622_v35 = vld [vmem:[%s3111_s6 + $0x60] sm:$0xff]  ;;  %v621_v37 = vld [vmem:[%s3111_s6 + $0x58] sm:$0xff] }
  0x17   : > { %794 = vmatpush1.msra.mxu1 %v630_v19  ;;  %715 = vmatpush1.msra.mxu0 %v696_v24  ;;  %v690_v36 = vld [vmem:[%s3112_s7 + $0x80] sm:$0xff]  ;;  %v689_v38 = vld [vmem:[%s3112_s7 + $0x78] sm:$0xff]  ;;  %v620_v39 = vld [vmem:[%s3111_s6 + $0x50] sm:$0xff]  ;;  %v2256_v19 = vsub.s32 1, %v488_v11 }
  0x18   : > { %795 = vmatprep.subr.mxu1 %v629_v21  ;;  %716 = vmatprep.subr.mxu0 %v695_v26  ;;  %v688_v40 = vld [vmem:[%s3112_s7 + $0x70] sm:$0xff]  ;;  %v619_v41 = vld [vmem:[%s3111_s6 + $0x48] sm:$0xff]  ;;  %v618_v43 = vld [vmem:[%s3111_s6 + $0x40] sm:$0xff] }
  0x19   : > { %796 = vmatpush1.msra.mxu1 %v628_v23  ;;  %717 = vmatpush1.msra.mxu0 %v694_v28  ;;  %v687_v42 = vld [vmem:[%s3112_s7 + $0x68] sm:$0xff]  ;;  %v686_v44 = vld [vmem:[%s3112_s7 + $0x60] sm:$0xff]  ;;  %v617_v45 = vld [vmem:[%s3111_s6 + $0x38] sm:$0xff] }
  0x1a   : > { %797 = vmatprep.subr.mxu1 %v627_v25  ;;  %718 = vmatprep.subr.mxu0 %v693_v30  ;;  %v685_v46 = vld [vmem:[%s3112_s7 + $0x58] sm:$0xff]  ;;  %v616_v47 = vld [vmem:[%s3111_s6 + $0x30] sm:$0xff]  ;;  %v615_v49 = vld [vmem:[%s3111_s6 + $0x28] sm:$0xff] }
  0x1b   : > { %798 = vmatpush1.msra.mxu1 %v626_v27  ;;  %719 = vmatpush1.msra.mxu0 %v692_v32  ;;  %v684_v48 = vld [vmem:[%s3112_s7 + $0x50] sm:$0xff]  ;;  %v683_v50 = vld [vmem:[%s3112_s7 + $0x48] sm:$0xff]  ;;  %v614_v51 = vld [vmem:[%s3111_s6 + $0x20] sm:$0xff] }
  0x1c   : > { %799 = vmatprep.subr.mxu1 %v625_v29  ;;  %720 = vmatprep.subr.mxu0 %v691_v34  ;;  %v613_v52 = vld [vmem:[%s3111_s6 + $0x18] sm:$0xff]  ;;  %v682_v53 = vld [vmem:[%s3112_s7 + $0x40] sm:$0xff]  ;;  %v612_v57 = vld [vmem:[%s3111_s6 + $0x10] sm:$0xff] }
  0x1d   : > { %800 = vmatpush1.msra.mxu1 %v624_v31  ;;  %721 = vmatpush1.msra.mxu0 %v690_v36  ;;  %v681_v54 = vld [vmem:[%s3112_s7 + $0x38] sm:$0xff]  ;;  %v566_v55 = vld [vmem:[%s2156_s28] sm:$0xff]  ;;  %v680_v58 = vld [vmem:[%s3112_s7 + $0x30] sm:$0xff] }
  0x1e   : > { %801 = vmatprep.subr.mxu1 %v623_v33  ;;  %722 = vmatprep.subr.mxu0 %v689_v38  ;;  %v2180_v56 = vld [vmem:[%s3109_s4] ss:$0 sm:$0xff]  ;;  %v611_v61 = vld [vmem:[%s3111_s6 + $0x8] sm:$0xff]  ;;  %v673_v3 = vld [vmem:[%s3111_s6 + $0x1f8] sm:$0xff] }
  0x1f   : > { %802 = vmatpush1.msra.mxu1 %v622_v35  ;;  %723 = vmatpush1.msra.mxu0 %v688_v40  ;;  %v575_v59 = vmul.f32 %v2180_v56, %v566_v55  ;;  %v2192_v60 = vld [vmem:[%s3110_s5] ss:$0 sm:$0xff]  ;;  %v679_v62 = vld [vmem:[%s3112_s7 + $0x28] sm:$0xff]  ;;  %v677_v5 = vld [vmem:[%s3112_s7 + $0x18] sm:$0xff] }
  0x20   : > { %803 = vmatprep.subr.mxu1 %v621_v37  ;;  %724 = vmatprep.subr.mxu0 %v687_v42  ;;  %v610_v0 = vld [vmem:[%s3111_s6] sm:$0xff]  ;;  %v672_v6 = vld [vmem:[%s3111_s6 + $0x1f0] sm:$0xff]  ;;  %v671_v9 = vld [vmem:[%s3111_s6 + $0x1e8] sm:$0xff] }
  0x21   : > { %804 = vmatpush1.msra.mxu1 %v620_v39  ;;  %725 = vmatpush1.msra.mxu0 %v686_v44  ;;  %v678_v1 = vld [vmem:[%s3112_s7 + $0x20] sm:$0xff]  ;;  %v2207_v2 = vadd.f32 %v2192_v60, %v575_v59  ;;  %v676_v7 = vld [vmem:[%s3112_s7 + $0x10] sm:$0xff]  ;;  %v675_v10 = vld [vmem:[%s3112_s7 + $0x8] sm:$0xff] }
  0x22   : > { %805 = vmatprep.subr.mxu1 %v619_v41  ;;  %726 = vmatprep.subr.mxu0 %v685_v46  ;;  %v670_v12 = vld [vmem:[%s3111_s6 + $0x1e0] sm:$0xff]  ;;  %v669_v14 = vld [vmem:[%s3111_s6 + $0x1d8] sm:$0xff]  ;;  %v668_v16 = vld [vmem:[%s3111_s6 + $0x1d0] sm:$0xff] }
  0x23   : > { %806 = vmatpush1.msra.mxu1 %v618_v43  ;;  %727 = vmatpush1.msra.mxu0 %v684_v48  ;;  %v1673_v8 = vmul.f32 -1.442695, %v2207_v2  ;;  %v674_v13 = vld [vmem:[%s3112_s7] sm:$0xff]  ;;  %v1712_v15 = vld [vmem:[%s3111_s6 + $0x2f8] sm:$0xff]  ;;  %v667_v17 = vld [vmem:[%s3111_s6 + $0x1c8] sm:$0xff] }
  0x24   : > { %807 = vmatprep.subr.mxu1 %v617_v45  ;;  %728 = vmatprep.subr.mxu0 %v683_v50  ;;  %v666_v20 = vld [vmem:[%s3111_s6 + $0x1c0] sm:$0xff]  ;;  %v665_v21 = vld [vmem:[%s3111_s6 + $0x1b8] sm:$0xff]  ;;  %v664_v22 = vld [vmem:[%s3111_s6 + $0x1b0] sm:$0xff] }
  0x25   : > { %808 = vmatpush1.msra.mxu1 %v616_v47  ;;  %729 = vmatpush1.msra.mxu0 %v682_v53  ;;  %1889 = vpow2.f32 %v1673_v8  ;;  %v482_v23 = vld [vmem:[%s2252_s20 + $0x8] sm:$0xff]  ;;  %v485_v24 = vld [vmem:[%s3107_s2] sm:$0x3]  ;;  %v661_v33 = vld [vmem:[%s3111_s6 + $0x198] sm:$0xff] }
  0x26   : > { %809 = vmatprep.subr.mxu1 %v615_v49  ;;  %730 = vmatprep.subr.mxu0 %v681_v54  ;;  %v663_v25 = vld [vmem:[%s3111_s6 + $0x1a8] sm:$0xff]  ;;  %v2275_v26 = vrot.slane %v485_v24, %v2254_v18  ;;  %v2278_v27 = vrot.slane %v485_v24, %v2256_v19  ;;  %v501_v28 = vld [vmem:[%s3108_s3] sm:$0x3]  ;;  %v660_v36 = vld [vmem:[%s3111_s6 + $0x190] sm:$0xff] }
  0x27   : > { %810 = vmatpush1.msra.mxu1 %v614_v51  ;;  %731 = vmatpush1.msra.mxu0 %v680_v58  ;;  %v481_v29 = vld [vmem:[%s2252_s20] sm:$0xff]  ;;  %v2288_v31 = vrot.slane %v501_v28, %v2254_v18  ;;  %v2291_v32 = vrot.slane %v501_v28, %v2256_v19  ;;  %v659_v37 = vld [vmem:[%s3111_s6 + $0x188] sm:$0xff]  ;;  %v657_v42 = vld [vmem:[%s3111_s6 + $0x178] sm:$0xff] }
  0x28   : > { %811 = vmatprep.subr.mxu1 %v613_v52  ;;  %732 = vmatprep.subr.mxu0 %v679_v62  ;;  %v662_v30 = vld [vmem:[%s3111_s6 + $0x1a0] sm:$0xff]  ;;  %v498_v34 = vmul.f32 %v2278_v27, %v482_v23  ;;  %v497_v35 = vmul.f32 %v2275_v26, %v481_v29  ;;  %v656_v46 = vld [vmem:[%s3111_s6 + $0x170] sm:$0xff]  ;;  %v655_v47 = vld [vmem:[%s3111_s6 + $0x168] sm:$0xff] }
  0x29   : > { %812 = vmatpush1.msra.mxu1 %v612_v57  ;;  %733 = vmatpush1.msra.mxu0 %v678_v1  ;;  %v658_v40 = vld [vmem:[%s3111_s6 + $0x180] sm:$0xff]  ;;  %v653_v49 = vld [vmem:[%s3111_s6 + $0x158] sm:$0xff]  ;;  %v652_v50 = vld [vmem:[%s3111_s6 + $0x150] sm:$0xff] }
  0x2a   : > { %813 = vmatprep.subr.mxu1 %v611_v61  ;;  %734 = vmatprep.subr.mxu0 %v677_v5  ;;  %v2305_v38 = vadd.f32 %v2291_v32, %v498_v34  ;;  %v2308_v39 = vadd.f32 %v2288_v31, %v497_v35  ;;  %v654_v48 = vld [vmem:[%s3111_s6 + $0x160] sm:$0xff]  ;;  %v651_v51 = vld [vmem:[%s3111_s6 + $0x148] sm:$0xff]  ;;  %v649_v53 = vld [vmem:[%s3111_s6 + $0x138] sm:$0xff] }
  0x2b   : > { %814 = vmatpush1.msra.mxu1 %v610_v0  ;;  %735 = vmatpush1.msra.mxu0 %v676_v7  ;;  %v650_v52 = vld [vmem:[%s3111_s6 + $0x140] sm:$0xff]  ;;  %v648_v54 = vld [vmem:[%s3111_s6 + $0x130] sm:$0xff]  ;;  %v647_v55 = vld [vmem:[%s3111_s6 + $0x128] sm:$0xff] }
  0x2c   : > { %815 = vmatprep.subr.mxu1 %v673_v3  ;;  %736 = vmatprep.subr.mxu0 %v675_v10  ;;  %v1668_v43 = vmul.f32 -1.442695, %v2305_v38  ;;  %v1667_v44 = vmul.f32 -1.442695, %v2308_v39  ;;  %v646_v57 = vld [vmem:[%s3111_s6 + $0x120] sm:$0xff]  ;;  %v645_v58 = vld [vmem:[%s3111_s6 + $0x118] sm:$0xff]  ;;  %vm2372_vm1 = vmneg %vm549_vm0 }
  0x2d   : > { %816 = vmatpush2.msra.mxu1 %v672_v6  ;;  %737 = vmatpush1.msra.mxu0 %v674_v13  ;;  %v644_v59 = vld [vmem:[%s3111_s6 + $0x110] sm:$0xff]  ;;  %v643_v61 = vld [vmem:[%s3111_s6 + $0x108] sm:$0xff]  ;;  %v642_v63 = vld [vmem:[%s3111_s6 + $0x100] sm:$0xff] }
  0x2e   : > { %817 = vmatprep.subr.mxu1 %v671_v9  ;;  %944 = vmatprep.subr.mxu0 %v1712_v15  ;;  %1891 = vpow2.f32 %v1668_v43  ;;  %v1776_v3 = vld [vmem:[%s3112_s7 + $0x1f8] sm:$0xff]  ;;  %v567_v9 = vld [vmem:[%s2156_s28 + $0x8] sm:$0xff]  ;;  %v483_v10 = vld [vmem:[%s2252_s20 + $0x10] sm:$0xff] }
  0x2f   : > { %818 = vmatpush2.msra.mxu1 %v670_v12  ;;  %v484_v5 = vld [vmem:[%s2252_s20 + $0x18] sm:$0xff]  ;;  %v576_v13 = vmul.f32 %v2180_v56, %v567_v9  ;;  %v1703_v29 = vld [vmem:[%s3111_s6 + $0x2b0] sm:$0xff]  ;;  %v1698_v35 = vld [vmem:[%s3111_s6 + $0x288] sm:$0xff] }
  0x30   : > { %819 = vmatprep.subr.mxu1 %v669_v14  ;;  %v500_v8 = vmul.f32 %v2278_v27, %v484_v5  ;;  %v499_v14 = vmul.f32 %v2275_v26, %v483_v10  ;;  %v1708_v23 = vld [vmem:[%s3111_s6 + $0x2d8] sm:$0xff]  ;;  %v1706_v26 = vld [vmem:[%s3111_s6 + $0x2c8] sm:$0xff]  ;;  %v1705_v27 = vld [vmem:[%s3111_s6 + $0x2c0] sm:$0xff] }
  0x31   : > { %820 = vmatpush2.msra.mxu1 %v668_v16  ;;  %v1704_v28 = vld [vmem:[%s3111_s6 + $0x2b8] sm:$0xff]  ;;  %v1699_v34 = vld [vmem:[%s3111_s6 + $0x290] sm:$0xff]  ;;  %v1766_v9 = vld [vmem:[%s3112_s7 + $0x1a8] sm:$0xff] }
  0x32   : > { %821 = vmatprep.subr.mxu1 %v667_v17  ;;  %v1890_v41 = vpop.eup %1889  ;;  %v2384_v16 = vadd.f32 %v2291_v32, %v500_v8  ;;  %v1710_v17 = vld [vmem:[%s3111_s6 + $0x2e8] sm:$0xff]  ;;  %v2393_v56 = vadd.f32 %v2288_v31, %v499_v14  ;;  %v1701_v31 = vld [vmem:[%s3111_s6 + $0x2a0] sm:$0xff]  ;;  %v1700_v32 = vld [vmem:[%s3111_s6 + $0x298] sm:$0xff] }
  0x33   : > { %822 = vmatpush2.msra.mxu1 %v666_v20  ;;  %v592_v45 = vadd.f32 1.0, %v1890_v41  ;;  %v2390_v20 = vadd.f32 %v2192_v60, %v576_v13  ;;  %v1696_v41 = vld [vmem:[%s3111_s6 + $0x278] sm:$0xff]  ;;  %v1685_v8 = vld [vmem:[%s3111_s6 + $0x220] sm:$0xff]  ;;  %v1682_v14 = vld [vmem:[%s3111_s6 + $0x208] sm:$0xff] }
  0x34   : > { %823 = vmatprep.subr.mxu1 %v665_v21  ;;  %v1709_v21 = vld [vmem:[%s3111_s6 + $0x2e0] sm:$0xff]  ;;  %v1669_v24 = vmul.f32 -1.442695, %v2393_v56  ;;  %v1768_v5 = vld [vmem:[%s3112_s7 + $0x1b8] sm:$0xff] }
  0x35   : > { %824 = vmatpush2.msra.mxu1 %v664_v22  ;;  %1893 = vrcp.f32 %v592_v45  ;;  %v1670_v22 = vmul.f32 -1.442695, %v2384_v16  ;;  %v1674_v60 = vmul.f32 -1.442695, %v2390_v20  ;;  %v1694_v45 = vld [vmem:[%s3111_s6 + $0x268] sm:$0xff]  ;;  %v1684_v10 = vld [vmem:[%s3111_s6 + $0x218] sm:$0xff] }
  0x36   : > { %825 = vmatprep.subr.mxu1 %v663_v25  ;;  %1895 = vpow2.f32 %v1667_v44  ;;  %v1707_v25 = vld [vmem:[%s3111_s6 + $0x2d0] sm:$0xff]  ;;  %v1765_v11 = vld [vmem:[%s3112_s7 + $0x1a0] sm:$0xff]  ;;  %v1764_v13 = vld [vmem:[%s3112_s7 + $0x198] sm:$0xff] }
  0x37   : > { %826 = vmatpush2.msra.mxu1 %v662_v30  ;;  %v1702_v30 = vld [vmem:[%s3111_s6 + $0x2a8] sm:$0xff] }
  0x38   : > { %827 = vmatprep.subr.mxu1 %v661_v33 }
  0x39   : > { %828 = vmatpush2.msra.mxu1 %v660_v36 }
  0x3a   : > { %829 = vmatprep.subr.mxu1 %v659_v37 }
  0x3b   : > { %830 = vmatpush2.msra.mxu1 %v658_v40  ;;  %v1892_v62 = vpop.eup %1891  ;;  %v1697_v40 = vld [vmem:[%s3111_s6 + $0x280] sm:$0xff] }
  0x3c   : > { %831 = vmatprep.subr.mxu1 %v657_v42  ;;  %v530_v1 = vadd.f32 1.0, %v1892_v62  ;;  %v1689_v62 = vld [vmem:[%s3111_s6 + $0x240] sm:$0xff] }
  0x3d   : > { %832 = vmatpush2.msra.mxu1 %v656_v46 }
  0x3e   : > { %833 = vmatprep.subr.mxu1 %v655_v47  ;;  %1897 = vrcp.f32 %v530_v1  ;;  %v1769_v1 = vld [vmem:[%s3112_s7 + $0x1c0] sm:$0xff] }
  0x3f   : > { %834 = vmatpush2.msra.mxu1 %v654_v48  ;;  %v1693_v48 = vld [vmem:[%s3111_s6 + $0x260] sm:$0xff] }
  0x40   : > { %835 = vmatprep.subr.mxu1 %v653_v49  ;;  %v1774_v49 = vld [vmem:[%s3112_s7 + $0x1e8] sm:$0xff] }
  0x41   : > { %836 = vmatpush2.msra.mxu1 %v652_v50 }
  0x42   : > { %837 = vmatprep.subr.mxu1 %v651_v51  ;;  %v1894_v0 = vpop.eup %1893 }
  0x43   : > { %838 = vmatpush2.msra.mxu1 %v650_v52  ;;  %v1896_v6 = vpop.eup %1895  ;;  %v598_v7 = vmul.f32 %v1894_v0, %v2207_v2  ;;  %v1711_v2 = vld [vmem:[%s3111_s6 + $0x2f0] sm:$0xff]  ;;  %v1692_v52 = vld [vmem:[%s3111_s6 + $0x258] sm:$0xff] }
  0x44   : > { %839 = vmatprep.subr.mxu1 %v649_v53  ;;  %v529_v12 = vadd.f32 1.0, %v1896_v6  ;;  %v1773_v53 = vld [vmem:[%s3112_s7 + $0x1e0] sm:$0xff]  ;;  %v1688_v0 = vld [vmem:[%s3111_s6 + $0x238] sm:$0xff]  ;;  %v1686_v6 = vld [vmem:[%s3111_s6 + $0x228] sm:$0xff] }
  0x45   : > { %840 = vmatpush2.msra.mxu1 %v648_v54  ;;  %v2378_v15 = vrot.slane %v598_v7, 7  ;;  %v1767_v7 = vld [vmem:[%s3112_s7 + $0x1b0] sm:$0xff] }
  0x46   : > { %841 = vmatprep.subr.mxu1 %v647_v55  ;;  %1899 = vrcp.f32 %v529_v12  ;;  %v1691_v55 = vld [vmem:[%s3111_s6 + $0x250] sm:$0xff] }
  0x47   : > { %842 = vmatpush2.msra.mxu1 %v646_v57  ;;  %1676 = vmatmul.mubr.msk.f32.vlgmr.msra.gmra.mxu0 %vm2372_vm1, %v2378_v15  ;;  %1901 = vpow2.f32 %v1670_v22  ;;  %v1772_v57 = vld [vmem:[%s3112_s7 + $0x1d8] sm:$0xff]  ;;  %v1683_v12 = vld [vmem:[%s3111_s6 + $0x210] sm:$0xff] }
  0x48   : > { %843 = vmatprep.subr.mxu1 %v645_v58  ;;  %945 = vmatpush1.msra.mxu0 %v1711_v2  ;;  %1903 = vpow2.f32 %v1674_v60  ;;  %v1763_v2 = vld [vmem:[%s3112_s7 + $0x190] sm:$0xff]  ;;  %v1744_v22 = vld [vmem:[%s3111_s6 + $0x3f8] sm:$0xff] }
  0x49   : > { %844 = vmatpush2.msra.mxu1 %v644_v59  ;;  %776 = vmatprep.mubr.f32.mxu0 %v1921_v4  ;;  %1905 = vpow2.f32 %v1669_v24  ;;  %v1690_v59 = vld [vmem:[%s3111_s6 + $0x248] sm:$0xff]  ;;  %v1743_v60 = vld [vmem:[%s3111_s6 + $0x3f0] sm:$0xff]  ;;  %v1760_v24 = vld [vmem:[%s3112_s7 + $0x178] sm:$0xff] }
  0x4a   : > { %845 = vmatprep.subr.mxu1 %v643_v61  ;;  %946 = vmatprep.subr.mxu0 %v1710_v17  ;;  %v1771_v61 = vld [vmem:[%s3112_s7 + $0x1d0] sm:$0xff]  ;;  %v1681_v17 = vld [vmem:[%s3111_s6 + $0x200] sm:$0xff] }
  0x4b   : > { %846 = vmatpush2.msra.mxu1 %v642_v63  ;;  %947 = vmatpush1.msra.mxu0 %v1709_v21  ;;  %v1898_v33 = vpop.eup %1897  ;;  %v1770_v63 = vld [vmem:[%s3112_s7 + $0x1c8] sm:$0xff] }
  0x4c   : > { %1067 = vmatprep.subr.mxu1 %v1776_v3  ;;  %948 = vmatprep.subr.mxu0 %v1708_v23  ;;  %v542_v36 = vmul.f32 %v1898_v33, %v2305_v38  ;;  %v1695_v38 = vld [vmem:[%s3111_s6 + $0x270] sm:$0xff]  ;;  %v1762_v21 = vld [vmem:[%s3112_s7 + $0x188] sm:$0xff]  ;;  %v1761_v23 = vld [vmem:[%s3112_s7 + $0x180] sm:$0xff] }
  0x4d   : > { %949 = vmatpush1.msra.mxu0 %v1707_v25  ;;  %v1687_v3 = vld [vmem:[%s3111_s6 + $0x230] sm:$0xff]  ;;  %v1740_v33 = vld [vmem:[%s3111_s6 + $0x3d8] sm:$0xff] }
  0x4e   : > { %950 = vmatprep.subr.mxu0 %v1706_v26  ;;  %v2445_v42 = vrot.slane %v542_v36, 7  ;;  %v1742_v26 = vld [vmem:[%s3111_s6 + $0x3e8] sm:$0xff]  ;;  %v1756_v36 = vld [vmem:[%s3112_s7 + $0x158] sm:$0xff] }
  0x4f   : > { %951 = vmatpush1.msra.mxu0 %v1705_v27  ;;  %v1759_v27 = vld [vmem:[%s3112_s7 + $0x170] sm:$0xff] }
  0x50   : > { %952 = vmatprep.subr.mxu0 %v1704_v28  ;;  %1678 = vmatprep.mubr.msk.f32.mxu1 %vm2372_vm1, %v2445_v42 }
  0x51   : > { %953 = vmatpush1.msra.mxu0 %v1703_v29  ;;  %v1741_v29 = vld [vmem:[%s3111_s6 + $0x3e0] sm:$0xff] }
  0x52   : > { %954 = vmatprep.subr.mxu0 %v1702_v30  ;;  %v1758_v30 = vld [vmem:[%s3112_s7 + $0x168] sm:$0xff] }
  0x53   : > { %955 = vmatpush1.msra.mxu0 %v1701_v31  ;;  %v1900_v37 = vpop.eup %1899 }
  0x54   : > { %956 = vmatprep.subr.mxu0 %v1700_v32  ;;  %v541_v43 = vmul.f32 %v1900_v37, %v2308_v39  ;;  %v1902_v44 = vpop.eup %1901  ;;  %v1775_v39 = vld [vmem:[%s3112_s7 + $0x1f0] sm:$0xff] }
  0x55   : > { %957 = vmatpush1.msra.mxu0 %v1699_v34  ;;  %v1904_v47 = vpop.eup %1903  ;;  %v532_v50 = vadd.f32 1.0, %v1902_v44  ;;  %v1757_v34 = vld [vmem:[%s3112_s7 + $0x160] sm:$0xff] }
  0x56   : > { %958 = vmatprep.subr.mxu0 %v1698_v35  ;;  %v2457_v46 = vrot.slane %v541_v43, 7  ;;  %v1906_v51 = vpop.eup %1905  ;;  %v593_v54 = vadd.f32 1.0, %v1904_v47  ;;  %v1737_v43 = vld [vmem:[%s3111_s6 + $0x3c0] sm:$0xff] }
  0x57   : > { %959 = vmatpush1.msra.mxu0 %v1697_v40  ;;  %1907 = vrcp.f32 %v532_v50  ;;  %v531_v58 = vadd.f32 1.0, %v1906_v51 }
  0x58   : > { %960 = vmatprep.subr.mxu0 %v1696_v41  ;;  %1680 = vmatmul.mubr.msk.f32.vlgmr.msra.gmra.mxu1 %vm2372_vm1, %v2457_v46  ;;  %1909 = vrcp.f32 %v593_v54  ;;  %v1755_v41 = vld [vmem:[%s3112_s7 + $0x150] sm:$0xff]  ;;  %v2601_v44 = vsel %vm549_vm0, 0.0, %v2457_v46 }
  0x59   : > { %961 = vmatpush1.msra.mxu0 %v1695_v38  ;;  %1068 = vmatpush1.msra.mxu1 %v1775_v39  ;;  %1911 = vrcp.f32 %v531_v58  ;;  %v1753_v39 = vld [vmem:[%s3112_s7 + $0x140] sm:$0xff] }
  0x5a   : > { %962 = vmatprep.subr.mxu0 %v1694_v45  ;;  %1069 = vmatprep.subr.mxu1 %v1774_v49  ;;  %v1736_v45 = vld [vmem:[%s3111_s6 + $0x3b8] sm:$0xff]  ;;  %v1735_v49 = vld [vmem:[%s3111_s6 + $0x3b0] sm:$0xff] }
  0x5b   : > { %963 = vmatpush1.msra.mxu0 %v1693_v48  ;;  %1070 = vmatpush1.msra.mxu1 %v1773_v53  ;;  %v1214_v48 = vrot.slane %v2601_v44, 2  ;;  %v1752_v53 = vld [vmem:[%s3112_s7 + $0x138] sm:$0xff] }
  0x5c   : > { %964 = vmatprep.subr.mxu0 %v1692_v52  ;;  %1071 = vmatprep.subr.mxu1 %v1772_v57  ;;  %v1734_v52 = vld [vmem:[%s3111_s6 + $0x3a8] sm:$0xff]  ;;  %v1732_v57 = vld [vmem:[%s3111_s6 + $0x398] sm:$0xff] }
  0x5d   : > { %965 = vmatpush1.msra.mxu0 %v1691_v55  ;;  %1072 = vmatpush1.msra.mxu1 %v1771_v61  ;;  %v2633_v55 = vsel %vm549_vm0, 0.0, %v2445_v42  ;;  %v1731_v61 = vld [vmem:[%s3111_s6 + $0x390] sm:$0xff] }
  0x5e   : > { %966 = vmatprep.subr.mxu0 %v1690_v59  ;;  %1073 = vmatprep.subr.mxu1 %v1770_v63  ;;  %v1751_v63 = vld [vmem:[%s3112_s7 + $0x130] sm:$0xff] }
  0x5f   : > { %967 = vmatpush1.msra.mxu0 %v1689_v62  ;;  %1074 = vmatpush1.msra.mxu1 %v1769_v1 }
  0x60   : > { %968 = vmatprep.subr.mxu0 %v1688_v0  ;;  %1075 = vmatprep.subr.mxu1 %v1768_v5  ;;  %v933_v0 = vrot.slane %v2633_v55, 1  ;;  %v1750_v5 = vld [vmem:[%s3112_s7 + $0x128] sm:$0xff] }
  0x61   : > { %969 = vmatpush1.msra.mxu0 %v1687_v3  ;;  %1076 = vmatpush1.msra.mxu1 %v1767_v7  ;;  %v1730_v3 = vld [vmem:[%s3111_s6 + $0x388] sm:$0xff]  ;;  %v1749_v7 = vld [vmem:[%s3112_s7 + $0x120] sm:$0xff] }
  0x62   : > { %970 = vmatprep.subr.mxu0 %v1686_v6  ;;  %1077 = vmatprep.subr.mxu1 %v1766_v9  ;;  %v1729_v6 = vld [vmem:[%s3111_s6 + $0x380] sm:$0xff] }
  0x63   : > { %971 = vmatpush1.msra.mxu0 %v1685_v8  ;;  %1078 = vmatpush1.msra.mxu1 %v1765_v11  ;;  %v2677_v8 = vsel %vm549_vm0, 0.0, %v2378_v15  ;;  %v1748_v11 = vld [vmem:[%s3112_s7 + $0x118] sm:$0xff] }
  0x64   : > { %972 = vmatprep.subr.mxu0 %v1684_v10  ;;  %1079 = vmatprep.subr.mxu1 %v1764_v13  ;;  %v1908_v25 = vpop.eup %1907  ;;  %v1728_v10 = vld [vmem:[%s3111_s6 + $0x378] sm:$0xff]  ;;  %v1726_v13 = vld [vmem:[%s3111_s6 + $0x368] sm:$0xff] }
  0x65   : > { %973 = vmatpush1.msra.mxu0 %v1683_v12  ;;  %1080 = vmatpush1.msra.mxu1 %v1763_v2  ;;  %v1910_v28 = vpop.eup %1909  ;;  %v2568_v31 = vmul.f32 %v1908_v25, %v2384_v16  ;;  %v1739_v16 = vld [vmem:[%s3111_s6 + $0x3d0] sm:$0xff] }
  0x66   : > { %974 = vmatprep.subr.mxu0 %v1682_v14  ;;  %1081 = vmatprep.subr.mxu1 %v1762_v21  ;;  %v1912_v32 = vpop.eup %1911  ;;  %v2577_v35 = vmul.f32 %v1910_v28, %v2390_v20  ;;  %v1738_v20 = vld [vmem:[%s3111_s6 + $0x3c8] sm:$0xff]  ;;  %v1727_v12 = vld [vmem:[%s3111_s6 + $0x370] sm:$0xff]  ;;  %v1725_v21 = vld [vmem:[%s3111_s6 + $0x360] sm:$0xff] }
  0x67   : > { %975 = vmatpush1.msra.mxu0 %v1681_v17  ;;  %1082 = vmatpush1.msra.mxu1 %v1761_v23  ;;  %v554_v37 = vrot.slane %v2568_v31, 7  ;;  %v543_v40 = vmul.f32 %v1912_v32, %v2393_v56  ;;  %v1754_v56 = vld [vmem:[%s3112_s7 + $0x148] sm:$0xff]  ;;  %v1747_v2 = vld [vmem:[%s3112_s7 + $0x110] sm:$0xff]  ;;  %v1060_v17 = vrot.slane %v2677_v8, 1  ;;  %v1872_v32 = vld [vmem:[%s3112_s7 + $0x2f8] sm:$0xff] }
  0x68   : > { %976 = vmatprep.subr.mxu0 %v1744_v22  ;;  %1083 = vmatprep.subr.mxu1 %v1760_v24  ;;  %v603_v47 = vrot.slane %v2577_v35, 7  ;;  %v1746_v22 = vld [vmem:[%s3112_s7 + $0x108] sm:$0xff]  ;;  %v1745_v24 = vld [vmem:[%s3112_s7 + $0x100] sm:$0xff]  ;;  %v1723_v25 = vld [vmem:[%s3111_s6 + $0x350] sm:$0xff] }
  0x69   : > { %977 = vmatpush2.msra.mxu0 %v1743_v60  ;;  %1084 = vmatpush1.msra.mxu1 %v1759_v27  ;;  %v552_v38 = vrot.slane %v543_v40, 7  ;;  %v2618_v50 = vsel %vm549_vm0, %v2445_v42, %v554_v37  ;;  %v1724_v60 = vld [vmem:[%s3111_s6 + $0x358] sm:$0xff]  ;;  %v1718_v35 = vld [vmem:[%s3111_s6 + $0x328] sm:$0xff]  ;;  %v1717_v40 = vld [vmem:[%s3111_s6 + $0x320] sm:$0xff] }
  0x6a   : > { %978 = vmatprep.subr.mxu0 %v1742_v26  ;;  %1085 = vmatprep.subr.mxu1 %v1758_v30  ;;  %v2644_v58 = vsel %vm549_vm0, %v2378_v15, %v603_v47  ;;  %v934_v62 = vrot.slane %v2618_v50, 1  ;;  %v2709_v23 = vsel %vm549_vm0, %v603_v47, 0.0  ;;  %v1722_v26 = vld [vmem:[%s3111_s6 + $0x348] sm:$0xff]  ;;  %v1720_v30 = vld [vmem:[%s3111_s6 + $0x338] sm:$0xff]  ;;  %v1713_v47 = vld [vmem:[%s3111_s6 + $0x300] sm:$0xff] }
  0x6b   : > { %979 = vmatpush2.msra.mxu0 %v1741_v29  ;;  %1086 = vmatpush1.msra.mxu1 %v1757_v34  ;;  %v2622_v51 = vsel %vm549_vm0, %v2457_v46, %v552_v38  ;;  %v1733_v46 = vld [vmem:[%s3111_s6 + $0x3a0] sm:$0xff]  ;;  %v2647_v42 = vsel %vm549_vm0, %v552_v38, 0.0  ;;  %v1061_v14 = vrot.slane %v2644_v58, 1  ;;  %v1063_v28 = vrot.slane %v2709_v23, 1  ;;  %v1871_v34 = vld [vmem:[%s3112_s7 + $0x2f0] sm:$0xff] }
  0x6c   : > { %980 = vmatprep.subr.mxu0 %v1740_v33  ;;  %1087 = vmatprep.subr.mxu1 %v1756_v36  ;;  %v1215_v54 = vrot.slane %v2622_v51, 2  ;;  %v1220_v1 = vrot.slane %v2647_v42, 2  ;;  %v935_v15 = vsel %vm929_vm3, %v933_v0, %v934_v62  ;;  %v1721_v29 = vld [vmem:[%s3111_s6 + $0x340] sm:$0xff]  ;;  %v1719_v33 = vld [vmem:[%s3111_s6 + $0x330] sm:$0xff]  ;;  %v931_v31 = vrot.slane %v2622_v51, 1 }
  0x6d   : > { %981 = vmatpush2.msra.mxu0 %v1739_v16  ;;  %1088 = vmatpush1.msra.mxu1 %v1755_v41  ;;  %v1062_v27 = vsel %vm929_vm3, %v1060_v17, %v1061_v14  ;;  %v2747_v16 = vsel %vm549_vm0, %v554_v37, 0.0  ;;  %v1064_v36 = vsel %vm929_vm3, %v1061_v14, %v1063_v28  ;;  %v1716_v37 = vld [vmem:[%s3111_s6 + $0x318] sm:$0xff]  ;;  %v930_v41 = vrot.slane %v2601_v44, 1  ;;  %v1714_v44 = vld [vmem:[%s3111_s6 + $0x308] sm:$0xff]  ;;  %v1803_v0 = vld [vmem:[%s3111_s6 + $0x4d0] sm:$0xff] }
  0x6e   : > { %982 = vmatprep.subr.mxu0 %v1738_v20  ;;  %1089 = vmatprep.subr.mxu1 %v1754_v56  ;;  %v2650_v59 = vsel %vm1213_vm2, %v1214_v48, %v1215_v54  ;;  %v2680_v9 = vsel %vm1213_vm2, %v1215_v54, %v1220_v1  ;;  %v1870_v20 = vld [vmem:[%s3112_s7 + $0x2e8] sm:$0xff]  ;;  %v1715_v56 = vld [vmem:[%s3111_s6 + $0x310] sm:$0xff]  ;;  %v938_v38 = vrot.slane %v2747_v16, 1  ;;  %v1857_v17 = vld [vmem:[%s3112_s7 + $0x280] sm:$0xff] }
  0x6f   : > { %983 = vmatpush2.msra.mxu0 %v1737_v43  ;;  %1090 = vmatpush1.msra.mxu1 %v1753_v39  ;;  %v1869_v43 = vld [vmem:[%s3112_s7 + $0x2e0] sm:$0xff]  ;;  %v1867_v39 = vld [vmem:[%s3112_s7 + $0x2d0] sm:$0xff]  ;;  %v1866_v48 = vld [vmem:[%s3112_s7 + $0x2c8] sm:$0xff] }
  0x70   : > { %984 = vmatprep.subr.mxu0 %v1736_v45  ;;  %853 = vmatprep.mubr.f32.mxu1 %v2618_v50  ;;  %v1868_v45 = vld [vmem:[%s3112_s7 + $0x2d8] sm:$0xff]  ;;  %v939_v54 = vsel %vm929_vm3, %v934_v62, %v938_v38  ;;  %v1863_v1 = vld [vmem:[%s3112_s7 + $0x2b0] sm:$0xff]  ;;  %v1858_v14 = vld [vmem:[%s3112_s7 + $0x288] sm:$0xff]  ;;  %v1218_v38 = vrot.slane %v2618_v50, 2 }
  0x71   : > { %985 = vmatpush2.msra.mxu0 %v1735_v49  ;;  %1091 = vmatprep.subr.mxu1 %v1752_v53  ;;  %v932_v49 = vsel %vm929_vm3, %v930_v41, %v931_v31  ;;  %v1807_v53 = vld [vmem:[%s3111_s6 + $0x4f0] sm:$0xff]  ;;  %v1853_v28 = vld [vmem:[%s3112_s7 + $0x260] sm:$0xff] }
  0x72   : > { %986 = vmatprep.subr.mxu0 %v1734_v52  ;;  %854 = vmatmul.mubr.f32.gmra.mxu1 %v2622_v51  ;;  %v1808_v51 = vld [vmem:[%s3111_s6 + $0x4f8] sm:$0xff]  ;;  %v936_v52 = vrot.slane %v2647_v42, 1  ;;  %v1805_v42 = vld [vmem:[%s3111_s6 + $0x4e0] sm:$0xff]  ;;  %v1847_v41 = vld [vmem:[%s3112_s7 + $0x230] sm:$0xff] }
  0x73   : > { %987 = vmatpush2.msra.mxu0 %v1733_v46  ;;  %1092 = vmatpush1.msra.mxu1 %v1751_v63  ;;  %v1806_v46 = vld [vmem:[%s3111_s6 + $0x4e8] sm:$0xff]  ;;  %v1804_v63 = vld [vmem:[%s3111_s6 + $0x4d8] sm:$0xff] }
  0x74   : > { %988 = vmatprep.subr.mxu0 %v1732_v57  ;;  %777 = vmatmul.mubr.f32.gmra.mxu0 %v2644_v58  ;;  %v1865_v57 = vld [vmem:[%s3112_s7 + $0x2c0] sm:$0xff]  ;;  %v937_v62 = vsel %vm929_vm3, %v931_v31, %v936_v52  ;;  %v1848_v31 = vld [vmem:[%s3112_s7 + $0x238] sm:$0xff]  ;;  %v1782_v52 = vld [vmem:[%s3111_s6 + $0x428] sm:$0xff] }
  0x75   : > { %989 = vmatpush2.msra.mxu0 %v1731_v61  ;;  %1093 = vmatprep.subr.mxu1 %v1750_v5  ;;  %v1864_v61 = vld [vmem:[%s3112_s7 + $0x2b8] sm:$0xff]  ;;  %v1862_v5 = vld [vmem:[%s3112_s7 + $0x2a8] sm:$0xff] }
  0x76   : > { %990 = vmatprep.subr.mxu0 %v1730_v3  ;;  %1094 = vmatpush1.msra.mxu1 %v1749_v7  ;;  %v1802_v3 = vld [vmem:[%s3111_s6 + $0x4c8] sm:$0xff]  ;;  %v1861_v7 = vld [vmem:[%s3112_s7 + $0x2a0] sm:$0xff] }
  0x77   : > { %991 = vmatpush2.msra.mxu0 %v1729_v6  ;;  %1095 = vmatprep.subr.mxu1 %v1748_v11  ;;  %v1801_v6 = vld [vmem:[%s3111_s6 + $0x4c0] sm:$0xff]  ;;  %v1860_v11 = vld [vmem:[%s3112_s7 + $0x298] sm:$0xff] }
  0x78   : > { %992 = vmatprep.subr.mxu0 %v1728_v10  ;;  %1008 = vmatprep.mubr.f32.mxu0 %v935_v15  ;;  %v1800_v10 = vld [vmem:[%s3111_s6 + $0x4b8] sm:$0xff]  ;;  %v1859_v15 = vld [vmem:[%s3112_s7 + $0x290] sm:$0xff] }
  0x79   : > { %993 = vmatpush2.msra.mxu0 %v1727_v12  ;;  %1096 = vmatpush1.msra.mxu1 %v1747_v2  ;;  %v1799_v12 = vld [vmem:[%s3111_s6 + $0x4b0] sm:$0xff]  ;;  %v1797_v2 = vld [vmem:[%s3111_s6 + $0x4a0] sm:$0xff] }
  0x7a   : > { %994 = vmatprep.subr.mxu0 %v1726_v13  ;;  %1097 = vmatprep.subr.mxu1 %v1746_v22  ;;  %v1798_v13 = vld [vmem:[%s3111_s6 + $0x4a8] sm:$0xff]  ;;  %v1856_v22 = vld [vmem:[%s3112_s7 + $0x278] sm:$0xff] }
  0x7b   : > { %995 = vmatpush2.msra.mxu0 %v1725_v21  ;;  %1098 = vmatpush1.msra.mxu1 %v1745_v24  ;;  %v1796_v21 = vld [vmem:[%s3111_s6 + $0x498] sm:$0xff]  ;;  %v1855_v24 = vld [vmem:[%s3112_s7 + $0x270] sm:$0xff] }
  0x7c   : > { %996 = vmatprep.subr.mxu0 %v1724_v60  ;;  %1131 = vmatprep.mubr.f32.mxu1 %v1921_v4  ;;  %v1795_v60 = vld [vmem:[%s3111_s6 + $0x490] sm:$0xff] }
  0x7d   : > { %997 = vmatpush2.msra.mxu0 %v1723_v25  ;;  %1132 = vmatmul.mubr.f32.vlgmr.msra.gmra.mxu1 %v1062_v27  ;;  %v1794_v25 = vld [vmem:[%s3111_s6 + $0x488] sm:$0xff]  ;;  %v1793_v27 = vld [vmem:[%s3111_s6 + $0x480] sm:$0xff] }
  0x7e   : > { %998 = vmatprep.subr.mxu0 %v1722_v26  ;;  %1137 = vmatprep.mubr.f32.mxu1 %v1921_v4  ;;  %v1854_v26 = vld [vmem:[%s3112_s7 + $0x268] sm:$0xff] }
  0x7f   : > { %999 = vmatpush2.msra.mxu0 %v1721_v29  ;;  %1349 = vmatprep.subr.mxu1 %v1872_v32  ;;  %v1792_v29 = vld [vmem:[%s3111_s6 + $0x478] sm:$0xff]  ;;  %v1791_v32 = vld [vmem:[%s3111_s6 + $0x470] sm:$0xff] }
  0x80   : > { %1000 = vmatprep.subr.mxu0 %v1720_v30  ;;  %1350 = vmatpush1.msra.mxu1 %v1871_v34  ;;  %v1852_v30 = vld [vmem:[%s3112_s7 + $0x258] sm:$0xff]  ;;  %v1790_v34 = vld [vmem:[%s3111_s6 + $0x468] sm:$0xff] }
  0x81   : > { %1001 = vmatpush2.msra.mxu0 %v1719_v33  ;;  %1138 = vmatmul.mubr.f32.gmra.mxu1 %v1064_v36  ;;  %v1851_v33 = vld [vmem:[%s3112_s7 + $0x250] sm:$0xff]  ;;  %v1789_v36 = vld [vmem:[%s3111_s6 + $0x460] sm:$0xff] }
  0x82   : > { %1002 = vmatprep.subr.mxu0 %v1718_v35  ;;  %1351 = vmatprep.subr.mxu1 %v1870_v20  ;;  %v1850_v35 = vld [vmem:[%s3112_s7 + $0x248] sm:$0xff]  ;;  %v1788_v20 = vld [vmem:[%s3111_s6 + $0x458] sm:$0xff] }
  0x83   : > { %1003 = vmatpush2.msra.mxu0 %v1717_v40  ;;  %1352 = vmatpush1.msra.mxu1 %v1869_v43  ;;  %v1849_v40 = vld [vmem:[%s3112_s7 + $0x240] sm:$0xff]  ;;  %v1786_v43 = vld [vmem:[%s3111_s6 + $0x448] sm:$0xff] }
  0x84   : > { %1004 = vmatprep.subr.mxu0 %v1716_v37  ;;  %1353 = vmatprep.subr.mxu1 %v1868_v45  ;;  %v1787_v37 = vld [vmem:[%s3111_s6 + $0x450] sm:$0xff]  ;;  %v1785_v45 = vld [vmem:[%s3111_s6 + $0x440] sm:$0xff] }
  0x85   : > { %1005 = vmatpush2.msra.mxu0 %v1715_v56  ;;  %1354 = vmatpush1.msra.mxu1 %v1867_v39  ;;  %v1846_v56 = vld [vmem:[%s3112_s7 + $0x228] sm:$0xff]  ;;  %v1217_v39 = vrot.slane %v2633_v55, 2  ;;  %v1843_v55 = vld [vmem:[%s3112_s7 + $0x210] sm:$0xff] }
  0x86   : > { %1006 = vmatprep.subr.mxu0 %v1714_v44  ;;  %1355 = vmatprep.subr.mxu1 %v1866_v48  ;;  %v1845_v44 = vld [vmem:[%s3112_s7 + $0x220] sm:$0xff]  ;;  %v1844_v48 = vld [vmem:[%s3112_s7 + $0x218] sm:$0xff] }
  0x87   : > { %1007 = vmatpush2.msra.mxu0 %v1713_v47  ;;  %1356 = vmatpush1.msra.mxu1 %v1865_v57  ;;  %v1784_v47 = vld [vmem:[%s3111_s6 + $0x438] sm:$0xff] }
  0x88   : > { %1009 = vmatmul.mubr.f32.vlgmr.msra.gmra.mxu0 %v932_v49  ;;  %1228 = vmatprep.subr.mxu0 %v1808_v51  ;;  %v1783_v49 = vld [vmem:[%s3111_s6 + $0x430] sm:$0xff]  ;;  %v1343_v51 = vrot.slane %v2644_v58, 2  ;;  %v1219_v58 = vsel %vm1213_vm2, %v1217_v39, %v1218_v38  ;;  %v1780_v57 = vld [vmem:[%s3111_s6 + $0x418] sm:$0xff] }
  0x89   : > { %1229 = vmatpush1.msra.mxu0 %v1807_v53  ;;  %1014 = vmatprep.mubr.f32.mxu0 %v939_v54  ;;  %v1842_v53 = vld [vmem:[%s3112_s7 + $0x208] sm:$0xff]  ;;  %v1342_v54 = vrot.slane %v2677_v8, 2  ;;  %v1841_v8 = vld [vmem:[%s3112_s7 + $0x200] sm:$0xff] }
  0x8a   : > { %1230 = vmatprep.subr.mxu0 %v1806_v46  ;;  %1357 = vmatprep.subr.mxu1 %v1864_v61  ;;  %v1781_v46 = vld [vmem:[%s3111_s6 + $0x420] sm:$0xff]  ;;  %v1778_v61 = vld [vmem:[%s3111_s6 + $0x408] sm:$0xff] }
  0x8b   : > { %1231 = vmatpush1.msra.mxu0 %v1805_v42  ;;  %1358 = vmatpush1.msra.mxu1 %v1863_v1  ;;  %v1779_v42 = vld [vmem:[%s3111_s6 + $0x410] sm:$0xff]  ;;  %v1840_v1 = vld [vmem:[%s3111_s6 + $0x5f8] sm:$0xff] }
  0x8c   : > { %1015 = vmatmul.mubr.f32.gmra.mxu0 %v937_v62  ;;  %1232 = vmatprep.subr.mxu0 %v1804_v63  ;;  %v1344_v62 = vsel %vm1213_vm2, %v1342_v54, %v1343_v51  ;;  %v1345_v63 = vrot.slane %v2709_v23, 2  ;;  %v1838_v23 = vld [vmem:[%s3111_s6 + $0x5e8] sm:$0xff] }
  0x8d   : > { %1233 = vmatpush1.msra.mxu0 %v1803_v0  ;;  %1359 = vmatprep.subr.mxu1 %v1862_v5  ;;  %v1777_v0 = vld [vmem:[%s3111_s6 + $0x400] sm:$0xff] }
  0x8e   : > { %1234 = vmatprep.subr.mxu0 %v1802_v3  ;;  %1360 = vmatpush1.msra.mxu1 %v1861_v7  ;;  %v1839_v3 = vld [vmem:[%s3111_s6 + $0x5f0] sm:$0xff]  ;;  %v1346_v5 = vsel %vm1213_vm2, %v1343_v51, %v1345_v63  ;;  %v1836_v7 = vld [vmem:[%s3111_s6 + $0x5d8] sm:$0xff] }
  0x8f   : > { %1235 = vmatpush1.msra.mxu0 %v1801_v6  ;;  %1361 = vmatprep.subr.mxu1 %v1860_v11  ;;  %v1837_v6 = vld [vmem:[%s3111_s6 + $0x5e0] sm:$0xff] }
  0x90   : > { %1236 = vmatprep.subr.mxu0 %v1800_v10  ;;  %1362 = vmatpush1.msra.mxu1 %v1859_v15  ;;  %v1835_v10 = vld [vmem:[%s3111_s6 + $0x5d0] sm:$0xff]  ;;  %v1833_v11 = vld [vmem:[%s3111_s6 + $0x5c0] sm:$0xff] }
  0x91   : > { %1237 = vmatpush1.msra.mxu0 %v1799_v12  ;;  %1363 = vmatprep.subr.mxu1 %v1858_v14  ;;  %v1832_v12 = vld [vmem:[%s3111_s6 + $0x5b8] sm:$0xff]  ;;  %v1831_v15 = vld [vmem:[%s3111_s6 + $0x5b0] sm:$0xff]  ;;  %v1829_v14 = vld [vmem:[%s3111_s6 + $0x5a0] sm:$0xff] }
  0x92   : > { %1238 = vmatprep.subr.mxu0 %v1798_v13  ;;  %1364 = vmatpush1.msra.mxu1 %v1857_v17  ;;  %v1830_v13 = vld [vmem:[%s3111_s6 + $0x5a8] sm:$0xff]  ;;  %v1827_v17 = vld [vmem:[%s3111_s6 + $0x590] sm:$0xff] }
  0x93   : > { %1239 = vmatpush1.msra.mxu0 %v1797_v2  ;;  %1365 = vmatprep.subr.mxu1 %v1856_v22  ;;  %v1828_v2 = vld [vmem:[%s3111_s6 + $0x598] sm:$0xff]  ;;  %v1825_v22 = vld [vmem:[%s3111_s6 + $0x580] sm:$0xff] }
  0x94   : > { %1240 = vmatprep.subr.mxu0 %v1796_v21  ;;  %1366 = vmatpush1.msra.mxu1 %v1855_v24  ;;  %v1826_v21 = vld [vmem:[%s3111_s6 + $0x588] sm:$0xff]  ;;  %v1823_v24 = vld [vmem:[%s3111_s6 + $0x570] sm:$0xff] }
  0x95   : > { %1241 = vmatpush1.msra.mxu0 %v1795_v60  ;;  %1367 = vmatprep.subr.mxu1 %v1854_v26  ;;  %v1824_v60 = vld [vmem:[%s3111_s6 + $0x578] sm:$0xff]  ;;  %v1821_v26 = vld [vmem:[%s3111_s6 + $0x560] sm:$0xff] }
  0x96   : > { %1242 = vmatprep.subr.mxu0 %v1794_v25  ;;  %1368 = vmatpush1.msra.mxu1 %v1853_v28  ;;  %v1822_v25 = vld [vmem:[%s3111_s6 + $0x568] sm:$0xff]  ;;  %v1819_v28 = vld [vmem:[%s3111_s6 + $0x550] sm:$0xff] }
  0x97   : > { %1243 = vmatpush1.msra.mxu0 %v1793_v27  ;;  %1369 = vmatprep.subr.mxu1 %v1852_v30  ;;  %v1820_v27 = vld [vmem:[%s3111_s6 + $0x558] sm:$0xff]  ;;  %v1817_v30 = vld [vmem:[%s3111_s6 + $0x540] sm:$0xff] }
  0x98   : > { %1244 = vmatprep.subr.mxu0 %v1792_v29  ;;  %1370 = vmatpush1.msra.mxu1 %v1851_v33  ;;  %v1818_v29 = vld [vmem:[%s3111_s6 + $0x548] sm:$0xff]  ;;  %v1815_v33 = vld [vmem:[%s3111_s6 + $0x530] sm:$0xff] }
  0x99   : > { %1245 = vmatpush1.msra.mxu0 %v1791_v32  ;;  %1371 = vmatprep.subr.mxu1 %v1850_v35  ;;  %v1816_v32 = vld [vmem:[%s3111_s6 + $0x538] sm:$0xff]  ;;  %v1813_v35 = vld [vmem:[%s3111_s6 + $0x520] sm:$0xff] }
  0x9a   : > { %1246 = vmatprep.subr.mxu0 %v1790_v34  ;;  %1372 = vmatpush1.msra.mxu1 %v1849_v40  ;;  %v1814_v34 = vld [vmem:[%s3111_s6 + $0x528] sm:$0xff]  ;;  %v1811_v40 = vld [vmem:[%s3111_s6 + $0x510] sm:$0xff] }
  0x9b   : > { %1247 = vmatpush1.msra.mxu0 %v1789_v36  ;;  %1373 = vmatprep.subr.mxu1 %v1848_v31  ;;  %v1812_v36 = vld [vmem:[%s3111_s6 + $0x518] sm:$0xff]  ;;  %v1810_v31 = vld [vmem:[%s3111_s6 + $0x508] sm:$0xff] }
  0x9c   : > { %1248 = vmatprep.subr.mxu0 %v1788_v20  ;;  %1374 = vmatpush1.msra.mxu1 %v1847_v41  ;;  %v1222_v20 = vrot.slane %v2747_v16, 2 }
  0x9d   : > { %1249 = vmatpush1.msra.mxu0 %v1787_v37  ;;  %1375 = vmatprep.subr.mxu1 %v1846_v56  ;;  %v1809_v37 = vld [vmem:[%s3111_s6 + $0x500] sm:$0xff] }
  0x9e   : > { %1250 = vmatprep.subr.mxu0 %v1786_v43  ;;  %1376 = vmatpush1.msra.mxu1 %v1845_v44  ;;  %v1223_v41 = vsel %vm1213_vm2, %v1218_v38, %v1222_v20 }
  0x9f   : > { %1251 = vmatpush1.msra.mxu0 %v1785_v45  ;;  %1377 = vmatprep.subr.mxu1 %v1844_v48 }
  0xa0   : > { %1252 = vmatprep.subr.mxu0 %v1784_v47  ;;  %1378 = vmatpush1.msra.mxu1 %v1843_v55 }
  0xa1   : > { %1253 = vmatpush1.msra.mxu0 %v1783_v49  ;;  %1379 = vmatprep.subr.mxu1 %v1842_v53 }
  0xa2   : > { %1254 = vmatprep.subr.mxu0 %v1782_v52  ;;  %1292 = vmatprep.mubr.f32.mxu0 %v1219_v58 }
  0xa3   : > { %1255 = vmatpush1.msra.mxu0 %v1781_v46  ;;  %1380 = vmatpush1.msra.mxu1 %v1841_v8 }
  0xa4   : > { %1256 = vmatprep.subr.mxu0 %v1780_v57  ;;  %1413 = vmatprep.mubr.f32.mxu1 %v1921_v4 }
  0xa5   : > { %1257 = vmatpush1.msra.mxu0 %v1779_v42  ;;  %1414 = vmatmul.mubr.f32.vlgmr.msra.gmra.mxu1 %v1344_v62  ;;  %v1430_v42 = vld [vmem:[%s3113_s8] sm:$0x3] }
  0xa6   : > { %1258 = vmatprep.subr.mxu0 %v1778_v61  ;;  %1419 = vmatprep.mubr.f32.mxu1 %v1921_v4  ;;  %v1834_v4 = vld [vmem:[%s3111_s6 + $0x5c8] sm:$0xff] }
  0xa7   : > { %1259 = vmatpush1.msra.mxu0 %v1777_v0  ;;  %v1446_v0 = vld [vmem:[%s466_s18] sm:$0x3] }
  0xa8   : > { %1260 = vmatprep.subr.mxu0 %v1840_v1 }
  0xa9   : > { %1261 = vmatpush2.msra.mxu0 %v1839_v3  ;;  %1420 = vmatmul.mubr.f32.gmra.mxu1 %v1346_v5 }
  0xaa   : > { %1262 = vmatprep.subr.mxu0 %v1838_v23 }
  0xab   : > { %1263 = vmatpush2.msra.mxu0 %v1837_v6 }
  0xac   : > { %1264 = vmatprep.subr.mxu0 %v1836_v7  ;;  %v1435_v7 = vrot.slane %v1430_v42, %v2254_v18 }
  0xad   : > { %1265 = vmatpush2.msra.mxu0 %v1835_v10  ;;  %v1462_v10 = vld [vmem:[%s470_s23] sm:$0x3] }
  0xae   : > { %1266 = vmatprep.subr.mxu0 %v1834_v4  ;;  %v1451_v4 = vrot.slane %v1446_v0, %v2254_v18 }
  0xaf   : > { %1267 = vmatpush2.msra.mxu0 %v1833_v11 }
  0xb0   : > { %1268 = vmatprep.subr.mxu0 %v1832_v12 }
  0xb1   : > { %1269 = vmatpush2.msra.mxu0 %v1831_v15 }
  0xb2   : > { %1270 = vmatprep.subr.mxu0 %v1830_v13 }
  0xb3   : > { %1271 = vmatpush2.msra.mxu0 %v1829_v14  ;;  %v1439_v14 = vrot.slane %v1430_v42, %v2256_v19 }
  0xb4   : > { %1272 = vmatprep.subr.mxu0 %v1828_v2  ;;  %v1467_v2 = vrot.slane %v1462_v10, %v2254_v18 }
  0xb5   : > { %1273 = vmatpush2.msra.mxu0 %v1827_v17  ;;  %v1455_v17 = vrot.slane %v1446_v0, %v2256_v19 }
  0xb6   : > { %1274 = vmatprep.subr.mxu0 %v1826_v21 }
  0xb7   : > { %1275 = vmatpush2.msra.mxu0 %v1825_v22 }
  0xb8   : > { %1276 = vmatprep.subr.mxu0 %v1824_v60 }
  0xb9   : > { %1277 = vmatpush2.msra.mxu0 %v1823_v24 }
  0xba   : > { %1278 = vmatprep.subr.mxu0 %v1822_v25 }
  0xbb   : > { %1279 = vmatpush2.msra.mxu0 %v1821_v26 }
  0xbc   : > { %1280 = vmatprep.subr.mxu0 %v1820_v27  ;;  %v1471_v27 = vrot.slane %v1462_v10, %v2256_v19 }
  0xbd   : > { %1281 = vmatpush2.msra.mxu0 %v1819_v28 }
  0xbe   : > { %1282 = vmatprep.subr.mxu0 %v1818_v29 }
  0xbf   : > { %1283 = vmatpush2.msra.mxu0 %v1817_v30 }
  0xc0   : > { %1284 = vmatprep.subr.mxu0 %v1816_v32 }
  0xc1   : > { %1285 = vmatpush2.msra.mxu0 %v1815_v33 }
  0xc2   : > { %1286 = vmatprep.subr.mxu0 %v1814_v34 }
  0xc3   : > { %1287 = vmatpush2.msra.mxu0 %v1813_v35 }
  0xc4   : > { %1288 = vmatprep.subr.mxu0 %v1812_v36 }
  0xc5   : > { %1289 = vmatpush2.msra.mxu0 %v1811_v40 }
  0xc6   : > { %1290 = vmatprep.subr.mxu0 %v1810_v31 }
  0xc7   : > { %1291 = vmatpush2.msra.mxu0 %v1809_v37 }
  0xc8   : > { %1293 = vmatmul.mubr.f32.vlgmr.msra.gmra.mxu0 %v2650_v59 }
  0xc9   : > { %1298 = vmatprep.mubr.f32.mxu0 %v1223_v41 }
  0xcc   : > { %1299 = vmatmul.mubr.f32.gmra.mxu0 %v2680_v9 }
 0x107   : > { %v772_v43 = vpop.f32.mrf.mxu0 }
 0x109   : > { %v774_v45 = vpop.f32.mrf.mxu0 }
 0x118   : > { %v849_v16 = vpop.f32.mrf.mxu1 }
 0x119   : > { %v850_v52 = vadd.f32 %v849_v16, %v772_v43 }
 0x11a   : > { %v851_v56 = vpop.f32.mrf.mxu1 }
 0x11b   : > { %v852_v54 = vadd.f32 %v851_v56, %v774_v45 }
 0x132   : > { %v855_v44 = vpop.f32.mrf.mxu1 }
 0x134   : > { %v778_v39 = vpop.f32.mrf.mxu0  ;;  %v857_v47 = vpop.f32.mrf.mxu1 }
 0x135   : > { %v856_v58 = vadd.f32 %v855_v44, %v778_v39 }
 0x136   : > { %v780_v48 = vpop.f32.mrf.mxu0 }
 0x137   : > { %v858_v61 = vadd.f32 %v857_v47, %v780_v48 }
 0x13d   : > { %v1133_v49 = vpop.f32.mrf.mxu1 }
 0x13f   : > { %v1135_v50 = vpop.f32.mrf.mxu1 }
 0x141   : > { %v1139_v38 = vpop.f32.mrf.mxu1 }
 0x143   : > { %v1141_v53 = vpop.f32.mrf.mxu1 }
 0x148   : > { %v1010_v55 = vpop.f32.mrf.mxu0 }
 0x149   : > { %v1021_v46 = vadd.f32 %v1010_v55, %v850_v52 }
 0x14a   : > { %v1012_v51 = vpop.f32.mrf.mxu0 }
 0x14b   : > { %v1022_v57 = vadd.f32 %v1012_v51, %v852_v54  ;;  %v1144_v62 = vadd.f32 %v1133_v49, %v1021_v46 }
 0x14c   : > { %v1016_v59 = vpop.f32.mrf.mxu0 }
 0x14d   : > { %v1023_v63 = vadd.f32 %v1016_v59, %v856_v58  ;;  %v1145_v23 = vadd.f32 %v1135_v50, %v1022_v57 }
 0x14e   : > { %v1018_v8 = vpop.f32.mrf.mxu0 }
 0x14f   : > { %v1024_v5 = vadd.f32 %v1018_v8, %v858_v61  ;;  %v1146_v12 = vadd.f32 %v1139_v38, %v1023_v63 }
 0x151   : > { %v1147_v60 = vadd.f32 %v1141_v53, %v1024_v5 }
 0x165   : > { %v1415_v9 = vpop.f32.mrf.mxu1 }
 0x167   : > { %v1417_v3 = vpop.f32.mrf.mxu1 }
 0x169   : > { %v1421_v22 = vpop.f32.mrf.mxu1 }
 0x16b   : > { %v1423_v18 = vpop.f32.mrf.mxu1 }
 0x188   : > { %v1294_v1 = vpop.f32.mrf.mxu0 }
 0x189   : > { %v1305_v6 = vadd.f32 %v1294_v1, %v1144_v62 }
 0x18a   : > { %v1296_v11 = vpop.f32.mrf.mxu0 }
 0x18b   : > { %v1426_v15 = vadd.f32 %v1415_v9, %v1305_v6  ;;  %v1306_v13 = vadd.f32 %v1296_v11, %v1145_v23 }
 0x18c   : > { %v1300_v21 = vpop.f32.mrf.mxu0 }
 0x18d   : > { %v1442_v24 = vadd.f32 %v1435_v7, %v1426_v15  ;;  %v1427_v25 = vadd.f32 %v1417_v3, %v1306_v13  ;;  %v1307_v26 = vadd.f32 %v1300_v21, %v1146_v12 }
 0x18e   : > { %v1302_v28 = vpop.f32.mrf.mxu0 }
 0x18f   : > { %v1458_v29 = vmul.f32 %v1451_v4, %v1442_v24  ;;  %v1443_v30 = vadd.f32 %v1439_v14, %v1427_v25  ;;  %v1428_v32 = vadd.f32 %v1421_v22, %v1307_v26  ;;  %v1308_v33 = vadd.f32 %v1302_v28, %v1147_v60 }
 0x191   : > { %v1474_v34 = vadd.f32 %v1467_v2, %v1458_v29  ;;  %v1459_v35 = vmul.f32 %v1455_v17, %v1443_v30  ;;  %v1444_v36 = vadd.f32 %v1435_v7, %v1428_v32  ;;  %v1429_v40 = vadd.f32 %v1423_v18, %v1308_v33 }
 0x193   : > { %1478 = vst [vmem:[%s475_s14] sm:$0xff] %v1474_v34  ;;  %v1475_v20 = vadd.f32 %v1471_v27, %v1459_v35  ;;  %v1460_v31 = vmul.f32 %v1451_v4, %v1444_v36  ;;  %v1445_v37 = vadd.f32 %v1439_v14, %v1429_v40  ;;  %v1496_v16 = vmul.f32 %v1474_v34, %v1474_v34 }
 0x195   : > { %1479 = vst [vmem:[%s475_s14 + $0x8] sm:$0xff] %v1475_v20  ;;  %v1476_v19 = vadd.f32 %v1467_v2, %v1460_v31  ;;  %v1461_v41 = vmul.f32 %v1455_v17, %v1445_v37  ;;  %v1497_v44 = vmul.f32 %v1475_v20, %v1475_v20 }
 0x197   : > { %1480 = vst [vmem:[%s475_s14 + $0x10] sm:$0xff] %v1476_v19  ;;  %v1482_v43 = vadd.f32 %v1476_v19, %v1474_v34  ;;  %v1498_v56 = vmul.f32 %v1476_v19, %v1476_v19  ;;  %v1477_v45 = vadd.f32 %v1471_v27, %v1461_v41 }
 0x199   : > { %v1483_v39 = vrot.slane %v1482_v43, 4  ;;  %v1500_v47 = vadd.f32 %v1498_v56, %v1496_v16  ;;  %1481 = vst [vmem:[%s475_s14 + $0x18] sm:$0xff] %v1477_v45  ;;  %v1489_v48 = vadd.f32 %v1477_v45, %v1475_v20  ;;  %v1499_v49 = vmul.f32 %v1477_v45, %v1477_v45 }
 0x19b   : > { %v1484_v55 = vadd.f32 %v1483_v39, %v1482_v43  ;;  %v1501_v50 = vrot.slane %v1500_v47, 4  ;;  %v1490_v51 = vrot.slane %v1489_v48, 4  ;;  %v1507_v38 = vadd.f32 %v1499_v49, %v1497_v44 }
 0x19d   : > { %v1485_v52 = vrot.slane %v1484_v55, 2  ;;  %v1502_v59 = vadd.f32 %v1501_v50, %v1500_v47  ;;  %v1491_v53 = vadd.f32 %v1490_v51, %v1489_v48  ;;  %v1508_v54 = vrot.slane %v1507_v38, 4 }
 0x19f   : > { %v1486_v46 = vadd.f32 %v1485_v52, %v1484_v55  ;;  %v1503_v9 = vrot.slane %v1502_v59, 2  ;;  %v1492_v58 = vrot.slane %v1491_v53, 2  ;;  %v1509_v57 = vadd.f32 %v1508_v54, %v1507_v38 }
 0x1a1   : > { %v1504_v8 = vadd.f32 %v1503_v9, %v1502_v59  ;;  %v1493_v42 = vadd.f32 %v1492_v58, %v1491_v53  ;;  %v1510_v61 = vrot.slane %v1509_v57, 2  ;;  %v1487_v62 = vrot.slane %v1486_v46, 1 }
 0x1a3   : > { %v1505_v63 = vrot.slane %v1504_v8, 1  ;;  %v1494_v0 = vrot.slane %v1493_v42, 1  ;;  %v1511_v1 = vadd.f32 %v1510_v61, %v1509_v57  ;;  %v1488_v5 = vadd.f32 %v1487_v62, %v1486_v46 }
 0x1a5   : > { %v1506_v3 = vadd.f32 %v1505_v63, %v1504_v8  ;;  %v1512_v23 = vrot.slane %v1511_v1, 1  ;;  %v1495_v6 = vadd.f32 %v1494_v0, %v1493_v42 }
 0x1a7   : > { %v1513_v7 = vadd.f32 %v1512_v23, %v1511_v1  ;;  %v1514_v10 = vsel %vm549_vm0, %v1488_v5, %v1506_v3 }
 0x1a9   : > { %v1515_v4 = vsel %vm549_vm0, %v1495_v6, %v1513_v7 }
 0x1aa   : > { %v1518_v11 = vcombine.low %v1514_v10, %v1515_v4 }
 0x1ac   : > { %1873 = vst.sshfl [vmem:[%s480_s15] sm:$0x33 pattern:$0x76325410] %v1518_v11 }
 0x1ad PF: > { %s23_s21 = sadd.s32 1, %s1919_s21  }
 0x1ae   : > { %p20_p4 = scmp.ge.s32.totalorder %s23_s21, 4  }
 0x1b0   :  { %22 = sbr.rel (!%p20_p4) target bundleno = 1 (0x1), region = 119 }

// kernel: upblock_forward_nchw.8
= control target key start
LH: loop header
LB: loop body
LE: loop exit
PB: predicated region body
PF: predicated region fallthrough
CT: control target
= control target key end

     0   :  { %17 = vsyncpa [#allocation3], 0  ;;  %s2901_s0 = inlined_call_operand.vmem [shape: f32[2,16,256], index: 0, kind: input, shape index: {}]   ;;  %s2902_s1 = inlined_call_operand.vmem [shape: f32[1,256], index: 1, kind: input, shape index: {}]   ;;  %s2903_s2 = inlined_call_operand.vmem [shape: f32[1,256], index: 2, kind: input, shape index: {}]   ;;  %s2904_s3 = inlined_call_operand.vmem [shape: f32[3,256,256], index: 3, kind: input, shape index: {}]   ;;  %s2905_s4 = inlined_call_operand.vmem [shape: f32[1,256], index: 4, kind: input, shape index: {}]   ;;  %s2906_s5 = inlined_call_operand.vmem [shape: f32[2,16,256], index: 5, kind: input, shape index: {}]   ;;  %s2907_s6 = inlined_call_operand.vmem [shape: f32[2,16,128], index: 6, kind: input, shape index: {}]   ;;  %s2908_s7 = inlined_call_operand.vmem [shape: f32[256,256], index: 7, kind: input, shape index: {}]   ;;  %s2909_s8 = inlined_call_operand.vmem [shape: f32[128,256], index: 8, kind: input, shape index: {}]   ;;  %s2910_s9 = inlined_call_operand.vmem [shape: f32[1,256], index: 9, kind: input, shape index: {}]   ;;  %s2911_s10 = inlined_call_operand.vmem [shape: f32[2,16,256], index: 10, kind: output, shape index: {0}]   ;;  %s2912_s11 = inlined_call_operand.hbm [shape: f32[2,2,256], index: 11, kind: output, shape index: {1}]  }
   0x1   :  { %19 = vsyncpa [#allocation3 + $0x1], 0  ;;  %s1799_s17 = smov 0   ;;  %s1801_s18 = smov 0  }
   0x2   :  { %s1803_s19 = smov 0   ;;  %s1805_s20 = smov 0  }
   0x3 LB: > { %2916 = sst [smem:[#allocation5_spill]] %s1731_s19  ;;  %s1820_s21 = sadd.s32 4294967295, %s1735_s20   ;;  %s1735_s20 = sphi %s1805_s20, %s2923_s20   ;;  %s1731_s19 = sphi %s1803_s19, %s2925_s19   ;;  %s1727_s18 = sphi %s1801_s18, %s2927_s18   ;;  %s1723_s17 = sphi %s1799_s17, %s2926_s17  }
   0x4   : > { %s1459_s22 = sadd.s32 4294967294, %s1735_s20   ;;  %s1824_s23 = sadd.s32 1, %s1735_s20  }
   0x5   : > { %2917 = sst [smem:[#allocation6_spill]] %s1824_s23  ;;  %s283_s24 = sadd.s32 1, %s1731_s19 }
   0x6   : > { %s280_s25 = ssub.s32 %s1735_s20, %s1824_s23  ;;  %p293_p0 = scmp.ne.s32.totalorder %s1731_s19, %s1727_s18 }
   0x7   : > { %p281_p1 = scmp.eq.s32.totalorder %s280_s25, 0  ;;  %p294_p2 = scmp.eq.s32.totalorder %s1820_s21, 1 }
   0x8   : > { %p299_p3 = scmp.ne.s32.totalorder %s1727_s18, %s1723_s17  ;;  %p300_p4 = scmp.eq.s32.totalorder %s1459_s22, 1 }
   0x9   : > { %s1835_s26 = scalar_select %p281_p1, %s1731_s19, %s283_s24  }
   0xa   : > { %p1837_p5 = por %p294_p2, %p293_p0  ;;  %p1841_p6 = por %p300_p4, %p299_p3 }
   0xb   : > { %2918 = sst [smem:[#allocation7_spill]] %s1835_s26  ;;  %p1462_p7 = scmp.ge.s32.totalorder %s1735_s20, 1 }
   0xc   : > { %p363_p8 = scmp.lt.s32.totalorder %s1735_s20, 3 }
   0xe   : > { %p364_p9 = pnand %p1462_p7, %p363_p8 }
   0xf   : > { %p418_p10 = scmp.lt.s32.totalorder (!%p364_p9), %s1820_s21, 1 }
  0x10   : > { %367 = sbr.rel (%p364_p9) target bundleno = 435 (0x1b3), region = 60 }
  0x15   : > { %v1507_v0 = vld [vmem:[%s2904_s3 + $0x2f8] sm:$0xff]  ;;  %v1506_v2 = vld [vmem:[%s2904_s3 + $0x2f0] sm:$0xff]  ;;  %v1505_v4 = vld [vmem:[%s2904_s3 + $0x2e8] sm:$0xff]  ;;  %s2061_s29 = scalar_select %p418_p10, %s1820_s21, 1  ;;  %vm506_vm0 = vcmask 1040384   ;;  %vm656_vm2 = vcmask 1046528  }
  0x16   : > { %v554_v1 = vld [vmem:[%s2904_s3 + $0xf8] sm:$0xff]  ;;  %671 = vmatprep.subr.mxu0 %v1507_v0  ;;  %v553_v3 = vld [vmem:[%s2904_s3 + $0xf0] sm:$0xff]  ;;  %v552_v5 = vld [vmem:[%s2904_s3 + $0xe8] sm:$0xff]  ;;  %vm890_vm3 = vcmask 1045504  }
  0x17   : > { %748 = vmatprep.subr.mxu1 %v554_v1  ;;  %672 = vmatpush1.msra.mxu0 %v1506_v2  ;;  %v1504_v6 = vld [vmem:[%s2904_s3 + $0x2e0] sm:$0xff]  ;;  %v1503_v8 = vld [vmem:[%s2904_s3 + $0x2d8] sm:$0xff]  ;;  %v1502_v10 = vld [vmem:[%s2904_s3 + $0x2d0] sm:$0xff]  ;;  %s2088_s22 = sshll.u32 %s2061_s29, 5  ;;  %s1616_s14 = sshll.u32 %s2061_s29, 4 }
  0x18   : > { %749 = vmatpush1.msra.mxu1 %v553_v3  ;;  %v551_v7 = vld [vmem:[%s2904_s3 + $0xe0] sm:$0xff]  ;;  %673 = vmatprep.subr.mxu0 %v1505_v4  ;;  %v550_v9 = vld [vmem:[%s2904_s3 + $0xd8] sm:$0xff]  ;;  %v549_v11 = vld [vmem:[%s2904_s3 + $0xd0] sm:$0xff]  ;;  %s422_s23 = scalar_lea.vmem %s2901_s0, %s2088_s22  ;;  %s2522_s26 = scalar_lea.vmem %s2907_s6, %s1616_s14 }
  0x19   : > { %750 = vmatprep.subr.mxu1 %v552_v5  ;;  %674 = vmatpush1.msra.mxu0 %v1504_v6  ;;  %v1501_v12 = vld [vmem:[%s2904_s3 + $0x2c8] sm:$0xff]  ;;  %v1500_v14 = vld [vmem:[%s2904_s3 + $0x2c0] sm:$0xff]  ;;  %v1499_v16 = vld [vmem:[%s2904_s3 + $0x2b8] sm:$0xff]  ;;  %v444_v6 = vlaneseq  ;;  %s2762_s13 = scalar_lea.vmem %s2906_s5, %s2088_s22  ;;  %s437_s25 = scalar_lea.vmem %s2911_s10, %s2088_s22 }
  0x1a   : > { %751 = vmatpush1.msra.mxu1 %v551_v7  ;;  %v548_v13 = vld [vmem:[%s2904_s3 + $0xc8] sm:$0xff]  ;;  %675 = vmatprep.subr.mxu0 %v1503_v8  ;;  %v547_v15 = vld [vmem:[%s2904_s3 + $0xc0] sm:$0xff]  ;;  %v546_v17 = vld [vmem:[%s2904_s3 + $0xb8] sm:$0xff]  ;;  %s415_s22 = sand.u32 1, %s1727_s18  }
  0x1b   : > { %752 = vmatprep.subr.mxu1 %v550_v9  ;;  %676 = vmatpush1.msra.mxu0 %v1502_v10  ;;  %v1498_v18 = vld [vmem:[%s2904_s3 + $0x2b0] sm:$0xff]  ;;  %v1497_v20 = vld [vmem:[%s2904_s3 + $0x2a8] sm:$0xff]  ;;  %v1496_v22 = vld [vmem:[%s2904_s3 + $0x2a0] sm:$0xff]  ;;  %s1463_s30 = sshll.u32 %s415_s22, 2 }
  0x1c   : > { %753 = vmatpush1.msra.mxu1 %v549_v11  ;;  %677 = vmatprep.subr.mxu0 %v1501_v12  ;;  %v545_v19 = vld [vmem:[%s2904_s3 + $0xb0] sm:$0xff]  ;;  %v544_v21 = vld [vmem:[%s2904_s3 + $0xa8] sm:$0xff]  ;;  %v543_v23 = vld [vmem:[%s2904_s3 + $0xa0] sm:$0xff]  ;;  %s417_s29 = scalar_lea.vmem [#allocation2], %s1463_s30 }
  0x1d   : > { %754 = vmatprep.subr.mxu1 %v548_v13  ;;  %678 = vmatpush1.msra.mxu0 %v1500_v14  ;;  %v1495_v24 = vld [vmem:[%s2904_s3 + $0x298] sm:$0xff]  ;;  %v1494_v26 = vld [vmem:[%s2904_s3 + $0x290] sm:$0xff]  ;;  %v1493_v28 = vld [vmem:[%s2904_s3 + $0x288] sm:$0xff]  ;;  %s1351_s12 = sshll.u32 %s417_s29, 4  ;;  %s1352_s12 = int_to_ptr.vmem [resolvable:$true] %s1351_s12 }
  0x1e   : > { %755 = vmatpush1.msra.mxu1 %v547_v15  ;;  %679 = vmatprep.subr.mxu0 %v1499_v16  ;;  %v542_v25 = vld [vmem:[%s2904_s3 + $0x98] sm:$0xff]  ;;  %v541_v27 = vld [vmem:[%s2904_s3 + $0x90] sm:$0xff]  ;;  %v540_v29 = vld [vmem:[%s2904_s3 + $0x88] sm:$0xff]  ;;  %v445_v15 = vshrl.u32 %v444_v6, 7  ;;  %s1675_s19 = scalar_lea.vmem %s1352_s12, 64 }
  0x1f   : > { %756 = vmatprep.subr.mxu1 %v546_v17  ;;  %680 = vmatpush1.msra.mxu0 %v1498_v18  ;;  %v1492_v30 = vld [vmem:[%s2904_s3 + $0x280] sm:$0xff]  ;;  %v1491_v32 = vld [vmem:[%s2904_s3 + $0x278] sm:$0xff]  ;;  %v1490_v34 = vld [vmem:[%s2904_s3 + $0x270] sm:$0xff]  ;;  %p1676_p11 = scmp.ne.s32.totalorder %s1352_s12, %s1675_s19 }
  0x20   : > { %757 = vmatpush1.msra.mxu1 %v545_v19  ;;  %681 = vmatprep.subr.mxu0 %v1497_v20  ;;  %v539_v31 = vld [vmem:[%s2904_s3 + $0x80] sm:$0xff]  ;;  %v538_v33 = vld [vmem:[%s2904_s3 + $0x78] sm:$0xff]  ;;  %v537_v35 = vld [vmem:[%s2904_s3 + $0x70] sm:$0xff] }
  0x21   : > { %758 = vmatprep.subr.mxu1 %v544_v21  ;;  %682 = vmatpush1.msra.mxu0 %v1496_v22  ;;  %v1489_v36 = vld [vmem:[%s2904_s3 + $0x268] sm:$0xff]  ;;  %v1488_v38 = vld [vmem:[%s2904_s3 + $0x260] sm:$0xff]  ;;  %v1487_v40 = vld [vmem:[%s2904_s3 + $0x258] sm:$0xff]  ;;  %p1677_p12 = pnand %p1676_p11, %p1837_p5 }
  0x22   : > { %759 = vmatpush1.msra.mxu1 %v543_v23  ;;  %683 = vmatprep.subr.mxu0 %v1495_v24  ;;  %v536_v37 = vld [vmem:[%s2904_s3 + $0x68] sm:$0xff]  ;;  %v535_v39 = vld [vmem:[%s2904_s3 + $0x60] sm:$0xff]  ;;  %v534_v41 = vld [vmem:[%s2904_s3 + $0x58] sm:$0xff] }
  0x23   : > { %760 = vmatprep.subr.mxu1 %v542_v25  ;;  %684 = vmatpush1.msra.mxu0 %v1494_v26  ;;  %v1486_v42 = vld [vmem:[%s2904_s3 + $0x250] sm:$0xff]  ;;  %v1485_v44 = vld [vmem:[%s2904_s3 + $0x248] sm:$0xff]  ;;  %v1484_v46 = vld [vmem:[%s2904_s3 + $0x240] sm:$0xff]  ;;  %v2124_v26 = vsub.s32 1, %v445_v15  ;;  %p1678_p13 = pneg %p1677_p12 }
  0x24   : > { %761 = vmatpush1.msra.mxu1 %v541_v27  ;;  %685 = vmatprep.subr.mxu0 %v1493_v28  ;;  %v533_v43 = vld [vmem:[%s2904_s3 + $0x50] sm:$0xff]  ;;  %v532_v45 = vld [vmem:[%s2904_s3 + $0x48] sm:$0xff]  ;;  %v531_v47 = vld [vmem:[%s2904_s3 + $0x40] sm:$0xff]  ;;  %v2126_v27 = vsub.s32 0, %v445_v15 }
  0x25   : > { %762 = vmatprep.subr.mxu1 %v540_v29  ;;  %686 = vmatpush1.msra.mxu0 %v1492_v30  ;;  %v1483_v48 = vld [vmem:[%s2904_s3 + $0x238] sm:$0xff]  ;;  %v1482_v50 = vld [vmem:[%s2904_s3 + $0x230] sm:$0xff]  ;;  %v1481_v52 = vld [vmem:[%s2904_s3 + $0x228] sm:$0xff] }
  0x26   : > { %763 = vmatpush1.msra.mxu1 %v539_v31  ;;  %687 = vmatprep.subr.mxu0 %v1491_v32  ;;  %v530_v49 = vld [vmem:[%s2904_s3 + $0x38] sm:$0xff]  ;;  %v529_v51 = vld [vmem:[%s2904_s3 + $0x30] sm:$0xff]  ;;  %v528_v53 = vld [vmem:[%s2904_s3 + $0x28] sm:$0xff] }
  0x27   : > { %764 = vmatprep.subr.mxu1 %v538_v33  ;;  %688 = vmatpush1.msra.mxu0 %v1490_v34  ;;  %v1480_v54 = vld [vmem:[%s2904_s3 + $0x220] sm:$0xff]  ;;  %v1479_v56 = vld [vmem:[%s2904_s3 + $0x218] sm:$0xff]  ;;  %v1478_v58 = vld [vmem:[%s2904_s3 + $0x210] sm:$0xff] }
  0x28   : > { %765 = vmatpush1.msra.mxu1 %v537_v35  ;;  %689 = vmatprep.subr.mxu0 %v1489_v36  ;;  %v527_v55 = vld [vmem:[%s2904_s3 + $0x20] sm:$0xff]  ;;  %v526_v57 = vld [vmem:[%s2904_s3 + $0x18] sm:$0xff]  ;;  %v525_v59 = vld [vmem:[%s2904_s3 + $0x10] sm:$0xff] }
  0x29   : > { %766 = vmatprep.subr.mxu1 %v536_v37  ;;  %690 = vmatpush1.msra.mxu0 %v1488_v38  ;;  %v1477_v60 = vld [vmem:[%s2904_s3 + $0x208] sm:$0xff]  ;;  %v1476_v62 = vld [vmem:[%s2904_s3 + $0x200] sm:$0xff]  ;;  %v1539_v0 = vld [vmem:[%s2904_s3 + $0x3f8] sm:$0xff] }
  0x2a   : > { %767 = vmatpush1.msra.mxu1 %v535_v39  ;;  %691 = vmatprep.subr.mxu0 %v1487_v40  ;;  %v524_v61 = vld [vmem:[%s2904_s3 + $0x8] sm:$0xff]  ;;  %v523_v63 = vld [vmem:[%s2904_s3] sm:$0xff]  ;;  %v586_v1 = vld [vmem:[%s2904_s3 + $0x1f8] sm:$0xff] }
  0x2b   : > { %768 = vmatprep.subr.mxu1 %v534_v41  ;;  %692 = vmatpush1.msra.mxu0 %v1486_v42  ;;  %v1538_v2 = vld [vmem:[%s2904_s3 + $0x3f0] sm:$0xff]  ;;  %v1537_v4 = vld [vmem:[%s2904_s3 + $0x3e8] sm:$0xff]  ;;  %v1536_v7 = vld [vmem:[%s2904_s3 + $0x3e0] sm:$0xff] }
  0x2c   : > { %769 = vmatpush1.msra.mxu1 %v533_v43  ;;  %693 = vmatprep.subr.mxu0 %v1485_v44  ;;  %v585_v3 = vld [vmem:[%s2904_s3 + $0x1f0] sm:$0xff]  ;;  %v584_v5 = vld [vmem:[%s2904_s3 + $0x1e8] sm:$0xff]  ;;  %v583_v8 = vld [vmem:[%s2904_s3 + $0x1e0] sm:$0xff] }
  0x2d   : > { %770 = vmatprep.subr.mxu1 %v532_v45  ;;  %694 = vmatpush1.msra.mxu0 %v1484_v46  ;;  %v1535_v9 = vld [vmem:[%s2904_s3 + $0x3d8] sm:$0xff]  ;;  %v1534_v11 = vld [vmem:[%s2904_s3 + $0x3d0] sm:$0xff]  ;;  %v1533_v13 = vld [vmem:[%s2904_s3 + $0x3c8] sm:$0xff] }
  0x2e   : > { %771 = vmatpush1.msra.mxu1 %v531_v47  ;;  %695 = vmatprep.subr.mxu0 %v1483_v48  ;;  %v582_v10 = vld [vmem:[%s2904_s3 + $0x1d8] sm:$0xff]  ;;  %v581_v12 = vld [vmem:[%s2904_s3 + $0x1d0] sm:$0xff]  ;;  %v580_v14 = vld [vmem:[%s2904_s3 + $0x1c8] sm:$0xff] }
  0x2f   : > { %772 = vmatprep.subr.mxu1 %v530_v49  ;;  %696 = vmatpush1.msra.mxu0 %v1482_v50  ;;  %v1532_v16 = vld [vmem:[%s2904_s3 + $0x3c0] sm:$0xff]  ;;  %v1531_v18 = vld [vmem:[%s2904_s3 + $0x3b8] sm:$0xff]  ;;  %v1530_v20 = vld [vmem:[%s2904_s3 + $0x3b0] sm:$0xff] }
  0x30   : > { %773 = vmatpush1.msra.mxu1 %v529_v51  ;;  %697 = vmatprep.subr.mxu0 %v1481_v52  ;;  %v579_v17 = vld [vmem:[%s2904_s3 + $0x1c0] sm:$0xff]  ;;  %v578_v19 = vld [vmem:[%s2904_s3 + $0x1b8] sm:$0xff]  ;;  %v577_v21 = vld [vmem:[%s2904_s3 + $0x1b0] sm:$0xff] }
  0x31   : > { %774 = vmatprep.subr.mxu1 %v528_v53  ;;  %698 = vmatpush1.msra.mxu0 %v1480_v54  ;;  %v1529_v22 = vld [vmem:[%s2904_s3 + $0x3a8] sm:$0xff]  ;;  %v1528_v24 = vld [vmem:[%s2904_s3 + $0x3a0] sm:$0xff]  ;;  %v1527_v28 = vld [vmem:[%s2904_s3 + $0x398] sm:$0xff] }
  0x32   : > { %775 = vmatpush1.msra.mxu1 %v527_v55  ;;  %699 = vmatprep.subr.mxu0 %v1479_v56  ;;  %v576_v23 = vld [vmem:[%s2904_s3 + $0x1a8] sm:$0xff]  ;;  %v575_v25 = vld [vmem:[%s2904_s3 + $0x1a0] sm:$0xff]  ;;  %v574_v29 = vld [vmem:[%s2904_s3 + $0x198] sm:$0xff] }
  0x33   : > { %776 = vmatprep.subr.mxu1 %v526_v57  ;;  %700 = vmatpush1.msra.mxu0 %v1478_v58  ;;  %v1526_v30 = vld [vmem:[%s2904_s3 + $0x390] sm:$0xff]  ;;  %v1525_v32 = vld [vmem:[%s2904_s3 + $0x388] sm:$0xff]  ;;  %v441_v34 = vld [vmem:[%s422_s23 + $0x18] sm:$0xff] }
  0x34   : > { %777 = vmatpush1.msra.mxu1 %v525_v59  ;;  %701 = vmatprep.subr.mxu0 %v1477_v60  ;;  %v573_v31 = vld [vmem:[%s2904_s3 + $0x190] sm:$0xff]  ;;  %v439_v33 = vld [vmem:[%s422_s23 + $0x8] sm:$0xff]  ;;  %v442_v35 = vld [vmem:[%s2902_s1] sm:$0x3] }
  0x35   : > { %778 = vmatprep.subr.mxu1 %v524_v61  ;;  %702 = vmatpush1.msra.mxu0 %v1476_v62  ;;  %v458_v36 = vld [vmem:[%s2903_s2] sm:$0x3]  ;;  %v572_v37 = vld [vmem:[%s2904_s3 + $0x188] sm:$0xff]  ;;  %v451_v38 = vrot.slane %v442_v35, %v2124_v26  ;;  %v440_v41 = vld [vmem:[%s422_s23 + $0x10] sm:$0xff]  ;;  %v447_v42 = vrot.slane %v442_v35, %v2126_v27 }
  0x36   : > { %779 = vmatpush1.msra.mxu1 %v523_v63  ;;  %703 = vmatprep.subr.mxu0 %v1539_v0  ;;  %v467_v39 = vrot.slane %v458_v36, %v2124_v26  ;;  %v438_v40 = vld [vmem:[%s422_s23] sm:$0xff]  ;;  %v463_v45 = vrot.slane %v458_v36, %v2126_v27  ;;  %v1523_v46 = vld [vmem:[%s2904_s3 + $0x378] sm:$0xff]  ;;  %v1522_v51 = vld [vmem:[%s2904_s3 + $0x370] sm:$0xff]  ;;  %s1618_s23 = sshll.u32 %s1820_s21, 6  ;;  %s1738_s21 = smov [#allocation2]  }
  0x37   : > { %780 = vmatprep.subr.mxu1 %v586_v1  ;;  %704 = vmatpush2.msra.mxu0 %v1538_v2  ;;  %v1524_v43 = vld [vmem:[%s2904_s3 + $0x380] sm:$0xff]  ;;  %v570_v47 = vld [vmem:[%s2904_s3 + $0x178] sm:$0xff]  ;;  %v455_v48 = vmul.f32 %v451_v38, %v439_v33  ;;  %v457_v49 = vmul.f32 %v451_v38, %v441_v34  ;;  %v454_v50 = vmul.f32 %v447_v42, %v438_v40  ;;  %v569_v52 = vld [vmem:[%s2904_s3 + $0x170] sm:$0xff]  ;;  %s1349_s15 = scalar_lea.hbm %s2912_s11, %s1618_s23  ;;  %s1679_s16 = sshll.u32 %s1738_s21, 4  ;;  %s1680_s16 = int_to_ptr.vmem [resolvable:$false] %s1679_s16 }
  0x38   : > { %781 = vmatpush2.msra.mxu1 %v585_v3  ;;  %705 = vmatprep.subr.mxu0 %v1537_v4  ;;  %v571_v44 = vld [vmem:[%s2904_s3 + $0x180] sm:$0xff]  ;;  %v456_v53 = vmul.f32 %v447_v42, %v440_v41  ;;  %v1521_v54 = vld [vmem:[%s2904_s3 + $0x368] sm:$0xff]  ;;  %v1519_v61 = vld [vmem:[%s2904_s3 + $0x358] sm:$0xff]  ;;  %s1681_s24 = scalar_lea.vmem %s1680_s16, 128  ;;  %p1682_p0 = scmp.lt.s32.totalorder %s1352_s12, %s1680_s16 }
  0x39   : > { %782 = vmatprep.subr.mxu1 %v584_v5  ;;  %706 = vmatpush2.msra.mxu0 %v1536_v7  ;;  %v568_v55 = vld [vmem:[%s2904_s3 + $0x168] sm:$0xff]  ;;  %v1520_v56 = vld [vmem:[%s2904_s3 + $0x360] sm:$0xff]  ;;  %v2183_v57 = vadd.f32 %v467_v39, %v455_v48  ;;  %v2185_v58 = vadd.f32 %v467_v39, %v457_v49  ;;  %v2187_v59 = vadd.f32 %v463_v45, %v454_v50  ;;  %v566_v62 = vld [vmem:[%s2904_s3 + $0x158] sm:$0xff]  ;;  %p1683_p1 = scmp.lt.s32.totalorder %s1681_s24, %s1675_s19 }
  0x3a   : > { %783 = vmatpush2.msra.mxu1 %v583_v8  ;;  %707 = vmatprep.subr.mxu0 %v1535_v9  ;;  %v567_v60 = vld [vmem:[%s2904_s3 + $0x160] sm:$0xff]  ;;  %v2198_v63 = vadd.f32 %v463_v45, %v456_v53  ;;  %v1518_v3 = vld [vmem:[%s2904_s3 + $0x350] sm:$0xff]  ;;  %v1517_v6 = vld [vmem:[%s2904_s3 + $0x348] sm:$0xff] }
  0x3b   : > { %784 = vmatprep.subr.mxu1 %v582_v10  ;;  %708 = vmatpush2.msra.mxu0 %v1534_v11  ;;  %v1473_v0 = vmul.f32 -1.442695, %v2183_v57  ;;  %v1475_v1 = vmul.f32 -1.442695, %v2185_v58  ;;  %v1472_v2 = vmul.f32 -1.442695, %v2187_v59  ;;  %vm2281_vm1 = vmneg %vm506_vm0  ;;  %p1684_p2 = por %p1683_p1, %p1682_p0 }
  0x3c   : > { %785 = vmatpush2.msra.mxu1 %v581_v12  ;;  %709 = vmatprep.subr.mxu0 %v1533_v13  ;;  %v565_v4 = vld [vmem:[%s2904_s3 + $0x150] sm:$0xff]  ;;  %v1474_v5 = vmul.f32 -1.442695, %v2198_v63  ;;  %v564_v7 = vld [vmem:[%s2904_s3 + $0x148] sm:$0xff]  ;;  %v1516_v8 = vld [vmem:[%s2904_s3 + $0x340] sm:$0xff] }
  0x3d   : > { %786 = vmatprep.subr.mxu1 %v580_v14  ;;  %710 = vmatpush2.msra.mxu0 %v1532_v16  ;;  %1659 = vpow2.f32 %v1473_v0  ;;  %v563_v9 = vld [vmem:[%s2904_s3 + $0x140] sm:$0xff]  ;;  %v1515_v10 = vld [vmem:[%s2904_s3 + $0x338] sm:$0xff]  ;;  %v1514_v12 = vld [vmem:[%s2904_s3 + $0x330] sm:$0xff]  ;;  %p1685_p3 = pnand %p1684_p2, %p1678_p13 }
  0x3e   : > { %787 = vmatpush2.msra.mxu1 %v579_v17  ;;  %711 = vmatprep.subr.mxu0 %v1531_v18  ;;  %1661 = vpow2.f32 %v1475_v1  ;;  %v562_v11 = vld [vmem:[%s2904_s3 + $0x138] sm:$0xff]  ;;  %v561_v13 = vld [vmem:[%s2904_s3 + $0x130] sm:$0xff]  ;;  %v1513_v14 = vld [vmem:[%s2904_s3 + $0x328] sm:$0xff] }
  0x3f   : > { %788 = vmatprep.subr.mxu1 %v578_v19  ;;  %712 = vmatpush2.msra.mxu0 %v1530_v20  ;;  %1663 = vpow2.f32 %v1472_v2  ;;  %v560_v15 = vld [vmem:[%s2904_s3 + $0x128] sm:$0xff]  ;;  %v1512_v16 = vld [vmem:[%s2904_s3 + $0x320] sm:$0xff]  ;;  %v1511_v18 = vld [vmem:[%s2904_s3 + $0x318] sm:$0xff] }
  0x40   : > { %789 = vmatpush2.msra.mxu1 %v577_v21  ;;  %713 = vmatprep.subr.mxu0 %v1529_v22  ;;  %1665 = vpow2.f32 %v1474_v5  ;;  %v559_v17 = vld [vmem:[%s2904_s3 + $0x120] sm:$0xff]  ;;  %v558_v19 = vld [vmem:[%s2904_s3 + $0x118] sm:$0xff]  ;;  %v1510_v20 = vld [vmem:[%s2904_s3 + $0x310] sm:$0xff] }
  0x41   : > { %790 = vmatprep.subr.mxu1 %v576_v23  ;;  %714 = vmatpush2.msra.mxu0 %v1528_v24  ;;  %v557_v21 = vld [vmem:[%s2904_s3 + $0x110] sm:$0xff]  ;;  %v1509_v22 = vld [vmem:[%s2904_s3 + $0x308] sm:$0xff]  ;;  %v1508_v24 = vld [vmem:[%s2904_s3 + $0x300] sm:$0xff] }
  0x42   : > { %791 = vmatpush2.msra.mxu1 %v575_v25  ;;  %715 = vmatprep.subr.mxu0 %v1527_v28  ;;  %v556_v23 = vld [vmem:[%s2904_s3 + $0x108] sm:$0xff]  ;;  %v555_v25 = vld [vmem:[%s2904_s3 + $0x100] sm:$0xff]  ;;  %v1575_v28 = vld [vmem:[%s2904_s3 + $0x4f8] sm:$0xff] }
  0x43   : > { %792 = vmatprep.subr.mxu1 %v574_v29  ;;  %716 = vmatpush2.msra.mxu0 %v1526_v30  ;;  %v1087_v29 = vld [vmem:[%s2909_s8 + $0xf8] sm:$0xff]  ;;  %v1082_v2 = vld [vmem:[%s2909_s8 + $0xd0] sm:$0xff] }
  0x44   : > { %793 = vmatpush2.msra.mxu1 %v573_v31  ;;  %717 = vmatprep.subr.mxu0 %v1525_v32 }
  0x45   : > { %794 = vmatprep.subr.mxu1 %v572_v37  ;;  %718 = vmatpush2.msra.mxu0 %v1524_v43  ;;  %v1558_v43 = vld [vmem:[%s2904_s3 + $0x470] sm:$0xff] }
  0x46   : > { %795 = vmatpush2.msra.mxu1 %v571_v44  ;;  %719 = vmatprep.subr.mxu0 %v1523_v46 }
  0x47   : > { %796 = vmatprep.subr.mxu1 %v570_v47  ;;  %720 = vmatpush2.msra.mxu0 %v1522_v51  ;;  %v1086_v51 = vld [vmem:[%s2909_s8 + $0xf0] sm:$0xff] }
  0x48   : > { %797 = vmatpush2.msra.mxu1 %v569_v52  ;;  %721 = vmatprep.subr.mxu0 %v1521_v54 }
  0x49   : > { %798 = vmatprep.subr.mxu1 %v568_v55  ;;  %722 = vmatpush2.msra.mxu0 %v1520_v56  ;;  %v1085_v55 = vld [vmem:[%s2909_s8 + $0xe8] sm:$0xff] }
  0x4a   : > { %799 = vmatpush2.msra.mxu1 %v567_v60  ;;  %723 = vmatprep.subr.mxu0 %v1519_v61  ;;  %v1660_v30 = vpop.eup %1659 }
  0x4b   : > { %800 = vmatprep.subr.mxu1 %v566_v62  ;;  %724 = vmatpush2.msra.mxu0 %v1518_v3  ;;  %v1662_v31 = vpop.eup %1661  ;;  %v487_v32 = vadd.f32 1.0, %v1660_v30  ;;  %v1083_v62 = vld [vmem:[%s2909_s8 + $0xd8] sm:$0xff]  ;;  %v1574_v3 = vld [vmem:[%s2904_s3 + $0x4f0] sm:$0xff]  ;;  %v1564_v30 = vld [vmem:[%s2904_s3 + $0x4a0] sm:$0xff] }
  0x4c   : > { %801 = vmatpush2.msra.mxu1 %v565_v4  ;;  %725 = vmatprep.subr.mxu0 %v1517_v6  ;;  %v1664_v33 = vpop.eup %1663  ;;  %v489_v34 = vadd.f32 1.0, %v1662_v31  ;;  %v1081_v4 = vld [vmem:[%s2909_s8 + $0xc8] sm:$0xff]  ;;  %v1071_v31 = vld [vmem:[%s2909_s8 + $0x78] sm:$0xff] }
  0x4d   : > { %802 = vmatprep.subr.mxu1 %v564_v7  ;;  %726 = vmatpush2.msra.mxu0 %v1516_v8  ;;  %v1666_v35 = vpop.eup %1665  ;;  %1667 = vrcp.f32 %v487_v32  ;;  %v486_v36 = vadd.f32 1.0, %v1664_v33  ;;  %v1573_v8 = vld [vmem:[%s2904_s3 + $0x4e8] sm:$0xff]  ;;  %v1563_v32 = vld [vmem:[%s2904_s3 + $0x498] sm:$0xff]  ;;  %v1070_v33 = vld [vmem:[%s2909_s8 + $0x70] sm:$0xff] }
  0x4e   : > { %803 = vmatpush2.msra.mxu1 %v563_v9  ;;  %727 = vmatprep.subr.mxu0 %v1515_v10  ;;  %1669 = vrcp.f32 %v489_v34  ;;  %v488_v37 = vadd.f32 1.0, %v1666_v35  ;;  %v1080_v9 = vld [vmem:[%s2909_s8 + $0xc0] sm:$0xff]  ;;  %v1562_v34 = vld [vmem:[%s2904_s3 + $0x490] sm:$0xff]  ;;  %v1069_v35 = vld [vmem:[%s2909_s8 + $0x68] sm:$0xff] }
  0x4f   : > { %804 = vmatprep.subr.mxu1 %v562_v11  ;;  %728 = vmatpush2.msra.mxu0 %v1514_v12  ;;  %1671 = vrcp.f32 %v486_v36  ;;  %v1572_v10 = vld [vmem:[%s2904_s3 + $0x4e0] sm:$0xff]  ;;  %v1079_v11 = vld [vmem:[%s2909_s8 + $0xb8] sm:$0xff]  ;;  %v1561_v36 = vld [vmem:[%s2904_s3 + $0x488] sm:$0xff] }
  0x50   : > { %805 = vmatpush2.msra.mxu1 %v561_v13  ;;  %729 = vmatprep.subr.mxu0 %v1513_v14  ;;  %1673 = vrcp.f32 %v488_v37  ;;  %v1571_v14 = vld [vmem:[%s2904_s3 + $0x4d8] sm:$0xff]  ;;  %v1068_v37 = vld [vmem:[%s2909_s8 + $0x60] sm:$0xff] }
  0x51   : > { %806 = vmatprep.subr.mxu1 %v560_v15  ;;  %730 = vmatpush2.msra.mxu0 %v1512_v16  ;;  %v1078_v15 = vld [vmem:[%s2909_s8 + $0xb0] sm:$0xff] }
  0x52   : > { %807 = vmatpush2.msra.mxu1 %v559_v17  ;;  %731 = vmatprep.subr.mxu0 %v1511_v18  ;;  %v1570_v16 = vld [vmem:[%s2904_s3 + $0x4d0] sm:$0xff]  ;;  %v1077_v17 = vld [vmem:[%s2909_s8 + $0xa8] sm:$0xff] }
  0x53   : > { %808 = vmatprep.subr.mxu1 %v558_v19  ;;  %732 = vmatpush2.msra.mxu0 %v1510_v20  ;;  %v1569_v18 = vld [vmem:[%s2904_s3 + $0x4c8] sm:$0xff]  ;;  %v1076_v19 = vld [vmem:[%s2909_s8 + $0xa0] sm:$0xff] }
  0x54   : > { %809 = vmatpush2.msra.mxu1 %v557_v21  ;;  %733 = vmatprep.subr.mxu0 %v1509_v22  ;;  %v1568_v20 = vld [vmem:[%s2904_s3 + $0x4c0] sm:$0xff]  ;;  %v1075_v21 = vld [vmem:[%s2909_s8 + $0x98] sm:$0xff] }
  0x55   : > { %810 = vmatprep.subr.mxu1 %v556_v23  ;;  %734 = vmatpush2.msra.mxu0 %v1508_v24  ;;  %v1567_v22 = vld [vmem:[%s2904_s3 + $0x4b8] sm:$0xff]  ;;  %v1074_v23 = vld [vmem:[%s2909_s8 + $0x90] sm:$0xff] }
  0x56   : > { %811 = vmatpush2.msra.mxu1 %v555_v25  ;;  %905 = vmatprep.subr.mxu0 %v1575_v28  ;;  %v1566_v24 = vld [vmem:[%s2904_s3 + $0x4b0] sm:$0xff]  ;;  %v1073_v25 = vld [vmem:[%s2909_s8 + $0x88] sm:$0xff] }
  0x57   : > { %1088 = vmatprep.subr.mxu1 %v1087_v29  ;;  %v1565_v28 = vld [vmem:[%s2904_s3 + $0x4a8] sm:$0xff]  ;;  %v1072_v29 = vld [vmem:[%s2909_s8 + $0x80] sm:$0xff] }
  0x5a   : > { %v1668_v38 = vpop.eup %1667 }
  0x5b   : > { %v1670_v39 = vpop.eup %1669  ;;  %v499_v40 = vmul.f32 %v1668_v38, %v2183_v57 }
  0x5c   : > { %v1672_v41 = vpop.eup %1671  ;;  %v2278_v42 = vmul.f32 %v1670_v39, %v2185_v58  ;;  %v1084_v58 = vld [vmem:[%s2909_s8 + $0xe0] sm:$0xff] }
  0x5d   : > { %v1674_v44 = vpop.eup %1673  ;;  %v508_v45 = vrot.slane %v499_v40, 7  ;;  %v498_v46 = vmul.f32 %v1672_v41, %v2187_v59  ;;  %v1560_v39 = vld [vmem:[%s2904_s3 + $0x480] sm:$0xff]  ;;  %v1067_v40 = vld [vmem:[%s2909_s8 + $0x58] sm:$0xff] }
  0x5e   : > { %v511_v47 = vrot.slane %v2278_v42, 7  ;;  %v2288_v48 = vmul.f32 %v1674_v44, %v2198_v63  ;;  %v1559_v41 = vld [vmem:[%s2904_s3 + $0x478] sm:$0xff]  ;;  %v1066_v42 = vld [vmem:[%s2909_s8 + $0x50] sm:$0xff]  ;;  %v1065_v44 = vld [vmem:[%s2909_s8 + $0x48] sm:$0xff] }
  0x5f   : > { %v520_v49 = vsel %vm506_vm0, 0.0, %v508_v45  ;;  %1541 = vmatprep.mubr.msk.f32.mxu1 %vm2281_vm1, %v508_v45  ;;  %v507_v50 = vrot.slane %v498_v46, 7 }
  0x60   : > { %v2299_v52 = vsel %vm506_vm0, %v508_v45, %v511_v47  ;;  %v660_v53 = vrot.slane %v520_v49, 1  ;;  %v509_v54 = vrot.slane %v2288_v48, 7  ;;  %v894_v63 = vrot.slane %v520_v49, 2  ;;  %v1064_v49 = vld [vmem:[%s2909_s8 + $0x40] sm:$0xff]  ;;  %v1063_v48 = vld [vmem:[%s2909_s8 + $0x38] sm:$0xff] }
  0x61   : > { %v661_v56 = vrot.slane %v2299_v52, 1  ;;  %v519_v57 = vsel %vm506_vm0, 0.0, %v507_v50  ;;  %1543 = vmatmul.mubr.msk.f32.vlgmr.msra.gmra.mxu1 %vm2281_vm1, %v507_v50  ;;  %v895_v5 = vrot.slane %v2299_v52, 2  ;;  %v2431_v38 = vsel %vm506_vm0, %v511_v47, 0.0  ;;  %v1557_v47 = vld [vmem:[%s2904_s3 + $0x468] sm:$0xff] }
  0x62   : > { %v2315_v59 = vsel %vm506_vm0, %v507_v50, %v509_v54  ;;  %v657_v60 = vrot.slane %v519_v57, 1  ;;  %v891_v61 = vrot.slane %v519_v57, 2  ;;  %1089 = vmatpush1.msra.mxu1 %v1086_v51  ;;  %818 = vmatprep.mubr.f32.mxu1 %v2299_v52  ;;  %v665_v45 = vrot.slane %v2431_v38, 1  ;;  %v1556_v50 = vld [vmem:[%s2904_s3 + $0x460] sm:$0xff]  ;;  %v1555_v51 = vld [vmem:[%s2904_s3 + $0x458] sm:$0xff] }
  0x63   : > { %v662_v0 = vsel %vm656_vm2, %v660_v53, %v661_v56  ;;  %v658_v1 = vrot.slane %v2315_v59, 1  ;;  %1090 = vmatprep.subr.mxu1 %v1085_v55  ;;  %v892_v6 = vrot.slane %v2315_v59, 2  ;;  %v2355_v12 = vsel %vm890_vm3, %v894_v63, %v895_v5  ;;  %v1062_v53 = vld [vmem:[%s2909_s8 + $0x30] sm:$0xff] }
  0x64   : > { %735 = vmatprep.mubr.f32.mxu0 %v662_v0  ;;  %1091 = vmatpush1.msra.mxu1 %v1084_v58  ;;  %v2455_v46 = vsel %vm506_vm0, %v509_v54, 0.0  ;;  %v1554_v55 = vld [vmem:[%s2904_s3 + $0x450] sm:$0xff]  ;;  %v666_v57 = vsel %vm656_vm2, %v661_v56, %v665_v45  ;;  %v1553_v58 = vld [vmem:[%s2904_s3 + $0x448] sm:$0xff]  ;;  %v1060_v56 = vld [vmem:[%s2909_s8 + $0x20] sm:$0xff] }
  0x65   : > { %v659_v7 = vsel %vm656_vm2, %v657_v60, %v658_v1  ;;  %1092 = vmatprep.subr.mxu1 %v1083_v62  ;;  %819 = vmatmul.mubr.f32.gmra.mxu1 %v2315_v59  ;;  %v2360_v13 = vsel %vm890_vm3, %v891_v61, %v892_v6  ;;  %v663_v54 = vrot.slane %v2455_v46, 1  ;;  %v1061_v60 = vld [vmem:[%s2909_s8 + $0x28] sm:$0xff]  ;;  %v1552_v61 = vld [vmem:[%s2904_s3 + $0x440] sm:$0xff]  ;;  %v1551_v62 = vld [vmem:[%s2904_s3 + $0x438] sm:$0xff] }
  0x66   : > { %736 = vmatmul.mubr.f32.vlgmr.msra.gmra.mxu0 %v659_v7  ;;  %1093 = vmatpush1.msra.mxu1 %v1082_v2  ;;  %v1550_v0 = vld [vmem:[%s2904_s3 + $0x430] sm:$0xff]  ;;  %v1059_v2 = vld [vmem:[%s2909_s8 + $0x18] sm:$0xff]  ;;  %v1057_v7 = vld [vmem:[%s2909_s8 + $0x8] sm:$0xff] }
  0x67   : > { %906 = vmatpush1.msra.mxu0 %v1574_v3  ;;  %1094 = vmatprep.subr.mxu1 %v1081_v4  ;;  %v664_v63 = vsel %vm656_vm2, %v658_v1, %v663_v54  ;;  %v1549_v3 = vld [vmem:[%s2904_s3 + $0x428] sm:$0xff]  ;;  %v1058_v1 = vld [vmem:[%s2909_s8 + $0x10] sm:$0xff]  ;;  %v1548_v4 = vld [vmem:[%s2904_s3 + $0x420] sm:$0xff] }
  0x68   : > { %907 = vmatprep.subr.mxu0 %v1573_v8  ;;  %1095 = vmatpush1.msra.mxu1 %v1080_v9  ;;  %v1547_v8 = vld [vmem:[%s2904_s3 + $0x418] sm:$0xff]  ;;  %v1056_v9 = vld [vmem:[%s2909_s8] sm:$0xff]  ;;  %v1047_v59 = vld [vmem:[%s2908_s7 + $0x1c8] sm:$0xff] }
  0x69   : > { %908 = vmatpush1.msra.mxu0 %v1572_v10  ;;  %1096 = vmatprep.subr.mxu1 %v1079_v11  ;;  %v1546_v10 = vld [vmem:[%s2904_s3 + $0x410] sm:$0xff]  ;;  %v1545_v11 = vld [vmem:[%s2904_s3 + $0x408] sm:$0xff]  ;;  %v1595_v45 = vld [vmem:[%s2904_s3 + $0x598] sm:$0xff] }
  0x6a   : > { %909 = vmatprep.subr.mxu0 %v1571_v14  ;;  %1097 = vmatpush1.msra.mxu1 %v1078_v15  ;;  %v1054_v14 = vld [vmem:[%s2522_s26] sm:$0xff]  ;;  %v1005_v54 = vld [vmem:[%s2908_s7 + $0x78] sm:$0xff] }
  0x6b   : > { %910 = vmatpush1.msra.mxu0 %v1570_v16  ;;  %1098 = vmatprep.subr.mxu1 %v1077_v17  ;;  %v1544_v15 = vld [vmem:[%s2904_s3 + $0x400] sm:$0xff]  ;;  %v1021_v16 = vld [vmem:[%s2908_s7 + $0xf8] sm:$0xff]  ;;  %v1737_v17 = vmov 0.0  }
  0x6c   : > { %911 = vmatprep.subr.mxu0 %v1569_v18  ;;  %1099 = vmatpush1.msra.mxu1 %v1076_v19  ;;  %v1607_v18 = vld [vmem:[%s2904_s3 + $0x5f8] sm:$0xff]  ;;  %v1020_v19 = vld [vmem:[%s2908_s7 + $0xf0] sm:$0xff] }
  0x6d   : > { %912 = vmatpush1.msra.mxu0 %v1568_v20  ;;  %1100 = vmatprep.subr.mxu1 %v1075_v21  ;;  %v1606_v20 = vld [vmem:[%s2904_s3 + $0x5f0] sm:$0xff]  ;;  %v1019_v21 = vld [vmem:[%s2908_s7 + $0xe8] sm:$0xff] }
  0x6e   : > { %913 = vmatprep.subr.mxu0 %v1567_v22  ;;  %1101 = vmatpush1.msra.mxu1 %v1074_v23  ;;  %v1605_v22 = vld [vmem:[%s2904_s3 + $0x5e8] sm:$0xff]  ;;  %v1018_v23 = vld [vmem:[%s2908_s7 + $0xe0] sm:$0xff] }
  0x6f   : > { %914 = vmatpush1.msra.mxu0 %v1566_v24  ;;  %1102 = vmatprep.subr.mxu1 %v1073_v25  ;;  %v1604_v24 = vld [vmem:[%s2904_s3 + $0x5e0] sm:$0xff]  ;;  %v1017_v25 = vld [vmem:[%s2908_s7 + $0xd8] sm:$0xff] }
  0x70   : > { %915 = vmatprep.subr.mxu0 %v1565_v28  ;;  %1103 = vmatpush1.msra.mxu1 %v1072_v29  ;;  %v1603_v28 = vld [vmem:[%s2904_s3 + $0x5d8] sm:$0xff]  ;;  %v1016_v29 = vld [vmem:[%s2908_s7 + $0xd0] sm:$0xff] }
  0x71   : > { %916 = vmatpush1.msra.mxu0 %v1564_v30  ;;  %1104 = vmatprep.subr.mxu1 %v1071_v31  ;;  %v1602_v30 = vld [vmem:[%s2904_s3 + $0x5d0] sm:$0xff]  ;;  %v1015_v31 = vld [vmem:[%s2908_s7 + $0xc8] sm:$0xff] }
  0x72   : > { %917 = vmatprep.subr.mxu0 %v1563_v32  ;;  %1105 = vmatpush1.msra.mxu1 %v1070_v33  ;;  %v1601_v32 = vld [vmem:[%s2904_s3 + $0x5c8] sm:$0xff]  ;;  %v1014_v33 = vld [vmem:[%s2908_s7 + $0xc0] sm:$0xff] }
  0x73   : > { %918 = vmatpush1.msra.mxu0 %v1562_v34  ;;  %1106 = vmatprep.subr.mxu1 %v1069_v35  ;;  %v1600_v34 = vld [vmem:[%s2904_s3 + $0x5c0] sm:$0xff]  ;;  %v1013_v35 = vld [vmem:[%s2908_s7 + $0xb8] sm:$0xff] }
  0x74   : > { %919 = vmatprep.subr.mxu0 %v1561_v36  ;;  %1107 = vmatpush1.msra.mxu1 %v1068_v37  ;;  %v1599_v36 = vld [vmem:[%s2904_s3 + $0x5b8] sm:$0xff]  ;;  %v1012_v37 = vld [vmem:[%s2908_s7 + $0xb0] sm:$0xff] }
  0x75   : > { %920 = vmatpush1.msra.mxu0 %v1560_v39  ;;  %1108 = vmatprep.subr.mxu1 %v1067_v40  ;;  %v1598_v39 = vld [vmem:[%s2904_s3 + $0x5b0] sm:$0xff]  ;;  %v1011_v40 = vld [vmem:[%s2908_s7 + $0xa8] sm:$0xff] }
  0x76   : > { %921 = vmatprep.subr.mxu0 %v1559_v41  ;;  %1109 = vmatpush1.msra.mxu1 %v1066_v42  ;;  %v1597_v41 = vld [vmem:[%s2904_s3 + $0x5a8] sm:$0xff]  ;;  %v1010_v42 = vld [vmem:[%s2908_s7 + $0xa0] sm:$0xff] }
  0x77   : > { %922 = vmatpush1.msra.mxu0 %v1558_v43  ;;  %1110 = vmatprep.subr.mxu1 %v1065_v44  ;;  %v1596_v43 = vld [vmem:[%s2904_s3 + $0x5a0] sm:$0xff]  ;;  %v1009_v44 = vld [vmem:[%s2908_s7 + $0x98] sm:$0xff] }
  0x78   : > { %923 = vmatprep.subr.mxu0 %v1557_v47  ;;  %1111 = vmatpush1.msra.mxu1 %v1064_v49  ;;  %v1008_v47 = vld [vmem:[%s2908_s7 + $0x90] sm:$0xff] }
  0x79   : > { %924 = vmatpush1.msra.mxu0 %v1556_v50  ;;  %1112 = vmatprep.subr.mxu1 %v1063_v48  ;;  %v1594_v49 = vld [vmem:[%s2904_s3 + $0x590] sm:$0xff]  ;;  %v1007_v50 = vld [vmem:[%s2908_s7 + $0x88] sm:$0xff] }
  0x7a   : > { %925 = vmatprep.subr.mxu0 %v1555_v51  ;;  %1113 = vmatpush1.msra.mxu1 %v1062_v53  ;;  %v1593_v48 = vld [vmem:[%s2904_s3 + $0x588] sm:$0xff]  ;;  %v1006_v51 = vld [vmem:[%s2908_s7 + $0x80] sm:$0xff] }
  0x7b   : > { %926 = vmatpush1.msra.mxu0 %v1554_v55  ;;  %741 = vmatprep.mubr.f32.mxu0 %v666_v57  ;;  %v1592_v53 = vld [vmem:[%s2904_s3 + $0x580] sm:$0xff]  ;;  %v1591_v55 = vld [vmem:[%s2904_s3 + $0x578] sm:$0xff]  ;;  %v1004_v57 = vld [vmem:[%s2908_s7 + $0x70] sm:$0xff] }
  0x7c   : > { %927 = vmatprep.subr.mxu0 %v1553_v58  ;;  %1114 = vmatprep.subr.mxu1 %v1061_v60  ;;  %v1590_v58 = vld [vmem:[%s2904_s3 + $0x570] sm:$0xff]  ;;  %v1003_v60 = vld [vmem:[%s2908_s7 + $0x68] sm:$0xff] }
  0x7d   : > { %928 = vmatpush1.msra.mxu0 %v1552_v61  ;;  %1115 = vmatpush1.msra.mxu1 %v1060_v56  ;;  %v1589_v61 = vld [vmem:[%s2904_s3 + $0x568] sm:$0xff]  ;;  %v1002_v56 = vld [vmem:[%s2908_s7 + $0x60] sm:$0xff] }
  0x7e   : > { %929 = vmatprep.subr.mxu0 %v1551_v62  ;;  %742 = vmatmul.mubr.f32.gmra.mxu0 %v664_v63  ;;  %v1588_v62 = vld [vmem:[%s2904_s3 + $0x560] sm:$0xff]  ;;  %v1001_v63 = vld [vmem:[%s2908_s7 + $0x58] sm:$0xff] }
  0x7f   : > { %930 = vmatpush1.msra.mxu0 %v1550_v0  ;;  %1116 = vmatprep.subr.mxu1 %v1059_v2  ;;  %v1587_v0 = vld [vmem:[%s2904_s3 + $0x558] sm:$0xff]  ;;  %v1000_v2 = vld [vmem:[%s2908_s7 + $0x50] sm:$0xff] }
  0x80   : > { %931 = vmatprep.subr.mxu0 %v1549_v3  ;;  %1117 = vmatpush1.msra.mxu1 %v1058_v1  ;;  %v1586_v3 = vld [vmem:[%s2904_s3 + $0x550] sm:$0xff]  ;;  %v999_v1 = vld [vmem:[%s2908_s7 + $0x48] sm:$0xff] }
  0x81   : > { %932 = vmatpush1.msra.mxu0 %v1548_v4  ;;  %1118 = vmatprep.subr.mxu1 %v1057_v7  ;;  %v1585_v4 = vld [vmem:[%s2904_s3 + $0x548] sm:$0xff]  ;;  %v998_v7 = vld [vmem:[%s2908_s7 + $0x40] sm:$0xff] }
  0x82   : > { %933 = vmatprep.subr.mxu0 %v1547_v8  ;;  %1119 = vmatpush1.msra.mxu1 %v1056_v9  ;;  %v1584_v8 = vld [vmem:[%s2904_s3 + $0x540] sm:$0xff]  ;;  %v997_v9 = vld [vmem:[%s2908_s7 + $0x38] sm:$0xff] }
  0x83   : > { %934 = vmatpush1.msra.mxu0 %v1546_v10  ;;  %1152 = vmatprep.mubr.f32.mxu1 %v1737_v17  ;;  %v1583_v10 = vld [vmem:[%s2904_s3 + $0x538] sm:$0xff] }
  0x84   : > { %935 = vmatprep.subr.mxu0 %v1545_v11  ;;  %1153 = vmatmul.mubr.f32.vlgmr.msra.gmra.mxu1 %v1054_v14  ;;  %v996_v11 = vld [vmem:[%s2908_s7 + $0x30] sm:$0xff] }
  0x85   : > { %936 = vmatpush1.msra.mxu0 %v1544_v15  ;;  %1165 = vmatprep.subr.mxu1 %v1021_v16  ;;  %v1582_v14 = vld [vmem:[%s2904_s3 + $0x530] sm:$0xff]  ;;  %v995_v15 = vld [vmem:[%s2908_s7 + $0x28] sm:$0xff] }
  0x86   : > { %937 = vmatprep.subr.mxu0 %v1607_v18  ;;  %1166 = vmatpush1.msra.mxu1 %v1020_v19  ;;  %v1581_v16 = vld [vmem:[%s2904_s3 + $0x528] sm:$0xff]  ;;  %v994_v18 = vld [vmem:[%s2908_s7 + $0x20] sm:$0xff] }
  0x87   : > { %938 = vmatpush2.msra.mxu0 %v1606_v20  ;;  %1167 = vmatprep.subr.mxu1 %v1019_v21  ;;  %v1580_v19 = vld [vmem:[%s2904_s3 + $0x520] sm:$0xff]  ;;  %v993_v20 = vld [vmem:[%s2908_s7 + $0x18] sm:$0xff] }
  0x88   : > { %939 = vmatprep.subr.mxu0 %v1605_v22  ;;  %1168 = vmatpush1.msra.mxu1 %v1018_v23  ;;  %v1579_v21 = vld [vmem:[%s2904_s3 + $0x518] sm:$0xff]  ;;  %v992_v22 = vld [vmem:[%s2908_s7 + $0x10] sm:$0xff] }
  0x89   : > { %940 = vmatpush2.msra.mxu0 %v1604_v24  ;;  %1169 = vmatprep.subr.mxu1 %v1017_v25  ;;  %v1578_v23 = vld [vmem:[%s2904_s3 + $0x510] sm:$0xff]  ;;  %v991_v24 = vld [vmem:[%s2908_s7 + $0x8] sm:$0xff]  ;;  %v899_v25 = vrot.slane %v2431_v38, 2  ;;  %v1053_v38 = vld [vmem:[%s2908_s7 + $0x1f8] sm:$0xff] }
  0x8a   : > { %941 = vmatprep.subr.mxu0 %v1603_v28  ;;  %1170 = vmatpush1.msra.mxu1 %v1016_v29  ;;  %v1577_v28 = vld [vmem:[%s2904_s3 + $0x508] sm:$0xff]  ;;  %v1576_v29 = vld [vmem:[%s2904_s3 + $0x500] sm:$0xff] }
  0x8b   : > { %942 = vmatpush2.msra.mxu0 %v1602_v30  ;;  %1171 = vmatprep.subr.mxu1 %v1015_v31  ;;  %v990_v30 = vld [vmem:[%s2908_s7] sm:$0xff]  ;;  %v897_v31 = vrot.slane %v2455_v46, 2 }
  0x8c   : > { %943 = vmatprep.subr.mxu0 %v1601_v32  ;;  %1172 = vmatpush1.msra.mxu1 %v1014_v33  ;;  %v1052_v32 = vld [vmem:[%s2908_s7 + $0x1f0] sm:$0xff]  ;;  %v900_v33 = vsel %vm890_vm3, %v895_v5, %v899_v25  ;;  %v1049_v5 = vld [vmem:[%s2908_s7 + $0x1d8] sm:$0xff]  ;;  %v1046_v46 = vld [vmem:[%s2908_s7 + $0x1c0] sm:$0xff] }
  0x8d   : > { %944 = vmatpush2.msra.mxu0 %v1600_v34  ;;  %1173 = vmatprep.subr.mxu1 %v1013_v35  ;;  %v1051_v34 = vld [vmem:[%s2908_s7 + $0x1e8] sm:$0xff]  ;;  %v898_v52 = vsel %vm890_vm3, %v892_v6, %v897_v31 }
  0x8e   : > { %945 = vmatprep.subr.mxu0 %v1599_v36  ;;  %1174 = vmatpush1.msra.mxu1 %v1012_v37  ;;  %v1055_v6 = vld [vmem:[%s2522_s26 + $0x8] sm:$0xff]  ;;  %v1045_v36 = vld [vmem:[%s2908_s7 + $0x1b8] sm:$0xff] }
  0x8f   : > { %946 = vmatpush2.msra.mxu0 %v1598_v39  ;;  %1175 = vmatprep.subr.mxu1 %v1011_v40  ;;  %v987_v35 = vld [vmem:[%s2762_s13 + $0x8] sm:$0xff]  ;;  %v1042_v39 = vld [vmem:[%s2908_s7 + $0x1a0] sm:$0xff]  ;;  %v1041_v40 = vld [vmem:[%s2908_s7 + $0x198] sm:$0xff] }
  0x90   : > { %947 = vmatprep.subr.mxu0 %v1597_v41  ;;  %1176 = vmatpush1.msra.mxu1 %v1010_v42  ;;  %v1043_v37 = vld [vmem:[%s2908_s7 + $0x1a8] sm:$0xff]  ;;  %v1040_v41 = vld [vmem:[%s2908_s7 + $0x190] sm:$0xff] }
  0x91   : > { %948 = vmatpush2.msra.mxu0 %v1596_v43  ;;  %1177 = vmatprep.subr.mxu1 %v1009_v44  ;;  %v1039_v42 = vld [vmem:[%s2908_s7 + $0x188] sm:$0xff]  ;;  %v1038_v43 = vld [vmem:[%s2908_s7 + $0x180] sm:$0xff]  ;;  %v1037_v44 = vld [vmem:[%s2908_s7 + $0x178] sm:$0xff] }
  0x92   : > { %949 = vmatprep.subr.mxu0 %v1595_v45  ;;  %1178 = vmatpush1.msra.mxu1 %v1008_v47  ;;  %v1036_v45 = vld [vmem:[%s2908_s7 + $0x170] sm:$0xff]  ;;  %v1035_v47 = vld [vmem:[%s2908_s7 + $0x168] sm:$0xff] }
  0x93   : > { %950 = vmatpush2.msra.mxu0 %v1594_v49  ;;  %1179 = vmatprep.subr.mxu1 %v1007_v50  ;;  %v1034_v49 = vld [vmem:[%s2908_s7 + $0x160] sm:$0xff]  ;;  %v1033_v50 = vld [vmem:[%s2908_s7 + $0x158] sm:$0xff] }
  0x94   : > { %951 = vmatprep.subr.mxu0 %v1593_v48  ;;  %1180 = vmatpush1.msra.mxu1 %v1006_v51  ;;  %v1032_v48 = vld [vmem:[%s2908_s7 + $0x150] sm:$0xff]  ;;  %v1031_v51 = vld [vmem:[%s2908_s7 + $0x148] sm:$0xff] }
  0x95   : > { %952 = vmatpush2.msra.mxu0 %v1592_v53  ;;  %1181 = vmatprep.subr.mxu1 %v1005_v54  ;;  %v1030_v53 = vld [vmem:[%s2908_s7 + $0x140] sm:$0xff]  ;;  %v1029_v54 = vld [vmem:[%s2908_s7 + $0x138] sm:$0xff] }
  0x96   : > { %953 = vmatprep.subr.mxu0 %v1591_v55  ;;  %1182 = vmatpush1.msra.mxu1 %v1004_v57  ;;  %v1028_v55 = vld [vmem:[%s2908_s7 + $0x130] sm:$0xff]  ;;  %v1027_v57 = vld [vmem:[%s2908_s7 + $0x128] sm:$0xff] }
  0x97   : > { %954 = vmatpush2.msra.mxu0 %v1590_v58  ;;  %1183 = vmatprep.subr.mxu1 %v1003_v60  ;;  %v1026_v58 = vld [vmem:[%s2908_s7 + $0x120] sm:$0xff]  ;;  %v1025_v60 = vld [vmem:[%s2908_s7 + $0x118] sm:$0xff] }
  0x98   : > { %955 = vmatprep.subr.mxu0 %v1589_v61  ;;  %1184 = vmatpush1.msra.mxu1 %v1002_v56  ;;  %v1024_v61 = vld [vmem:[%s2908_s7 + $0x110] sm:$0xff]  ;;  %v1023_v56 = vld [vmem:[%s2908_s7 + $0x108] sm:$0xff] }
  0x99   : > { %956 = vmatpush2.msra.mxu0 %v1588_v62  ;;  %1185 = vmatprep.subr.mxu1 %v1001_v63  ;;  %v1022_v62 = vld [vmem:[%s2908_s7 + $0x100] sm:$0xff] }
  0x9a   : > { %957 = vmatprep.subr.mxu0 %v1587_v0  ;;  %1186 = vmatpush1.msra.mxu1 %v1000_v2  ;;  %v986_v63 = vld [vmem:[%s2762_s13] sm:$0xff]  ;;  %v989_v0 = vld [vmem:[%s2762_s13 + $0x18] sm:$0xff]  ;;  %v988_v2 = vld [vmem:[%s2762_s13 + $0x10] sm:$0xff]  ;;  %s1334_s13 = scalar_lea.sflag [#allocation3], %s415_s22 }
  0x9b   : > { %958 = vmatpush2.msra.mxu0 %v1586_v3  ;;  %1187 = vmatprep.subr.mxu1 %v999_v1 }
  0x9c   : > { %959 = vmatprep.subr.mxu0 %v1585_v4  ;;  %1188 = vmatpush1.msra.mxu1 %v998_v7 }
  0x9d   : > { %960 = vmatpush2.msra.mxu0 %v1584_v8  ;;  %1189 = vmatprep.subr.mxu1 %v997_v9 }
  0x9e   : > { %961 = vmatprep.subr.mxu0 %v1583_v10  ;;  %1190 = vmatpush1.msra.mxu1 %v996_v11 }
  0x9f   : > { %962 = vmatpush2.msra.mxu0 %v1582_v14  ;;  %1191 = vmatprep.subr.mxu1 %v995_v15 }
  0xa0   : > { %963 = vmatprep.subr.mxu0 %v1581_v16  ;;  %1192 = vmatpush1.msra.mxu1 %v994_v18 }
  0xa1   : > { %964 = vmatpush2.msra.mxu0 %v1580_v19  ;;  %1193 = vmatprep.subr.mxu1 %v993_v20  ;;  %v1242_v19 = vld [vmem:[%s2905_s4] sm:$0x3] }
  0xa2   : > { %965 = vmatprep.subr.mxu0 %v1579_v21  ;;  %1194 = vmatpush1.msra.mxu1 %v992_v22  ;;  %v1247_v25 = vrot.slane %v1242_v19, %v2126_v27  ;;  %v1251_v31 = vrot.slane %v1242_v19, %v2124_v26 }
  0xa3   : > { %966 = vmatpush2.msra.mxu0 %v1578_v23  ;;  %1195 = vmatprep.subr.mxu1 %v991_v24 }
  0xa4   : > { %967 = vmatprep.subr.mxu0 %v1577_v28  ;;  %969 = vmatprep.mubr.f32.mxu0 %v2355_v12  ;;  %v1050_v12 = vld [vmem:[%s2908_s7 + $0x1e0] sm:$0xff] }
  0xa5   : > { %968 = vmatpush2.msra.mxu0 %v1576_v29  ;;  %1196 = vmatpush1.msra.mxu1 %v990_v30  ;;  %v1262_v28 = vld [vmem:[%s2910_s9] sm:$0x3] }
  0xa6   : > { %970 = vmatmul.mubr.f32.vlgmr.msra.gmra.mxu0 %v2360_v13  ;;  %1197 = vmatprep.subr.mxu1 %v1053_v38  ;;  %v1048_v13 = vld [vmem:[%s2908_s7 + $0x1d0] sm:$0xff] }
  0xa7   : > { %1198 = vmatpush2.msra.mxu1 %v1052_v32  ;;  %975 = vmatprep.mubr.f32.mxu0 %v900_v33 }
  0xa8   : > { %1199 = vmatprep.subr.mxu1 %v1051_v34  ;;  %1158 = vmatprep.mubr.f32.mxu1 %v1737_v17  ;;  %v1044_v17 = vld [vmem:[%s2908_s7 + $0x1b0] sm:$0xff]  ;;  %v1267_v34 = vrot.slane %v1262_v28, %v2126_v27 }
  0xa9   : > { %1200 = vmatpush2.msra.mxu1 %v1050_v12 }
  0xaa   : > { %976 = vmatmul.mubr.f32.gmra.mxu0 %v898_v52  ;;  %1201 = vmatprep.subr.mxu1 %v1049_v5 }
  0xab   : > { %1202 = vmatpush2.msra.mxu1 %v1048_v13 }
  0xac   : > { %1203 = vmatprep.subr.mxu1 %v1047_v59  ;;  %1159 = vmatmul.mubr.f32.gmra.mxu1 %v1055_v6  ;;  %v1271_v6 = vrot.slane %v1262_v28, %v2124_v26 }
  0xad   : > { %1204 = vmatpush2.msra.mxu1 %v1046_v46  ;;  %1229 = vmatprep.mubr.f32.mxu1 %v987_v35 }
  0xae   : > { %1205 = vmatprep.subr.mxu1 %v1045_v36 }
  0xaf   : > { %1206 = vmatpush2.msra.mxu1 %v1044_v17 }
  0xb0   : > { %1207 = vmatprep.subr.mxu1 %v1043_v37 }
  0xb1   : > { %1208 = vmatpush2.msra.mxu1 %v1042_v39 }
  0xb2   : > { %1209 = vmatprep.subr.mxu1 %v1041_v40 }
  0xb3   : > { %1210 = vmatpush2.msra.mxu1 %v1040_v41 }
  0xb4   : > { %1211 = vmatprep.subr.mxu1 %v1039_v42 }
  0xb5   : > { %1212 = vmatpush2.msra.mxu1 %v1038_v43 }
  0xb6   : > { %1213 = vmatprep.subr.mxu1 %v1037_v44 }
  0xb7   : > { %1214 = vmatpush2.msra.mxu1 %v1036_v45 }
  0xb8   : > { %1215 = vmatprep.subr.mxu1 %v1035_v47 }
  0xb9   : > { %1216 = vmatpush2.msra.mxu1 %v1034_v49 }
  0xba   : > { %1217 = vmatprep.subr.mxu1 %v1033_v50 }
  0xbb   : > { %1218 = vmatpush2.msra.mxu1 %v1032_v48 }
  0xbc   : > { %1219 = vmatprep.subr.mxu1 %v1031_v51 }
  0xbd   : > { %1220 = vmatpush2.msra.mxu1 %v1030_v53 }
  0xbe   : > { %1221 = vmatprep.subr.mxu1 %v1029_v54 }
  0xbf   : > { %1222 = vmatpush2.msra.mxu1 %v1028_v55 }
  0xc0   : > { %1223 = vmatprep.subr.mxu1 %v1027_v57 }
  0xc1   : > { %1224 = vmatpush2.msra.mxu1 %v1026_v58 }
  0xc2   : > { %1225 = vmatprep.subr.mxu1 %v1025_v60 }
  0xc3   : > { %1226 = vmatpush2.msra.mxu1 %v1024_v61 }
  0xc4   : > { %1227 = vmatprep.subr.mxu1 %v1023_v56 }
  0xc5   : > { %1228 = vmatpush2.msra.mxu1 %v1022_v62 }
  0xc6   : > { %1230 = vmatmul.mubr.f32.vlgmr.msra.gmra.mxu1 %v986_v63 }
  0xc7   : > { %1235 = vmatprep.mubr.f32.mxu1 %v989_v0 }
  0xca   : > { %1236 = vmatmul.mubr.f32.gmra.mxu1 %v988_v2 }
 0x121   : > { %v814_v3 = vpop.f32.mrf.mxu1 }
 0x123   : > { %v816_v4 = vpop.f32.mrf.mxu1 }
 0x125   : > { %v820_v8 = vpop.f32.mrf.mxu1 }
 0x126   : > { %v737_v1 = vpop.f32.mrf.mxu0 }
 0x127   : > { %v822_v10 = vpop.f32.mrf.mxu1  ;;  %v815_v21 = vadd.f32 %v814_v3, %v737_v1 }
 0x128   : > { %v739_v7 = vpop.f32.mrf.mxu0 }
 0x129   : > { %v817_v23 = vadd.f32 %v816_v4, %v739_v7 }
 0x13e   : > { %v743_v9 = vpop.f32.mrf.mxu0 }
 0x13f   : > { %v821_v30 = vadd.f32 %v820_v8, %v743_v9 }
 0x140   : > { %v745_v11 = vpop.f32.mrf.mxu0 }
 0x141   : > { %v823_v12 = vadd.f32 %v822_v10, %v745_v11 }
 0x144   : > { %v1154_v14 = vpop.f32.mrf.mxu1 }
 0x146   : > { %v1156_v16 = vpop.f32.mrf.mxu1 }
 0x166   : > { %v971_v15 = vpop.f32.mrf.mxu0 }
 0x167   : > { %v982_v24 = vadd.f32 %v971_v15, %v815_v21 }
 0x168   : > { %v973_v18 = vpop.f32.mrf.mxu0 }
 0x169   : > { %v983_v38 = vadd.f32 %v973_v18, %v817_v23  ;;  %v1254_v52 = vadd.f32 %v1247_v25, %v982_v24 }
 0x16a   : > { %v977_v22 = vpop.f32.mrf.mxu0 }
 0x16b   : > { %v984_v5 = vadd.f32 %v977_v22, %v821_v30  ;;  %v1255_v46 = vadd.f32 %v1251_v31, %v983_v38 }
 0x16c   : > { %v1160_v20 = vpop.f32.mrf.mxu1  ;;  %v979_v32 = vpop.f32.mrf.mxu0 }
 0x16d   : > { %v985_v35 = vadd.f32 %v979_v32, %v823_v12  ;;  %v1256_v39 = vadd.f32 %v1247_v25, %v984_v5 }
 0x16e   : > { %v1162_v29 = vpop.f32.mrf.mxu1 }
 0x16f   : > { %v1257_v43 = vadd.f32 %v1251_v31, %v985_v35 }
 0x186   : > { %v1231_v33 = vpop.f32.mrf.mxu1 }
 0x187   : > { %v1232_v13 = vadd.f32 %v1231_v33, %v1154_v14 }
 0x188   : > { %v1233_v59 = vpop.f32.mrf.mxu1 }
 0x189   : > { %v1258_v36 = vadd.f32 %v1254_v52, %v1232_v13  ;;  %v1234_v17 = vadd.f32 %v1233_v59, %v1156_v16 }
 0x18a   : > { %v1237_v37 = vpop.f32.mrf.mxu1 }
 0x18b   : > { %v1274_v40 = vadd.f32 %v1267_v34, %v1258_v36  ;;  %v1259_v41 = vadd.f32 %v1255_v46, %v1234_v17  ;;  %v1238_v27 = vadd.f32 %v1237_v37, %v1160_v20 }
 0x18c   : > { %v1239_v42 = vpop.f32.mrf.mxu1 }
 0x18d   : > { %1278 = vst [vmem:[%s437_s25] sm:$0xff] %v1274_v40  ;;  %v1275_v44 = vadd.f32 %v1271_v6, %v1259_v41  ;;  %v1260_v45 = vadd.f32 %v1256_v39, %v1238_v27  ;;  %v1240_v47 = vadd.f32 %v1239_v42, %v1162_v29  ;;  %v1296_v50 = vmul.f32 %v1274_v40, %v1274_v40 }
 0x18f   : > { %1279 = vst [vmem:[%s437_s25 + $0x8] sm:$0xff] %v1275_v44  ;;  %v1276_v26 = vadd.f32 %v1267_v34, %v1260_v45  ;;  %v1261_v49 = vadd.f32 %v1257_v43, %v1240_v47  ;;  %v1297_v54 = vmul.f32 %v1275_v44, %v1275_v44 }
 0x191   : > { %1280 = vst [vmem:[%s437_s25 + $0x10] sm:$0xff] %v1276_v26  ;;  %v1282_v48 = vadd.f32 %v1276_v26, %v1274_v40  ;;  %v1298_v51 = vmul.f32 %v1276_v26, %v1276_v26  ;;  %v1277_v53 = vadd.f32 %v1271_v6, %v1261_v49 }
 0x193   : > { %v1283_v55 = vrot.slane %v1282_v48, 4  ;;  %v1300_v57 = vadd.f32 %v1298_v51, %v1296_v50  ;;  %1281 = vst [vmem:[%s437_s25 + $0x18] sm:$0xff] %v1277_v53  ;;  %v1289_v58 = vadd.f32 %v1277_v53, %v1275_v44  ;;  %v1299_v60 = vmul.f32 %v1277_v53, %v1277_v53 }
 0x195   : > { %v1284_v61 = vadd.f32 %v1283_v55, %v1282_v48  ;;  %v1301_v56 = vrot.slane %v1300_v57, 4  ;;  %v1290_v62 = vrot.slane %v1289_v58, 4  ;;  %v1307_v63 = vadd.f32 %v1299_v60, %v1297_v54 }
 0x197   : > { %v1285_v0 = vrot.slane %v1284_v61, 2  ;;  %v1302_v2 = vadd.f32 %v1301_v56, %v1300_v57  ;;  %v1291_v3 = vadd.f32 %v1290_v62, %v1289_v58  ;;  %v1308_v1 = vrot.slane %v1307_v63, 4 }
 0x199   : > { %v1292_v4 = vrot.slane %v1291_v3, 2  ;;  %v1309_v7 = vadd.f32 %v1308_v1, %v1307_v63  ;;  %v1286_v8 = vadd.f32 %v1285_v0, %v1284_v61  ;;  %v1303_v9 = vrot.slane %v1302_v2, 2 }
 0x19b   : > { %v1293_v10 = vadd.f32 %v1292_v4, %v1291_v3  ;;  %v1304_v11 = vadd.f32 %v1303_v9, %v1302_v2  ;;  %v1310_v14 = vrot.slane %v1309_v7, 2  ;;  %v1287_v15 = vrot.slane %v1286_v8, 1 }
 0x19d   : > { %v1294_v16 = vrot.slane %v1293_v10, 1  ;;  %v1305_v18 = vrot.slane %v1304_v11, 1  ;;  %v1311_v19 = vadd.f32 %v1310_v14, %v1309_v7  ;;  %v1288_v22 = vadd.f32 %v1287_v15, %v1286_v8 }
 0x19f   : > { %v1306_v20 = vadd.f32 %v1305_v18, %v1304_v11  ;;  %v1312_v21 = vrot.slane %v1311_v19, 1  ;;  %v1295_v23 = vadd.f32 %v1294_v16, %v1293_v10 }
 0x1a1   : > { %v1313_v24 = vadd.f32 %v1312_v21, %v1311_v19  ;;  %v1314_v25 = vsel %vm506_vm0, %v1288_v22, %v1306_v20 }
 0x1a3   : > { %v1315_v28 = vsel %vm506_vm0, %v1295_v23, %v1313_v24 }
 0x1a4   : > { %v1318_v29 = vcombine.low %v1314_v25, %v1315_v28 }
 0x1a6   : > { %1608 = vst.sshfl [vmem:[%s417_s29] sm:$0x33 pattern:$0x76325410] %v1318_v29 }
 0x1a7   : > { %1688 = shalt.err (!%p1685_p3)
}
 0x1a8   : > { %s1689_s25 = scalar_lea.hbm %s1349_s15, 64  ;;  %s1693_s23 = scalar_lea.hbm %s2912_s11, 128 }
 0x1a9   : > { %p1690_p4 = scmp.ne.s32.totalorder %s1349_s15, %s1689_s25  ;;  %p1694_p9 = scmp.lt.s32.totalorder %s1349_s15, %s2912_s11 }
 0x1aa   : > { %p1695_p10 = scmp.lt.s32.totalorder %s1693_s23, %s1689_s25 }
 0x1ab   : > { %p1691_p7 = pnand %p1690_p4, %p1837_p5 }
 0x1ac   : > { %p1696_p11 = por %p1695_p10, %p1694_p9 }
 0x1ad   : > { %p1692_p8 = pneg %p1691_p7 }
 0x1af   : > { %p1697_p12 = pnand %p1696_p11, %p1692_p8 }
 0x1b1   : > { %1700 = shalt.err (!%p1697_p12)
}
 0x1b2   : > { %1619 = dma.vmem_to_hbm [thread:$0]  (%p1837_p5), %s1352_s12, 64, %s1349_s15, %s1334_s13  }
 0x1b3 PF: > { %p1625_p13 = scmp.ge.s32.totalorder %s1735_s20, 2  ;;  %s1371_s26 = sand.u32 1, %s1723_s17  }
 0x1b4   : > { %s1372_s19 = scalar_lea.sflag [#allocation3], %s1371_s26 }
 0x1b5   : > { %p1622_p0 = pnand %p1625_p13, %p1841_p6 }
 0x1b7   : > { %p1623_p1 = pneg %p1622_p0 }
 0x1b9   : > { %1718 = dma.done.wait (%p1623_p1), %s1372_s19, 64  }
 0x1ba   : > { %1720 = vsyncadd (%p1623_p1), %s1372_s19, 4294967232  ;;  %s2923_s20 = sld [smem:[#allocation6_spill]]  ;;  %s2926_s17 = smov %s1727_s18 }
 0x1bb   : > { %s2924_s21 = sld [smem:[#allocation5_spill]] }
 0x1bc   : > { %s2925_s19 = sld [smem:[#allocation7_spill]] }
 0x1c0   : > { %p22_p2 = scmp.ge.s32.totalorder %s2923_s20, 4  }
 0x1c1   : > { %s2927_s18 = smov %s2924_s21 }
 0x1c2   :  { %24 = sbr.rel (!%p22_p2) target bundleno = 3 (0x3), region = 115 }
 0x1c7   :  { %1377 = vsyncpa [#allocation3], 1 }
 0x1c8   :  { %1379 = vsyncpa [#allocation3 + $0x1], 1 }

// kernel: tile.228
= control target key start
LH: loop header
LB: loop body
LE: loop exit
PB: predicated region body
PF: predicated region fallthrough
CT: control target
= control target key end

     0   :  { %s40_s0 = inlined_call_operand.vmem [shape: f32[16], index: 0, kind: input, shape index: {}]   ;;  %s41_s1 = inlined_call_operand.vmem [shape: f32[32,16], index: 1, kind: output, shape index: {}]  }
   0x1   :  { %v4_v0 = vld [vmem:[%s40_s0] ss:$0 sm:$0xff] }
   0x2   :  { %5 = vst [vmem:[%s41_s1] sm:$0xff] %v4_v0  ;;  %12 = vst [vmem:[%s41_s1 + $0x8] sm:$0xff] %v4_v0 }
   0x3   :  { %13 = vst [vmem:[%s41_s1 + $0x10] sm:$0xff] %v4_v0  ;;  %14 = vst [vmem:[%s41_s1 + $0x18] sm:$0xff] %v4_v0 }

// kernel: tile.229
= control target key start
LH: loop header
LB: loop body
LE: loop exit
PB: predicated region body
PF: predicated region fallthrough
CT: control target
= control target key end

     0   :  { %s94_s8 = smov 112   ;;  %s95_s11 = smov 80   ;;  %vm3_vm0 = vcmask 130048   ;;  %vm9_vm1 = vcmask 1048448   ;;  %vm15_vm2 = vcmask 917248   ;;  %vm21_vm3 = vcmask 786048   ;;  %s147_s0 = inlined_call_operand.vmem [shape: f32[32,16], index: 0, kind: input, shape index: {}]   ;;  %s148_s1 = inlined_call_operand.vmem [shape: f32[1,512], index: 1, kind: output, shape index: {}]  }
   0x1   :  { %v77_v0 = vld [vmem:[%s147_s0 + $0x7] ss:$8 sm:$0xf]   ;;  %v79_v1 = vld [vmem:[%s147_s0 + $0x5] ss:$8 sm:$0xf]  }
   0x2   :  { %7 = vrot.lane.b32.xlu0 %v77_v0, %s94_s8  ;;  %19 = vrot.lane.b32.xlu1 %v79_v1, %s95_s11  ;;  %v78_v2 = vld [vmem:[%s147_s0 + $0x6] ss:$8 sm:$0xf]   ;;  %v80_v3 = vld [vmem:[%s147_s0 + $0x4] ss:$8 sm:$0xf]  }
   0x3   :  { %s96_s16 = smov 96   ;;  %v2_v4 = vld [vmem:[%s147_s0] ss:$8 sm:$0xf]   ;;  %s97_s19 = smov 64   ;;  %vm27_vm4 = vcmask 654848  }
   0x4   :  { %v81_v5 = vld [vmem:[%s147_s0 + $0x3] ss:$8 sm:$0xf]   ;;  %4 = vst.msk [vmem:[#allocation0] ss:$8 sm:$0xf] %vm3_vm0, %v2_v4  }
   0x5   :  { %v82_v6 = vld [vmem:[%s147_s0 + $0x2] ss:$8 sm:$0xf]   ;;  %s98_s24 = smov 48   ;;  %s99_s25 = smov 32   ;;  %vm33_vm5 = vcmask 523648  }
   0x6   :  { %13 = vrot.lane.b32.xlu0 %v78_v2, %s96_s16  ;;  %25 = vrot.lane.b32.xlu1 %v80_v3, %s97_s19  ;;  %v83_v7 = vld [vmem:[%s147_s0 + $0x1] ss:$8 sm:$0xf]   ;;  %s100_s0 = smov 16   ;;  %vm39_vm6 = vcmask 392448   ;;  %vm45_vm7 = vcmask 261248  }
   0xa   :  { %31 = vrot.lane.b32.xlu0 %v81_v5, %s98_s24  ;;  %37 = vrot.lane.b32.xlu1 %v82_v6, %s99_s25 }
   0xe   :  { %43 = vrot.lane.b32.xlu0 %v83_v7, %s100_s0 }
  0x74   :  { %v8_v8 = vpop.permute.xlu0 %7   ;;  %v20_v9 = vpop.permute.xlu1 %19  }
  0x75   :  { %10 = vst.msk [vmem:[#allocation0] ss:$8 sm:$0xf] %vm9_vm1, %v8_v8  }
  0x78   :  { %v14_v10 = vpop.permute.xlu0 %13   ;;  %v26_v11 = vpop.permute.xlu1 %25  }
  0x79   :  { %16 = vst.msk [vmem:[#allocation0] ss:$8 sm:$0xf] %vm15_vm2, %v14_v10  }
  0x7a   :  { %22 = vst.msk [vmem:[#allocation0] ss:$8 sm:$0xf] %vm21_vm3, %v20_v9  }
  0x7b   :  { %28 = vst.msk [vmem:[#allocation0] ss:$8 sm:$0xf] %vm27_vm4, %v26_v11  }
  0x7c   :  { %v32_v12 = vpop.permute.xlu0 %31   ;;  %v38_v13 = vpop.permute.xlu1 %37  }
  0x7d   :  { %34 = vst.msk [vmem:[#allocation0] ss:$8 sm:$0xf] %vm33_vm5, %v32_v12  }
  0x7e   :  { %40 = vst.msk [vmem:[#allocation0] ss:$8 sm:$0xf] %vm39_vm6, %v38_v13  }
  0x80   :  { %v44_v14 = vpop.permute.xlu0 %43  }
  0x81   :  { %46 = vst.msk [vmem:[#allocation0] ss:$8 sm:$0xf] %vm45_vm7, %v44_v14  }
  0x88   :  { %v51_v15 = vld [vmem:[#allocation0] sm:$0x1]  ;;  %v56_v16 = vld [vmem:[#allocation0 + $0x8] sm:$0x1]  ;;  %v62_v17 = vld [vmem:[#allocation0 + $0x10] sm:$0x1] }
  0x89   :  { %54 = vst [vmem:[%s148_s1] sm:$0x1] %v51_v15  ;;  %84 = vst [vmem:[%s148_s1 + $0x1] sm:$0x1] %v56_v16  ;;  %v69_v18 = vld [vmem:[#allocation0 + $0x18] sm:$0x1] }
  0x8a   :  { %85 = vst [vmem:[%s148_s1 + $0x2] sm:$0x1] %v62_v17  ;;  %86 = vst [vmem:[%s148_s1 + $0x3] sm:$0x1] %v69_v18 }

// kernel: upblock_forward_nchw.9
= control target key start
LH: loop header
LB: loop body
LE: loop exit
PB: predicated region body
PF: predicated region fallthrough
CT: control target
= control target key end

     0   :  { %s1772_s15 = smov 0   ;;  %s3155_s0 = inlined_call_operand.vmem [shape: f32[2,16,256], index: 0, kind: input, shape index: {}]   ;;  %s3156_s1 = inlined_call_operand.vmem [shape: f32[32,16], index: 1, kind: input, shape index: {}]   ;;  %s3157_s2 = inlined_call_operand.vmem [shape: f32[3,256,512], index: 2, kind: input, shape index: {}]   ;;  %s3158_s3 = inlined_call_operand.vmem [shape: f32[1,512], index: 3, kind: input, shape index: {}]   ;;  %s3159_s4 = inlined_call_operand.vmem [shape: f32[2,32,512], index: 4, kind: output, shape index: {}]  }
   0x1 LB: > { %s1448_s16 = sadd.s32 4294967295, %s1744_s15   ;;  %p1452_p0 = scmp.ge.s32.totalorder %s1744_s15, 1  ;;  %s1744_s15 = sphi %s1772_s15, %s14_s15  }
   0x2   : > { %p162_p1 = scmp.lt.s32.totalorder %s1744_s15, 3 }
   0x4   : > { %p163_p2 = pnand %p1452_p0, %p162_p1 }
   0x5   : > { %p188_p3 = scmp.lt.s32.totalorder (!%p163_p2), %s1448_s16, 1 }
   0x6   : > { %166 = sbr.rel (%p163_p2) target bundleno = 581 (0x245), region = 36 }
   0xb   : > { %v1746_v0 = vmov 0.0   ;;  %v1522_v1 = vld [vmem:[%s3157_s2 + $0x5e8] sm:$0xff]  ;;  %s3163_s16 = smov (!%p188_p3, %s1448_s16), 1  ;;  %v1521_v2 = vld [vmem:[%s3157_s2 + $0x5e0] sm:$0xff]  ;;  %vm206_vm0 = vcmask 130048   ;;  %v1524_v14 = vld [vmem:[%s3157_s2 + $0x5f8] sm:$0xff] }
   0xc   : > { %283 = vmatprep.mubr.f32.mxu0 %v1746_v0  ;;  %633 = vmatprep.subr.mxu1 %v1522_v1  ;;  %v1518_v3 = vld [vmem:[%s3157_s2 + $0x5c8] sm:$0xff]  ;;  %v1517_v4 = vld [vmem:[%s3157_s2 + $0x5c0] sm:$0xff]  ;;  %s1727_s25 = sshll.u32 %s3163_s16, 5  ;;  %v1523_v16 = vld [vmem:[%s3157_s2 + $0x5f0] sm:$0xff]  ;;  %vm316_vm1 = vcmask 1040384   ;;  %vm606_vm2 = vcmask 1046528  }
   0xd   : > { %634 = vmatpush1.msra.mxu1 %v1521_v2  ;;  %v1514_v5 = vld [vmem:[%s3157_s2 + $0x5a8] sm:$0xff]  ;;  %v1513_v6 = vld [vmem:[%s3157_s2 + $0x5a0] sm:$0xff]  ;;  %s192_s6 = scalar_lea.vmem %s3155_s0, %s1727_s25  ;;  %v1520_v17 = vld [vmem:[%s3157_s2 + $0x5d8] sm:$0xff]  ;;  %vm1118_vm3 = vcmask 1045504   ;;  %s1728_s5 = sshll.u32 %s3163_s16, 7 }
   0xe   : > { %635 = vmatprep.subr.mxu1 %v1518_v3  ;;  %v1510_v7 = vld [vmem:[%s3157_s2 + $0x588] sm:$0xff]  ;;  %v205_v8 = vld [vmem:[%s192_s6 + $0x18] sm:$0xff]  ;;  %v204_v9 = vld [vmem:[%s192_s6 + $0x10] sm:$0xff]  ;;  %s3108_s16 = scalar_lea.vmem %s3159_s4, %s1728_s5 }
   0xf   : > { %636 = vmatpush1.msra.mxu1 %v1517_v4  ;;  %v203_v10 = vld [vmem:[%s192_s6 + $0x8] sm:$0xff]  ;;  %247 = vmatprep.subr.mxu0 %v205_v8  ;;  %v202_v11 = vld [vmem:[%s192_s6] sm:$0xff]  ;;  %v1519_v19 = vld [vmem:[%s3157_s2 + $0x5d0] sm:$0xff] }
  0x10   : > { %637 = vmatprep.subr.mxu1 %v1514_v5  ;;  %v1509_v12 = vld [vmem:[%s3157_s2 + $0x580] sm:$0xff]  ;;  %248 = vmatpush1.msra.mxu0 %v204_v9  ;;  %v1506_v15 = vld [vmem:[%s3157_s2 + $0x568] sm:$0xff]  ;;  %v1516_v22 = vld [vmem:[%s3157_s2 + $0x5b8] sm:$0xff] }
  0x11   : > { %638 = vmatpush1.msra.mxu1 %v1513_v6  ;;  %v198_v13 = vld [vmem:[%s3156_s1] sm:$0xff]  ;;  %249 = vmatprep.subr.mxu0 %v203_v10  ;;  %v1502_v20 = vld [vmem:[%s3157_s2 + $0x548] sm:$0xff]  ;;  %v1515_v23 = vld [vmem:[%s3157_s2 + $0x5b0] sm:$0xff] }
  0x12   : > { %639 = vmatprep.subr.mxu1 %v1510_v7  ;;  %250 = vmatpush1.msra.mxu0 %v202_v11  ;;  %v1505_v18 = vld [vmem:[%s3157_s2 + $0x560] sm:$0xff]  ;;  %v199_v21 = vld [vmem:[%s3156_s1 + $0x8] sm:$0xff]  ;;  %v1512_v24 = vld [vmem:[%s3157_s2 + $0x598] sm:$0xff] }
  0x13   : > { %640 = vmatpush1.msra.mxu1 %v1509_v12  ;;  %1457 = vmatmul.mubr.msk.f32.vlgmr.msra.gmra.mxu0 %vm206_vm0, %v198_v13  ;;  %v1501_v25 = vld [vmem:[%s3157_s2 + $0x540] sm:$0xff]  ;;  %v1511_v26 = vld [vmem:[%s3157_s2 + $0x590] sm:$0xff]  ;;  %v1498_v27 = vld [vmem:[%s3157_s2 + $0x528] sm:$0xff] }
  0x14   : > { %641 = vmatprep.subr.mxu1 %v1506_v15  ;;  %722 = vmatprep.subr.mxu0 %v1524_v14  ;;  %v200_v28 = vld [vmem:[%s3156_s1 + $0x10] sm:$0xff]  ;;  %v1508_v29 = vld [vmem:[%s3157_s2 + $0x578] sm:$0xff]  ;;  %v1497_v32 = vld [vmem:[%s3157_s2 + $0x520] sm:$0xff] }
  0x15   : > { %289 = vmatprep.mubr.f32.mxu0 %v1746_v0  ;;  %723 = vmatpush1.msra.mxu0 %v1523_v16  ;;  %v1507_v30 = vld [vmem:[%s3157_s2 + $0x570] sm:$0xff]  ;;  %v1504_v31 = vld [vmem:[%s3157_s2 + $0x558] sm:$0xff]  ;;  %v1494_v34 = vld [vmem:[%s3157_s2 + $0x508] sm:$0xff] }
  0x16   : > { %724 = vmatprep.subr.mxu0 %v1520_v17  ;;  %642 = vmatpush1.msra.mxu1 %v1505_v18  ;;  %v1503_v33 = vld [vmem:[%s3157_s2 + $0x550] sm:$0xff]  ;;  %v201_v35 = vld [vmem:[%s3156_s1 + $0x18] sm:$0xff]  ;;  %v1493_v38 = vld [vmem:[%s3157_s2 + $0x500] sm:$0xff] }
  0x17   : > { %725 = vmatpush1.msra.mxu0 %v1519_v19  ;;  %643 = vmatprep.subr.mxu1 %v1502_v20  ;;  %v1500_v36 = vld [vmem:[%s3157_s2 + $0x538] sm:$0xff]  ;;  %v1499_v37 = vld [vmem:[%s3157_s2 + $0x530] sm:$0xff]  ;;  %v1490_v40 = vld [vmem:[%s3157_s2 + $0x4e8] sm:$0xff] }
  0x18   : > { %1458 = vmatmul.mubr.msk.f32.gmra.mxu0 %vm206_vm0, %v199_v21  ;;  %726 = vmatprep.subr.mxu0 %v1516_v22  ;;  %v1496_v39 = vld [vmem:[%s3157_s2 + $0x518] sm:$0xff]  ;;  %v1495_v41 = vld [vmem:[%s3157_s2 + $0x510] sm:$0xff]  ;;  %v1489_v42 = vld [vmem:[%s3157_s2 + $0x4e0] sm:$0xff] }
  0x19   : > { %295 = vmatprep.mubr.f32.mxu0 %v1746_v0  ;;  %727 = vmatpush1.msra.mxu0 %v1515_v23  ;;  %v1492_v43 = vld [vmem:[%s3157_s2 + $0x4f8] sm:$0xff]  ;;  %v1486_v44 = vld [vmem:[%s3157_s2 + $0x4c8] sm:$0xff]  ;;  %v1491_v45 = vld [vmem:[%s3157_s2 + $0x4f0] sm:$0xff] }
  0x1a   : > { %728 = vmatprep.subr.mxu0 %v1512_v24  ;;  %644 = vmatpush1.msra.mxu1 %v1501_v25  ;;  %v1485_v46 = vld [vmem:[%s3157_s2 + $0x4c0] sm:$0xff]  ;;  %v1488_v47 = vld [vmem:[%s3157_s2 + $0x4d8] sm:$0xff]  ;;  %v1482_v48 = vld [vmem:[%s3157_s2 + $0x4a8] sm:$0xff] }
  0x1b   : > { %729 = vmatpush1.msra.mxu0 %v1511_v26  ;;  %645 = vmatprep.subr.mxu1 %v1498_v27  ;;  %v1487_v49 = vld [vmem:[%s3157_s2 + $0x4d0] sm:$0xff]  ;;  %v1481_v50 = vld [vmem:[%s3157_s2 + $0x4a0] sm:$0xff]  ;;  %v1484_v51 = vld [vmem:[%s3157_s2 + $0x4b8] sm:$0xff] }
  0x1c   : > { %1459 = vmatmul.mubr.msk.f32.gmra.mxu0 %vm206_vm0, %v200_v28  ;;  %730 = vmatprep.subr.mxu0 %v1508_v29  ;;  %v1478_v52 = vld [vmem:[%s3157_s2 + $0x488] sm:$0xff]  ;;  %v1483_v53 = vld [vmem:[%s3157_s2 + $0x4b0] sm:$0xff]  ;;  %v1477_v54 = vld [vmem:[%s3157_s2 + $0x480] sm:$0xff] }
  0x1d   : > { %301 = vmatprep.mubr.f32.mxu0 %v1746_v0  ;;  %731 = vmatpush1.msra.mxu0 %v1507_v30  ;;  %v1480_v55 = vld [vmem:[%s3157_s2 + $0x498] sm:$0xff]  ;;  %v1474_v56 = vld [vmem:[%s3157_s2 + $0x468] sm:$0xff]  ;;  %v1479_v57 = vld [vmem:[%s3157_s2 + $0x490] sm:$0xff] }
  0x1e   : > { %732 = vmatprep.subr.mxu0 %v1504_v31  ;;  %646 = vmatpush1.msra.mxu1 %v1497_v32  ;;  %v1473_v58 = vld [vmem:[%s3157_s2 + $0x460] sm:$0xff]  ;;  %v1476_v59 = vld [vmem:[%s3157_s2 + $0x478] sm:$0xff]  ;;  %v1470_v60 = vld [vmem:[%s3157_s2 + $0x448] sm:$0xff] }
  0x1f   : > { %733 = vmatpush1.msra.mxu0 %v1503_v33  ;;  %647 = vmatprep.subr.mxu1 %v1494_v34  ;;  %v1475_v61 = vld [vmem:[%s3157_s2 + $0x470] sm:$0xff]  ;;  %v1469_v62 = vld [vmem:[%s3157_s2 + $0x440] sm:$0xff]  ;;  %v1472_v63 = vld [vmem:[%s3157_s2 + $0x458] sm:$0xff] }
  0x20   : > { %1460 = vmatmul.mubr.msk.f32.gmra.mxu0 %vm206_vm0, %v201_v35  ;;  %734 = vmatprep.subr.mxu0 %v1500_v36  ;;  %v1466_v0 = vld [vmem:[%s3157_s2 + $0x428] sm:$0xff]  ;;  %v1471_v1 = vld [vmem:[%s3157_s2 + $0x450] sm:$0xff]  ;;  %v1465_v2 = vld [vmem:[%s3157_s2 + $0x420] sm:$0xff] }
  0x21   : > { %735 = vmatpush1.msra.mxu0 %v1499_v37  ;;  %648 = vmatpush1.msra.mxu1 %v1493_v38  ;;  %v1468_v3 = vld [vmem:[%s3157_s2 + $0x438] sm:$0xff]  ;;  %v1462_v4 = vld [vmem:[%s3157_s2 + $0x408] sm:$0xff]  ;;  %v1467_v5 = vld [vmem:[%s3157_s2 + $0x430] sm:$0xff] }
  0x22   : > { %736 = vmatprep.subr.mxu0 %v1496_v39  ;;  %649 = vmatprep.subr.mxu1 %v1490_v40  ;;  %v1461_v6 = vld [vmem:[%s3157_s2 + $0x400] sm:$0xff]  ;;  %v1464_v7 = vld [vmem:[%s3157_s2 + $0x418] sm:$0xff]  ;;  %v1586_v8 = vld [vmem:[%s3157_s2 + $0x7e8] sm:$0xff] }
  0x23   : > { %737 = vmatpush1.msra.mxu0 %v1495_v41  ;;  %650 = vmatpush1.msra.mxu1 %v1489_v42  ;;  %v1463_v9 = vld [vmem:[%s3157_s2 + $0x410] sm:$0xff]  ;;  %v1585_v10 = vld [vmem:[%s3157_s2 + $0x7e0] sm:$0xff]  ;;  %v1588_v11 = vld [vmem:[%s3157_s2 + $0x7f8] sm:$0xff] }
  0x24   : > { %738 = vmatprep.subr.mxu0 %v1492_v43  ;;  %651 = vmatprep.subr.mxu1 %v1486_v44  ;;  %v1582_v12 = vld [vmem:[%s3157_s2 + $0x7c8] sm:$0xff]  ;;  %v1587_v13 = vld [vmem:[%s3157_s2 + $0x7f0] sm:$0xff]  ;;  %v1581_v14 = vld [vmem:[%s3157_s2 + $0x7c0] sm:$0xff] }
  0x25   : > { %739 = vmatpush1.msra.mxu0 %v1491_v45  ;;  %652 = vmatpush1.msra.mxu1 %v1485_v46  ;;  %v1584_v15 = vld [vmem:[%s3157_s2 + $0x7d8] sm:$0xff]  ;;  %v1578_v16 = vld [vmem:[%s3157_s2 + $0x7a8] sm:$0xff]  ;;  %v1583_v17 = vld [vmem:[%s3157_s2 + $0x7d0] sm:$0xff] }
  0x26   : > { %740 = vmatprep.subr.mxu0 %v1488_v47  ;;  %653 = vmatprep.subr.mxu1 %v1482_v48  ;;  %v1577_v18 = vld [vmem:[%s3157_s2 + $0x7a0] sm:$0xff]  ;;  %v1580_v19 = vld [vmem:[%s3157_s2 + $0x7b8] sm:$0xff]  ;;  %v1574_v20 = vld [vmem:[%s3157_s2 + $0x788] sm:$0xff] }
  0x27   : > { %741 = vmatpush1.msra.mxu0 %v1487_v49  ;;  %654 = vmatpush1.msra.mxu1 %v1481_v50  ;;  %v1579_v21 = vld [vmem:[%s3157_s2 + $0x7b0] sm:$0xff]  ;;  %v1573_v22 = vld [vmem:[%s3157_s2 + $0x780] sm:$0xff]  ;;  %v1576_v23 = vld [vmem:[%s3157_s2 + $0x798] sm:$0xff] }
  0x28   : > { %742 = vmatprep.subr.mxu0 %v1484_v51  ;;  %655 = vmatprep.subr.mxu1 %v1478_v52  ;;  %v1570_v24 = vld [vmem:[%s3157_s2 + $0x768] sm:$0xff]  ;;  %v1575_v25 = vld [vmem:[%s3157_s2 + $0x790] sm:$0xff]  ;;  %v1569_v26 = vld [vmem:[%s3157_s2 + $0x760] sm:$0xff] }
  0x29   : > { %743 = vmatpush1.msra.mxu0 %v1483_v53  ;;  %656 = vmatpush1.msra.mxu1 %v1477_v54  ;;  %v1572_v27 = vld [vmem:[%s3157_s2 + $0x778] sm:$0xff]  ;;  %v1566_v28 = vld [vmem:[%s3157_s2 + $0x748] sm:$0xff]  ;;  %v1571_v29 = vld [vmem:[%s3157_s2 + $0x770] sm:$0xff] }
  0x2a   : > { %744 = vmatprep.subr.mxu0 %v1480_v55  ;;  %657 = vmatprep.subr.mxu1 %v1474_v56  ;;  %v1565_v30 = vld [vmem:[%s3157_s2 + $0x740] sm:$0xff]  ;;  %v1568_v31 = vld [vmem:[%s3157_s2 + $0x758] sm:$0xff]  ;;  %v1562_v32 = vld [vmem:[%s3157_s2 + $0x728] sm:$0xff] }
  0x2b   : > { %745 = vmatpush1.msra.mxu0 %v1479_v57  ;;  %658 = vmatpush1.msra.mxu1 %v1473_v58  ;;  %v1567_v33 = vld [vmem:[%s3157_s2 + $0x750] sm:$0xff]  ;;  %v1561_v34 = vld [vmem:[%s3157_s2 + $0x720] sm:$0xff]  ;;  %v1564_v35 = vld [vmem:[%s3157_s2 + $0x738] sm:$0xff] }
  0x2c   : > { %746 = vmatprep.subr.mxu0 %v1476_v59  ;;  %659 = vmatprep.subr.mxu1 %v1470_v60  ;;  %v1558_v36 = vld [vmem:[%s3157_s2 + $0x708] sm:$0xff]  ;;  %v1563_v37 = vld [vmem:[%s3157_s2 + $0x730] sm:$0xff]  ;;  %v1557_v38 = vld [vmem:[%s3157_s2 + $0x700] sm:$0xff] }
  0x2d   : > { %747 = vmatpush1.msra.mxu0 %v1475_v61  ;;  %660 = vmatpush1.msra.mxu1 %v1469_v62  ;;  %v1560_v39 = vld [vmem:[%s3157_s2 + $0x718] sm:$0xff]  ;;  %v1554_v40 = vld [vmem:[%s3157_s2 + $0x6e8] sm:$0xff]  ;;  %v1559_v41 = vld [vmem:[%s3157_s2 + $0x710] sm:$0xff] }
  0x2e   : > { %748 = vmatprep.subr.mxu0 %v1472_v63  ;;  %661 = vmatprep.subr.mxu1 %v1466_v0  ;;  %v1553_v42 = vld [vmem:[%s3157_s2 + $0x6e0] sm:$0xff]  ;;  %v1556_v43 = vld [vmem:[%s3157_s2 + $0x6f8] sm:$0xff]  ;;  %v1550_v44 = vld [vmem:[%s3157_s2 + $0x6c8] sm:$0xff] }
  0x2f   : > { %749 = vmatpush1.msra.mxu0 %v1471_v1  ;;  %662 = vmatpush1.msra.mxu1 %v1465_v2  ;;  %v1555_v45 = vld [vmem:[%s3157_s2 + $0x6f0] sm:$0xff]  ;;  %v1552_v46 = vld [vmem:[%s3157_s2 + $0x6d8] sm:$0xff]  ;;  %v1549_v47 = vld [vmem:[%s3157_s2 + $0x6c0] sm:$0xff] }
  0x30   : > { %750 = vmatprep.subr.mxu0 %v1468_v3  ;;  %663 = vmatprep.subr.mxu1 %v1462_v4  ;;  %v1551_v48 = vld [vmem:[%s3157_s2 + $0x6d0] sm:$0xff]  ;;  %v1546_v49 = vld [vmem:[%s3157_s2 + $0x6a8] sm:$0xff]  ;;  %v1548_v50 = vld [vmem:[%s3157_s2 + $0x6b8] sm:$0xff] }
  0x31   : > { %751 = vmatpush1.msra.mxu0 %v1467_v5  ;;  %664 = vmatpush1.msra.mxu1 %v1461_v6  ;;  %v1545_v51 = vld [vmem:[%s3157_s2 + $0x6a0] sm:$0xff]  ;;  %v1547_v52 = vld [vmem:[%s3157_s2 + $0x6b0] sm:$0xff]  ;;  %v1542_v53 = vld [vmem:[%s3157_s2 + $0x688] sm:$0xff] }
  0x32   : > { %752 = vmatprep.subr.mxu0 %v1464_v7  ;;  %665 = vmatprep.subr.mxu1 %v1586_v8  ;;  %v1544_v54 = vld [vmem:[%s3157_s2 + $0x698] sm:$0xff]  ;;  %v1541_v55 = vld [vmem:[%s3157_s2 + $0x680] sm:$0xff]  ;;  %v1543_v56 = vld [vmem:[%s3157_s2 + $0x690] sm:$0xff] }
  0x33   : > { %753 = vmatpush1.msra.mxu0 %v1463_v9  ;;  %666 = vmatpush2.msra.mxu1 %v1585_v10  ;;  %v1538_v57 = vld [vmem:[%s3157_s2 + $0x668] sm:$0xff]  ;;  %v1540_v58 = vld [vmem:[%s3157_s2 + $0x678] sm:$0xff]  ;;  %v1537_v59 = vld [vmem:[%s3157_s2 + $0x660] sm:$0xff] }
  0x34   : > { %754 = vmatprep.subr.mxu0 %v1588_v11  ;;  %667 = vmatprep.subr.mxu1 %v1582_v12  ;;  %v1539_v60 = vld [vmem:[%s3157_s2 + $0x670] sm:$0xff]  ;;  %v1534_v61 = vld [vmem:[%s3157_s2 + $0x648] sm:$0xff]  ;;  %v1536_v62 = vld [vmem:[%s3157_s2 + $0x658] sm:$0xff] }
  0x35   : > { %755 = vmatpush2.msra.mxu0 %v1587_v13  ;;  %668 = vmatpush2.msra.mxu1 %v1581_v14  ;;  %v1533_v63 = vld [vmem:[%s3157_s2 + $0x640] sm:$0xff]  ;;  %v1535_v0 = vld [vmem:[%s3157_s2 + $0x650] sm:$0xff]  ;;  %v1530_v1 = vld [vmem:[%s3157_s2 + $0x628] sm:$0xff] }
  0x36   : > { %756 = vmatprep.subr.mxu0 %v1584_v15  ;;  %669 = vmatprep.subr.mxu1 %v1578_v16  ;;  %v1532_v2 = vld [vmem:[%s3157_s2 + $0x638] sm:$0xff]  ;;  %v1529_v3 = vld [vmem:[%s3157_s2 + $0x620] sm:$0xff]  ;;  %v1531_v4 = vld [vmem:[%s3157_s2 + $0x630] sm:$0xff] }
  0x37   : > { %757 = vmatpush2.msra.mxu0 %v1583_v17  ;;  %670 = vmatpush2.msra.mxu1 %v1577_v18  ;;  %v1526_v5 = vld [vmem:[%s3157_s2 + $0x608] sm:$0xff]  ;;  %v1528_v6 = vld [vmem:[%s3157_s2 + $0x618] sm:$0xff]  ;;  %v1525_v7 = vld [vmem:[%s3157_s2 + $0x600] sm:$0xff] }
  0x38   : > { %758 = vmatprep.subr.mxu0 %v1580_v19  ;;  %671 = vmatprep.subr.mxu1 %v1574_v20  ;;  %v1527_v8 = vld [vmem:[%s3157_s2 + $0x610] sm:$0xff]  ;;  %v406_v9 = vld [vmem:[%s3157_s2 + $0x1e8] sm:$0xff]  ;;  %v408_v10 = vld [vmem:[%s3157_s2 + $0x1f8] sm:$0xff] }
  0x39   : > { %759 = vmatpush2.msra.mxu0 %v1579_v21  ;;  %672 = vmatpush2.msra.mxu1 %v1573_v22  ;;  %vm2341_vm4 = vmneg %vm316_vm1 }
  0x3a   : > { %760 = vmatprep.subr.mxu0 %v1576_v23  ;;  %673 = vmatprep.subr.mxu1 %v1570_v24 }
  0x3b   : > { %761 = vmatpush2.msra.mxu0 %v1575_v25  ;;  %674 = vmatpush2.msra.mxu1 %v1569_v26 }
  0x3c   : > { %762 = vmatprep.subr.mxu0 %v1572_v27  ;;  %675 = vmatprep.subr.mxu1 %v1566_v28 }
  0x3d   : > { %763 = vmatpush2.msra.mxu0 %v1571_v29  ;;  %676 = vmatpush2.msra.mxu1 %v1565_v30 }
  0x3e   : > { %764 = vmatprep.subr.mxu0 %v1568_v31  ;;  %677 = vmatprep.subr.mxu1 %v1562_v32 }
  0x3f   : > { %765 = vmatpush2.msra.mxu0 %v1567_v33  ;;  %678 = vmatpush2.msra.mxu1 %v1561_v34  ;;  %v405_v34 = vld [vmem:[%s3157_s2 + $0x1e0] sm:$0xff] }
  0x40   : > { %766 = vmatprep.subr.mxu0 %v1564_v35  ;;  %679 = vmatprep.subr.mxu1 %v1558_v36  ;;  %v407_v35 = vld [vmem:[%s3157_s2 + $0x1f0] sm:$0xff] }
  0x41   : > { %767 = vmatpush2.msra.mxu0 %v1563_v37  ;;  %680 = vmatpush2.msra.mxu1 %v1557_v38 }
  0x42   : > { %768 = vmatprep.subr.mxu0 %v1560_v39  ;;  %681 = vmatprep.subr.mxu1 %v1554_v40  ;;  %v402_v39 = vld [vmem:[%s3157_s2 + $0x1c8] sm:$0xff]  ;;  %v404_v40 = vld [vmem:[%s3157_s2 + $0x1d8] sm:$0xff] }
  0x43   : > { %769 = vmatpush2.msra.mxu0 %v1559_v41  ;;  %682 = vmatpush2.msra.mxu1 %v1553_v42  ;;  %v401_v42 = vld [vmem:[%s3157_s2 + $0x1c0] sm:$0xff] }
  0x44   : > { %770 = vmatprep.subr.mxu0 %v1556_v43  ;;  %683 = vmatprep.subr.mxu1 %v1550_v44  ;;  %v403_v43 = vld [vmem:[%s3157_s2 + $0x1d0] sm:$0xff] }
  0x45   : > { %771 = vmatpush2.msra.mxu0 %v1555_v45  ;;  %684 = vmatpush2.msra.mxu1 %v1549_v47 }
  0x46   : > { %772 = vmatprep.subr.mxu0 %v1552_v46  ;;  %685 = vmatprep.subr.mxu1 %v1546_v49 }
  0x47   : > { %773 = vmatpush2.msra.mxu0 %v1551_v48  ;;  %686 = vmatpush2.msra.mxu1 %v1545_v51  ;;  %v398_v51 = vld [vmem:[%s3157_s2 + $0x1a8] sm:$0xff] }
  0x48   : > { %774 = vmatprep.subr.mxu0 %v1548_v50  ;;  %687 = vmatprep.subr.mxu1 %v1542_v53 }
  0x49   : > { %775 = vmatpush2.msra.mxu0 %v1547_v52  ;;  %688 = vmatpush2.msra.mxu1 %v1541_v55  ;;  %v400_v52 = vld [vmem:[%s3157_s2 + $0x1b8] sm:$0xff]  ;;  %v397_v55 = vld [vmem:[%s3157_s2 + $0x1a0] sm:$0xff] }
  0x4a   : > { %776 = vmatprep.subr.mxu0 %v1544_v54  ;;  %689 = vmatprep.subr.mxu1 %v1538_v57 }
  0x4b   : > { %777 = vmatpush2.msra.mxu0 %v1543_v56  ;;  %690 = vmatpush2.msra.mxu1 %v1537_v59  ;;  %v399_v56 = vld [vmem:[%s3157_s2 + $0x1b0] sm:$0xff]  ;;  %v394_v59 = vld [vmem:[%s3157_s2 + $0x188] sm:$0xff] }
  0x4c   : > { %778 = vmatprep.subr.mxu0 %v1540_v58  ;;  %691 = vmatprep.subr.mxu1 %v1534_v61 }
  0x4d   : > { %779 = vmatpush2.msra.mxu0 %v1539_v60  ;;  %692 = vmatpush2.msra.mxu1 %v1533_v63  ;;  %v396_v60 = vld [vmem:[%s3157_s2 + $0x198] sm:$0xff]  ;;  %v393_v63 = vld [vmem:[%s3157_s2 + $0x180] sm:$0xff] }
  0x4e   : > { %780 = vmatprep.subr.mxu0 %v1536_v62  ;;  %693 = vmatprep.subr.mxu1 %v1530_v1 }
  0x4f   : > { %781 = vmatpush2.msra.mxu0 %v1535_v0  ;;  %694 = vmatpush2.msra.mxu1 %v1529_v3  ;;  %v395_v0 = vld [vmem:[%s3157_s2 + $0x190] sm:$0xff]  ;;  %v390_v3 = vld [vmem:[%s3157_s2 + $0x168] sm:$0xff] }
  0x50   : > { %782 = vmatprep.subr.mxu0 %v1532_v2  ;;  %695 = vmatprep.subr.mxu1 %v1526_v5 }
  0x51   : > { %783 = vmatpush2.msra.mxu0 %v1531_v4  ;;  %696 = vmatpush2.msra.mxu1 %v1525_v7  ;;  %v392_v4 = vld [vmem:[%s3157_s2 + $0x178] sm:$0xff]  ;;  %v391_v7 = vld [vmem:[%s3157_s2 + $0x170] sm:$0xff] }
  0x52   : > { %784 = vmatprep.subr.mxu0 %v1528_v6  ;;  %811 = vmatprep.subr.mxu1 %v406_v9  ;;  %v389_v6 = vld [vmem:[%s3157_s2 + $0x160] sm:$0xff] }
  0x53   : > { %785 = vmatpush2.msra.mxu0 %v1527_v8 }
  0x54   : > { %900 = vmatprep.subr.mxu0 %v408_v10  ;;  %v386_v10 = vld [vmem:[%s3157_s2 + $0x148] sm:$0xff] }
  0xd3   : > { %v285_v11 = vpop.f32.mrf.mxu0 }
  0xd4   : > { %v2198_v14 = vrot.slane %v285_v11, 7  ;;  %v388_v11 = vld [vmem:[%s3157_s2 + $0x158] sm:$0xff] }
  0xd5   : > { %v287_v12 = vpop.f32.mrf.mxu0 }
  0xd6   : > { %v2196_v13 = vrot.slane %v287_v12, 7  ;;  %v2210_v22 = vsel %vm316_vm1, 0.0, %v2198_v14  ;;  %v385_v12 = vld [vmem:[%s3157_s2 + $0x140] sm:$0xff] }
  0xd7   : > { %v607_v30 = vrot.slane %v2210_v22, 1 }
  0xd8   : > { %v291_v15 = vpop.f32.mrf.mxu0  ;;  %v2206_v20 = vsel %vm316_vm1, 0.0, %v2196_v13 }
  0xd9   : > { %v319_v16 = vrot.slane %v291_v15, 7  ;;  %v610_v27 = vrot.slane %v2206_v20, 1  ;;  %v387_v15 = vld [vmem:[%s3157_s2 + $0x150] sm:$0xff] }
  0xda   : > { %v293_v17 = vpop.f32.mrf.mxu0 }
  0xdb   : > { %v2202_v18 = vsel %vm316_vm1, %v2198_v14, %v319_v16  ;;  %v321_v19 = vrot.slane %v293_v17, 7  ;;  %v382_v17 = vld [vmem:[%s3157_s2 + $0x128] sm:$0xff] }
  0xdc   : > { %v297_v21 = vpop.f32.mrf.mxu0  ;;  %v608_v25 = vrot.slane %v2202_v18, 1 }
  0xdd   : > { %v2214_v23 = vsel %vm316_vm1, %v2196_v13, %v321_v19  ;;  %v323_v24 = vrot.slane %v297_v21, 7 }
  0xde   : > { %v299_v26 = vpop.f32.mrf.mxu0  ;;  %v611_v28 = vrot.slane %v2214_v23, 1  ;;  %v609_v38 = vsel %vm606_vm2, %v607_v30, %v608_v25  ;;  %v379_v30 = vld [vmem:[%s3157_s2 + $0x110] sm:$0xff] }
  0xdf   : > { %v325_v29 = vrot.slane %v299_v26, 7  ;;  %v2221_v31 = vsel %vm316_vm1, %v319_v16, %v323_v24  ;;  %v378_v26 = vld [vmem:[%s3157_s2 + $0x108] sm:$0xff] }
  0xe0   : > { %v303_v32 = vpop.f32.mrf.mxu0  ;;  %v612_v33 = vsel %vm606_vm2, %v610_v27, %v611_v28  ;;  %v613_v48 = vrot.slane %v2221_v31, 1  ;;  %v1655_v27 = vld [vmem:[%s3157_s2 + $0x9d0] sm:$0xff] }
  0xe1   : > { %v2231_v36 = vsel %vm316_vm1, %v321_v19, %v325_v29  ;;  %v327_v37 = vrot.slane %v303_v32, 7  ;;  %697 = vmatprep.mubr.f32.mxu1 %v612_v33  ;;  %786 = vmatprep.mubr.f32.mxu0 %v612_v33  ;;  %v384_v19 = vld [vmem:[%s3157_s2 + $0x138] sm:$0xff]  ;;  %v374_v32 = vld [vmem:[%s3157_s2 + $0xe8] sm:$0xff] }
  0xe2   : > { %v305_v41 = vpop.f32.mrf.mxu0  ;;  %698 = vmatmul.mubr.f32.vlgmr.msra.gmra.mxu1 %v609_v38  ;;  %787 = vmatmul.mubr.f32.vlgmr.msra.gmra.mxu0 %v609_v38  ;;  %v615_v44 = vrot.slane %v2231_v36, 1  ;;  %v614_v58 = vsel %vm606_vm2, %v608_v25, %v613_v48  ;;  %v383_v25 = vld [vmem:[%s3157_s2 + $0x130] sm:$0xff]  ;;  %v376_v33 = vld [vmem:[%s3157_s2 + $0xf8] sm:$0xff] }
  0xe3   : > { %v2248_v45 = vsel %vm316_vm1, %v323_v24, %v327_v37  ;;  %v2251_v46 = vsel %vm316_vm1, %v327_v37, 0.0  ;;  %v329_v47 = vrot.slane %v305_v41, 7  ;;  %812 = vmatpush1.msra.mxu1 %v405_v34  ;;  %901 = vmatpush1.msra.mxu0 %v407_v35  ;;  %v381_v24 = vld [vmem:[%s3157_s2 + $0x120] sm:$0xff]  ;;  %v375_v35 = vld [vmem:[%s3157_s2 + $0xf0] sm:$0xff]  ;;  %v370_v37 = vld [vmem:[%s3157_s2 + $0xc8] sm:$0xff] }
  0xe4   : > { %v1133_v49 = vrot.slane %v2251_v46, 2  ;;  %813 = vmatprep.subr.mxu1 %v402_v39  ;;  %902 = vmatprep.subr.mxu0 %v404_v40  ;;  %v616_v50 = vsel %vm606_vm2, %v611_v28, %v615_v44  ;;  %v1129_v54 = vrot.slane %v2248_v45, 2  ;;  %v617_v2 = vrot.slane %v2248_v45, 1  ;;  %v380_v28 = vld [vmem:[%s3157_s2 + $0x118] sm:$0xff]  ;;  %v373_v34 = vld [vmem:[%s3157_s2 + $0xe0] sm:$0xff]  ;;  %v371_v39 = vld [vmem:[%s3157_s2 + $0xd0] sm:$0xff] }
  0xe5   : > { %v2263_v53 = vsel %vm316_vm1, %v325_v29, %v329_v47  ;;  %814 = vmatpush1.msra.mxu1 %v401_v42  ;;  %903 = vmatpush1.msra.mxu0 %v403_v43  ;;  %v2286_v62 = vsel %vm316_vm1, %v329_v47, 0.0  ;;  %v621_v8 = vrot.slane %v2251_v46, 1  ;;  %v377_v29 = vld [vmem:[%s3157_s2 + $0x100] sm:$0xff]  ;;  %v372_v38 = vld [vmem:[%s3157_s2 + $0xd8] sm:$0xff]  ;;  %v366_v40 = vld [vmem:[%s3157_s2 + $0xa8] sm:$0xff] }
  0xe6   : > { %703 = vmatprep.mubr.f32.mxu1 %v616_v50  ;;  %792 = vmatprep.mubr.f32.mxu0 %v616_v50  ;;  %v619_v57 = vrot.slane %v2263_v53, 1  ;;  %v2283_v61 = vsel %vm1118_vm3, %v1129_v54, %v1133_v49  ;;  %v623_v5 = vrot.slane %v2286_v62, 1  ;;  %v618_v9 = vsel %vm606_vm2, %v613_v48, %v617_v2  ;;  %v368_v41 = vld [vmem:[%s3157_s2 + $0xb8] sm:$0xff]  ;;  %v365_v42 = vld [vmem:[%s3157_s2 + $0xa0] sm:$0xff]  ;;  %v367_v43 = vld [vmem:[%s3157_s2 + $0xb0] sm:$0xff] }
  0xe7   : > { %815 = vmatprep.subr.mxu1 %v398_v51  ;;  %904 = vmatprep.subr.mxu0 %v400_v52  ;;  %v622_v21 = vsel %vm606_vm2, %v617_v2, %v621_v8  ;;  %v364_v46 = vld [vmem:[%s3157_s2 + $0x98] sm:$0xff]  ;;  %v361_v47 = vld [vmem:[%s3157_s2 + $0x80] sm:$0xff]  ;;  %v363_v48 = vld [vmem:[%s3157_s2 + $0x90] sm:$0xff] }
  0xe8   : > { %704 = vmatmul.mubr.f32.gmra.mxu1 %v614_v58  ;;  %793 = vmatmul.mubr.f32.gmra.mxu0 %v614_v58  ;;  %v620_v1 = vsel %vm606_vm2, %v615_v44, %v619_v57  ;;  %v624_v16 = vsel %vm606_vm2, %v619_v57, %v623_v5  ;;  %v362_v44 = vld [vmem:[%s3157_s2 + $0x88] sm:$0xff]  ;;  %v360_v50 = vld [vmem:[%s3157_s2 + $0x78] sm:$0xff]  ;;  %v357_v51 = vld [vmem:[%s3157_s2 + $0x60] sm:$0xff] }
  0xe9   : > { %816 = vmatpush1.msra.mxu1 %v397_v55  ;;  %905 = vmatpush1.msra.mxu0 %v399_v56  ;;  %v358_v49 = vld [vmem:[%s3157_s2 + $0x68] sm:$0xff]  ;;  %v359_v52 = vld [vmem:[%s3157_s2 + $0x70] sm:$0xff]  ;;  %v356_v56 = vld [vmem:[%s3157_s2 + $0x58] sm:$0xff] }
  0xea   : > { %817 = vmatprep.subr.mxu1 %v394_v59  ;;  %906 = vmatprep.subr.mxu0 %v396_v60  ;;  %v354_v55 = vld [vmem:[%s3157_s2 + $0x48] sm:$0xff]  ;;  %v353_v57 = vld [vmem:[%s3157_s2 + $0x40] sm:$0xff]  ;;  %v355_v58 = vld [vmem:[%s3157_s2 + $0x50] sm:$0xff] }
  0xeb   : > { %818 = vmatpush1.msra.mxu1 %v393_v63  ;;  %907 = vmatpush1.msra.mxu0 %v395_v0  ;;  %v350_v59 = vld [vmem:[%s3157_s2 + $0x28] sm:$0xff]  ;;  %v352_v60 = vld [vmem:[%s3157_s2 + $0x38] sm:$0xff]  ;;  %v349_v63 = vld [vmem:[%s3157_s2 + $0x20] sm:$0xff] }
  0xec   : > { %709 = vmatprep.mubr.f32.mxu1 %v620_v1  ;;  %798 = vmatprep.mubr.f32.mxu0 %v620_v1  ;;  %v351_v0 = vld [vmem:[%s3157_s2 + $0x30] sm:$0xff]  ;;  %v346_v1 = vld [vmem:[%s3157_s2 + $0x8] sm:$0xff]  ;;  %v348_v2 = vld [vmem:[%s3157_s2 + $0x18] sm:$0xff] }
  0xed   : > { %819 = vmatprep.subr.mxu1 %v390_v3  ;;  %908 = vmatprep.subr.mxu0 %v392_v4  ;;  %v345_v3 = vld [vmem:[%s3157_s2] sm:$0xff]  ;;  %v347_v4 = vld [vmem:[%s3157_s2 + $0x10] sm:$0xff]  ;;  %v470_v5 = vld [vmem:[%s3157_s2 + $0x3e8] sm:$0xff] }
  0xee   : > { %710 = vmatmul.mubr.f32.gmra.mxu1 %v618_v9  ;;  %799 = vmatmul.mubr.f32.gmra.mxu0 %v618_v9  ;;  %v471_v8 = vld [vmem:[%s3157_s2 + $0x3f0] sm:$0xff]  ;;  %v466_v9 = vld [vmem:[%s3157_s2 + $0x3c8] sm:$0xff] }
  0xef   : > { %820 = vmatpush1.msra.mxu1 %v389_v6  ;;  %909 = vmatpush1.msra.mxu0 %v391_v7  ;;  %v472_v6 = vld [vmem:[%s3157_s2 + $0x3f8] sm:$0xff]  ;;  %v469_v7 = vld [vmem:[%s3157_s2 + $0x3e0] sm:$0xff] }
  0xf0   : > { %821 = vmatprep.subr.mxu1 %v386_v10  ;;  %910 = vmatprep.subr.mxu0 %v388_v11  ;;  %v468_v10 = vld [vmem:[%s3157_s2 + $0x3d8] sm:$0xff]  ;;  %v465_v11 = vld [vmem:[%s3157_s2 + $0x3c0] sm:$0xff] }
  0xf1   : > { %822 = vmatpush1.msra.mxu1 %v385_v12  ;;  %911 = vmatpush1.msra.mxu0 %v387_v15  ;;  %v467_v12 = vld [vmem:[%s3157_s2 + $0x3d0] sm:$0xff]  ;;  %v462_v15 = vld [vmem:[%s3157_s2 + $0x3a8] sm:$0xff] }
  0xf2   : > { %715 = vmatprep.mubr.f32.mxu1 %v624_v16  ;;  %804 = vmatprep.mubr.f32.mxu0 %v624_v16  ;;  %v464_v16 = vld [vmem:[%s3157_s2 + $0x3b8] sm:$0xff] }
  0xf3   : > { %823 = vmatprep.subr.mxu1 %v382_v17  ;;  %912 = vmatprep.subr.mxu0 %v384_v19  ;;  %v461_v17 = vld [vmem:[%s3157_s2 + $0x3a0] sm:$0xff]  ;;  %v463_v19 = vld [vmem:[%s3157_s2 + $0x3b0] sm:$0xff] }
  0xf4   : > { %716 = vmatmul.mubr.f32.gmra.mxu1 %v622_v21  ;;  %805 = vmatmul.mubr.f32.gmra.mxu0 %v622_v21  ;;  %v458_v21 = vld [vmem:[%s3157_s2 + $0x388] sm:$0xff] }
  0xf5   : > { %824 = vmatpush1.msra.mxu1 %v381_v24  ;;  %913 = vmatpush1.msra.mxu0 %v383_v25  ;;  %v460_v24 = vld [vmem:[%s3157_s2 + $0x398] sm:$0xff]  ;;  %v457_v25 = vld [vmem:[%s3157_s2 + $0x380] sm:$0xff] }
  0xf6   : > { %825 = vmatprep.subr.mxu1 %v378_v26  ;;  %1590 = vmatprep.mubr.msk.f32.mxu1 %vm2341_vm4, %v2196_v13  ;;  %v459_v26 = vld [vmem:[%s3157_s2 + $0x390] sm:$0xff] }
  0xf7   : > { %914 = vmatprep.subr.mxu0 %v380_v28  ;;  %1594 = vmatprep.mubr.msk.f32.mxu0 %vm2341_vm4, %v2196_v13  ;;  %v369_v13 = vld [vmem:[%s3157_s2 + $0xc0] sm:$0xff]  ;;  %v454_v28 = vld [vmem:[%s3157_s2 + $0x368] sm:$0xff] }
  0xf8   : > { %826 = vmatpush1.msra.mxu1 %v377_v29  ;;  %915 = vmatpush1.msra.mxu0 %v379_v30  ;;  %v456_v29 = vld [vmem:[%s3157_s2 + $0x378] sm:$0xff]  ;;  %v453_v30 = vld [vmem:[%s3157_s2 + $0x360] sm:$0xff] }
  0xf9   : > { %827 = vmatprep.subr.mxu1 %v374_v32  ;;  %916 = vmatprep.subr.mxu0 %v376_v33  ;;  %v455_v32 = vld [vmem:[%s3157_s2 + $0x370] sm:$0xff]  ;;  %v450_v33 = vld [vmem:[%s3157_s2 + $0x348] sm:$0xff] }
  0xfa   : > { %828 = vmatpush1.msra.mxu1 %v373_v34  ;;  %917 = vmatpush1.msra.mxu0 %v375_v35  ;;  %v452_v34 = vld [vmem:[%s3157_s2 + $0x358] sm:$0xff]  ;;  %v449_v35 = vld [vmem:[%s3157_s2 + $0x340] sm:$0xff] }
  0xfb   : > { %829 = vmatprep.subr.mxu1 %v370_v37  ;;  %918 = vmatprep.subr.mxu0 %v372_v38  ;;  %v451_v37 = vld [vmem:[%s3157_s2 + $0x350] sm:$0xff]  ;;  %v446_v38 = vld [vmem:[%s3157_s2 + $0x328] sm:$0xff] }
  0xfc   : > { %830 = vmatpush1.msra.mxu1 %v369_v13  ;;  %919 = vmatpush1.msra.mxu0 %v371_v39  ;;  %v448_v13 = vld [vmem:[%s3157_s2 + $0x338] sm:$0xff]  ;;  %v445_v39 = vld [vmem:[%s3157_s2 + $0x320] sm:$0xff] }
  0xfd   : > { %831 = vmatprep.subr.mxu1 %v366_v40  ;;  %920 = vmatprep.subr.mxu0 %v368_v41  ;;  %v447_v40 = vld [vmem:[%s3157_s2 + $0x330] sm:$0xff]  ;;  %v442_v41 = vld [vmem:[%s3157_s2 + $0x308] sm:$0xff] }
  0xfe   : > { %832 = vmatpush1.msra.mxu1 %v365_v42  ;;  %921 = vmatpush1.msra.mxu0 %v367_v43  ;;  %v444_v42 = vld [vmem:[%s3157_s2 + $0x318] sm:$0xff]  ;;  %v441_v43 = vld [vmem:[%s3157_s2 + $0x300] sm:$0xff] }
  0xff   : > { %833 = vmatprep.subr.mxu1 %v362_v44  ;;  %922 = vmatprep.subr.mxu0 %v364_v46  ;;  %v443_v44 = vld [vmem:[%s3157_s2 + $0x310] sm:$0xff]  ;;  %v438_v46 = vld [vmem:[%s3157_s2 + $0x2e8] sm:$0xff] }
 0x100   : > { %834 = vmatpush1.msra.mxu1 %v361_v47  ;;  %923 = vmatpush1.msra.mxu0 %v363_v48  ;;  %v440_v47 = vld [vmem:[%s3157_s2 + $0x2f8] sm:$0xff]  ;;  %v437_v48 = vld [vmem:[%s3157_s2 + $0x2e0] sm:$0xff] }
 0x101   : > { %835 = vmatprep.subr.mxu1 %v358_v49  ;;  %924 = vmatprep.subr.mxu0 %v360_v50  ;;  %v439_v49 = vld [vmem:[%s3157_s2 + $0x2f0] sm:$0xff]  ;;  %v434_v50 = vld [vmem:[%s3157_s2 + $0x2c8] sm:$0xff] }
 0x102   : > { %836 = vmatpush1.msra.mxu1 %v357_v51  ;;  %925 = vmatpush1.msra.mxu0 %v359_v52  ;;  %v436_v51 = vld [vmem:[%s3157_s2 + $0x2d8] sm:$0xff]  ;;  %v433_v52 = vld [vmem:[%s3157_s2 + $0x2c0] sm:$0xff] }
 0x103   : > { %837 = vmatprep.subr.mxu1 %v354_v55  ;;  %926 = vmatprep.subr.mxu0 %v356_v56  ;;  %v435_v55 = vld [vmem:[%s3157_s2 + $0x2d0] sm:$0xff]  ;;  %v430_v56 = vld [vmem:[%s3157_s2 + $0x2a8] sm:$0xff] }
 0x104   : > { %838 = vmatpush1.msra.mxu1 %v353_v57  ;;  %927 = vmatpush1.msra.mxu0 %v355_v58  ;;  %v432_v57 = vld [vmem:[%s3157_s2 + $0x2b8] sm:$0xff]  ;;  %v429_v58 = vld [vmem:[%s3157_s2 + $0x2a0] sm:$0xff] }
 0x105   : > { %839 = vmatprep.subr.mxu1 %v350_v59  ;;  %928 = vmatprep.subr.mxu0 %v352_v60  ;;  %v431_v59 = vld [vmem:[%s3157_s2 + $0x2b0] sm:$0xff]  ;;  %v426_v60 = vld [vmem:[%s3157_s2 + $0x288] sm:$0xff] }
 0x106   : > { %840 = vmatpush1.msra.mxu1 %v349_v63  ;;  %929 = vmatpush1.msra.mxu0 %v351_v0  ;;  %v428_v63 = vld [vmem:[%s3157_s2 + $0x298] sm:$0xff]  ;;  %v425_v0 = vld [vmem:[%s3157_s2 + $0x280] sm:$0xff] }
 0x107   : > { %841 = vmatprep.subr.mxu1 %v346_v1  ;;  %930 = vmatprep.subr.mxu0 %v348_v2  ;;  %v427_v1 = vld [vmem:[%s3157_s2 + $0x290] sm:$0xff]  ;;  %v422_v2 = vld [vmem:[%s3157_s2 + $0x268] sm:$0xff] }
 0x108   : > { %842 = vmatpush1.msra.mxu1 %v345_v3  ;;  %931 = vmatpush1.msra.mxu0 %v347_v4  ;;  %v424_v3 = vld [vmem:[%s3157_s2 + $0x278] sm:$0xff]  ;;  %v421_v4 = vld [vmem:[%s3157_s2 + $0x260] sm:$0xff] }
 0x109   : > { %843 = vmatprep.subr.mxu1 %v470_v5  ;;  %932 = vmatprep.subr.mxu0 %v472_v6  ;;  %v423_v5 = vld [vmem:[%s3157_s2 + $0x270] sm:$0xff]  ;;  %v418_v6 = vld [vmem:[%s3157_s2 + $0x248] sm:$0xff] }
 0x10a   : > { %844 = vmatpush2.msra.mxu1 %v469_v7  ;;  %933 = vmatpush2.msra.mxu0 %v471_v8  ;;  %v420_v7 = vld [vmem:[%s3157_s2 + $0x258] sm:$0xff]  ;;  %v417_v8 = vld [vmem:[%s3157_s2 + $0x240] sm:$0xff] }
 0x10b   : > { %845 = vmatprep.subr.mxu1 %v466_v9  ;;  %934 = vmatprep.subr.mxu0 %v468_v10  ;;  %v419_v9 = vld [vmem:[%s3157_s2 + $0x250] sm:$0xff]  ;;  %v414_v10 = vld [vmem:[%s3157_s2 + $0x228] sm:$0xff] }
 0x10c   : > { %846 = vmatpush2.msra.mxu1 %v465_v11  ;;  %935 = vmatpush2.msra.mxu0 %v467_v12  ;;  %v416_v11 = vld [vmem:[%s3157_s2 + $0x238] sm:$0xff]  ;;  %v413_v12 = vld [vmem:[%s3157_s2 + $0x220] sm:$0xff] }
 0x10d   : > { %847 = vmatprep.subr.mxu1 %v462_v15  ;;  %936 = vmatprep.subr.mxu0 %v464_v16  ;;  %v415_v15 = vld [vmem:[%s3157_s2 + $0x230] sm:$0xff]  ;;  %v410_v16 = vld [vmem:[%s3157_s2 + $0x208] sm:$0xff] }
 0x10e   : > { %848 = vmatpush2.msra.mxu1 %v461_v17  ;;  %937 = vmatpush2.msra.mxu0 %v463_v19  ;;  %v412_v17 = vld [vmem:[%s3157_s2 + $0x218] sm:$0xff]  ;;  %v409_v19 = vld [vmem:[%s3157_s2 + $0x200] sm:$0xff] }
 0x10f   : > { %849 = vmatprep.subr.mxu1 %v458_v21  ;;  %938 = vmatprep.subr.mxu0 %v460_v24  ;;  %v411_v21 = vld [vmem:[%s3157_s2 + $0x210] sm:$0xff]  ;;  %v1658_v24 = vld [vmem:[%s3157_s2 + $0x9e8] sm:$0xff] }
 0x110   : > { %850 = vmatpush2.msra.mxu1 %v457_v25  ;;  %939 = vmatpush2.msra.mxu0 %v459_v26  ;;  %v1660_v25 = vld [vmem:[%s3157_s2 + $0x9f8] sm:$0xff]  ;;  %v1657_v26 = vld [vmem:[%s3157_s2 + $0x9e0] sm:$0xff] }
 0x111   : > { %851 = vmatprep.subr.mxu1 %v454_v28  ;;  %940 = vmatprep.subr.mxu0 %v456_v29  ;;  %v1659_v28 = vld [vmem:[%s3157_s2 + $0x9f0] sm:$0xff]  ;;  %v1654_v29 = vld [vmem:[%s3157_s2 + $0x9c8] sm:$0xff] }
 0x112   : > { %852 = vmatpush2.msra.mxu1 %v453_v30  ;;  %941 = vmatpush2.msra.mxu0 %v455_v32  ;;  %v1656_v30 = vld [vmem:[%s3157_s2 + $0x9d8] sm:$0xff]  ;;  %v1650_v32 = vld [vmem:[%s3157_s2 + $0x9a8] sm:$0xff] }
 0x113   : > { %853 = vmatprep.subr.mxu1 %v450_v33  ;;  %942 = vmatprep.subr.mxu0 %v452_v34  ;;  %v1652_v33 = vld [vmem:[%s3157_s2 + $0x9b8] sm:$0xff]  ;;  %v1649_v34 = vld [vmem:[%s3157_s2 + $0x9a0] sm:$0xff] }
 0x114   : > { %854 = vmatpush2.msra.mxu1 %v449_v35  ;;  %943 = vmatpush2.msra.mxu0 %v451_v37  ;;  %v1651_v35 = vld [vmem:[%s3157_s2 + $0x9b0] sm:$0xff]  ;;  %v1646_v37 = vld [vmem:[%s3157_s2 + $0x988] sm:$0xff] }
 0x115   : > { %855 = vmatprep.subr.mxu1 %v446_v38  ;;  %944 = vmatprep.subr.mxu0 %v448_v13  ;;  %v1648_v38 = vld [vmem:[%s3157_s2 + $0x998] sm:$0xff]  ;;  %v1645_v13 = vld [vmem:[%s3157_s2 + $0x980] sm:$0xff] }
 0x116   : > { %856 = vmatpush2.msra.mxu1 %v445_v39  ;;  %945 = vmatpush2.msra.mxu0 %v447_v40  ;;  %v1647_v39 = vld [vmem:[%s3157_s2 + $0x990] sm:$0xff]  ;;  %v1642_v40 = vld [vmem:[%s3157_s2 + $0x968] sm:$0xff] }
 0x117   : > { %857 = vmatprep.subr.mxu1 %v442_v41  ;;  %946 = vmatprep.subr.mxu0 %v444_v42  ;;  %v1644_v41 = vld [vmem:[%s3157_s2 + $0x978] sm:$0xff]  ;;  %v1641_v42 = vld [vmem:[%s3157_s2 + $0x960] sm:$0xff] }
 0x118   : > { %858 = vmatpush2.msra.mxu1 %v441_v43  ;;  %947 = vmatpush2.msra.mxu0 %v443_v44  ;;  %v1643_v43 = vld [vmem:[%s3157_s2 + $0x970] sm:$0xff]  ;;  %v1638_v44 = vld [vmem:[%s3157_s2 + $0x948] sm:$0xff] }
 0x119   : > { %859 = vmatprep.subr.mxu1 %v438_v46  ;;  %948 = vmatprep.subr.mxu0 %v440_v47  ;;  %v1640_v46 = vld [vmem:[%s3157_s2 + $0x958] sm:$0xff]  ;;  %v1637_v47 = vld [vmem:[%s3157_s2 + $0x940] sm:$0xff] }
 0x11a   : > { %860 = vmatpush2.msra.mxu1 %v437_v48  ;;  %949 = vmatpush2.msra.mxu0 %v439_v49  ;;  %v1639_v48 = vld [vmem:[%s3157_s2 + $0x950] sm:$0xff]  ;;  %v1123_v49 = vrot.slane %v2214_v23, 2 }
 0x11b   : > { %861 = vmatprep.subr.mxu1 %v434_v50  ;;  %950 = vmatprep.subr.mxu0 %v436_v51  ;;  %v1634_v50 = vld [vmem:[%s3157_s2 + $0x928] sm:$0xff]  ;;  %v1636_v51 = vld [vmem:[%s3157_s2 + $0x938] sm:$0xff] }
 0x11c   : > { %862 = vmatpush2.msra.mxu1 %v433_v52  ;;  %951 = vmatpush2.msra.mxu0 %v435_v55  ;;  %v1633_v52 = vld [vmem:[%s3157_s2 + $0x920] sm:$0xff]  ;;  %v1122_v55 = vrot.slane %v2206_v20, 2  ;;  %v1632_v20 = vld [vmem:[%s3157_s2 + $0x918] sm:$0xff] }
 0x11d   : > { %863 = vmatprep.subr.mxu1 %v430_v56  ;;  %952 = vmatprep.subr.mxu0 %v432_v57  ;;  %v1635_v56 = vld [vmem:[%s3157_s2 + $0x930] sm:$0xff] }
 0x11e   : > { %864 = vmatpush2.msra.mxu1 %v429_v58  ;;  %953 = vmatpush2.msra.mxu0 %v431_v59  ;;  %v1124_v57 = vsel %vm1118_vm3, %v1122_v55, %v1123_v49  ;;  %v1630_v58 = vld [vmem:[%s3157_s2 + $0x908] sm:$0xff]  ;;  %v1629_v59 = vld [vmem:[%s3157_s2 + $0x900] sm:$0xff] }
 0x11f   : > { %865 = vmatprep.subr.mxu1 %v426_v60  ;;  %954 = vmatprep.subr.mxu0 %v428_v63  ;;  %v1631_v60 = vld [vmem:[%s3157_s2 + $0x910] sm:$0xff]  ;;  %v1626_v63 = vld [vmem:[%s3157_s2 + $0x8e8] sm:$0xff]  ;;  %v1709_v55 = vld [vmem:[%s3157_s2 + $0xb80] sm:$0xff] }
 0x120   : > { %866 = vmatpush2.msra.mxu1 %v425_v0  ;;  %955 = vmatpush2.msra.mxu0 %v427_v1  ;;  %v1628_v0 = vld [vmem:[%s3157_s2 + $0x8f8] sm:$0xff]  ;;  %v1625_v1 = vld [vmem:[%s3157_s2 + $0x8e0] sm:$0xff] }
 0x121   : > { %867 = vmatprep.subr.mxu1 %v422_v2  ;;  %956 = vmatprep.subr.mxu0 %v424_v3  ;;  %v1627_v2 = vld [vmem:[%s3157_s2 + $0x8f0] sm:$0xff]  ;;  %v1622_v3 = vld [vmem:[%s3157_s2 + $0x8c8] sm:$0xff] }
 0x122   : > { %868 = vmatpush2.msra.mxu1 %v421_v4  ;;  %957 = vmatpush2.msra.mxu0 %v423_v5  ;;  %v1624_v4 = vld [vmem:[%s3157_s2 + $0x8d8] sm:$0xff]  ;;  %v1621_v5 = vld [vmem:[%s3157_s2 + $0x8c0] sm:$0xff] }
 0x123   : > { %869 = vmatprep.subr.mxu1 %v418_v6  ;;  %958 = vmatprep.subr.mxu0 %v420_v7  ;;  %v1623_v6 = vld [vmem:[%s3157_s2 + $0x8d0] sm:$0xff]  ;;  %v1618_v7 = vld [vmem:[%s3157_s2 + $0x8a8] sm:$0xff] }
 0x124   : > { %870 = vmatpush2.msra.mxu1 %v417_v8  ;;  %959 = vmatpush2.msra.mxu0 %v419_v9  ;;  %v1620_v8 = vld [vmem:[%s3157_s2 + $0x8b8] sm:$0xff]  ;;  %v1617_v9 = vld [vmem:[%s3157_s2 + $0x8a0] sm:$0xff] }
 0x125   : > { %871 = vmatprep.subr.mxu1 %v414_v10  ;;  %960 = vmatprep.subr.mxu0 %v416_v11  ;;  %v1619_v10 = vld [vmem:[%s3157_s2 + $0x8b0] sm:$0xff]  ;;  %v1614_v11 = vld [vmem:[%s3157_s2 + $0x888] sm:$0xff] }
 0x126   : > { %872 = vmatpush2.msra.mxu1 %v413_v12  ;;  %961 = vmatpush2.msra.mxu0 %v415_v15  ;;  %v1616_v12 = vld [vmem:[%s3157_s2 + $0x898] sm:$0xff]  ;;  %v1613_v15 = vld [vmem:[%s3157_s2 + $0x880] sm:$0xff] }
 0x127   : > { %873 = vmatprep.subr.mxu1 %v410_v16  ;;  %962 = vmatprep.subr.mxu0 %v412_v17  ;;  %v1615_v16 = vld [vmem:[%s3157_s2 + $0x890] sm:$0xff]  ;;  %v1610_v17 = vld [vmem:[%s3157_s2 + $0x868] sm:$0xff] }
 0x128   : > { %874 = vmatpush2.msra.mxu1 %v409_v19  ;;  %963 = vmatpush2.msra.mxu0 %v411_v21  ;;  %v1612_v19 = vld [vmem:[%s3157_s2 + $0x878] sm:$0xff]  ;;  %v1609_v21 = vld [vmem:[%s3157_s2 + $0x860] sm:$0xff] }
 0x129   : > { %1592 = vmatmul.mubr.msk.f32.vlgmr.msra.gmra.mxu1 %vm2341_vm4, %v2198_v14  ;;  %1596 = vmatmul.mubr.msk.f32.vlgmr.msra.gmra.mxu0 %vm2341_vm4, %v2198_v14  ;;  %v1653_v14 = vld [vmem:[%s3157_s2 + $0x9c0] sm:$0xff] }
 0x12a   : > { %1145 = vmatprep.subr.mxu1 %v1658_v24  ;;  %1234 = vmatprep.subr.mxu0 %v1660_v25  ;;  %v1611_v24 = vld [vmem:[%s3157_s2 + $0x870] sm:$0xff]  ;;  %v1606_v25 = vld [vmem:[%s3157_s2 + $0x848] sm:$0xff] }
 0x12b   : > { %881 = vmatprep.mubr.f32.mxu1 %v2214_v23  ;;  %970 = vmatprep.mubr.f32.mxu0 %v2214_v23 }
 0x12c   : > { %1146 = vmatpush1.msra.mxu1 %v1657_v26  ;;  %1235 = vmatpush1.msra.mxu0 %v1659_v28  ;;  %v1608_v26 = vld [vmem:[%s3157_s2 + $0x858] sm:$0xff]  ;;  %v1605_v28 = vld [vmem:[%s3157_s2 + $0x840] sm:$0xff] }
 0x12d   : > { %1147 = vmatprep.subr.mxu1 %v1654_v29  ;;  %1236 = vmatprep.subr.mxu0 %v1656_v30  ;;  %v1607_v29 = vld [vmem:[%s3157_s2 + $0x850] sm:$0xff]  ;;  %v1602_v30 = vld [vmem:[%s3157_s2 + $0x828] sm:$0xff] }
 0x12e   : > { %1148 = vmatpush1.msra.mxu1 %v1653_v14  ;;  %1237 = vmatpush1.msra.mxu0 %v1655_v27  ;;  %v1604_v14 = vld [vmem:[%s3157_s2 + $0x838] sm:$0xff]  ;;  %v1601_v27 = vld [vmem:[%s3157_s2 + $0x820] sm:$0xff] }
 0x12f   : > { %882 = vmatmul.mubr.f32.gmra.mxu1 %v2202_v18  ;;  %971 = vmatmul.mubr.f32.gmra.mxu0 %v2202_v18 }
 0x130   : > { %1149 = vmatprep.subr.mxu1 %v1650_v32  ;;  %1238 = vmatprep.subr.mxu0 %v1652_v33  ;;  %v1603_v32 = vld [vmem:[%s3157_s2 + $0x830] sm:$0xff]  ;;  %v1598_v33 = vld [vmem:[%s3157_s2 + $0x808] sm:$0xff] }
 0x131   : > { %887 = vmatprep.mubr.f32.mxu1 %v2231_v36  ;;  %976 = vmatprep.mubr.f32.mxu0 %v2231_v36 }
 0x132   : > { %1150 = vmatpush1.msra.mxu1 %v1649_v34  ;;  %1239 = vmatpush1.msra.mxu0 %v1651_v35  ;;  %v1600_v34 = vld [vmem:[%s3157_s2 + $0x818] sm:$0xff]  ;;  %v1597_v35 = vld [vmem:[%s3157_s2 + $0x800] sm:$0xff] }
 0x133   : > { %1151 = vmatprep.subr.mxu1 %v1646_v37  ;;  %1240 = vmatprep.subr.mxu0 %v1648_v38  ;;  %v1599_v37 = vld [vmem:[%s3157_s2 + $0x810] sm:$0xff]  ;;  %v1722_v38 = vld [vmem:[%s3157_s2 + $0xbe8] sm:$0xff] }
 0x134   : > { %1152 = vmatpush1.msra.mxu1 %v1645_v13  ;;  %1241 = vmatpush1.msra.mxu0 %v1647_v39  ;;  %v1724_v13 = vld [vmem:[%s3157_s2 + $0xbf8] sm:$0xff]  ;;  %v1721_v39 = vld [vmem:[%s3157_s2 + $0xbe0] sm:$0xff] }
 0x135   : > { %888 = vmatmul.mubr.f32.gmra.mxu1 %v2221_v31  ;;  %977 = vmatmul.mubr.f32.gmra.mxu0 %v2221_v31 }
 0x136   : > { %1153 = vmatprep.subr.mxu1 %v1642_v40  ;;  %1242 = vmatprep.subr.mxu0 %v1644_v41  ;;  %v1723_v40 = vld [vmem:[%s3157_s2 + $0xbf0] sm:$0xff]  ;;  %v1718_v41 = vld [vmem:[%s3157_s2 + $0xbc8] sm:$0xff] }
 0x137   : > { %893 = vmatprep.mubr.f32.mxu1 %v2263_v53  ;;  %982 = vmatprep.mubr.f32.mxu0 %v2263_v53 }
 0x138   : > { %1154 = vmatpush1.msra.mxu1 %v1641_v42  ;;  %1243 = vmatpush1.msra.mxu0 %v1643_v43  ;;  %v1720_v42 = vld [vmem:[%s3157_s2 + $0xbd8] sm:$0xff]  ;;  %v1717_v43 = vld [vmem:[%s3157_s2 + $0xbc0] sm:$0xff] }
 0x139   : > { %1155 = vmatprep.subr.mxu1 %v1638_v44  ;;  %1244 = vmatprep.subr.mxu0 %v1640_v46  ;;  %v1719_v44 = vld [vmem:[%s3157_s2 + $0xbd0] sm:$0xff]  ;;  %v1714_v46 = vld [vmem:[%s3157_s2 + $0xba8] sm:$0xff] }
 0x13a   : > { %1156 = vmatpush1.msra.mxu1 %v1637_v47  ;;  %1245 = vmatpush1.msra.mxu0 %v1639_v48  ;;  %v1716_v47 = vld [vmem:[%s3157_s2 + $0xbb8] sm:$0xff]  ;;  %v1713_v48 = vld [vmem:[%s3157_s2 + $0xba0] sm:$0xff] }
 0x13b   : > { %894 = vmatmul.mubr.f32.gmra.mxu1 %v2248_v45  ;;  %983 = vmatmul.mubr.f32.gmra.mxu0 %v2248_v45 }
 0x13c   : > { %1157 = vmatprep.subr.mxu1 %v1634_v50  ;;  %1246 = vmatprep.subr.mxu0 %v1636_v51  ;;  %v1715_v50 = vld [vmem:[%s3157_s2 + $0xbb0] sm:$0xff]  ;;  %v1710_v51 = vld [vmem:[%s3157_s2 + $0xb88] sm:$0xff] }
 0x13d   : > { %1158 = vmatpush1.msra.mxu1 %v1633_v52  ;;  %1209 = vmatprep.mubr.f32.mxu1 %v1124_v57  ;;  %v1712_v52 = vld [vmem:[%s3157_s2 + $0xb98] sm:$0xff] }
 0x13e   : > { %1247 = vmatpush1.msra.mxu0 %v1635_v56  ;;  %1298 = vmatprep.mubr.f32.mxu0 %v1124_v57  ;;  %v1711_v56 = vld [vmem:[%s3157_s2 + $0xb90] sm:$0xff]  ;;  %v1706_v57 = vld [vmem:[%s3157_s2 + $0xb68] sm:$0xff] }
 0x13f   : > { %1159 = vmatprep.subr.mxu1 %v1630_v58  ;;  %1248 = vmatprep.subr.mxu0 %v1632_v20  ;;  %v1708_v58 = vld [vmem:[%s3157_s2 + $0xb78] sm:$0xff]  ;;  %v1705_v20 = vld [vmem:[%s3157_s2 + $0xb60] sm:$0xff] }
 0x140   : > { %1160 = vmatpush1.msra.mxu1 %v1629_v59  ;;  %1249 = vmatpush1.msra.mxu0 %v1631_v60  ;;  %v1707_v59 = vld [vmem:[%s3157_s2 + $0xb70] sm:$0xff]  ;;  %v1702_v60 = vld [vmem:[%s3157_s2 + $0xb48] sm:$0xff] }
 0x141   : > { %1161 = vmatprep.subr.mxu1 %v1626_v63  ;;  %1250 = vmatprep.subr.mxu0 %v1628_v0  ;;  %v1704_v63 = vld [vmem:[%s3157_s2 + $0xb58] sm:$0xff]  ;;  %v1701_v0 = vld [vmem:[%s3157_s2 + $0xb40] sm:$0xff] }
 0x142   : > { %1162 = vmatpush1.msra.mxu1 %v1625_v1  ;;  %1251 = vmatpush1.msra.mxu0 %v1627_v2  ;;  %v1703_v1 = vld [vmem:[%s3157_s2 + $0xb50] sm:$0xff]  ;;  %v1698_v2 = vld [vmem:[%s3157_s2 + $0xb28] sm:$0xff] }
 0x143   : > { %1163 = vmatprep.subr.mxu1 %v1622_v3  ;;  %1252 = vmatprep.subr.mxu0 %v1624_v4  ;;  %v1700_v3 = vld [vmem:[%s3157_s2 + $0xb38] sm:$0xff]  ;;  %v1697_v4 = vld [vmem:[%s3157_s2 + $0xb20] sm:$0xff] }
 0x144   : > { %1164 = vmatpush1.msra.mxu1 %v1621_v5  ;;  %1253 = vmatpush1.msra.mxu0 %v1623_v6  ;;  %v1699_v5 = vld [vmem:[%s3157_s2 + $0xb30] sm:$0xff]  ;;  %v1694_v6 = vld [vmem:[%s3157_s2 + $0xb08] sm:$0xff] }
 0x145   : > { %1165 = vmatprep.subr.mxu1 %v1618_v7  ;;  %1254 = vmatprep.subr.mxu0 %v1620_v8  ;;  %v1696_v7 = vld [vmem:[%s3157_s2 + $0xb18] sm:$0xff]  ;;  %v1693_v8 = vld [vmem:[%s3157_s2 + $0xb00] sm:$0xff] }
 0x146   : > { %1166 = vmatpush1.msra.mxu1 %v1617_v9  ;;  %1255 = vmatpush1.msra.mxu0 %v1619_v10  ;;  %v1695_v9 = vld [vmem:[%s3157_s2 + $0xb10] sm:$0xff]  ;;  %v1690_v10 = vld [vmem:[%s3157_s2 + $0xae8] sm:$0xff] }
 0x147   : > { %1167 = vmatprep.subr.mxu1 %v1614_v11  ;;  %1256 = vmatprep.subr.mxu0 %v1616_v12  ;;  %v1692_v11 = vld [vmem:[%s3157_s2 + $0xaf8] sm:$0xff]  ;;  %v1689_v12 = vld [vmem:[%s3157_s2 + $0xae0] sm:$0xff] }
 0x148   : > { %1168 = vmatpush1.msra.mxu1 %v1613_v15  ;;  %1257 = vmatpush1.msra.mxu0 %v1615_v16  ;;  %v1691_v15 = vld [vmem:[%s3157_s2 + $0xaf0] sm:$0xff]  ;;  %v1686_v16 = vld [vmem:[%s3157_s2 + $0xac8] sm:$0xff] }
 0x149   : > { %1169 = vmatprep.subr.mxu1 %v1610_v17  ;;  %1258 = vmatprep.subr.mxu0 %v1612_v19  ;;  %v1688_v17 = vld [vmem:[%s3157_s2 + $0xad8] sm:$0xff]  ;;  %v1685_v19 = vld [vmem:[%s3157_s2 + $0xac0] sm:$0xff] }
 0x14a   : > { %1170 = vmatpush1.msra.mxu1 %v1609_v21  ;;  %1259 = vmatpush1.msra.mxu0 %v1611_v24  ;;  %v1687_v21 = vld [vmem:[%s3157_s2 + $0xad0] sm:$0xff]  ;;  %v1682_v24 = vld [vmem:[%s3157_s2 + $0xaa8] sm:$0xff] }
 0x14b   : > { %1171 = vmatprep.subr.mxu1 %v1606_v25  ;;  %1260 = vmatprep.subr.mxu0 %v1608_v26  ;;  %v1684_v25 = vld [vmem:[%s3157_s2 + $0xab8] sm:$0xff]  ;;  %v1681_v26 = vld [vmem:[%s3157_s2 + $0xaa0] sm:$0xff] }
 0x14c   : > { %1172 = vmatpush1.msra.mxu1 %v1605_v28  ;;  %1261 = vmatpush1.msra.mxu0 %v1607_v29  ;;  %v1683_v28 = vld [vmem:[%s3157_s2 + $0xab0] sm:$0xff]  ;;  %v1678_v29 = vld [vmem:[%s3157_s2 + $0xa88] sm:$0xff] }
 0x14d   : > { %1173 = vmatprep.subr.mxu1 %v1602_v30  ;;  %1262 = vmatprep.subr.mxu0 %v1604_v14  ;;  %v1680_v30 = vld [vmem:[%s3157_s2 + $0xa98] sm:$0xff]  ;;  %v1677_v14 = vld [vmem:[%s3157_s2 + $0xa80] sm:$0xff] }
 0x14e   : > { %1174 = vmatpush1.msra.mxu1 %v1601_v27  ;;  %1263 = vmatpush1.msra.mxu0 %v1603_v32  ;;  %v1679_v27 = vld [vmem:[%s3157_s2 + $0xa90] sm:$0xff]  ;;  %v1674_v32 = vld [vmem:[%s3157_s2 + $0xa68] sm:$0xff] }
 0x14f   : > { %1175 = vmatprep.subr.mxu1 %v1598_v33  ;;  %1264 = vmatprep.subr.mxu0 %v1600_v34  ;;  %v1676_v33 = vld [vmem:[%s3157_s2 + $0xa78] sm:$0xff]  ;;  %v1673_v34 = vld [vmem:[%s3157_s2 + $0xa60] sm:$0xff] }
 0x150   : > { %1176 = vmatpush1.msra.mxu1 %v1597_v35  ;;  %1265 = vmatpush1.msra.mxu0 %v1599_v37  ;;  %v1675_v35 = vld [vmem:[%s3157_s2 + $0xa70] sm:$0xff]  ;;  %v1670_v37 = vld [vmem:[%s3157_s2 + $0xa48] sm:$0xff] }
 0x151   : > { %1177 = vmatprep.subr.mxu1 %v1722_v38  ;;  %1266 = vmatprep.subr.mxu0 %v1724_v13  ;;  %v1672_v38 = vld [vmem:[%s3157_s2 + $0xa58] sm:$0xff]  ;;  %v1669_v13 = vld [vmem:[%s3157_s2 + $0xa40] sm:$0xff] }
 0x152   : > { %1178 = vmatpush2.msra.mxu1 %v1721_v39  ;;  %1267 = vmatpush2.msra.mxu0 %v1723_v40  ;;  %v1671_v39 = vld [vmem:[%s3157_s2 + $0xa50] sm:$0xff]  ;;  %v1666_v40 = vld [vmem:[%s3157_s2 + $0xa28] sm:$0xff] }
 0x153   : > { %1179 = vmatprep.subr.mxu1 %v1718_v41  ;;  %1268 = vmatprep.subr.mxu0 %v1720_v42  ;;  %v1668_v41 = vld [vmem:[%s3157_s2 + $0xa38] sm:$0xff]  ;;  %v1665_v42 = vld [vmem:[%s3157_s2 + $0xa20] sm:$0xff] }
 0x154   : > { %1180 = vmatpush2.msra.mxu1 %v1717_v43  ;;  %1269 = vmatpush2.msra.mxu0 %v1719_v44  ;;  %v1667_v43 = vld [vmem:[%s3157_s2 + $0xa30] sm:$0xff]  ;;  %v1120_v44 = vrot.slane %v2202_v18, 2 }
 0x155   : > { %1181 = vmatprep.subr.mxu1 %v1714_v46  ;;  %1270 = vmatprep.subr.mxu0 %v1716_v47  ;;  %v1662_v46 = vld [vmem:[%s3157_s2 + $0xa08] sm:$0xff]  ;;  %v1664_v47 = vld [vmem:[%s3157_s2 + $0xa18] sm:$0xff]  ;;  %v1663_v18 = vld [vmem:[%s3157_s2 + $0xa10] sm:$0xff] }
 0x156   : > { %1182 = vmatpush2.msra.mxu1 %v1713_v48  ;;  %1271 = vmatpush2.msra.mxu0 %v1715_v50  ;;  %v1661_v48 = vld [vmem:[%s3157_s2 + $0xa00] sm:$0xff]  ;;  %v1127_v50 = vrot.slane %v2231_v36, 2  ;;  %v1131_v36 = vrot.slane %v2263_v53, 2 }
 0x157   : > { %1183 = vmatprep.subr.mxu1 %v1710_v51  ;;  %1272 = vmatprep.subr.mxu0 %v1712_v52  ;;  %v1119_v51 = vrot.slane %v2210_v22, 2 }
 0x158   : > { %1184 = vmatpush2.msra.mxu1 %v1709_v55  ;;  %1273 = vmatpush2.msra.mxu0 %v1711_v56  ;;  %v1125_v55 = vrot.slane %v2221_v31, 2  ;;  %v1128_v56 = vsel %vm1118_vm3, %v1123_v49, %v1127_v50 }
 0x159   : > { %1185 = vmatprep.subr.mxu1 %v1706_v57  ;;  %1274 = vmatprep.subr.mxu0 %v1708_v58  ;;  %v1121_v52 = vsel %vm1118_vm3, %v1119_v51, %v1120_v44  ;;  %v1135_v57 = vrot.slane %v2286_v62, 2  ;;  %v1132_v58 = vsel %vm1118_vm3, %v1127_v50, %v1131_v36 }
 0x15a   : > { %1186 = vmatpush2.msra.mxu1 %v1705_v20  ;;  %1275 = vmatpush2.msra.mxu0 %v1707_v59  ;;  %v1126_v22 = vsel %vm1118_vm3, %v1120_v44, %v1125_v55  ;;  %v1130_v23 = vsel %vm1118_vm3, %v1125_v55, %v1129_v54 }
 0x15b   : > { %1187 = vmatprep.subr.mxu1 %v1702_v60  ;;  %1276 = vmatprep.subr.mxu0 %v1704_v63  ;;  %v1136_v31 = vsel %vm1118_vm3, %v1131_v36, %v1135_v57 }
 0x15c   : > { %1188 = vmatpush2.msra.mxu1 %v1701_v0  ;;  %1277 = vmatpush2.msra.mxu0 %v1703_v1 }
 0x15d   : > { %1189 = vmatprep.subr.mxu1 %v1698_v2  ;;  %1278 = vmatprep.subr.mxu0 %v1700_v3 }
 0x15e   : > { %1190 = vmatpush2.msra.mxu1 %v1697_v4  ;;  %1279 = vmatpush2.msra.mxu0 %v1699_v5 }
 0x15f   : > { %1191 = vmatprep.subr.mxu1 %v1694_v6  ;;  %1280 = vmatprep.subr.mxu0 %v1696_v7 }
 0x160   : > { %1192 = vmatpush2.msra.mxu1 %v1693_v8  ;;  %1281 = vmatpush2.msra.mxu0 %v1695_v9 }
 0x161   : > { %1193 = vmatprep.subr.mxu1 %v1690_v10  ;;  %1282 = vmatprep.subr.mxu0 %v1692_v11 }
 0x162   : > { %1194 = vmatpush2.msra.mxu1 %v1689_v12  ;;  %1283 = vmatpush2.msra.mxu0 %v1691_v15 }
 0x163   : > { %1195 = vmatprep.subr.mxu1 %v1686_v16  ;;  %1284 = vmatprep.subr.mxu0 %v1688_v17 }
 0x164   : > { %1196 = vmatpush2.msra.mxu1 %v1685_v19  ;;  %1285 = vmatpush2.msra.mxu0 %v1687_v21  ;;  %v1341_v19 = vlaneseq }
 0x165   : > { %1197 = vmatprep.subr.mxu1 %v1682_v24  ;;  %1286 = vmatprep.subr.mxu0 %v1684_v25 }
 0x166   : > { %1198 = vmatpush2.msra.mxu1 %v1681_v26  ;;  %1287 = vmatpush2.msra.mxu0 %v1683_v28  ;;  %v1342_v25 = vshrl.u32 %v1341_v19, 7 }
 0x167   : > { %1199 = vmatprep.subr.mxu1 %v1678_v29  ;;  %1288 = vmatprep.subr.mxu0 %v1680_v30 }
 0x168   : > { %1200 = vmatpush2.msra.mxu1 %v1677_v14  ;;  %1289 = vmatpush2.msra.mxu0 %v1679_v27  ;;  %v1343_v29 = vsub.s32 0, %v1342_v25  ;;  %v1351_v30 = vsub.s32 2, %v1342_v25  ;;  %v1339_v14 = vld [vmem:[%s3158_s3] sm:$0xf]  ;;  %v1347_v27 = vsub.s32 1, %v1342_v25 }
 0x169   : > { %1201 = vmatprep.subr.mxu1 %v1674_v32  ;;  %1290 = vmatprep.subr.mxu0 %v1676_v33  ;;  %v1355_v32 = vsub.s32 3, %v1342_v25 }
 0x16a   : > { %1202 = vmatpush2.msra.mxu1 %v1673_v34  ;;  %1291 = vmatpush2.msra.mxu0 %v1675_v35 }
 0x16b   : > { %1203 = vmatprep.subr.mxu1 %v1670_v37  ;;  %1292 = vmatprep.subr.mxu0 %v1672_v38  ;;  %v3097_v38 = vrot.slane %v1339_v14, %v1343_v29 }
 0x16c   : > { %1204 = vmatpush2.msra.mxu1 %v1669_v13  ;;  %1293 = vmatpush2.msra.mxu0 %v1671_v39  ;;  %v3099_v13 = vrot.slane %v1339_v14, %v1351_v30 }
 0x16d   : > { %1205 = vmatprep.subr.mxu1 %v1666_v40  ;;  %1294 = vmatprep.subr.mxu0 %v1668_v41  ;;  %v3101_v41 = vrot.slane %v1339_v14, %v1347_v27 }
 0x16e   : > { %1206 = vmatpush2.msra.mxu1 %v1665_v42  ;;  %1295 = vmatpush2.msra.mxu0 %v1667_v43  ;;  %v3103_v42 = vrot.slane %v1339_v14, %v1355_v32 }
 0x16f   : > { %1207 = vmatprep.subr.mxu1 %v1662_v46  ;;  %1296 = vmatprep.subr.mxu0 %v1664_v47 }
 0x170   : > { %1208 = vmatpush2.msra.mxu1 %v1661_v48  ;;  %1297 = vmatpush2.msra.mxu0 %v1663_v18 }
 0x171   : > { %1210 = vmatmul.mubr.f32.vlgmr.msra.gmra.mxu1 %v1121_v52  ;;  %1299 = vmatmul.mubr.f32.vlgmr.msra.gmra.mxu0 %v1121_v52 }
 0x172   : > { %1215 = vmatprep.mubr.f32.mxu1 %v1128_v56  ;;  %1304 = vmatprep.mubr.f32.mxu0 %v1128_v56 }
 0x175   : > { %1216 = vmatmul.mubr.f32.gmra.mxu1 %v1126_v22  ;;  %1305 = vmatmul.mubr.f32.gmra.mxu0 %v1126_v22 }
 0x176   : > { %1221 = vmatprep.mubr.f32.mxu1 %v1132_v58  ;;  %1310 = vmatprep.mubr.f32.mxu0 %v1132_v58 }
 0x179   : > { %1222 = vmatmul.mubr.f32.gmra.mxu1 %v1130_v23  ;;  %1311 = vmatmul.mubr.f32.gmra.mxu0 %v1130_v23 }
 0x17a   : > { %1227 = vmatprep.mubr.f32.mxu1 %v1136_v31  ;;  %1316 = vmatprep.mubr.f32.mxu0 %v1136_v31 }
 0x17d   : > { %1228 = vmatmul.mubr.f32.gmra.mxu1 %v2283_v61  ;;  %1317 = vmatmul.mubr.f32.gmra.mxu0 %v2283_v61 }
 0x1a2   : > { %v699_v53 = vpop.f32.mrf.mxu1  ;;  %v788_v62 = vpop.f32.mrf.mxu0 }
 0x1a4   : > { %v701_v49 = vpop.f32.mrf.mxu1  ;;  %v790_v20 = vpop.f32.mrf.mxu0 }
 0x1a8   : > { %v705_v59 = vpop.f32.mrf.mxu1  ;;  %v794_v60 = vpop.f32.mrf.mxu0 }
 0x1aa   : > { %v707_v63 = vpop.f32.mrf.mxu1  ;;  %v796_v45 = vpop.f32.mrf.mxu0 }
 0x1ae   : > { %v3073_v0 = vpop.f32.mrf.mxu1  ;;  %v3075_v54 = vpop.f32.mrf.mxu0 }
 0x1b0   : > { %v3077_v1 = vpop.f32.mrf.mxu1  ;;  %v3079_v2 = vpop.f32.mrf.mxu0 }
 0x1b4   : > { %v3081_v3 = vpop.f32.mrf.mxu1  ;;  %v3083_v4 = vpop.f32.mrf.mxu0 }
 0x1b6   : > { %v3085_v61 = vpop.f32.mrf.mxu1  ;;  %v3087_v5 = vpop.f32.mrf.mxu0 }
 0x1e9   : > { %v877_v6 = vpop.f32.mrf.mxu1  ;;  %v966_v7 = vpop.f32.mrf.mxu0 }
 0x1ea   : > { %v878_v35 = vadd.f32 %v877_v6, %v699_v53  ;;  %v967_v37 = vadd.f32 %v966_v7, %v788_v62 }
 0x1eb   : > { %v879_v8 = vpop.f32.mrf.mxu1  ;;  %v968_v9 = vpop.f32.mrf.mxu0 }
 0x1ec   : > { %v880_v43 = vadd.f32 %v879_v8, %v701_v49  ;;  %v969_v44 = vadd.f32 %v968_v9, %v790_v20 }
 0x1ef   : > { %v883_v10 = vpop.f32.mrf.mxu1  ;;  %v972_v11 = vpop.f32.mrf.mxu0 }
 0x1f0   : > { %v884_v48 = vadd.f32 %v883_v10, %v705_v59  ;;  %v973_v18 = vadd.f32 %v972_v11, %v794_v60 }
 0x1f1   : > { %v885_v12 = vpop.f32.mrf.mxu1  ;;  %v974_v15 = vpop.f32.mrf.mxu0 }
 0x1f2   : > { %v886_v22 = vadd.f32 %v885_v12, %v707_v63  ;;  %v975_v57 = vadd.f32 %v974_v15, %v796_v45 }
 0x1f5   : > { %v889_v16 = vpop.f32.mrf.mxu1  ;;  %v978_v17 = vpop.f32.mrf.mxu0 }
 0x1f6   : > { %v890_v20 = vadd.f32 %v889_v16, %v3073_v0  ;;  %v979_v59 = vadd.f32 %v978_v17, %v3075_v54 }
 0x1f7   : > { %v891_v21 = vpop.f32.mrf.mxu1  ;;  %v980_v24 = vpop.f32.mrf.mxu0 }
 0x1f8   : > { %v892_v9 = vadd.f32 %v891_v21, %v3077_v1  ;;  %v981_v10 = vadd.f32 %v980_v24, %v3079_v2 }
 0x1fb   : > { %v895_v26 = vpop.f32.mrf.mxu1  ;;  %v984_v28 = vpop.f32.mrf.mxu0 }
 0x1fc   : > { %v896_v17 = vadd.f32 %v895_v26, %v3081_v3  ;;  %v985_v19 = vadd.f32 %v984_v28, %v3083_v4 }
 0x1fd   : > { %v3092_v33 = vpop.f32.mrf.mxu1  ;;  %v3094_v34 = vpop.f32.mrf.mxu0 }
 0x1fe   : > { %v898_v30 = vadd.f32 %v3092_v33, %v3085_v61  ;;  %v987_v3 = vadd.f32 %v3094_v34, %v3087_v5 }
 0x231   : > { %v1211_v39 = vpop.f32.mrf.mxu1  ;;  %v1300_v40 = vpop.f32.mrf.mxu0 }
 0x232   : > { %v1323_v46 = vadd.f32 %v1211_v39, %v878_v35  ;;  %v1325_v47 = vadd.f32 %v1300_v40, %v967_v37 }
 0x233   : > { %v1213_v50 = vpop.f32.mrf.mxu1  ;;  %v1302_v51 = vpop.f32.mrf.mxu0 }
 0x234   : > { %v1361_v52 = vadd.f32 %v3097_v38, %v1323_v46  ;;  %v1363_v55 = vadd.f32 %v3099_v13, %v1325_v47  ;;  %v1324_v56 = vadd.f32 %v1213_v50, %v880_v43  ;;  %v1326_v36 = vadd.f32 %v1302_v51, %v969_v44 }
 0x235   : > { %v1217_v58 = vpop.f32.mrf.mxu1  ;;  %v1306_v23 = vpop.f32.mrf.mxu0 }
 0x236   : > { %1377 = vst [vmem:[%s3108_s16] sm:$0xff] %v1361_v52  ;;  %1379 = vst [vmem:[%s3108_s16 + $0x10] sm:$0xff] %v1363_v55  ;;  %v1362_v31 = vadd.f32 %v3101_v41, %v1324_v56  ;;  %v1364_v53 = vadd.f32 %v3103_v42, %v1326_v36  ;;  %v1327_v62 = vadd.f32 %v1217_v58, %v884_v48 }
 0x237   : > { %v1329_v49 = vadd.f32 %v1306_v23, %v973_v18  ;;  %v1219_v60 = vpop.f32.mrf.mxu1  ;;  %v1308_v6 = vpop.f32.mrf.mxu0 }
 0x238   : > { %1378 = vst [vmem:[%s3108_s16 + $0x8] sm:$0xff] %v1362_v31  ;;  %1380 = vst [vmem:[%s3108_s16 + $0x18] sm:$0xff] %v1364_v53  ;;  %v1365_v63 = vadd.f32 %v3097_v38, %v1327_v62  ;;  %v1328_v7 = vadd.f32 %v1219_v60, %v886_v22  ;;  %v1330_v8 = vadd.f32 %v1308_v6, %v975_v57 }
 0x239   : > { %v1367_v45 = vadd.f32 %v3099_v13, %v1329_v49  ;;  %v1223_v11 = vpop.f32.mrf.mxu1  ;;  %v1312_v0 = vpop.f32.mrf.mxu0 }
 0x23a   : > { %1381 = vst [vmem:[%s3108_s16 + $0x20] sm:$0xff] %v1365_v63  ;;  %v1366_v54 = vadd.f32 %v3101_v41, %v1328_v7  ;;  %v1368_v12 = vadd.f32 %v3103_v42, %v1330_v8  ;;  %v1331_v15 = vadd.f32 %v1223_v11, %v890_v20  ;;  %v1333_v16 = vadd.f32 %v1312_v0, %v979_v59 }
 0x23b   : > { %1383 = vst [vmem:[%s3108_s16 + $0x30] sm:$0xff] %v1367_v45  ;;  %v1225_v25 = vpop.f32.mrf.mxu1  ;;  %v1314_v1 = vpop.f32.mrf.mxu0 }
 0x23c   : > { %1382 = vst [vmem:[%s3108_s16 + $0x28] sm:$0xff] %v1366_v54  ;;  %1384 = vst [vmem:[%s3108_s16 + $0x38] sm:$0xff] %v1368_v12  ;;  %v1369_v2 = vadd.f32 %v3097_v38, %v1331_v15  ;;  %v1371_v21 = vadd.f32 %v3099_v13, %v1333_v16  ;;  %v1332_v24 = vadd.f32 %v1225_v25, %v892_v9 }
 0x23d   : > { %v1334_v29 = vadd.f32 %v1314_v1, %v981_v10  ;;  %v1229_v26 = vpop.f32.mrf.mxu1  ;;  %v1318_v4 = vpop.f32.mrf.mxu0 }
 0x23e   : > { %1385 = vst [vmem:[%s3108_s16 + $0x40] sm:$0xff] %v1369_v2  ;;  %1387 = vst [vmem:[%s3108_s16 + $0x50] sm:$0xff] %v1371_v21  ;;  %v1370_v28 = vadd.f32 %v3101_v41, %v1332_v24  ;;  %v1335_v27 = vadd.f32 %v1229_v26, %v896_v17  ;;  %v1337_v32 = vadd.f32 %v1318_v4, %v985_v19 }
 0x23f   : > { %v1372_v14 = vadd.f32 %v3103_v42, %v1334_v29  ;;  %v1231_v35 = vpop.f32.mrf.mxu1  ;;  %v1320_v37 = vpop.f32.mrf.mxu0 }
 0x240   : > { %1386 = vst [vmem:[%s3108_s16 + $0x48] sm:$0xff] %v1370_v28  ;;  %v1373_v61 = vadd.f32 %v3097_v38, %v1335_v27  ;;  %v1375_v5 = vadd.f32 %v3099_v13, %v1337_v32  ;;  %v1336_v33 = vadd.f32 %v1231_v35, %v898_v30  ;;  %v1338_v34 = vadd.f32 %v1320_v37, %v987_v3 }
 0x241   : > { %1388 = vst [vmem:[%s3108_s16 + $0x58] sm:$0xff] %v1372_v14 }
 0x242   : > { %1389 = vst [vmem:[%s3108_s16 + $0x60] sm:$0xff] %v1373_v61  ;;  %1391 = vst [vmem:[%s3108_s16 + $0x70] sm:$0xff] %v1375_v5  ;;  %v1374_v39 = vadd.f32 %v3101_v41, %v1336_v33  ;;  %v1376_v40 = vadd.f32 %v3103_v42, %v1338_v34 }
 0x244   : > { %1390 = vst [vmem:[%s3108_s16 + $0x68] sm:$0xff] %v1374_v39  ;;  %1392 = vst [vmem:[%s3108_s16 + $0x78] sm:$0xff] %v1376_v40 }
 0x245 PF: > { %s14_s15 = sadd.s32 1, %s1744_s15  }
 0x246   : > { %p11_p4 = scmp.ge.s32.totalorder %s14_s15, 4  }
 0x248   :  { %13 = sbr.rel (!%p11_p4) target bundleno = 1 (0x1), region = 68 }

</bundles_post_ra>
